<compile_context>
chip_gen: v7x
topology: tpu7x:2x2x1
jax: 0.10.0
libtpu: 0.0.40
codegen_flags: <defaults>
</compile_context>

<pallas_src>
import functools

import jax
import jax.numpy as jnp
import numpy as np
from jax.experimental import pallas as pl
from jax.experimental.pallas import tpu as pltpu

K = 7           # depthwise kernel size
PAD = 3         # padding (same as PyTorch padding=3)
LN_EPS = 1e-5   # nn.LayerNorm default eps


def _round_up(n, m):
    return ((n + m - 1) // m) * m


def _tree_sum(vals):
    """Balanced pairwise sum of a list of arrays."""
    vals = list(vals)
    while len(vals) > 1:
        nxt = []
        for i in range(0, len(vals) - 1, 2):
            nxt.append(vals[i] + vals[i + 1])
        if len(vals) % 2:
            nxt.append(vals[-1])
        vals = nxt
    return vals[0]


def _convnext_kernel(x_ref, dww_ref, dwb_ref, lnw_ref, lnb_ref,
                     w1_ref, b1_ref, w2_ref, b2_ref, gamma_ref,
                     out_ref, xpad_ref, *, H, W, C_real, TH):
    h = pl.program_id(1)
    Cp = x_ref.shape[-1]
    Hp = H + 2 * PAD
    Wp = W + 2 * PAD

    # Build the zero-padded copy of this batch element once; it is reused by
    # every row tile of the same batch element (row axis is "arbitrary", so
    # the h loop is sequential per core and per batch element).  Only the halo
    # border is zeroed; the interior is overwritten right after.
    @pl.when(h == 0)
    def _():
        xpad_ref[0:PAD, :, :] = jnp.zeros((PAD, Wp, Cp), jnp.float32)
        xpad_ref[PAD + H:Hp, :, :] = jnp.zeros((PAD, Wp, Cp), jnp.float32)
        xpad_ref[PAD:PAD + H, 0:PAD, :] = jnp.zeros((H, PAD, Cp), jnp.float32)
        xpad_ref[PAD:PAD + H, PAD + W:Wp, :] = jnp.zeros((H, PAD, Cp), jnp.float32)
        xpad_ref[PAD:PAD + H, PAD:PAD + W, :] = x_ref[0].astype(jnp.float32)

    r0 = pl.multiple_of(h * TH, TH)          # first output row of this tile

    # ---- depthwise 7x7 conv (groups == channels) ---------------------------
    # One sublane-shifted load per kw; the 7 kh taps are free leading-dim
    # slices.  Tree-sum the taps and the kw partials so the (TH, W, Cp) f32
    # accumulator is materialized once instead of 49 read-modify-write sweeps.
    dww = dww_ref[...].astype(jnp.float32)                        # (49, Cp)
    kw_parts = []
    for kw in range(K):
        x_kw = xpad_ref[pl.ds(r0, TH + 2 * PAD), pl.ds(kw, W), :]  # (TH+6, W, Cp)
        taps = [x_kw[kh:kh + TH] * dww[kh * K + kw] for kh in range(K)]
        kw_parts.append(_tree_sum(taps))
    bias = jnp.broadcast_to(dwb_ref[0, :].astype(jnp.float32), (TH, W, Cp))
    acc = _tree_sum(kw_parts) + bias

    # ---- LayerNorm over the REAL channel count (f32) ------------------------
    # Pad channels of `acc` are exactly zero (zero input / weights / bias), so
    # the plain sum is the sum over real channels; divide by C_real.
    inv_c = jnp.float32(1.0 / C_real)
    mean = jnp.sum(acc, axis=-1, keepdims=True) * inv_c
    diff = acc - mean
    if Cp != C_real:
        cmask = jax.lax.broadcasted_iota(jnp.int32, (1, 1, Cp), 2) < C_real
        sq = jnp.where(cmask, diff * diff, 0.0)
    else:
        sq = diff * diff
    var = jnp.sum(sq, axis=-1, keepdims=True) * inv_c
    y = diff * jax.lax.rsqrt(var + LN_EPS)
    y = y * lnw_ref[0, :].astype(jnp.float32) + lnb_ref[0, :].astype(jnp.float32)

    # ---- pointwise conv1 -> exact GELU -> pointwise conv2 -------------------
    # bf16 MXU matmuls with f32 accumulation.  W is a multiple of 8, so the
    # reshape is a free relabel.
    y2 = y.reshape(TH * W, Cp).astype(jnp.bfloat16)
    hid = jnp.dot(y2, w1_ref[...], preferred_element_type=jnp.float32)
    hid = hid + b1_ref[0, :].astype(jnp.float32)
    # nn.GELU() default is the exact erf-based GELU (kept for parity with the
    # PyTorch module; tanh-approx GELU would offload to the EUP if allowed).
    hid = 0.5 * hid * (1.0 + jax.lax.erf(hid * np.float32(1.0 / np.sqrt(2.0))))
    z = jnp.dot(hid.astype(jnp.bfloat16), w2_ref[...],
                preferred_element_type=jnp.float32)
    z = z + b2_ref[0, :].astype(jnp.float32)

    # ---- layer scale + residual ---------------------------------------------
    z = z * gamma_ref[0, :].astype(jnp.float32)
    res = x_ref[0, pl.ds(r0, TH), :, :].astype(jnp.float32)  # slice of resident input
    out_ref[0] = (z.reshape(TH, W, Cp) + res).astype(out_ref.dtype)


def _vmem_limit_bytes():
    """Scoped-VMEM request sized per TPU generation, with ~12 MiB headroom for
    Mosaic internal scratch (128 MiB/core on v5e/v6e, 64 MiB/core on v7x)."""
    try:
        cap = int(pltpu.get_tpu_info().vmem_capacity_bytes)
    except Exception:
        cap = 64 * 1024 * 1024
    return int(max(cap - 12 * 1024 * 1024, 32 * 1024 * 1024))


def _pick_block_rows(H, W, Cp, Ep, vmem_limit, requested=None):
    """Largest divisor of H whose per-row-tile f32 intermediates fit a budget."""
    if requested is not None:
        if H % requested != 0:
            raise ValueError(f"block_rows={requested} must divide H={H}")
        return requested
    budget = vmem_limit // 3  # rest goes to xpad scratch, resident input, weights, output
    best = 1
    for th in range(1, H + 1):
        if H % th:
            continue
        per_tile = 4 * (
            (th + 2 * PAD) * W * Cp      # widest x_kw staging load
            + 4 * th * W * Cp            # acc / y / z / kw-partial headroom
            + 2 * th * W * Ep            # f32 hid + bf16 copy (rounded up)
        )
        if per_tile <= budget:
            best = th
    return best


def convnext_block_pallas(x_nchw, params, *, block_rows=None):
    """x_nchw: (B, C, H, W) float32.  Returns (B, C, H, W)."""
    B, C, H, W = x_nchw.shape
    E = params["w1"].shape[1]  # expanded width = C * expansion

    # Lane-dense padding: channels / expanded width to a multiple of 128,
    # width to a multiple of 8.  Pad channels/columns are zero end-to-end and
    # sliced off after the pallas_call.
    Cp = _round_up(C, 128)
    Ep = _round_up(E, 128)
    Wpd = _round_up(W, 8)

    vmem_limit = _vmem_limit_bytes()
    TH = _pick_block_rows(H, Wpd, Cp, Ep, vmem_limit, block_rows)
    nH = H // TH
    Hp, Wp = H + 2 * PAD, Wpd + 2 * PAD

    # NCHW -> NHWC (channels on the lane dim) + zero pad to (Wpd, Cp).
    # TODO(synk): if the surrounding model can run NHWC end-to-end, drop the
    # two transposes (each is a full HBM read+write of the activation).
    x = jnp.transpose(x_nchw, (0, 2, 3, 1))                        # (B, H, W, C)
    if Cp != C or Wpd != W:
        x = jnp.pad(x, ((0, 0), (0, 0), (0, Wpd - W), (0, Cp - C)))

    def padc(a, c_to):
        return jnp.pad(a, ((0, 0), (0, c_to - a.shape[1])))

    dw_w = jnp.pad(params["dw_w"], ((0, 0), (0, Cp - C)))
    dw_b = padc(params["dw_b"], Cp)
    ln_w = padc(params["ln_w"], Cp)
    ln_b = padc(params["ln_b"], Cp)
    # bf16 weights for the MXU matmuls (f32 accumulation in-kernel).
    w1 = jnp.pad(params["w1"], ((0, Cp - C), (0, Ep - E))).astype(jnp.bfloat16)
    b1 = padc(params["b1"], Ep)
    w2 = jnp.pad(params["w2"], ((0, Ep - E), (0, Cp - C))).astype(jnp.bfloat16)
    b2 = padc(params["b2"], Cp)
    gamma = padc(params["gamma"], Cp)

    def rep_spec(shape):
        nd = len(shape)
        return pl.BlockSpec(shape, lambda b, h, _nd=nd: (0,) * _nd)

    kernel = functools.partial(_convnext_kernel, H=H, W=Wpd, C_real=C, TH=TH)

    out_nhwc = pl.pallas_call(
        kernel,
        out_shape=jax.ShapeDtypeStruct((B, H, Wpd, Cp), x.dtype),
        grid_spec=pltpu.PrefetchScalarGridSpec(
            num_scalar_prefetch=0,
            grid=(B, nH),
            in_specs=[
                # full batch element; index map ignores h -> resident (fetched
                # once per batch element, not per row tile)
                pl.BlockSpec((1, H, Wpd, Cp), lambda b, h: (b, 0, 0, 0)),
                rep_spec((K * K, Cp)),   # depthwise weights, tap-major
                rep_spec((1, Cp)),       # depthwise bias
                rep_spec((1, Cp)),       # LayerNorm weight
                rep_spec((1, Cp)),       # LayerNorm bias
                rep_spec((Cp, Ep)),      # pw_conv1 weight (transposed, bf16)
                rep_spec((1, Ep)),       # pw_conv1 bias
                rep_spec((Ep, Cp)),      # pw_conv2 weight (transposed, bf16)
                rep_spec((1, Cp)),       # pw_conv2 bias
                rep_spec((1, Cp)),       # gamma (layer scale)
            ],
            out_specs=pl.BlockSpec((1, TH, Wpd, Cp), lambda b, h: (b, h, 0, 0)),
            scratch_shapes=[pltpu.VMEM((Hp, Wp, Cp), jnp.float32)],  # padded halo copy
        ),
        compiler_params=pltpu.CompilerParams(
            dimension_semantics=("parallel", "arbitrary"),
            vmem_limit_bytes=vmem_limit,
        ),
    )(x, dw_w, dw_b, ln_w, ln_b, w1, b1, w2, b2, gamma)

    out = out_nhwc[:, :, :W, :C]                       # drop pad columns / channels
    return jnp.transpose(out, (0, 3, 1, 2))            # back to NCHW


def make_params(key, channels, expansion=4, layer_scale_init=1e-6):
    """Deterministic synthetic parameters with the same shapes as the PyTorch module."""
    C, E = channels, channels * expansion
    ks = jax.random.split(key, 6)
    # dw_conv.weight has shape (C, 1, 7, 7) in PyTorch; store as (49, C), tap-major.
    dw_w_torch = jax.random.normal(ks[0], (C, 1, K, K), jnp.float32) * 0.05
    dw_w = jnp.transpose(dw_w_torch.reshape(C, K * K), (1, 0))            # (49, C)
    dw_b = (jax.random.normal(ks[1], (C,), jnp.float32) * 0.05).reshape(1, C)
    ln_w = jnp.ones((1, C), jnp.float32)
    ln_b = jnp.zeros((1, C), jnp.float32)
    # nn.Linear weight is (out, in); store transposed for x @ W.
    w1 = jnp.transpose(jax.random.normal(ks[2], (E, C), jnp.float32) * 0.05, (1, 0))  # (C, E)
    b1 = (jax.random.normal(ks[3], (E,), jnp.float32) * 0.05).reshape(1, E)
    w2 = jnp.transpose(jax.random.normal(ks[4], (C, E), jnp.float32) * 0.05, (1, 0))  # (E, C)
    b2 = (jax.random.normal(ks[5], (C,), jnp.float32) * 0.05).reshape(1, C)
    gamma = (jnp.ones((C,), jnp.float32) * layer_scale_init).reshape(1, C)
    return dict(dw_w=dw_w, dw_b=dw_b, ln_w=ln_w, ln_b=ln_b,
                w1=w1, b1=b1, w2=w2, b2=b2, gamma=gamma)


def convnext_block_reference(x_nchw, params):
    """Pure-JAX (f32) reference mirroring the PyTorch forward exactly."""
    B, C, H, W = x_nchw.shape
    res = x_nchw
    dw_w = jnp.transpose(params["dw_w"], (1, 0)).reshape(C, 1, K, K)  # (C,1,7,7) OIHW
    y = jax.lax.conv_general_dilated(
        x_nchw, dw_w, window_strides=(1, 1), padding=((PAD, PAD), (PAD, PAD)),
        dimension_numbers=("NCHW", "OIHW", "NCHW"), feature_group_count=C)
    y = y + params["dw_b"].reshape(1, C, 1, 1)
    y = jnp.transpose(y, (0, 2, 3, 1))  # NHWC
    mean = jnp.mean(y, axis=-1, keepdims=True)
    var = jnp.mean((y - mean) ** 2, axis=-1, keepdims=True)
    y = (y - mean) / jnp.sqrt(var + LN_EPS)
    y = y * params["ln_w"][0] + params["ln_b"][0]
    h = y @ params["w1"] + params["b1"][0]
    h = 0.5 * h * (1.0 + jax.lax.erf(h / np.sqrt(2.0)))
    z = h @ params["w2"] + params["b2"][0]
    z = z * params["gamma"][0]
    z = jnp.transpose(z, (0, 3, 1, 2))  # back to NCHW
    return z + res


if __name__ == "__main__":
    B, C, H, W = 2, 4, 16, 16
    key = jax.random.PRNGKey(0)
    kx, kp = jax.random.split(key)
    x = jax.random.normal(kx, (B, C, H, W), jnp.float32)
    # layer_scale_init=1.0 so the MLP path is actually exercised by the check
    # (with the default 1e-6 the output is ~= residual and hides the MXU path).
    params = make_params(kp, C, expansion=4, layer_scale_init=1.0)

    # block_rows=8 -> grid=(2, 2): exercises the row-tiling path at this shape.
    out = jax.block_until_ready(convnext_block_pallas(x, params, block_rows=8))
    ref = jax.block_until_ready(convnext_block_reference(x, params))

    # bf16 MXU matmuls (f32 accumulation) -> looser tolerance than a pure-f32 kernel.
    np.testing.assert_allclose(np.asarray(out), np.asarray(ref), rtol=2e-2, atol=2e-3)

    print("KERNEL_OK")
</pallas_src>

<mosaic_0001>
module attributes {stable_mosaic.version = 11 : i64} {
  func.func @_convnext_kernel(%arg0: i32, %arg1: i32, %arg2: memref<1x16x16x128xf32, #tpu.memory_space<vmem>>, %arg3: memref<49x128xf32, #tpu.memory_space<vmem>>, %arg4: memref<1x128xf32, #tpu.memory_space<vmem>>, %arg5: memref<1x128xf32, #tpu.memory_space<vmem>>, %arg6: memref<1x128xf32, #tpu.memory_space<vmem>>, %arg7: memref<128x128xbf16, #tpu.memory_space<vmem>>, %arg8: memref<1x128xf32, #tpu.memory_space<vmem>>, %arg9: memref<128x128xbf16, #tpu.memory_space<vmem>>, %arg10: memref<1x128xf32, #tpu.memory_space<vmem>>, %arg11: memref<1x128xf32, #tpu.memory_space<vmem>>, %arg12: memref<1x8x16x128xf32, #tpu.memory_space<vmem>>, %arg13: memref<22x22x128xf32, #tpu.memory_space<vmem>>) attributes {dimension_semantics = [#tpu.dimension_semantics<parallel>, #tpu.dimension_semantics<arbitrary>], iteration_bounds = array<i64: 2, 2>, scalar_prefetch = 0 : i64, scratch_operands = 1 : i64, tpu.core_type = #tpu.core_type<tc>, window_params = [{transform_indices = @transform_0, window_bounds = array<i64: 1, 16, 16, 128>}, {pipeline_mode = #tpu.pipeline_mode<synchronous>, transform_indices = @transform_1, window_bounds = array<i64: 49, 128>}, {pipeline_mode = #tpu.pipeline_mode<synchronous>, transform_indices = @transform_2, window_bounds = array<i64: 1, 128>}, {pipeline_mode = #tpu.pipeline_mode<synchronous>, transform_indices = @transform_3, window_bounds = array<i64: 1, 128>}, {pipeline_mode = #tpu.pipeline_mode<synchronous>, transform_indices = @transform_4, window_bounds = array<i64: 1, 128>}, {pipeline_mode = #tpu.pipeline_mode<synchronous>, transform_indices = @transform_5, window_bounds = array<i64: 128, 128>}, {pipeline_mode = #tpu.pipeline_mode<synchronous>, transform_indices = @transform_6, window_bounds = array<i64: 1, 128>}, {pipeline_mode = #tpu.pipeline_mode<synchronous>, transform_indices = @transform_7, window_bounds = array<i64: 128, 128>}, {pipeline_mode = #tpu.pipeline_mode<synchronous>, transform_indices = @transform_8, window_bounds = array<i64: 1, 128>}, {pipeline_mode = #tpu.pipeline_mode<synchronous>, transform_indices = @transform_9, window_bounds = array<i64: 1, 128>}, {transform_indices = @transform_10, window_bounds = array<i64: 1, 8, 16, 128>}]} {
    %c0_i32 = arith.constant 0 : i32
    %0 = arith.cmpi eq, %arg1, %c0_i32 : i32
    %1 = arith.extui %0 : i1 to i32
    %c0_i32_0 = arith.constant 0 : i32
    %2 = arith.cmpi ne, %1, %c0_i32_0 : i32
    scf.if %2 {
      %cst_43 = arith.constant 0.000000e+00 : f32
      %438 = vector.broadcast %cst_43 : f32 to vector<3x22x128xf32>
      %c0_44 = arith.constant 0 : index
      %c0_45 = arith.constant 0 : index
      %c0_46 = arith.constant 0 : index
      %439 = vector.load %arg13[%c0_44, %c0_45, %c0_46] : memref<22x22x128xf32, #tpu.memory_space<vmem>>, vector<3x22x128xf32>
      tpu.vector_store %arg13[%c0_44, %c0_45, %c0_46], %438 {strides = array<i32>} : memref<22x22x128xf32, #tpu.memory_space<vmem>>, vector<3x22x128xf32>,
      %cst_47 = arith.constant 0.000000e+00 : f32
      %440 = vector.broadcast %cst_47 : f32 to vector<3x22x128xf32>
      %c19 = arith.constant 19 : index
      %c0_48 = arith.constant 0 : index
      %c0_49 = arith.constant 0 : index
      %441 = vector.load %arg13[%c19, %c0_48, %c0_49] : memref<22x22x128xf32, #tpu.memory_space<vmem>>, vector<3x22x128xf32>
      tpu.vector_store %arg13[%c19, %c0_48, %c0_49], %440 {strides = array<i32>} : memref<22x22x128xf32, #tpu.memory_space<vmem>>, vector<3x22x128xf32>,
      %cst_50 = arith.constant 0.000000e+00 : f32
      %442 = vector.broadcast %cst_50 : f32 to vector<16x3x128xf32>
      %c3_51 = arith.constant 3 : index
      %c0_52 = arith.constant 0 : index
      %c0_53 = arith.constant 0 : index
      %443 = vector.load %arg13[%c3_51, %c0_52, %c0_53] : memref<22x22x128xf32, #tpu.memory_space<vmem>>, vector<16x3x128xf32>
      tpu.vector_store %arg13[%c3_51, %c0_52, %c0_53], %442 {strides = array<i32>} : memref<22x22x128xf32, #tpu.memory_space<vmem>>, vector<16x3x128xf32>,
      %cst_54 = arith.constant 0.000000e+00 : f32
      %444 = vector.broadcast %cst_54 : f32 to vector<16x3x128xf32>
      %c3_55 = arith.constant 3 : index
      %c19_56 = arith.constant 19 : index
      %c0_57 = arith.constant 0 : index
      %445 = vector.load %arg13[%c3_55, %c19_56, %c0_57] : memref<22x22x128xf32, #tpu.memory_space<vmem>>, vector<16x3x128xf32>
      tpu.vector_store %arg13[%c3_55, %c19_56, %c0_57], %444 {strides = array<i32>} : memref<22x22x128xf32, #tpu.memory_space<vmem>>, vector<16x3x128xf32>,
      %c0_58 = arith.constant 0 : index
      %c0_59 = arith.constant 0 : index
      %c0_60 = arith.constant 0 : index
      %c0_61 = arith.constant 0 : index
      %446 = vector.load %arg2[%c0_58, %c0_59, %c0_60, %c0_61] : memref<1x16x16x128xf32, #tpu.memory_space<vmem>>, vector<1x16x16x128xf32>
      %447 = vector.shape_cast %446 : vector<1x16x16x128xf32> to vector<16x16x128xf32>
      %c3_62 = arith.constant 3 : index
      %c3_63 = arith.constant 3 : index
      %c0_64 = arith.constant 0 : index
      %448 = vector.load %arg13[%c3_62, %c3_63, %c0_64] : memref<22x22x128xf32, #tpu.memory_space<vmem>>, vector<16x16x128xf32>
      tpu.vector_store %arg13[%c3_62, %c3_63, %c0_64], %447 {strides = array<i32>} : memref<22x22x128xf32, #tpu.memory_space<vmem>>, vector<16x16x128xf32>,
    } else {
    }
    %c8_i32 = arith.constant 8 : i32
    %3 = arith.muli %arg1, %c8_i32 : i32
    %4 = tpu.assume_multiple %3, 8 : i32
    %c0 = arith.constant 0 : index
    %c0_1 = arith.constant 0 : index
    %5 = vector.load %arg3[%c0, %c0_1] : memref<49x128xf32, #tpu.memory_space<vmem>>, vector<49x128xf32>
    %6 = arith.index_cast %4 : i32 to index
    %c0_2 = arith.constant 0 : index
    %c0_3 = arith.constant 0 : index
    %7 = vector.load %arg13[%6, %c0_2, %c0_3] : memref<22x22x128xf32, #tpu.memory_space<vmem>>, vector<14x16x128xf32>
    %8 = vector.extract_strided_slice %7 {offsets = [0, 0, 0], sizes = [8, 16, 128], strides = [1, 1, 1]} : vector<14x16x128xf32> to vector<8x16x128xf32>
    %9 = vector.extract_strided_slice %5 {offsets = [0, 0], sizes = [1, 128], strides = [1, 1]} : vector<49x128xf32> to vector<1x128xf32>
    %10 = vector.shape_cast %9 : vector<1x128xf32> to vector<128xf32>
    %11 = vector.shape_cast %10 : vector<128xf32> to vector<1x1x128xf32>
    %12 = vector.broadcast %11 : vector<1x1x128xf32> to vector<8x16x128xf32>
    %13 = arith.mulf %8, %12 : vector<8x16x128xf32>
    %14 = vector.extract_strided_slice %7 {offsets = [1, 0, 0], sizes = [8, 16, 128], strides = [1, 1, 1]} : vector<14x16x128xf32> to vector<8x16x128xf32>
    %15 = vector.extract_strided_slice %5 {offsets = [7, 0], sizes = [1, 128], strides = [1, 1]} : vector<49x128xf32> to vector<1x128xf32>
    %16 = vector.shape_cast %15 : vector<1x128xf32> to vector<128xf32>
    %17 = vector.shape_cast %16 : vector<128xf32> to vector<1x1x128xf32>
    %18 = vector.broadcast %17 : vector<1x1x128xf32> to vector<8x16x128xf32>
    %19 = arith.mulf %14, %18 : vector<8x16x128xf32>
    %20 = vector.extract_strided_slice %7 {offsets = [2, 0, 0], sizes = [8, 16, 128], strides = [1, 1, 1]} : vector<14x16x128xf32> to vector<8x16x128xf32>
    %21 = vector.extract_strided_slice %5 {offsets = [14, 0], sizes = [1, 128], strides = [1, 1]} : vector<49x128xf32> to vector<1x128xf32>
    %22 = vector.shape_cast %21 : vector<1x128xf32> to vector<128xf32>
    %23 = vector.shape_cast %22 : vector<128xf32> to vector<1x1x128xf32>
    %24 = vector.broadcast %23 : vector<1x1x128xf32> to vector<8x16x128xf32>
    %25 = arith.mulf %20, %24 : vector<8x16x128xf32>
    %26 = vector.extract_strided_slice %7 {offsets = [3, 0, 0], sizes = [8, 16, 128], strides = [1, 1, 1]} : vector<14x16x128xf32> to vector<8x16x128xf32>
    %27 = vector.extract_strided_slice %5 {offsets = [21, 0], sizes = [1, 128], strides = [1, 1]} : vector<49x128xf32> to vector<1x128xf32>
    %28 = vector.shape_cast %27 : vector<1x128xf32> to vector<128xf32>
    %29 = vector.shape_cast %28 : vector<128xf32> to vector<1x1x128xf32>
    %30 = vector.broadcast %29 : vector<1x1x128xf32> to vector<8x16x128xf32>
    %31 = arith.mulf %26, %30 : vector<8x16x128xf32>
    %32 = vector.extract_strided_slice %7 {offsets = [4, 0, 0], sizes = [8, 16, 128], strides = [1, 1, 1]} : vector<14x16x128xf32> to vector<8x16x128xf32>
    %33 = vector.extract_strided_slice %5 {offsets = [28, 0], sizes = [1, 128], strides = [1, 1]} : vector<49x128xf32> to vector<1x128xf32>
    %34 = vector.shape_cast %33 : vector<1x128xf32> to vector<128xf32>
    %35 = vector.shape_cast %34 : vector<128xf32> to vector<1x1x128xf32>
    %36 = vector.broadcast %35 : vector<1x1x128xf32> to vector<8x16x128xf32>
    %37 = arith.mulf %32, %36 : vector<8x16x128xf32>
    %38 = vector.extract_strided_slice %7 {offsets = [5, 0, 0], sizes = [8, 16, 128], strides = [1, 1, 1]} : vector<14x16x128xf32> to vector<8x16x128xf32>
    %39 = vector.extract_strided_slice %5 {offsets = [35, 0], sizes = [1, 128], strides = [1, 1]} : vector<49x128xf32> to vector<1x128xf32>
    %40 = vector.shape_cast %39 : vector<1x128xf32> to vector<128xf32>
    %41 = vector.shape_cast %40 : vector<128xf32> to vector<1x1x128xf32>
    %42 = vector.broadcast %41 : vector<1x1x128xf32> to vector<8x16x128xf32>
    %43 = arith.mulf %38, %42 : vector<8x16x128xf32>
    %44 = vector.extract_strided_slice %7 {offsets = [6, 0, 0], sizes = [8, 16, 128], strides = [1, 1, 1]} : vector<14x16x128xf32> to vector<8x16x128xf32>
    %45 = vector.extract_strided_slice %5 {offsets = [42, 0], sizes = [1, 128], strides = [1, 1]} : vector<49x128xf32> to vector<1x128xf32>
    %46 = vector.shape_cast %45 : vector<1x128xf32> to vector<128xf32>
    %47 = vector.shape_cast %46 : vector<128xf32> to vector<1x1x128xf32>
    %48 = vector.broadcast %47 : vector<1x1x128xf32> to vector<8x16x128xf32>
    %49 = arith.mulf %44, %48 : vector<8x16x128xf32>
    %50 = arith.addf %13, %19 : vector<8x16x128xf32>
    %51 = arith.addf %25, %31 : vector<8x16x128xf32>
    %52 = arith.addf %37, %43 : vector<8x16x128xf32>
    %53 = arith.addf %50, %51 : vector<8x16x128xf32>
    %54 = arith.addf %52, %49 : vector<8x16x128xf32>
    %55 = arith.addf %53, %54 : vector<8x16x128xf32>
    %56 = arith.index_cast %4 : i32 to index
    %c1 = arith.constant 1 : index
    %c0_4 = arith.constant 0 : index
    %57 = vector.load %arg13[%56, %c1, %c0_4] : memref<22x22x128xf32, #tpu.memory_space<vmem>>, vector<14x16x128xf32>
    %58 = vector.extract_strided_slice %57 {offsets = [0, 0, 0], sizes = [8, 16, 128], strides = [1, 1, 1]} : vector<14x16x128xf32> to vector<8x16x128xf32>
    %59 = vector.extract_strided_slice %5 {offsets = [1, 0], sizes = [1, 128], strides = [1, 1]} : vector<49x128xf32> to vector<1x128xf32>
    %60 = vector.shape_cast %59 : vector<1x128xf32> to vector<128xf32>
    %61 = vector.shape_cast %60 : vector<128xf32> to vector<1x1x128xf32>
    %62 = vector.broadcast %61 : vector<1x1x128xf32> to vector<8x16x128xf32>
    %63 = arith.mulf %58, %62 : vector<8x16x128xf32>
    %64 = vector.extract_strided_slice %57 {offsets = [1, 0, 0], sizes = [8, 16, 128], strides = [1, 1, 1]} : vector<14x16x128xf32> to vector<8x16x128xf32>
    %65 = vector.extract_strided_slice %5 {offsets = [8, 0], sizes = [1, 128], strides = [1, 1]} : vector<49x128xf32> to vector<1x128xf32>
    %66 = vector.shape_cast %65 : vector<1x128xf32> to vector<128xf32>
    %67 = vector.shape_cast %66 : vector<128xf32> to vector<1x1x128xf32>
    %68 = vector.broadcast %67 : vector<1x1x128xf32> to vector<8x16x128xf32>
    %69 = arith.mulf %64, %68 : vector<8x16x128xf32>
    %70 = vector.extract_strided_slice %57 {offsets = [2, 0, 0], sizes = [8, 16, 128], strides = [1, 1, 1]} : vector<14x16x128xf32> to vector<8x16x128xf32>
    %71 = vector.extract_strided_slice %5 {offsets = [15, 0], sizes = [1, 128], strides = [1, 1]} : vector<49x128xf32> to vector<1x128xf32>
    %72 = vector.shape_cast %71 : vector<1x128xf32> to vector<128xf32>
    %73 = vector.shape_cast %72 : vector<128xf32> to vector<1x1x128xf32>
    %74 = vector.broadcast %73 : vector<1x1x128xf32> to vector<8x16x128xf32>
    %75 = arith.mulf %70, %74 : vector<8x16x128xf32>
    %76 = vector.extract_strided_slice %57 {offsets = [3, 0, 0], sizes = [8, 16, 128], strides = [1, 1, 1]} : vector<14x16x128xf32> to vector<8x16x128xf32>
    %77 = vector.extract_strided_slice %5 {offsets = [22, 0], sizes = [1, 128], strides = [1, 1]} : vector<49x128xf32> to vector<1x128xf32>
    %78 = vector.shape_cast %77 : vector<1x128xf32> to vector<128xf32>
    %79 = vector.shape_cast %78 : vector<128xf32> to vector<1x1x128xf32>
    %80 = vector.broadcast %79 : vector<1x1x128xf32> to vector<8x16x128xf32>
    %81 = arith.mulf %76, %80 : vector<8x16x128xf32>
    %82 = vector.extract_strided_slice %57 {offsets = [4, 0, 0], sizes = [8, 16, 128], strides = [1, 1, 1]} : vector<14x16x128xf32> to vector<8x16x128xf32>
    %83 = vector.extract_strided_slice %5 {offsets = [29, 0], sizes = [1, 128], strides = [1, 1]} : vector<49x128xf32> to vector<1x128xf32>
    %84 = vector.shape_cast %83 : vector<1x128xf32> to vector<128xf32>
    %85 = vector.shape_cast %84 : vector<128xf32> to vector<1x1x128xf32>
    %86 = vector.broadcast %85 : vector<1x1x128xf32> to vector<8x16x128xf32>
    %87 = arith.mulf %82, %86 : vector<8x16x128xf32>
    %88 = vector.extract_strided_slice %57 {offsets = [5, 0, 0], sizes = [8, 16, 128], strides = [1, 1, 1]} : vector<14x16x128xf32> to vector<8x16x128xf32>
    %89 = vector.extract_strided_slice %5 {offsets = [36, 0], sizes = [1, 128], strides = [1, 1]} : vector<49x128xf32> to vector<1x128xf32>
    %90 = vector.shape_cast %89 : vector<1x128xf32> to vector<128xf32>
    %91 = vector.shape_cast %90 : vector<128xf32> to vector<1x1x128xf32>
    %92 = vector.broadcast %91 : vector<1x1x128xf32> to vector<8x16x128xf32>
    %93 = arith.mulf %88, %92 : vector<8x16x128xf32>
    %94 = vector.extract_strided_slice %57 {offsets = [6, 0, 0], sizes = [8, 16, 128], strides = [1, 1, 1]} : vector<14x16x128xf32> to vector<8x16x128xf32>
    %95 = vector.extract_strided_slice %5 {offsets = [43, 0], sizes = [1, 128], strides = [1, 1]} : vector<49x128xf32> to vector<1x128xf32>
    %96 = vector.shape_cast %95 : vector<1x128xf32> to vector<128xf32>
    %97 = vector.shape_cast %96 : vector<128xf32> to vector<1x1x128xf32>
    %98 = vector.broadcast %97 : vector<1x1x128xf32> to vector<8x16x128xf32>
    %99 = arith.mulf %94, %98 : vector<8x16x128xf32>
    %100 = arith.addf %63, %69 : vector<8x16x128xf32>
    %101 = arith.addf %75, %81 : vector<8x16x128xf32>
    %102 = arith.addf %87, %93 : vector<8x16x128xf32>
    %103 = arith.addf %100, %101 : vector<8x16x128xf32>
    %104 = arith.addf %102, %99 : vector<8x16x128xf32>
    %105 = arith.addf %103, %104 : vector<8x16x128xf32>
    %106 = arith.index_cast %4 : i32 to index
    %c2 = arith.constant 2 : index
    %c0_5 = arith.constant 0 : index
    %107 = vector.load %arg13[%106, %c2, %c0_5] : memref<22x22x128xf32, #tpu.memory_space<vmem>>, vector<14x16x128xf32>
    %108 = vector.extract_strided_slice %107 {offsets = [0, 0, 0], sizes = [8, 16, 128], strides = [1, 1, 1]} : vector<14x16x128xf32> to vector<8x16x128xf32>
    %109 = vector.extract_strided_slice %5 {offsets = [2, 0], sizes = [1, 128], strides = [1, 1]} : vector<49x128xf32> to vector<1x128xf32>
    %110 = vector.shape_cast %109 : vector<1x128xf32> to vector<128xf32>
    %111 = vector.shape_cast %110 : vector<128xf32> to vector<1x1x128xf32>
    %112 = vector.broadcast %111 : vector<1x1x128xf32> to vector<8x16x128xf32>
    %113 = arith.mulf %108, %112 : vector<8x16x128xf32>
    %114 = vector.extract_strided_slice %107 {offsets = [1, 0, 0], sizes = [8, 16, 128], strides = [1, 1, 1]} : vector<14x16x128xf32> to vector<8x16x128xf32>
    %115 = vector.extract_strided_slice %5 {offsets = [9, 0], sizes = [1, 128], strides = [1, 1]} : vector<49x128xf32> to vector<1x128xf32>
    %116 = vector.shape_cast %115 : vector<1x128xf32> to vector<128xf32>
    %117 = vector.shape_cast %116 : vector<128xf32> to vector<1x1x128xf32>
    %118 = vector.broadcast %117 : vector<1x1x128xf32> to vector<8x16x128xf32>
    %119 = arith.mulf %114, %118 : vector<8x16x128xf32>
    %120 = vector.extract_strided_slice %107 {offsets = [2, 0, 0], sizes = [8, 16, 128], strides = [1, 1, 1]} : vector<14x16x128xf32> to vector<8x16x128xf32>
    %121 = vector.extract_strided_slice %5 {offsets = [16, 0], sizes = [1, 128], strides = [1, 1]} : vector<49x128xf32> to vector<1x128xf32>
    %122 = vector.shape_cast %121 : vector<1x128xf32> to vector<128xf32>
    %123 = vector.shape_cast %122 : vector<128xf32> to vector<1x1x128xf32>
    %124 = vector.broadcast %123 : vector<1x1x128xf32> to vector<8x16x128xf32>
    %125 = arith.mulf %120, %124 : vector<8x16x128xf32>
    %126 = vector.extract_strided_slice %107 {offsets = [3, 0, 0], sizes = [8, 16, 128], strides = [1, 1, 1]} : vector<14x16x128xf32> to vector<8x16x128xf32>
    %127 = vector.extract_strided_slice %5 {offsets = [23, 0], sizes = [1, 128], strides = [1, 1]} : vector<49x128xf32> to vector<1x128xf32>
    %128 = vector.shape_cast %127 : vector<1x128xf32> to vector<128xf32>
    %129 = vector.shape_cast %128 : vector<128xf32> to vector<1x1x128xf32>
    %130 = vector.broadcast %129 : vector<1x1x128xf32> to vector<8x16x128xf32>
    %131 = arith.mulf %126, %130 : vector<8x16x128xf32>
    %132 = vector.extract_strided_slice %107 {offsets = [4, 0, 0], sizes = [8, 16, 128], strides = [1, 1, 1]} : vector<14x16x128xf32> to vector<8x16x128xf32>
    %133 = vector.extract_strided_slice %5 {offsets = [30, 0], sizes = [1, 128], strides = [1, 1]} : vector<49x128xf32> to vector<1x128xf32>
    %134 = vector.shape_cast %133 : vector<1x128xf32> to vector<128xf32>
    %135 = vector.shape_cast %134 : vector<128xf32> to vector<1x1x128xf32>
    %136 = vector.broadcast %135 : vector<1x1x128xf32> to vector<8x16x128xf32>
    %137 = arith.mulf %132, %136 : vector<8x16x128xf32>
    %138 = vector.extract_strided_slice %107 {offsets = [5, 0, 0], sizes = [8, 16, 128], strides = [1, 1, 1]} : vector<14x16x128xf32> to vector<8x16x128xf32>
    %139 = vector.extract_strided_slice %5 {offsets = [37, 0], sizes = [1, 128], strides = [1, 1]} : vector<49x128xf32> to vector<1x128xf32>
    %140 = vector.shape_cast %139 : vector<1x128xf32> to vector<128xf32>
    %141 = vector.shape_cast %140 : vector<128xf32> to vector<1x1x128xf32>
    %142 = vector.broadcast %141 : vector<1x1x128xf32> to vector<8x16x128xf32>
    %143 = arith.mulf %138, %142 : vector<8x16x128xf32>
    %144 = vector.extract_strided_slice %107 {offsets = [6, 0, 0], sizes = [8, 16, 128], strides = [1, 1, 1]} : vector<14x16x128xf32> to vector<8x16x128xf32>
    %145 = vector.extract_strided_slice %5 {offsets = [44, 0], sizes = [1, 128], strides = [1, 1]} : vector<49x128xf32> to vector<1x128xf32>
    %146 = vector.shape_cast %145 : vector<1x128xf32> to vector<128xf32>
    %147 = vector.shape_cast %146 : vector<128xf32> to vector<1x1x128xf32>
    %148 = vector.broadcast %147 : vector<1x1x128xf32> to vector<8x16x128xf32>
    %149 = arith.mulf %144, %148 : vector<8x16x128xf32>
    %150 = arith.addf %113, %119 : vector<8x16x128xf32>
    %151 = arith.addf %125, %131 : vector<8x16x128xf32>
    %152 = arith.addf %137, %143 : vector<8x16x128xf32>
    %153 = arith.addf %150, %151 : vector<8x16x128xf32>
    %154 = arith.addf %152, %149 : vector<8x16x128xf32>
    %155 = arith.addf %153, %154 : vector<8x16x128xf32>
    %156 = arith.index_cast %4 : i32 to index
    %c3 = arith.constant 3 : index
    %c0_6 = arith.constant 0 : index
    %157 = vector.load %arg13[%156, %c3, %c0_6] : memref<22x22x128xf32, #tpu.memory_space<vmem>>, vector<14x16x128xf32>
    %158 = vector.extract_strided_slice %157 {offsets = [0, 0, 0], sizes = [8, 16, 128], strides = [1, 1, 1]} : vector<14x16x128xf32> to vector<8x16x128xf32>
    %159 = vector.extract_strided_slice %5 {offsets = [3, 0], sizes = [1, 128], strides = [1, 1]} : vector<49x128xf32> to vector<1x128xf32>
    %160 = vector.shape_cast %159 : vector<1x128xf32> to vector<128xf32>
    %161 = vector.shape_cast %160 : vector<128xf32> to vector<1x1x128xf32>
    %162 = vector.broadcast %161 : vector<1x1x128xf32> to vector<8x16x128xf32>
    %163 = arith.mulf %158, %162 : vector<8x16x128xf32>
    %164 = vector.extract_strided_slice %157 {offsets = [1, 0, 0], sizes = [8, 16, 128], strides = [1, 1, 1]} : vector<14x16x128xf32> to vector<8x16x128xf32>
    %165 = vector.extract_strided_slice %5 {offsets = [10, 0], sizes = [1, 128], strides = [1, 1]} : vector<49x128xf32> to vector<1x128xf32>
    %166 = vector.shape_cast %165 : vector<1x128xf32> to vector<128xf32>
    %167 = vector.shape_cast %166 : vector<128xf32> to vector<1x1x128xf32>
    %168 = vector.broadcast %167 : vector<1x1x128xf32> to vector<8x16x128xf32>
    %169 = arith.mulf %164, %168 : vector<8x16x128xf32>
    %170 = vector.extract_strided_slice %157 {offsets = [2, 0, 0], sizes = [8, 16, 128], strides = [1, 1, 1]} : vector<14x16x128xf32> to vector<8x16x128xf32>
    %171 = vector.extract_strided_slice %5 {offsets = [17, 0], sizes = [1, 128], strides = [1, 1]} : vector<49x128xf32> to vector<1x128xf32>
    %172 = vector.shape_cast %171 : vector<1x128xf32> to vector<128xf32>
    %173 = vector.shape_cast %172 : vector<128xf32> to vector<1x1x128xf32>
    %174 = vector.broadcast %173 : vector<1x1x128xf32> to vector<8x16x128xf32>
    %175 = arith.mulf %170, %174 : vector<8x16x128xf32>
    %176 = vector.extract_strided_slice %157 {offsets = [3, 0, 0], sizes = [8, 16, 128], strides = [1, 1, 1]} : vector<14x16x128xf32> to vector<8x16x128xf32>
    %177 = vector.extract_strided_slice %5 {offsets = [24, 0], sizes = [1, 128], strides = [1, 1]} : vector<49x128xf32> to vector<1x128xf32>
    %178 = vector.shape_cast %177 : vector<1x128xf32> to vector<128xf32>
    %179 = vector.shape_cast %178 : vector<128xf32> to vector<1x1x128xf32>
    %180 = vector.broadcast %179 : vector<1x1x128xf32> to vector<8x16x128xf32>
    %181 = arith.mulf %176, %180 : vector<8x16x128xf32>
    %182 = vector.extract_strided_slice %157 {offsets = [4, 0, 0], sizes = [8, 16, 128], strides = [1, 1, 1]} : vector<14x16x128xf32> to vector<8x16x128xf32>
    %183 = vector.extract_strided_slice %5 {offsets = [31, 0], sizes = [1, 128], strides = [1, 1]} : vector<49x128xf32> to vector<1x128xf32>
    %184 = vector.shape_cast %183 : vector<1x128xf32> to vector<128xf32>
    %185 = vector.shape_cast %184 : vector<128xf32> to vector<1x1x128xf32>
    %186 = vector.broadcast %185 : vector<1x1x128xf32> to vector<8x16x128xf32>
    %187 = arith.mulf %182, %186 : vector<8x16x128xf32>
    %188 = vector.extract_strided_slice %157 {offsets = [5, 0, 0], sizes = [8, 16, 128], strides = [1, 1, 1]} : vector<14x16x128xf32> to vector<8x16x128xf32>
    %189 = vector.extract_strided_slice %5 {offsets = [38, 0], sizes = [1, 128], strides = [1, 1]} : vector<49x128xf32> to vector<1x128xf32>
    %190 = vector.shape_cast %189 : vector<1x128xf32> to vector<128xf32>
    %191 = vector.shape_cast %190 : vector<128xf32> to vector<1x1x128xf32>
    %192 = vector.broadcast %191 : vector<1x1x128xf32> to vector<8x16x128xf32>
    %193 = arith.mulf %188, %192 : vector<8x16x128xf32>
    %194 = vector.extract_strided_slice %157 {offsets = [6, 0, 0], sizes = [8, 16, 128], strides = [1, 1, 1]} : vector<14x16x128xf32> to vector<8x16x128xf32>
    %195 = vector.extract_strided_slice %5 {offsets = [45, 0], sizes = [1, 128], strides = [1, 1]} : vector<49x128xf32> to vector<1x128xf32>
    %196 = vector.shape_cast %195 : vector<1x128xf32> to vector<128xf32>
    %197 = vector.shape_cast %196 : vector<128xf32> to vector<1x1x128xf32>
    %198 = vector.broadcast %197 : vector<1x1x128xf32> to vector<8x16x128xf32>
    %199 = arith.mulf %194, %198 : vector<8x16x128xf32>
    %200 = arith.addf %163, %169 : vector<8x16x128xf32>
    %201 = arith.addf %175, %181 : vector<8x16x128xf32>
    %202 = arith.addf %187, %193 : vector<8x16x128xf32>
    %203 = arith.addf %200, %201 : vector<8x16x128xf32>
    %204 = arith.addf %202, %199 : vector<8x16x128xf32>
    %205 = arith.addf %203, %204 : vector<8x16x128xf32>
    %206 = arith.index_cast %4 : i32 to index
    %c4 = arith.constant 4 : index
    %c0_7 = arith.constant 0 : index
    %207 = vector.load %arg13[%206, %c4, %c0_7] : memref<22x22x128xf32, #tpu.memory_space<vmem>>, vector<14x16x128xf32>
    %208 = vector.extract_strided_slice %207 {offsets = [0, 0, 0], sizes = [8, 16, 128], strides = [1, 1, 1]} : vector<14x16x128xf32> to vector<8x16x128xf32>
    %209 = vector.extract_strided_slice %5 {offsets = [4, 0], sizes = [1, 128], strides = [1, 1]} : vector<49x128xf32> to vector<1x128xf32>
    %210 = vector.shape_cast %209 : vector<1x128xf32> to vector<128xf32>
    %211 = vector.shape_cast %210 : vector<128xf32> to vector<1x1x128xf32>
    %212 = vector.broadcast %211 : vector<1x1x128xf32> to vector<8x16x128xf32>
    %213 = arith.mulf %208, %212 : vector<8x16x128xf32>
    %214 = vector.extract_strided_slice %207 {offsets = [1, 0, 0], sizes = [8, 16, 128], strides = [1, 1, 1]} : vector<14x16x128xf32> to vector<8x16x128xf32>
    %215 = vector.extract_strided_slice %5 {offsets = [11, 0], sizes = [1, 128], strides = [1, 1]} : vector<49x128xf32> to vector<1x128xf32>
    %216 = vector.shape_cast %215 : vector<1x128xf32> to vector<128xf32>
    %217 = vector.shape_cast %216 : vector<128xf32> to vector<1x1x128xf32>
    %218 = vector.broadcast %217 : vector<1x1x128xf32> to vector<8x16x128xf32>
    %219 = arith.mulf %214, %218 : vector<8x16x128xf32>
    %220 = vector.extract_strided_slice %207 {offsets = [2, 0, 0], sizes = [8, 16, 128], strides = [1, 1, 1]} : vector<14x16x128xf32> to vector<8x16x128xf32>
    %221 = vector.extract_strided_slice %5 {offsets = [18, 0], sizes = [1, 128], strides = [1, 1]} : vector<49x128xf32> to vector<1x128xf32>
    %222 = vector.shape_cast %221 : vector<1x128xf32> to vector<128xf32>
    %223 = vector.shape_cast %222 : vector<128xf32> to vector<1x1x128xf32>
    %224 = vector.broadcast %223 : vector<1x1x128xf32> to vector<8x16x128xf32>
    %225 = arith.mulf %220, %224 : vector<8x16x128xf32>
    %226 = vector.extract_strided_slice %207 {offsets = [3, 0, 0], sizes = [8, 16, 128], strides = [1, 1, 1]} : vector<14x16x128xf32> to vector<8x16x128xf32>
    %227 = vector.extract_strided_slice %5 {offsets = [25, 0], sizes = [1, 128], strides = [1, 1]} : vector<49x128xf32> to vector<1x128xf32>
    %228 = vector.shape_cast %227 : vector<1x128xf32> to vector<128xf32>
    %229 = vector.shape_cast %228 : vector<128xf32> to vector<1x1x128xf32>
    %230 = vector.broadcast %229 : vector<1x1x128xf32> to vector<8x16x128xf32>
    %231 = arith.mulf %226, %230 : vector<8x16x128xf32>
    %232 = vector.extract_strided_slice %207 {offsets = [4, 0, 0], sizes = [8, 16, 128], strides = [1, 1, 1]} : vector<14x16x128xf32> to vector<8x16x128xf32>
    %233 = vector.extract_strided_slice %5 {offsets = [32, 0], sizes = [1, 128], strides = [1, 1]} : vector<49x128xf32> to vector<1x128xf32>
    %234 = vector.shape_cast %233 : vector<1x128xf32> to vector<128xf32>
    %235 = vector.shape_cast %234 : vector<128xf32> to vector<1x1x128xf32>
    %236 = vector.broadcast %235 : vector<1x1x128xf32> to vector<8x16x128xf32>
    %237 = arith.mulf %232, %236 : vector<8x16x128xf32>
    %238 = vector.extract_strided_slice %207 {offsets = [5, 0, 0], sizes = [8, 16, 128], strides = [1, 1, 1]} : vector<14x16x128xf32> to vector<8x16x128xf32>
    %239 = vector.extract_strided_slice %5 {offsets = [39, 0], sizes = [1, 128], strides = [1, 1]} : vector<49x128xf32> to vector<1x128xf32>
    %240 = vector.shape_cast %239 : vector<1x128xf32> to vector<128xf32>
    %241 = vector.shape_cast %240 : vector<128xf32> to vector<1x1x128xf32>
    %242 = vector.broadcast %241 : vector<1x1x128xf32> to vector<8x16x128xf32>
    %243 = arith.mulf %238, %242 : vector<8x16x128xf32>
    %244 = vector.extract_strided_slice %207 {offsets = [6, 0, 0], sizes = [8, 16, 128], strides = [1, 1, 1]} : vector<14x16x128xf32> to vector<8x16x128xf32>
    %245 = vector.extract_strided_slice %5 {offsets = [46, 0], sizes = [1, 128], strides = [1, 1]} : vector<49x128xf32> to vector<1x128xf32>
    %246 = vector.shape_cast %245 : vector<1x128xf32> to vector<128xf32>
    %247 = vector.shape_cast %246 : vector<128xf32> to vector<1x1x128xf32>
    %248 = vector.broadcast %247 : vector<1x1x128xf32> to vector<8x16x128xf32>
    %249 = arith.mulf %244, %248 : vector<8x16x128xf32>
    %250 = arith.addf %213, %219 : vector<8x16x128xf32>
    %251 = arith.addf %225, %231 : vector<8x16x128xf32>
    %252 = arith.addf %237, %243 : vector<8x16x128xf32>
    %253 = arith.addf %250, %251 : vector<8x16x128xf32>
    %254 = arith.addf %252, %249 : vector<8x16x128xf32>
    %255 = arith.addf %253, %254 : vector<8x16x128xf32>
    %256 = arith.index_cast %4 : i32 to index
    %c5 = arith.constant 5 : index
    %c0_8 = arith.constant 0 : index
    %257 = vector.load %arg13[%256, %c5, %c0_8] : memref<22x22x128xf32, #tpu.memory_space<vmem>>, vector<14x16x128xf32>
    %258 = vector.extract_strided_slice %257 {offsets = [0, 0, 0], sizes = [8, 16, 128], strides = [1, 1, 1]} : vector<14x16x128xf32> to vector<8x16x128xf32>
    %259 = vector.extract_strided_slice %5 {offsets = [5, 0], sizes = [1, 128], strides = [1, 1]} : vector<49x128xf32> to vector<1x128xf32>
    %260 = vector.shape_cast %259 : vector<1x128xf32> to vector<128xf32>
    %261 = vector.shape_cast %260 : vector<128xf32> to vector<1x1x128xf32>
    %262 = vector.broadcast %261 : vector<1x1x128xf32> to vector<8x16x128xf32>
    %263 = arith.mulf %258, %262 : vector<8x16x128xf32>
    %264 = vector.extract_strided_slice %257 {offsets = [1, 0, 0], sizes = [8, 16, 128], strides = [1, 1, 1]} : vector<14x16x128xf32> to vector<8x16x128xf32>
    %265 = vector.extract_strided_slice %5 {offsets = [12, 0], sizes = [1, 128], strides = [1, 1]} : vector<49x128xf32> to vector<1x128xf32>
    %266 = vector.shape_cast %265 : vector<1x128xf32> to vector<128xf32>
    %267 = vector.shape_cast %266 : vector<128xf32> to vector<1x1x128xf32>
    %268 = vector.broadcast %267 : vector<1x1x128xf32> to vector<8x16x128xf32>
    %269 = arith.mulf %264, %268 : vector<8x16x128xf32>
    %270 = vector.extract_strided_slice %257 {offsets = [2, 0, 0], sizes = [8, 16, 128], strides = [1, 1, 1]} : vector<14x16x128xf32> to vector<8x16x128xf32>
    %271 = vector.extract_strided_slice %5 {offsets = [19, 0], sizes = [1, 128], strides = [1, 1]} : vector<49x128xf32> to vector<1x128xf32>
    %272 = vector.shape_cast %271 : vector<1x128xf32> to vector<128xf32>
    %273 = vector.shape_cast %272 : vector<128xf32> to vector<1x1x128xf32>
    %274 = vector.broadcast %273 : vector<1x1x128xf32> to vector<8x16x128xf32>
    %275 = arith.mulf %270, %274 : vector<8x16x128xf32>
    %276 = vector.extract_strided_slice %257 {offsets = [3, 0, 0], sizes = [8, 16, 128], strides = [1, 1, 1]} : vector<14x16x128xf32> to vector<8x16x128xf32>
    %277 = vector.extract_strided_slice %5 {offsets = [26, 0], sizes = [1, 128], strides = [1, 1]} : vector<49x128xf32> to vector<1x128xf32>
    %278 = vector.shape_cast %277 : vector<1x128xf32> to vector<128xf32>
    %279 = vector.shape_cast %278 : vector<128xf32> to vector<1x1x128xf32>
    %280 = vector.broadcast %279 : vector<1x1x128xf32> to vector<8x16x128xf32>
    %281 = arith.mulf %276, %280 : vector<8x16x128xf32>
    %282 = vector.extract_strided_slice %257 {offsets = [4, 0, 0], sizes = [8, 16, 128], strides = [1, 1, 1]} : vector<14x16x128xf32> to vector<8x16x128xf32>
    %283 = vector.extract_strided_slice %5 {offsets = [33, 0], sizes = [1, 128], strides = [1, 1]} : vector<49x128xf32> to vector<1x128xf32>
    %284 = vector.shape_cast %283 : vector<1x128xf32> to vector<128xf32>
    %285 = vector.shape_cast %284 : vector<128xf32> to vector<1x1x128xf32>
    %286 = vector.broadcast %285 : vector<1x1x128xf32> to vector<8x16x128xf32>
    %287 = arith.mulf %282, %286 : vector<8x16x128xf32>
    %288 = vector.extract_strided_slice %257 {offsets = [5, 0, 0], sizes = [8, 16, 128], strides = [1, 1, 1]} : vector<14x16x128xf32> to vector<8x16x128xf32>
    %289 = vector.extract_strided_slice %5 {offsets = [40, 0], sizes = [1, 128], strides = [1, 1]} : vector<49x128xf32> to vector<1x128xf32>
    %290 = vector.shape_cast %289 : vector<1x128xf32> to vector<128xf32>
    %291 = vector.shape_cast %290 : vector<128xf32> to vector<1x1x128xf32>
    %292 = vector.broadcast %291 : vector<1x1x128xf32> to vector<8x16x128xf32>
    %293 = arith.mulf %288, %292 : vector<8x16x128xf32>
    %294 = vector.extract_strided_slice %257 {offsets = [6, 0, 0], sizes = [8, 16, 128], strides = [1, 1, 1]} : vector<14x16x128xf32> to vector<8x16x128xf32>
    %295 = vector.extract_strided_slice %5 {offsets = [47, 0], sizes = [1, 128], strides = [1, 1]} : vector<49x128xf32> to vector<1x128xf32>
    %296 = vector.shape_cast %295 : vector<1x128xf32> to vector<128xf32>
    %297 = vector.shape_cast %296 : vector<128xf32> to vector<1x1x128xf32>
    %298 = vector.broadcast %297 : vector<1x1x128xf32> to vector<8x16x128xf32>
    %299 = arith.mulf %294, %298 : vector<8x16x128xf32>
    %300 = arith.addf %263, %269 : vector<8x16x128xf32>
    %301 = arith.addf %275, %281 : vector<8x16x128xf32>
    %302 = arith.addf %287, %293 : vector<8x16x128xf32>
    %303 = arith.addf %300, %301 : vector<8x16x128xf32>
    %304 = arith.addf %302, %299 : vector<8x16x128xf32>
    %305 = arith.addf %303, %304 : vector<8x16x128xf32>
    %306 = arith.index_cast %4 : i32 to index
    %c6 = arith.constant 6 : index
    %c0_9 = arith.constant 0 : index
    %307 = vector.load %arg13[%306, %c6, %c0_9] : memref<22x22x128xf32, #tpu.memory_space<vmem>>, vector<14x16x128xf32>
    %308 = vector.extract_strided_slice %307 {offsets = [0, 0, 0], sizes = [8, 16, 128], strides = [1, 1, 1]} : vector<14x16x128xf32> to vector<8x16x128xf32>
    %309 = vector.extract_strided_slice %5 {offsets = [6, 0], sizes = [1, 128], strides = [1, 1]} : vector<49x128xf32> to vector<1x128xf32>
    %310 = vector.shape_cast %309 : vector<1x128xf32> to vector<128xf32>
    %311 = vector.shape_cast %310 : vector<128xf32> to vector<1x1x128xf32>
    %312 = vector.broadcast %311 : vector<1x1x128xf32> to vector<8x16x128xf32>
    %313 = arith.mulf %308, %312 : vector<8x16x128xf32>
    %314 = vector.extract_strided_slice %307 {offsets = [1, 0, 0], sizes = [8, 16, 128], strides = [1, 1, 1]} : vector<14x16x128xf32> to vector<8x16x128xf32>
    %315 = vector.extract_strided_slice %5 {offsets = [13, 0], sizes = [1, 128], strides = [1, 1]} : vector<49x128xf32> to vector<1x128xf32>
    %316 = vector.shape_cast %315 : vector<1x128xf32> to vector<128xf32>
    %317 = vector.shape_cast %316 : vector<128xf32> to vector<1x1x128xf32>
    %318 = vector.broadcast %317 : vector<1x1x128xf32> to vector<8x16x128xf32>
    %319 = arith.mulf %314, %318 : vector<8x16x128xf32>
    %320 = vector.extract_strided_slice %307 {offsets = [2, 0, 0], sizes = [8, 16, 128], strides = [1, 1, 1]} : vector<14x16x128xf32> to vector<8x16x128xf32>
    %321 = vector.extract_strided_slice %5 {offsets = [20, 0], sizes = [1, 128], strides = [1, 1]} : vector<49x128xf32> to vector<1x128xf32>
    %322 = vector.shape_cast %321 : vector<1x128xf32> to vector<128xf32>
    %323 = vector.shape_cast %322 : vector<128xf32> to vector<1x1x128xf32>
    %324 = vector.broadcast %323 : vector<1x1x128xf32> to vector<8x16x128xf32>
    %325 = arith.mulf %320, %324 : vector<8x16x128xf32>
    %326 = vector.extract_strided_slice %307 {offsets = [3, 0, 0], sizes = [8, 16, 128], strides = [1, 1, 1]} : vector<14x16x128xf32> to vector<8x16x128xf32>
    %327 = vector.extract_strided_slice %5 {offsets = [27, 0], sizes = [1, 128], strides = [1, 1]} : vector<49x128xf32> to vector<1x128xf32>
    %328 = vector.shape_cast %327 : vector<1x128xf32> to vector<128xf32>
    %329 = vector.shape_cast %328 : vector<128xf32> to vector<1x1x128xf32>
    %330 = vector.broadcast %329 : vector<1x1x128xf32> to vector<8x16x128xf32>
    %331 = arith.mulf %326, %330 : vector<8x16x128xf32>
    %332 = vector.extract_strided_slice %307 {offsets = [4, 0, 0], sizes = [8, 16, 128], strides = [1, 1, 1]} : vector<14x16x128xf32> to vector<8x16x128xf32>
    %333 = vector.extract_strided_slice %5 {offsets = [34, 0], sizes = [1, 128], strides = [1, 1]} : vector<49x128xf32> to vector<1x128xf32>
    %334 = vector.shape_cast %333 : vector<1x128xf32> to vector<128xf32>
    %335 = vector.shape_cast %334 : vector<128xf32> to vector<1x1x128xf32>
    %336 = vector.broadcast %335 : vector<1x1x128xf32> to vector<8x16x128xf32>
    %337 = arith.mulf %332, %336 : vector<8x16x128xf32>
    %338 = vector.extract_strided_slice %307 {offsets = [5, 0, 0], sizes = [8, 16, 128], strides = [1, 1, 1]} : vector<14x16x128xf32> to vector<8x16x128xf32>
    %339 = vector.extract_strided_slice %5 {offsets = [41, 0], sizes = [1, 128], strides = [1, 1]} : vector<49x128xf32> to vector<1x128xf32>
    %340 = vector.shape_cast %339 : vector<1x128xf32> to vector<128xf32>
    %341 = vector.shape_cast %340 : vector<128xf32> to vector<1x1x128xf32>
    %342 = vector.broadcast %341 : vector<1x1x128xf32> to vector<8x16x128xf32>
    %343 = arith.mulf %338, %342 : vector<8x16x128xf32>
    %344 = vector.extract_strided_slice %307 {offsets = [6, 0, 0], sizes = [8, 16, 128], strides = [1, 1, 1]} : vector<14x16x128xf32> to vector<8x16x128xf32>
    %345 = vector.extract_strided_slice %5 {offsets = [48, 0], sizes = [1, 128], strides = [1, 1]} : vector<49x128xf32> to vector<1x128xf32>
    %346 = vector.shape_cast %345 : vector<1x128xf32> to vector<128xf32>
    %347 = vector.shape_cast %346 : vector<128xf32> to vector<1x1x128xf32>
    %348 = vector.broadcast %347 : vector<1x1x128xf32> to vector<8x16x128xf32>
    %349 = arith.mulf %344, %348 : vector<8x16x128xf32>
    %350 = arith.addf %313, %319 : vector<8x16x128xf32>
    %351 = arith.addf %325, %331 : vector<8x16x128xf32>
    %352 = arith.addf %337, %343 : vector<8x16x128xf32>
    %353 = arith.addf %350, %351 : vector<8x16x128xf32>
    %354 = arith.addf %352, %349 : vector<8x16x128xf32>
    %355 = arith.addf %353, %354 : vector<8x16x128xf32>
    %c0_10 = arith.constant 0 : index
    %c0_11 = arith.constant 0 : index
    %356 = vector.load %arg4[%c0_10, %c0_11] : memref<1x128xf32, #tpu.memory_space<vmem>>, vector<1x128xf32>
    %357 = vector.shape_cast %356 : vector<1x128xf32> to vector<128xf32>
    %358 = vector.shape_cast %357 : vector<128xf32> to vector<1x1x128xf32>
    %359 = vector.broadcast %358 : vector<1x1x128xf32> to vector<8x16x128xf32>
    %360 = arith.addf %55, %105 : vector<8x16x128xf32>
    %361 = arith.addf %155, %205 : vector<8x16x128xf32>
    %362 = arith.addf %255, %305 : vector<8x16x128xf32>
    %363 = arith.addf %360, %361 : vector<8x16x128xf32>
    %364 = arith.addf %362, %355 : vector<8x16x128xf32>
    %365 = arith.addf %363, %364 : vector<8x16x128xf32>
    %366 = arith.addf %365, %359 : vector<8x16x128xf32>
    %cst = arith.constant dense<0.000000e+00> : vector<8x16xf32>
    %367 = vector.multi_reduction <add>, %366, %cst [2] : vector<8x16x128xf32> to vector<8x16xf32>
    %368 = vector.shape_cast %367 : vector<8x16xf32> to vector<8x16x1xf32>
    %cst_12 = arith.constant 2.500000e-01 : f32
    %369 = vector.broadcast %cst_12 : f32 to vector<8x16x1xf32>
    %370 = arith.mulf %368, %369 : vector<8x16x1xf32>
    %371 = vector.broadcast %370 : vector<8x16x1xf32> to vector<8x16x128xf32>
    %372 = arith.subf %366, %371 : vector<8x16x128xf32>
    %373 = tpu.iota {dimensions = array<i32: 2>} : vector<1x1x128xi32>
    %c4_i32 = arith.constant 4 : i32
    %374 = vector.broadcast %c4_i32 : i32 to vector<1x1x128xi32>
    %375 = arith.cmpi slt, %373, %374 : vector<1x1x128xi32>
    %376 = arith.mulf %372, %372 : vector<8x16x128xf32>
    %cst_13 = arith.constant 0.000000e+00 : f32
    %377 = vector.shape_cast %375 : vector<1x1x128xi1> to vector<1x1x128xi1>
    %378 = vector.broadcast %377 : vector<1x1x128xi1> to vector<8x16x128xi1>
    %379 = vector.broadcast %cst_13 : f32 to vector<8x16x128xf32>
    %380 = arith.select %378, %376, %379 : vector<8x16x128xi1>, vector<8x16x128xf32>
    %cst_14 = arith.constant dense<0.000000e+00> : vector<8x16xf32>
    %381 = vector.multi_reduction <add>, %380, %cst_14 [2] : vector<8x16x128xf32> to vector<8x16xf32>
    %382 = vector.shape_cast %381 : vector<8x16xf32> to vector<8x16x1xf32>
    %cst_15 = arith.constant 2.500000e-01 : f32
    %383 = vector.broadcast %cst_15 : f32 to vector<8x16x1xf32>
    %384 = arith.mulf %382, %383 : vector<8x16x1xf32>
    %cst_16 = arith.constant 9.99999974E-6 : f32
    %385 = vector.broadcast %cst_16 : f32 to vector<8x16x1xf32>
    %386 = arith.addf %384, %385 : vector<8x16x1xf32>
    %387 = math.rsqrt %386 : vector<8x16x1xf32>
    %388 = vector.broadcast %387 : vector<8x16x1xf32> to vector<8x16x128xf32>
    %389 = arith.mulf %372, %388 : vector<8x16x128xf32>
    %c0_17 = arith.constant 0 : index
    %c0_18 = arith.constant 0 : index
    %390 = vector.load %arg5[%c0_17, %c0_18] : memref<1x128xf32, #tpu.memory_space<vmem>>, vector<1x128xf32>
    %391 = vector.shape_cast %390 : vector<1x128xf32> to vector<128xf32>
    %392 = vector.shape_cast %391 : vector<128xf32> to vector<1x1x128xf32>
    %393 = vector.broadcast %392 : vector<1x1x128xf32> to vector<8x16x128xf32>
    %394 = arith.mulf %389, %393 : vector<8x16x128xf32>
    %c0_19 = arith.constant 0 : index
    %c0_20 = arith.constant 0 : index
    %395 = vector.load %arg6[%c0_19, %c0_20] : memref<1x128xf32, #tpu.memory_space<vmem>>, vector<1x128xf32>
    %396 = vector.shape_cast %395 : vector<1x128xf32> to vector<128xf32>
    %397 = vector.shape_cast %396 : vector<128xf32> to vector<1x1x128xf32>
    %398 = vector.broadcast %397 : vector<1x1x128xf32> to vector<8x16x128xf32>
    %399 = arith.addf %394, %398 : vector<8x16x128xf32>
    %400 = vector.shape_cast %399 : vector<8x16x128xf32> to vector<128x128xf32>
    %401 = arith.truncf %400 : vector<128x128xf32> to vector<128x128xbf16>
    %c0_21 = arith.constant 0 : index
    %c0_22 = arith.constant 0 : index
    %402 = vector.load %arg7[%c0_21, %c0_22] : memref<128x128xbf16, #tpu.memory_space<vmem>>, vector<128x128xbf16>
    %cst_23 = arith.constant dense<0.000000e+00> : vector<128x128xf32>
    %403 = tpu.matmul %401, %402, %cst_23 {dimension_numbers = #tpu.dot_dimension_numbers<[1], [0], [0], [1], [0, 0, 1, 1], [], []>} : vector<128x128xbf16>, vector<128x128xbf16>, vector<128x128xf32> -> vector<128x128xf32>
    %c0_24 = arith.constant 0 : index
    %c0_25 = arith.constant 0 : index
    %404 = vector.load %arg8[%c0_24, %c0_25] : memref<1x128xf32, #tpu.memory_space<vmem>>, vector<1x128xf32>
    %405 = vector.shape_cast %404 : vector<1x128xf32> to vector<128xf32>
    %406 = vector.shape_cast %405 : vector<128xf32> to vector<1x128xf32>
    %407 = vector.broadcast %406 : vector<1x128xf32> to vector<128x128xf32>
    %408 = arith.addf %403, %407 : vector<128x128xf32>
    %cst_26 = arith.constant 5.000000e-01 : f32
    %409 = vector.broadcast %cst_26 : f32 to vector<128x128xf32>
    %410 = arith.mulf %409, %408 : vector<128x128xf32>
    %cst_27 = arith.constant 0.707106769 : f32
    %411 = vector.broadcast %cst_27 : f32 to vector<128x128xf32>
    %412 = arith.mulf %408, %411 : vector<128x128xf32>
    %413 = math.erf %412 : vector<128x128xf32>
    %cst_28 = arith.constant 1.000000e+00 : f32
    %414 = vector.broadcast %cst_28 : f32 to vector<128x128xf32>
    %415 = arith.addf %414, %413 : vector<128x128xf32>
    %416 = arith.mulf %410, %415 : vector<128x128xf32>
    %417 = arith.truncf %416 : vector<128x128xf32> to vector<128x128xbf16>
    %c0_29 = arith.constant 0 : index
    %c0_30 = arith.constant 0 : index
    %418 = vector.load %arg9[%c0_29, %c0_30] : memref<128x128xbf16, #tpu.memory_space<vmem>>, vector<128x128xbf16>
    %cst_31 = arith.constant dense<0.000000e+00> : vector<128x128xf32>
    %419 = tpu.matmul %417, %418, %cst_31 {dimension_numbers = #tpu.dot_dimension_numbers<[1], [0], [0], [1], [0, 0, 1, 1], [], []>} : vector<128x128xbf16>, vector<128x128xbf16>, vector<128x128xf32> -> vector<128x128xf32>
    %c0_32 = arith.constant 0 : index
    %c0_33 = arith.constant 0 : index
    %420 = vector.load %arg10[%c0_32, %c0_33] : memref<1x128xf32, #tpu.memory_space<vmem>>, vector<1x128xf32>
    %421 = vector.shape_cast %420 : vector<1x128xf32> to vector<128xf32>
    %422 = vector.shape_cast %421 : vector<128xf32> to vector<1x128xf32>
    %423 = vector.broadcast %422 : vector<1x128xf32> to vector<128x128xf32>
    %424 = arith.addf %419, %423 : vector<128x128xf32>
    %c0_34 = arith.constant 0 : index
    %c0_35 = arith.constant 0 : index
    %425 = vector.load %arg11[%c0_34, %c0_35] : memref<1x128xf32, #tpu.memory_space<vmem>>, vector<1x128xf32>
    %426 = vector.shape_cast %425 : vector<1x128xf32> to vector<128xf32>
    %427 = vector.shape_cast %426 : vector<128xf32> to vector<1x128xf32>
    %428 = vector.broadcast %427 : vector<1x128xf32> to vector<128x128xf32>
    %429 = arith.mulf %424, %428 : vector<128x128xf32>
    %c0_36 = arith.constant 0 : index
    %430 = arith.index_cast %4 : i32 to index
    %c0_37 = arith.constant 0 : index
    %c0_38 = arith.constant 0 : index
    %431 = vector.load %arg2[%c0_36, %430, %c0_37, %c0_38] : memref<1x16x16x128xf32, #tpu.memory_space<vmem>>, vector<1x8x16x128xf32>
    %432 = vector.shape_cast %431 : vector<1x8x16x128xf32> to vector<8x16x128xf32>
    %433 = vector.shape_cast %429 : vector<128x128xf32> to vector<8x16x128xf32>
    %434 = arith.addf %433, %432 : vector<8x16x128xf32>
    %c0_39 = arith.constant 0 : index
    %c0_40 = arith.constant 0 : index
    %c0_41 = arith.constant 0 : index
    %c0_42 = arith.constant 0 : index
    %435 = vector.load %arg12[%c0_39, %c0_40, %c0_41, %c0_42] : memref<1x8x16x128xf32, #tpu.memory_space<vmem>>, vector<1x8x16x128xf32>
    %436 = vector.shape_cast %435 : vector<1x8x16x128xf32> to vector<8x16x128xf32>
    %437 = vector.shape_cast %434 : vector<8x16x128xf32> to vector<1x8x16x128xf32>
    tpu.vector_store %arg12[%c0_39, %c0_40, %c0_41, %c0_42], %437 {strides = array<i32>} : memref<1x8x16x128xf32, #tpu.memory_space<vmem>>, vector<1x8x16x128xf32>,
    return
  }
  func.func @transform_0(%arg0: i32, %arg1: i32) -> (i32, i32, i32, i32) {
    %c0_i32 = arith.constant 0 : i32
    %c0_i32_0 = arith.constant 0 : i32
    %c0_i32_1 = arith.constant 0 : i32
    %c0_i32_2 = arith.constant 0 : i32
    return %arg0, %c0_i32, %c0_i32_0, %c0_i32_1 : i32, i32, i32, i32
  }
  func.func @transform_1(%arg0: i32, %arg1: i32) -> (i32, i32) {
    %c0_i32 = arith.constant 0 : i32
    %c0_i32_0 = arith.constant 0 : i32
    %c0_i32_1 = arith.constant 0 : i32
    return %c0_i32, %c0_i32_0 : i32, i32
  }
  func.func @transform_2(%arg0: i32, %arg1: i32) -> (i32, i32) {
    %c0_i32 = arith.constant 0 : i32
    %c0_i32_0 = arith.constant 0 : i32
    %c0_i32_1 = arith.constant 0 : i32
    return %c0_i32, %c0_i32_0 : i32, i32
  }
  func.func @transform_3(%arg0: i32, %arg1: i32) -> (i32, i32) {
    %c0_i32 = arith.constant 0 : i32
    %c0_i32_0 = arith.constant 0 : i32
    %c0_i32_1 = arith.constant 0 : i32
    return %c0_i32, %c0_i32_0 : i32, i32
  }
  func.func @transform_4(%arg0: i32, %arg1: i32) -> (i32, i32) {
    %c0_i32 = arith.constant 0 : i32
    %c0_i32_0 = arith.constant 0 : i32
    %c0_i32_1 = arith.constant 0 : i32
    return %c0_i32, %c0_i32_0 : i32, i32
  }
  func.func @transform_5(%arg0: i32, %arg1: i32) -> (i32, i32) {
    %c0_i32 = arith.constant 0 : i32
    %c0_i32_0 = arith.constant 0 : i32
    %c0_i32_1 = arith.constant 0 : i32
    return %c0_i32, %c0_i32_0 : i32, i32
  }
  func.func @transform_6(%arg0: i32, %arg1: i32) -> (i32, i32) {
    %c0_i32 = arith.constant 0 : i32
    %c0_i32_0 = arith.constant 0 : i32
    %c0_i32_1 = arith.constant 0 : i32
    return %c0_i32, %c0_i32_0 : i32, i32
  }
  func.func @transform_7(%arg0: i32, %arg1: i32) -> (i32, i32) {
    %c0_i32 = arith.constant 0 : i32
    %c0_i32_0 = arith.constant 0 : i32
    %c0_i32_1 = arith.constant 0 : i32
    return %c0_i32, %c0_i32_0 : i32, i32
  }
  func.func @transform_8(%arg0: i32, %arg1: i32) -> (i32, i32) {
    %c0_i32 = arith.constant 0 : i32
    %c0_i32_0 = arith.constant 0 : i32
    %c0_i32_1 = arith.constant 0 : i32
    return %c0_i32, %c0_i32_0 : i32, i32
  }
  func.func @transform_9(%arg0: i32, %arg1: i32) -> (i32, i32) {
    %c0_i32 = arith.constant 0 : i32
    %c0_i32_0 = arith.constant 0 : i32
    %c0_i32_1 = arith.constant 0 : i32
    return %c0_i32, %c0_i32_0 : i32, i32
  }
  func.func @transform_10(%arg0: i32, %arg1: i32) -> (i32, i32, i32, i32) {
    %c0_i32 = arith.constant 0 : i32
    %c0_i32_0 = arith.constant 0 : i32
    %c0_i32_1 = arith.constant 0 : i32
    return %arg0, %arg1, %c0_i32, %c0_i32_0 : i32, i32, i32, i32
  }
}

</mosaic_0001>

<bundles_post_ra>
// kernel: tpu_custom_call.1
= control target key start
LH: loop header
LB: loop body
LE: loop exit
PB: predicated region body
PF: predicated region fallthrough
CT: control target
= control target key end

     0   :  { %s7679_s0 = inlined_call_operand.hbm [shape: f32[2,16,16,128], index: 0, kind: input, shape index: {}]   ;;  %s7680_s1 = inlined_call_operand.hbm [shape: f32[49,128], index: 1, kind: input, shape index: {}]   ;;  %s7681_s2 = inlined_call_operand.vmem [shape: f32[1,128], index: 2, kind: input, shape index: {}]   ;;  %s7682_s3 = inlined_call_operand.vmem [shape: f32[1,128], index: 3, kind: input, shape index: {}]   ;;  %s7683_s4 = inlined_call_operand.vmem [shape: f32[1,128], index: 4, kind: input, shape index: {}]   ;;  %s7684_s5 = inlined_call_operand.hbm [shape: bf16[128,128], index: 5, kind: input, shape index: {}]   ;;  %s7685_s6 = inlined_call_operand.vmem [shape: f32[1,128], index: 6, kind: input, shape index: {}]   ;;  %s7686_s7 = inlined_call_operand.hbm [shape: bf16[128,128], index: 7, kind: input, shape index: {}]   ;;  %s7687_s8 = inlined_call_operand.vmem [shape: f32[1,128], index: 8, kind: input, shape index: {}]   ;;  %s7688_s9 = inlined_call_operand.vmem [shape: f32[1,128], index: 9, kind: input, shape index: {}]   ;;  %s7689_s10 = inlined_call_operand.hbm [shape: f32[2,16,16,128], index: 10, kind: output, shape index: {}]  }
   0x1   :  { %8269 = sst [smem:[#allocation131_spill]] %s7680_s1 }
   0x2   :  { %8270 = sst [smem:[#allocation132_spill]] %s7682_s3 }
   0x3   :  { %8271 = sst [smem:[#allocation133_spill]] %s7683_s4 }
   0x4   :  { %8272 = sst [smem:[#allocation134_spill]] %s7684_s5 }
   0x5   :  { %8273 = sst [smem:[#allocation135_spill]] %s7685_s6 }
   0x6   :  { %8274 = sst [smem:[#allocation136_spill]] %s7686_s7 }
   0x7   :  { %8275 = sst [smem:[#allocation137_spill]] %s7687_s8 }
   0x8   :  { %8276 = sst [smem:[#allocation138_spill]] %s7688_s9 }
   0x9   :  { %8277 = sst [smem:[#allocation139_spill]] %s7689_s10 }
   0xa   :  { %15 = vsyncpa [#allocation4], 0 }
   0xb   :  { %17 = vsyncpa [#allocation4 + $0x1], 0 }
   0xc   :  { %18 = vsyncpa [#allocation7], 0 }
   0xd   :  { %19 = vsyncpa [#allocation10], 0 }
   0xe   :  { %20 = vsyncpa [#allocation5], 0 }
   0xf   :  { %22 = vsyncpa [#allocation5 + $0x1], 0  ;;  %s4261_s13 = smov 0   ;;  %s4263_s14 = smov 0  }
  0x10   :  { %s4265_s15 = smov 0   ;;  %s4267_s16 = smov 0  }
  0x11   :  { %s4269_s17 = smov 0   ;;  %s4271_s18 = smov 0  }
  0x12   :  { %s4273_s19 = smov 0   ;;  %s4275_s20 = smov 0  }
  0x13   :  { %s4277_s21 = smov 0   ;;  %s4279_s22 = smov 0  }
  0x14   :  { %s4281_s23 = smov 0  }
  0x15 LB: > { %8278 = sst [smem:[#allocation16_spill]] %s4152_s13  ;;  %s3420_s24 = sadd.s32 4294967295, %s4192_s23   ;;  %s4192_s23 = sphi %s4281_s23, %s28_s23   ;;  %s4188_s22 = sphi %s4279_s22, %s9284_s22   ;;  %s4184_s21 = sphi %s4277_s21, %s9283_s21   ;;  %s4180_s20 = sphi %s4275_s20, %s9282_s20   ;;  %s4176_s19 = sphi %s4273_s19, %s9281_s19   ;;  %s4172_s18 = sphi %s4271_s18, %s9280_s18   ;;  %s4168_s17 = sphi %s4269_s17, %s9279_s17   ;;  %s4164_s16 = sphi %s4267_s16, %s9278_s16   ;;  %s4160_s15 = sphi %s4265_s15, %s9277_s15   ;;  %s4156_s14 = sphi %s4263_s14, %s9276_s14   ;;  %s4152_s13 = sphi %s4261_s13, %s9275_s13  }
  0x16   : > { %8279 = sst [smem:[#allocation17_spill]] %s4180_s20  ;;  %s3421_s25 = sadd.s32 4294967294, %s4192_s23  }
  0x17   : > { %p60_p0 = scmp.ne.s32.totalorder %s4168_s17, %s4164_s16  ;;  %p4317_p1 = scmp.eq.s32.totalorder %s3420_s24, 0 }
  0x18   : > { %p274_p2 = scmp.ne.s32.totalorder %s4160_s15, %s4156_s14  ;;  %p275_p4 = scmp.eq.s32.totalorder %s3420_s24, 3 }
  0x19   : > { %s8280_s26 = scalar_select %p4317_p1, 1, 0 }
  0x1a   : > { %p4326_p3 = por %p4317_p1, %p60_p0  ;;  %p280_p5 = scmp.ne.s32.totalorder %s4156_s14, %s4152_s13 }
  0x1b   : > { %p281_p6 = scmp.eq.s32.totalorder %s3421_s25, 3  ;;  %p4332_p7 = por %p275_p4, %p274_p2 }
  0x1c   : > { %s8281_s28 = scalar_select %p4326_p3, 1, 0 }
  0x1d   : > { %s8282_s29 = scalar_select %p4332_p7, 1, 0 }
  0x1e   : > { %p3422_p8 = scmp.ge.s32.totalorder %s4192_s23, 1  ;;  %p4337_p9 = por %p281_p6, %p280_p5 }
  0x1f   : > { %8283 = sst [smem:[#allocation18_spill]] %s8282_s29  ;;  %p288_p10 = scmp.lt.s32.totalorder %s4192_s23, 5 }
  0x20   : > { %s8284_s30 = scalar_select %p4337_p9, 1, 0 }
  0x21   : > { %p4342_p11 = pnand %p3422_p8, %p288_p10  ;;  %s4194_s12 = smov [#allocation6]  }
  0x22   : > { %8285 = sst [smem:[#allocation19_spill]] %s8284_s30  ;;  %s300_s16 = sshll.u32 %s4194_s12, 4  ;;  %s301_s16 = int_to_ptr.vmem [resolvable:$true] %s300_s16 }
  0x23   : > { %s8286_s11 = scalar_select %p4342_p11, 1, 0 }
  0x24   : > { %p3585_p12 = pneg %p4342_p11  ;;  %s4195_s25 = smov [#allocation8]  }
  0x25   : > { %s322_s27 = sshll.u32 %s4195_s25, 4  ;;  %s8288_s1 = sld [smem:[#allocation131_spill]]  ;;  %s4354_s27 = int_to_ptr.vmem [resolvable:$true] %s322_s27 }
  0x26   : > { %p4350_p13 = pnand %p3585_p12, %p4317_p1 }
  0x28   : > { %p4364_p2 = pneg %p4350_p13 }
  0x2b   : > { %s3948_s10 = scalar_lea.hbm %s8288_s1, 896 }
  0x2c   : > { %p3949_p0 = scmp.ne.s32.totalorder %s8288_s1, %s3948_s10  ;;  %p3955_p6 = scmp.lt.u32.totalorder %s3948_s10, %s8288_s1 }
  0x2e   : > { %p3951_p4 = pnand %p4364_p2, %p3949_p0 }
  0x30   : > { %p3952_p5 = pneg %p3951_p4 }
  0x32   : > { %p3957_p8 = pnand %p3955_p6, %p3952_p5 }
  0x34   : > { %3960 = shalt.err (!%p3957_p8)
}
  0x35   : > { %s3961_s13 = scalar_lea.vmem %s301_s16, 896  ;;  %p3969_p7 = scmp.lt.s32.totalorder %s301_s16, %s301_s16 }
  0x36   : > { %p3962_p10 = scmp.ne.s32.totalorder %s301_s16, %s3961_s13  ;;  %p3970_p1 = scmp.lt.s32.totalorder %s3961_s13, %s3961_s13 }
  0x38   : > { %p3964_p12 = pnand %p3962_p10, %p4364_p2  ;;  %p3971_p3 = por %p3970_p1, %p3969_p7 }
  0x3a   : > { %p3965_p9 = pneg %p3964_p12 }
  0x3c   : > { %p3972_p11 = pnand %p3971_p3, %p3965_p9 }
  0x3e   : > { %3975 = shalt.err (!%p3972_p11)
}
  0x3f   : > { %s7700_s20 = smov 128   ;;  %s7701_s29 = smov 8  }
  0x40   : > { %3588 = dma.hbm_to_vmem [thread:$0]  (!%p4350_p13), %s8288_s1, 896, %s301_s16, [#allocation7], %s7700_s20, %s7700_s20, %s7701_s29  }
  0x41   : > { %s8290_s5 = sld [smem:[#allocation134_spill]] }
  0x47   : > { %s3976_s8 = scalar_lea.hbm %s8290_s5, 1024 }
  0x48   : > { %p3977_p1 = scmp.ne.s32.totalorder %s8290_s5, %s3976_s8  ;;  %p3983_p9 = scmp.lt.u32.totalorder %s3976_s8, %s8290_s5 }
  0x4a   : > { %p3979_p3 = pnand %p3977_p1, %p4364_p2 }
  0x4c   : > { %p3980_p7 = pneg %p3979_p3 }
  0x4e   : > { %p3985_p11 = pnand %p3983_p9, %p3980_p7 }
  0x50   : > { %3988 = shalt.err (!%p3985_p11)
}
  0x51   : > { %s3989_s16 = scalar_lea.vmem %s4354_s27, 1024  ;;  %p3997_p6 = scmp.lt.s32.totalorder %s4354_s27, %s4354_s27 }
  0x52   : > { %p3990_p0 = scmp.ne.s32.totalorder %s4354_s27, %s3989_s16  ;;  %p3998_p8 = scmp.lt.s32.totalorder %s3989_s16, %s3989_s16 }
  0x54   : > { %p3992_p4 = pnand %p3990_p0, %p4364_p2  ;;  %p3999_p10 = por %p3998_p8, %p3997_p6 }
  0x56   : > { %p3993_p5 = pneg %p3992_p4 }
  0x58   : > { %p4000_p12 = pnand %p3999_p10, %p3993_p5 }
  0x5a   : > { %4003 = shalt.err (!%p4000_p12)
}
  0x5b   : > { %s4198_s6 = smov 64   ;;  %s4199_s3 = smov 4  }
  0x5c   : > { %3591 = dma.hbm_to_vmem [thread:$0]  (!%p4350_p13), %s8290_s5, 1024, %s4354_s27, [#allocation7], %s4198_s6, %s4198_s6, %s4199_s3  }
  0x5d   : > { %s4200_s9 = smov [#allocation9]   ;;  %s8291_s7 = sld [smem:[#allocation136_spill]] }
  0x5e   : > { %s338_s10 = sshll.u32 %s4200_s9, 4  ;;  %s339_s10 = int_to_ptr.vmem [resolvable:$true] %s338_s10 }
  0x63   : > { %s4004_s13 = scalar_lea.hbm %s8291_s7, 1024 }
  0x64   : > { %p4005_p1 = scmp.ne.s32.totalorder %s8291_s7, %s4004_s13  ;;  %p4011_p9 = scmp.lt.u32.totalorder %s4004_s13, %s8291_s7 }
  0x66   : > { %p4007_p3 = pnand %p4005_p1, %p4364_p2 }
  0x68   : > { %p4008_p7 = pneg %p4007_p3 }
  0x6a   : > { %p4013_p11 = pnand %p4011_p9, %p4008_p7 }
  0x6c   : > { %4016 = shalt.err (!%p4013_p11)
}
  0x6d   : > { %s4017_s27 = scalar_lea.vmem %s339_s10, 1024  ;;  %p4025_p6 = scmp.lt.s32.totalorder %s339_s10, %s339_s10 }
  0x6e   : > { %p4018_p0 = scmp.ne.s32.totalorder %s339_s10, %s4017_s27  ;;  %p4026_p8 = scmp.lt.s32.totalorder %s4017_s27, %s4017_s27 }
  0x70   : > { %p4020_p4 = pnand %p4018_p0, %p4364_p2  ;;  %p4027_p10 = por %p4026_p8, %p4025_p6 }
  0x72   : > { %p4021_p5 = pneg %p4020_p4 }
  0x74   : > { %p4028_p12 = pnand %p4027_p10, %p4021_p5 }
  0x76   : > { %4031 = shalt.err (!%p4028_p12)
}
  0x77   : > { %3594 = dma.hbm_to_vmem [thread:$0]  (!%p4350_p13), %s8291_s7, 1024, %s339_s10, [#allocation10], %s4198_s6, %s4198_s6, %s4199_s3  }
  0x78   : > { %s37_s1 = sadd.s32 1, %s4184_s21  ;;  %s40_s12 = sadd.s32 1, %s4188_s22 }
  0x79   : > { %p38_p2 = scmp.ge.s32.totalorder %s37_s1, 2  ;;  %s47_s29 = sadd.s32 1, %s4172_s18 }
  0x7a   : > { %p54_p1 = scmp.ne.s32.totalorder %s4172_s18, %s4168_s17  ;;  %p55_p3 = scmp.eq.s32.totalorder %s4192_s23, 0 }
  0x7b   : > { %s9286_s1 = smov (%p38_p2, %s37_s1), 0  ;;  %s9288_s12 = smov (!%p38_p2, %s40_s12), %s4188_s22 }
  0x7c   : > { %s260_s24 = ssub.s32 %s4184_s21, %s9286_s1  ;;  %p42_p7 = scmp.ge.s32.totalorder %s9288_s12, 2 }
  0x7d   : > { %p3606_p9 = scmp.lt.s32.totalorder %s4192_s23, 4  ;;  %p4436_p13 = por %p55_p3, %p54_p1 }
  0x7e   : > { %s358_s3 = sand.u32 1, %s4172_s18   ;;  %s9290_s12 = smov (%p42_p7, %s9288_s12), 0 }
  0x7f   : > { %s3427_s8 = sshll.u32 %s358_s3, 8  ;;  %s44_s9 = ssub.s32 %s4188_s22, %s9290_s12 }
  0x80   : > { %p45_p11 = scmp.eq.s32.totalorder %s44_s9, 0  ;;  %s261_s10 = sor.u32 %s260_s24, %s44_s9 }
  0x81   : > { %p262_p0 = scmp.eq.s32.totalorder %s261_s10, 0  ;;  %s3470_s30 = sshll.u32 %s4188_s22, 12 }
  0x82   : > { %s4447_s25 = scalar_select %p45_p11, %s4172_s18, %s47_s29  }
  0x83   : > { %s8293_s13 = sadd.s32 1, %s4160_s15  ;;  %s4457_s4 = scalar_lea.hbm %s7679_s0, %s3470_s30 }
  0x84   : > { %s4452_s16 = scalar_select %p262_p0, %s4160_s15, %s8293_s13  }
  0x85   : > { %s362_s5 = scalar_lea.vmem [#allocation3], %s3427_s8  ;;  %p4465_p4 = pnand %p3606_p9, %p4436_p13 }
  0x86   : > { %s369_s7 = sshll.u32 %s362_s5, 4  ;;  %s4469_s24 = scalar_lea.sflag [#allocation4], %s358_s3  ;;  %s4459_s7 = int_to_ptr.vmem [resolvable:$true] %s369_s7 }
  0x87   : > { %s4032_s9 = scalar_lea.hbm %s4457_s4, 4096  ;;  %p4034_p6 = pneg %p4465_p4 }
  0x88   : > { %p4033_p5 = scmp.ne.s32.totalorder %s4457_s4, %s4032_s9  ;;  %s4037_s6 = scalar_lea.hbm %s7679_s0, 8192 }
  0x89   : > { %p4038_p12 = scmp.lt.u32.totalorder %s4457_s4, %s7679_s0  ;;  %p4039_p2 = scmp.lt.u32.totalorder %s4037_s6, %s4032_s9 }
  0x8a   : > { %p4035_p8 = pnand %p4034_p6, %p4033_p5  ;;  %p4041_p3 = scmp.lt.u32.totalorder %s4032_s9, %s4457_s4 }
  0x8b   : > { %p4040_p1 = por %p4039_p2, %p4038_p12 }
  0x8c   : > { %p4036_p10 = pneg %p4035_p8 }
  0x8d   : > { %p4042_p7 = por %p4041_p3, %p4040_p1 }
  0x8f   : > { %p4043_p9 = pnand %p4042_p7, %p4036_p10 }
  0x91   : > { %4046 = shalt.err (!%p4043_p9)
}
  0x92   : > { %s4047_s3 = scalar_lea.vmem %s4459_s7, 4096  ;;  %s4201_s13 = smov [#allocation3]  }
  0x93   : > { %p4048_p13 = scmp.ne.s32.totalorder %s4459_s7, %s4047_s3  ;;  %s4052_s27 = sshll.u32 %s4201_s13, 4  ;;  %s4053_s27 = int_to_ptr.vmem [resolvable:$false] %s4052_s27 }
  0x94   : > { %s4054_s20 = scalar_lea.vmem %s4053_s27, 8192  ;;  %p4055_p5 = scmp.lt.s32.totalorder %s4459_s7, %s4053_s27 }
  0x95   : > { %p4050_p11 = pnand %p4048_p13, %p4034_p6  ;;  %p4056_p8 = scmp.lt.s32.totalorder %s4054_s20, %s4047_s3 }
  0x97   : > { %p4051_p0 = pneg %p4050_p11  ;;  %p4057_p12 = por %p4056_p8, %p4055_p5 }
  0x99   : > { %p4058_p2 = pnand %p4057_p12, %p4051_p0 }
  0x9b   : > { %4061 = shalt.err (!%p4058_p2)
}
  0x9c   : > { %s8295_s9 = smov 8   ;;  %s8296_s5 = smov 128  }
  0x9d   : > { %3598 = dma.hbm_to_vmem [thread:$0]  (!%p4465_p4), %s4457_s4, 4096, %s4459_s7, %s4469_s24, %s8296_s5, %s8296_s5, %s8295_s9  }
  0x9e   : > { %p8297_p6 = scmp.ne.s32.totalorder %s8286_s11, 0 }
  0xa0   : > { %381 = sbr.rel (%p8297_p6) target bundleno = 1464 (0x5b8), region = 60 }
  0xa7   : > { %s383_s8 = sand.u32 1, %s4168_s17   ;;  %p8298_p10 = scmp.ne.s32.totalorder %s8281_s28, 0 }
  0xa8   : > { %s3431_s6 = sshll.u32 %s383_s8, 8  ;;  %s384_s10 = scalar_lea.sflag [#allocation4], %s383_s8 }
  0xa9   : > { %s4503_s30 = scalar_lea.vmem [#allocation3], %s3431_s6 }
  0xaa   : > { %4135 = dma.done.wait (%p8298_p10), %s384_s10, 4096  }
  0xab   : > { %4137 = vsyncadd (%p8298_p10), %s384_s10, 4294963200  ;;  %p8299_p1 = scmp.ne.s32.totalorder %s8280_s26, 0 }
  0xad   : > { %4139 = dma.done.wait (%p8299_p1), [#allocation7], 1920  }
  0xae   : > { %4141 = vsyncadd (%p8299_p1), [#allocation7], 4294965376 }
  0xaf   : > { %4143 = dma.done.wait (%p8299_p1), [#allocation10], 1024  }
  0xb0   : > { %4145 = vsyncadd (%p8299_p1), [#allocation10], 4294966272  ;;  %s433_s7 = sand.u32 1, %s4156_s14   ;;  %p3436_p4 = scmp.ne.s32.totalorder %s4176_s19, 0 }
  0xb1   : > { %s3435_s11 = sshll.u32 %s433_s7, 7  ;;  %v494_v0 = vld [vmem:[%s4503_s30] sm:$0xff] (!%p3436_p4)  ;;  %v495_v1 = vld [vmem:[%s4503_s30 + $0x8] sm:$0xff] (!%p3436_p4)  ;;  %v496_v2 = vld [vmem:[%s4503_s30 + $0x10] sm:$0xff] (!%p3436_p4)  ;;  %v4202_v3 = vmov (!%p3436_p4), 0.0  }
  0xb2   : > { %s4520_s4 = scalar_lea.vmem [#allocation11], %s3435_s11  ;;  %441 = sbr.rel (%p3436_p4) target bundleno = 219 (0xdb), region = 80  ;;  %442 = vst [vmem:[#allocation2] sm:$0xff] (!%p3436_p4), %v4202_v3  ;;  %443 = vst [vmem:[#allocation2 + $0x8] sm:$0xff] (!%p3436_p4), %v4202_v3  ;;  %v497_v4 = vld [vmem:[%s4503_s30 + $0x18] sm:$0xff] (!%p3436_p4)  ;;  %v498_v5 = vld [vmem:[%s4503_s30 + $0x20] sm:$0xff] (!%p3436_p4) }
  0xb3   : > { %444 = vst [vmem:[#allocation2 + $0x10] sm:$0x3f] (!%p3436_p4), %v4202_v3  ;;  %445 = vst [vmem:[#allocation2 + $0x18] sm:$0xff] (!%p3436_p4), %v4202_v3  ;;  %v499_v6 = vld [vmem:[%s4503_s30 + $0x28] sm:$0xff] (!%p3436_p4)  ;;  %v500_v7 = vld [vmem:[%s4503_s30 + $0x30] sm:$0xff] (!%p3436_p4) }
  0xb4   : > { %446 = vst [vmem:[#allocation2 + $0x20] sm:$0xff] (!%p3436_p4), %v4202_v3  ;;  %447 = vst [vmem:[#allocation2 + $0x28] sm:$0x3f] (!%p3436_p4), %v4202_v3  ;;  %v501_v8 = vld [vmem:[%s4503_s30 + $0x38] sm:$0xff] (!%p3436_p4)  ;;  %v502_v9 = vld [vmem:[%s4503_s30 + $0x40] sm:$0xff] (!%p3436_p4) }
  0xb5   : > { %448 = vst [vmem:[#allocation2 + $0x30] sm:$0xff] (!%p3436_p4), %v4202_v3  ;;  %449 = vst [vmem:[#allocation2 + $0x38] sm:$0xff] (!%p3436_p4), %v4202_v3  ;;  %v503_v10 = vld [vmem:[%s4503_s30 + $0x48] sm:$0xff] (!%p3436_p4)  ;;  %v504_v11 = vld [vmem:[%s4503_s30 + $0x50] sm:$0xff] (!%p3436_p4) }
  0xb6   : > { %450 = vst [vmem:[#allocation2 + $0x40] sm:$0x3f] (!%p3436_p4), %v4202_v3  ;;  %452 = vst [vmem:[#allocation2 + $0x1c8] sm:$0xff] (!%p3436_p4), %v4202_v3  ;;  %v505_v12 = vld [vmem:[%s4503_s30 + $0x58] sm:$0xff] (!%p3436_p4)  ;;  %v506_v13 = vld [vmem:[%s4503_s30 + $0x60] sm:$0xff] (!%p3436_p4) }
  0xb7   : > { %453 = vst [vmem:[#allocation2 + $0x1d0] sm:$0xff] (!%p3436_p4), %v4202_v3  ;;  %454 = vst [vmem:[#allocation2 + $0x1d8] sm:$0x3f] (!%p3436_p4), %v4202_v3  ;;  %v507_v14 = vld [vmem:[%s4503_s30 + $0x68] sm:$0xff] (!%p3436_p4)  ;;  %v508_v15 = vld [vmem:[%s4503_s30 + $0x70] sm:$0xff] (!%p3436_p4) }
  0xb8   : > { %455 = vst [vmem:[#allocation2 + $0x1e0] sm:$0xff] (!%p3436_p4), %v4202_v3  ;;  %456 = vst [vmem:[#allocation2 + $0x1e8] sm:$0xff] (!%p3436_p4), %v4202_v3  ;;  %v509_v16 = vld [vmem:[%s4503_s30 + $0x78] sm:$0xff] (!%p3436_p4)  ;;  %v510_v17 = vld [vmem:[%s4503_s30 + $0x80] sm:$0xff] (!%p3436_p4) }
  0xb9   : > { %457 = vst [vmem:[#allocation2 + $0x1f0] sm:$0x3f] %v4202_v3  ;;  %458 = vst [vmem:[#allocation2 + $0x1f8] sm:$0xff] %v4202_v3  ;;  %v511_v18 = vld [vmem:[%s4503_s30 + $0x88] sm:$0xff]  ;;  %v512_v19 = vld [vmem:[%s4503_s30 + $0x90] sm:$0xff] }
  0xba   : > { %459 = vst [vmem:[#allocation2 + $0x200] sm:$0xff] %v4202_v3  ;;  %460 = vst [vmem:[#allocation2 + $0x208] sm:$0x3f] %v4202_v3  ;;  %v513_v20 = vld [vmem:[%s4503_s30 + $0x98] sm:$0xff]  ;;  %v514_v21 = vld [vmem:[%s4503_s30 + $0xa0] sm:$0xff] }
  0xbb   : > { %462 = vst [vmem:[#allocation2 + $0x48] sm:$0x7] %v4202_v3  ;;  %463 = vst [vmem:[#allocation2 + $0x60] sm:$0x7] %v4202_v3  ;;  %v515_v22 = vld [vmem:[%s4503_s30 + $0xa8] sm:$0xff]  ;;  %v516_v23 = vld [vmem:[%s4503_s30 + $0xb0] sm:$0xff] }
  0xbc   : > { %464 = vst [vmem:[#allocation2 + $0x78] sm:$0x7] %v4202_v3  ;;  %465 = vst [vmem:[#allocation2 + $0x90] sm:$0x7] %v4202_v3  ;;  %v517_v24 = vld [vmem:[%s4503_s30 + $0xb8] sm:$0xff]  ;;  %v518_v25 = vld [vmem:[%s4503_s30 + $0xc0] sm:$0xff] }
  0xbd   : > { %466 = vst [vmem:[#allocation2 + $0xa8] sm:$0x7] %v4202_v3  ;;  %467 = vst [vmem:[#allocation2 + $0xc0] sm:$0x7] %v4202_v3  ;;  %v519_v26 = vld [vmem:[%s4503_s30 + $0xc8] sm:$0xff]  ;;  %v520_v27 = vld [vmem:[%s4503_s30 + $0xd0] sm:$0xff] }
  0xbe   : > { %468 = vst [vmem:[#allocation2 + $0xd8] sm:$0x7] %v4202_v3  ;;  %469 = vst [vmem:[#allocation2 + $0xf0] sm:$0x7] %v4202_v3  ;;  %v521_v28 = vld [vmem:[%s4503_s30 + $0xd8] sm:$0xff]  ;;  %v522_v29 = vld [vmem:[%s4503_s30 + $0xe0] sm:$0xff] }
  0xbf   : > { %470 = vst [vmem:[#allocation2 + $0x108] sm:$0x7] %v4202_v3  ;;  %471 = vst [vmem:[#allocation2 + $0x120] sm:$0x7] %v4202_v3  ;;  %v523_v30 = vld [vmem:[%s4503_s30 + $0xe8] sm:$0xff]  ;;  %v524_v31 = vld [vmem:[%s4503_s30 + $0xf0] sm:$0xff] }
  0xc0   : > { %472 = vst [vmem:[#allocation2 + $0x138] sm:$0x7] %v4202_v3  ;;  %473 = vst [vmem:[#allocation2 + $0x150] sm:$0x7] %v4202_v3  ;;  %v525_v32 = vld [vmem:[%s4503_s30 + $0xf8] sm:$0xff] }
  0xc1   : > { %474 = vst [vmem:[#allocation2 + $0x168] sm:$0x7] %v4202_v3  ;;  %475 = vst [vmem:[#allocation2 + $0x180] sm:$0x7] %v4202_v3 }
  0xc2   : > { %476 = vst [vmem:[#allocation2 + $0x198] sm:$0x7] %v4202_v3  ;;  %477 = vst [vmem:[#allocation2 + $0x1b0] sm:$0x7] %v4202_v3 }
  0xc3   : > { %478 = vst [vmem:[#allocation2 + $0x5b] sm:$0x7] %v4202_v3  ;;  %479 = vst [vmem:[#allocation2 + $0x73] sm:$0x7] %v4202_v3 }
  0xc4   : > { %480 = vst [vmem:[#allocation2 + $0x8b] sm:$0x7] %v4202_v3  ;;  %481 = vst [vmem:[#allocation2 + $0xa3] sm:$0x7] %v4202_v3 }
  0xc5   : > { %482 = vst [vmem:[#allocation2 + $0xbb] sm:$0x7] %v4202_v3  ;;  %483 = vst [vmem:[#allocation2 + $0xd3] sm:$0x7] %v4202_v3 }
  0xc6   : > { %484 = vst [vmem:[#allocation2 + $0xeb] sm:$0x7] %v4202_v3  ;;  %485 = vst [vmem:[#allocation2 + $0x103] sm:$0x7] %v4202_v3 }
  0xc7   : > { %486 = vst [vmem:[#allocation2 + $0x11b] sm:$0x7] %v4202_v3  ;;  %487 = vst [vmem:[#allocation2 + $0x133] sm:$0x7] %v4202_v3 }
  0xc8   : > { %488 = vst [vmem:[#allocation2 + $0x14b] sm:$0x7] %v4202_v3  ;;  %489 = vst [vmem:[#allocation2 + $0x163] sm:$0x7] %v4202_v3 }
  0xc9   : > { %490 = vst [vmem:[#allocation2 + $0x17b] sm:$0x7] %v4202_v3  ;;  %491 = vst [vmem:[#allocation2 + $0x193] sm:$0x7] %v4202_v3 }
  0xca   : > { %492 = vst [vmem:[#allocation2 + $0x1ab] sm:$0x7] %v4202_v3  ;;  %493 = vst [vmem:[#allocation2 + $0x1c3] sm:$0x7] %v4202_v3 }
  0xcb   : > { %526 = vst [vmem:[#allocation2 + $0x4b] sm:$0xff] %v494_v0  ;;  %527 = vst [vmem:[#allocation2 + $0x53] sm:$0xff] %v495_v1 }
  0xcc   : > { %528 = vst [vmem:[#allocation2 + $0x63] sm:$0xff] %v496_v2  ;;  %529 = vst [vmem:[#allocation2 + $0x6b] sm:$0xff] %v497_v4 }
  0xcd   : > { %530 = vst [vmem:[#allocation2 + $0x7b] sm:$0xff] %v498_v5  ;;  %531 = vst [vmem:[#allocation2 + $0x83] sm:$0xff] %v499_v6 }
  0xce   : > { %532 = vst [vmem:[#allocation2 + $0x93] sm:$0xff] %v500_v7  ;;  %533 = vst [vmem:[#allocation2 + $0x9b] sm:$0xff] %v501_v8 }
  0xcf   : > { %534 = vst [vmem:[#allocation2 + $0xab] sm:$0xff] %v502_v9  ;;  %535 = vst [vmem:[#allocation2 + $0xb3] sm:$0xff] %v503_v10 }
  0xd0   : > { %536 = vst [vmem:[#allocation2 + $0xc3] sm:$0xff] %v504_v11  ;;  %537 = vst [vmem:[#allocation2 + $0xcb] sm:$0xff] %v505_v12 }
  0xd1   : > { %538 = vst [vmem:[#allocation2 + $0xdb] sm:$0xff] %v506_v13  ;;  %539 = vst [vmem:[#allocation2 + $0xe3] sm:$0xff] %v507_v14 }
  0xd2   : > { %540 = vst [vmem:[#allocation2 + $0xf3] sm:$0xff] %v508_v15  ;;  %541 = vst [vmem:[#allocation2 + $0xfb] sm:$0xff] %v509_v16 }
  0xd3   : > { %542 = vst [vmem:[#allocation2 + $0x10b] sm:$0xff] %v510_v17  ;;  %543 = vst [vmem:[#allocation2 + $0x113] sm:$0xff] %v511_v18 }
  0xd4   : > { %544 = vst [vmem:[#allocation2 + $0x123] sm:$0xff] %v512_v19  ;;  %545 = vst [vmem:[#allocation2 + $0x12b] sm:$0xff] %v513_v20 }
  0xd5   : > { %546 = vst [vmem:[#allocation2 + $0x13b] sm:$0xff] %v514_v21  ;;  %547 = vst [vmem:[#allocation2 + $0x143] sm:$0xff] %v515_v22 }
  0xd6   : > { %548 = vst [vmem:[#allocation2 + $0x153] sm:$0xff] %v516_v23  ;;  %549 = vst [vmem:[#allocation2 + $0x15b] sm:$0xff] %v517_v24 }
  0xd7   : > { %550 = vst [vmem:[#allocation2 + $0x16b] sm:$0xff] %v518_v25  ;;  %551 = vst [vmem:[#allocation2 + $0x173] sm:$0xff] %v519_v26 }
  0xd8   : > { %552 = vst [vmem:[#allocation2 + $0x183] sm:$0xff] %v520_v27  ;;  %553 = vst [vmem:[#allocation2 + $0x18b] sm:$0xff] %v521_v28 }
  0xd9   : > { %554 = vst [vmem:[#allocation2 + $0x19b] sm:$0xff] %v522_v29  ;;  %555 = vst [vmem:[#allocation2 + $0x1a3] sm:$0xff] %v523_v30 }
  0xda   : > { %556 = vst [vmem:[#allocation2 + $0x1b3] sm:$0xff] %v524_v31  ;;  %557 = vst [vmem:[#allocation2 + $0x1bb] sm:$0xff] %v525_v32 }
  0xdb PF: > { %s3438_s26 = smul.u32 192, %s4176_s19  ;;  %v7702_v33 = vlaneseq  ;;  %v4556_v34 = vld [vmem:[#allocation6] sm:$0xff]  ;;  %v4558_v35 = vld [vmem:[#allocation6 + $0x8] sm:$0xff]  ;;  %v4561_v37 = vld [vmem:[#allocation6 + $0x10] sm:$0xff]  ;;  %s9263_s10 = sld [smem:[#allocation132_spill]] }
  0xdc   : > { %v4563_v38 = vld [vmem:[#allocation6 + $0x18] sm:$0xff]  ;;  %v4565_v39 = vld [vmem:[#allocation6 + $0x20] sm:$0xff]  ;;  %v4567_v40 = vld [vmem:[#allocation6 + $0x28] sm:$0xff]  ;;  %s9265_s3 = sld [smem:[#allocation135_spill]]  ;;  %s3471_s13 = sshll.u32 %s4176_s19, 7 }
  0xdd   : > { %v597_v36 = vshrl.u32 %v7702_v33, 7  ;;  %s4569_s28 = scalar_lea.vmem [#allocation2], %s3438_s26  ;;  %s9266_s9 = sld [smem:[#allocation137_spill]] }
  0xde   : > { %s7535_s5 = scalar_lea.vmem %s4503_s30, %s3471_s13 [#allocation3]  ;;  %s9268_s30 = sld [smem:[#allocation17_spill]] }
  0xdf   : > { %v4575_v43 = vsub.s32 0, %v597_v36  ;;  %v4577_v44 = vsub.s32 7, %v597_v36  ;;  %v4579_v45 = vsub.s32 6, %v597_v36  ;;  %v4587_v48 = vsub.s32 5, %v597_v36  ;;  %s3472_s11 = sshll.u32 %s4176_s19, 4  ;;  %s3300_s29 = sshll.u32 %s4520_s4, 4  ;;  %s7611_s29 = int_to_ptr.vmem [resolvable:$true] %s3300_s29 }
  0xe0   : > { %v4589_v49 = vsub.s32 4, %v597_v36  ;;  %v4591_v50 = vsub.s32 3, %v597_v36  ;;  %v4593_v51 = vsub.s32 2, %v597_v36  ;;  %v4616_v58 = vsub.s32 1, %v597_v36  ;;  %s9269_s24 = sld [smem:[#allocation18_spill]]  ;;  %s9270_s27 = sld [smem:[#allocation139_spill]] }
  0xe1   : > { %v568_v41 = vld [vmem:[%s4569_s28] sm:$0xff]  ;;  %v4573_v42 = vld [vmem:[%s4569_s28 + $0x18] sm:$0xff]  ;;  %v4582_v46 = vld [vmem:[%s4569_s28 + $0x30] sm:$0xff]  ;;  %v4606_v55 = vrot.slane %v4556_v34, %v4575_v43  ;;  %v4610_v56 = vrot.slane %v4556_v34, %v4577_v44  ;;  %v4614_v57 = vrot.slane %v4558_v35, %v4579_v45  ;;  %v4620_v59 = vrot.slane %v4561_v37, %v4587_v48  ;;  %s4203_s8 = smov [#allocation11]  }
  0xe2   : > { %v4585_v47 = vld [vmem:[%s4569_s28 + $0x48] sm:$0xff]  ;;  %v4596_v52 = vld [vmem:[%s4569_s28 + $0x60] sm:$0xff]  ;;  %v4599_v53 = vld [vmem:[%s4569_s28 + $0x78] sm:$0xff]  ;;  %v4624_v60 = vrot.slane %v4563_v38, %v4589_v49  ;;  %v4628_v61 = vrot.slane %v4565_v39, %v4591_v50  ;;  %v4632_v62 = vrot.slane %v4567_v40, %v4593_v51  ;;  %v4642_v3 = vrot.slane %v4556_v34, %v4616_v58  ;;  %s4066_s6 = sshll.u32 %s4203_s8, 4  ;;  %s4067_s6 = int_to_ptr.vmem [resolvable:$false] %s4066_s6 }
  0xe3   : > { %v4602_v54 = vld [vmem:[%s4569_s28 + $0x90] sm:$0xff]  ;;  %v832_v63 = vld [vmem:[%s4569_s28 + $0x1] sm:$0xff]  ;;  %v600_v0 = vmul.f32 %v4606_v55, %v568_v41  ;;  %v620_v1 = vmul.f32 %v4610_v56, %v4573_v42  ;;  %v640_v2 = vmul.f32 %v4614_v57, %v4582_v46  ;;  %v660_v4 = vmul.f32 %v4620_v59, %v4585_v47  ;;  %v4653_v8 = vld [vmem:[%s4569_s28 + $0x19] sm:$0xff]  ;;  %p4069_p11 = scmp.lt.s32.totalorder %s7611_s29, %s4067_s6 }
  0xe4   : > { %8300 = vst [vmem:[#allocation20_spill] sm:$0xff] %v4628_v61  ;;  %8301 = vst [vmem:[#allocation21_spill] sm:$0xff] %v4632_v62  ;;  %v680_v5 = vmul.f32 %v4624_v60, %v4596_v52  ;;  %v700_v6 = vmul.f32 %v4628_v61, %v4599_v53  ;;  %v720_v7 = vmul.f32 %v4632_v62, %v4602_v54  ;;  %v4656_v9 = vld [vmem:[%s4569_s28 + $0x31] sm:$0xff]  ;;  %v4659_v11 = vld [vmem:[%s4569_s28 + $0x49] sm:$0xff]  ;;  %s3466_s26 = sshll.u32 %s9268_s30, 5 }
  0xe5   : > { %v736_v10 = vadd.f32 %v620_v1, %v600_v0  ;;  %v4662_v12 = vld [vmem:[%s4569_s28 + $0x61] sm:$0xff]  ;;  %v864_v13 = vmul.f32 %v4642_v3, %v832_v63  ;;  %v4667_v14 = vrot.slane %v4558_v35, %v4575_v43  ;;  %v4671_v15 = vrot.slane %v4558_v35, %v4577_v44  ;;  %v4674_v18 = vld [vmem:[%s4569_s28 + $0x79] sm:$0xff]  ;;  %v4677_v19 = vld [vmem:[%s4569_s28 + $0x91] sm:$0xff] }
  0xe6   : > { %v752_v16 = vadd.f32 %v660_v4, %v640_v2  ;;  %v768_v17 = vadd.f32 %v700_v6, %v680_v5  ;;  %v4681_v20 = vrot.slane %v4561_v37, %v4579_v45  ;;  %v4685_v21 = vrot.slane %v4563_v38, %v4587_v48  ;;  %v1096_v30 = vld [vmem:[%s4569_s28 + $0x2] sm:$0xff]  ;;  %v4709_v41 = vld [vmem:[%s4569_s28 + $0x1a] sm:$0xff]  ;;  %v4712_v63 = vld [vmem:[%s4569_s28 + $0x32] sm:$0xff]  ;;  %p9271_p7 = scmp.ne.s32.totalorder %s9269_s24, 0 }
  0xe7   : > { %8302 = vst [vmem:[#allocation22_spill] sm:$0xff] %v4671_v15  ;;  %v884_v22 = vmul.f32 %v4667_v14, %v4653_v8  ;;  %v904_v23 = vmul.f32 %v4671_v15, %v4656_v9  ;;  %v4693_v24 = vrot.slane %v4565_v39, %v4589_v49  ;;  %v4697_v25 = vrot.slane %v4567_v40, %v4591_v50  ;;  %v4721_v4 = vld [vmem:[%s4569_s28 + $0x4a] sm:$0xff]  ;;  %v4724_v5 = vld [vmem:[%s4569_s28 + $0x62] sm:$0xff] }
  0xe8   : > { %8303 = vst [vmem:[#allocation23_spill] sm:$0xff] %v4681_v20  ;;  %8304 = vst [vmem:[#allocation24_spill] sm:$0xff] %v4685_v21  ;;  %v784_v26 = vadd.f32 %v752_v16, %v736_v10  ;;  %v800_v27 = vadd.f32 %v768_v17, %v720_v7  ;;  %v924_v28 = vmul.f32 %v4681_v20, %v4659_v11  ;;  %v1360_v33 = vld [vmem:[%s4569_s28 + $0x3] sm:$0xff] }
  0xe9   : > { %8305 = vst [vmem:[#allocation25_spill] sm:$0xff] %v4693_v24  ;;  %8306 = vst [vmem:[#allocation26_spill] sm:$0xff] %v4697_v25  ;;  %v944_v29 = vmul.f32 %v4685_v21, %v4662_v12  ;;  %v964_v31 = vmul.f32 %v4693_v24, %v4674_v18  ;;  %v984_v32 = vmul.f32 %v4697_v25, %v4677_v19  ;;  %v4919_v25 = vld [vmem:[%s4569_s28 + $0x7d] sm:$0xff] }
  0xea   : > { %v1000_v36 = vadd.f32 %v884_v22, %v864_v13  ;;  %8307 = vst [vmem:[#allocation27_spill] sm:$0xff] %v4709_v41  ;;  %8308 = vst [vmem:[#allocation28_spill] sm:$0xff] %v4712_v63  ;;  %v4716_v0 = vrot.slane %v4556_v34, %v4593_v51  ;;  %v4718_v1 = vadd.f32 %v800_v27, %v784_v26  ;;  %v4735_v13 = vld [vmem:[%s4569_s28 + $0x7a] sm:$0xff]  ;;  %v4747_v26 = vld [vmem:[%s4569_s28 + $0x92] sm:$0xff] }
  0xeb   : > { %v1016_v2 = vadd.f32 %v924_v28, %v904_v23  ;;  %8310 = vst [vmem:[#allocation30_spill] sm:$0xff] %v4721_v4  ;;  %8311 = vst [vmem:[#allocation31_spill] sm:$0xff] %v4724_v5  ;;  %v4728_v6 = vrot.slane %v4558_v35, %v4616_v58  ;;  %v4732_v7 = vrot.slane %v4561_v37, %v4575_v43 }
  0xec   : > { %8309 = vst [vmem:[#allocation29_spill] sm:$0xff] %v4716_v0  ;;  %v1032_v10 = vadd.f32 %v964_v31, %v944_v29  ;;  %8314 = vst [vmem:[#allocation34_spill] sm:$0xff] %v4735_v13  ;;  %v1128_v16 = vmul.f32 %v4716_v0, %v1096_v30  ;;  %v4740_v17 = vrot.slane %v4561_v37, %v4577_v44  ;;  %v4787_v0 = vld [vmem:[%s4569_s28 + $0x4b] sm:$0xff] }
  0xed   : > { %8312 = vst [vmem:[#allocation32_spill] sm:$0xff] %v4728_v6  ;;  %8313 = vst [vmem:[#allocation33_spill] sm:$0xff] %v4732_v7  ;;  %v4744_v22 = vrot.slane %v4563_v38, %v4579_v45  ;;  %v1048_v23 = vadd.f32 %v1016_v2, %v1000_v36  ;;  %v1148_v27 = vmul.f32 %v4728_v6, %v4709_v41  ;;  %v4859_v41 = vld [vmem:[%s4569_s28 + $0x7c] sm:$0xff] }
  0xee   : > { %8315 = vst [vmem:[#allocation35_spill] sm:$0xff] %v4740_v17  ;;  %8317 = vst [vmem:[#allocation37_spill] sm:$0xff] %v4747_v26  ;;  %v1168_v28 = vmul.f32 %v4732_v7, %v4712_v63  ;;  %v4755_v29 = vrot.slane %v4565_v39, %v4587_v48  ;;  %v1064_v30 = vadd.f32 %v1032_v10, %v984_v32  ;;  %v4767_v7 = vld [vmem:[%s4569_s28 + $0x1b] sm:$0xff]  ;;  %v4772_v32 = vld [vmem:[%s4569_s28 + $0x33] sm:$0xff] }
  0xef   : > { %8316 = vst [vmem:[#allocation36_spill] sm:$0xff] %v4744_v22  ;;  %v1188_v31 = vmul.f32 %v4740_v17, %v4721_v4  ;;  %v1208_v36 = vmul.f32 %v4744_v22, %v4724_v5  ;;  %v4763_v2 = vrot.slane %v4567_v40, %v4589_v49  ;;  %8320 = vst [vmem:[#allocation40_spill] sm:$0xff] %v4767_v7 }
  0xf0   : > { %8318 = vst [vmem:[#allocation38_spill] sm:$0xff] %v4755_v29  ;;  %v1228_v6 = vmul.f32 %v4755_v29, %v4735_v13  ;;  %v1264_v63 = vadd.f32 %v1148_v27, %v1128_v16  ;;  %8321 = vst [vmem:[#allocation41_spill] sm:$0xff] %v4772_v32  ;;  %v4776_v10 = vrot.slane %v4556_v34, %v4591_v50  ;;  %v4794_v29 = vld [vmem:[%s4569_s28 + $0x63] sm:$0xff]  ;;  %v4797_v13 = vld [vmem:[%s4569_s28 + $0x7b] sm:$0xff] }
  0xf1   : > { %8319 = vst [vmem:[#allocation39_spill] sm:$0xff] %v4763_v2  ;;  %v4780_v22 = vrot.slane %v4558_v35, %v4593_v51  ;;  %v4782_v17 = vadd.f32 %v1064_v30, %v1048_v23  ;;  %v1248_v5 = vmul.f32 %v4763_v2, %v4747_v26  ;;  %v1280_v4 = vadd.f32 %v1188_v31, %v1168_v28  ;;  %v4807_v2 = vld [vmem:[%s4569_s28 + $0x93] sm:$0xff] }
  0xf2   : > { %8322 = vst [vmem:[#allocation42_spill] sm:$0xff] %v4776_v10  ;;  %8324 = vst [vmem:[#allocation44_spill] sm:$0xff] %v4787_v0  ;;  %v4791_v16 = vrot.slane %v4561_v37, %v4616_v58  ;;  %v1296_v27 = vadd.f32 %v1228_v6, %v1208_v36  ;;  %v1392_v23 = vmul.f32 %v4776_v10, %v1360_v33 }
  0xf3   : > { %8323 = vst [vmem:[#allocation43_spill] sm:$0xff] %v4780_v22  ;;  %8326 = vst [vmem:[#allocation46_spill] sm:$0xff] %v4794_v29  ;;  %v1412_v30 = vmul.f32 %v4780_v22, %v4767_v7  ;;  %v4804_v28 = vrot.slane %v4563_v38, %v4575_v43  ;;  %v1312_v31 = vadd.f32 %v1280_v4, %v1264_v63 }
  0xf4   : > { %8325 = vst [vmem:[#allocation45_spill] sm:$0xff] %v4791_v16  ;;  %8327 = vst [vmem:[#allocation47_spill] sm:$0xff] %v4797_v13  ;;  %v1432_v6 = vmul.f32 %v4791_v16, %v4772_v32  ;;  %v4813_v36 = vrot.slane %v4563_v38, %v4577_v44  ;;  %v4817_v33 = vrot.slane %v4565_v39, %v4579_v45  ;;  %v1624_v16 = vld [vmem:[%s4569_s28 + $0x4] sm:$0xff]  ;;  %v4827_v32 = vld [vmem:[%s4569_s28 + $0x1c] sm:$0xff] }
  0xf5   : > { %8328 = vst [vmem:[#allocation48_spill] sm:$0xff] %v4804_v28  ;;  %8329 = vst [vmem:[#allocation49_spill] sm:$0xff] %v4807_v2  ;;  %v1328_v22 = vadd.f32 %v1296_v27, %v1248_v5  ;;  %v1452_v10 = vmul.f32 %v4804_v28, %v4787_v0  ;;  %v4823_v63 = vrot.slane %v4567_v40, %v4587_v48  ;;  %v4834_v5 = vld [vmem:[%s4569_s28 + $0x34] sm:$0xff]  ;;  %v4856_v0 = vld [vmem:[%s4569_s28 + $0x64] sm:$0xff] }
  0xf6   : > { %8330 = vst [vmem:[#allocation50_spill] sm:$0xff] %v4813_v36  ;;  %8331 = vst [vmem:[#allocation51_spill] sm:$0xff] %v4817_v33  ;;  %v1528_v4 = vadd.f32 %v1412_v30, %v1392_v23  ;;  %v1472_v7 = vmul.f32 %v4813_v36, %v4794_v29  ;;  %v1492_v26 = vmul.f32 %v4817_v33, %v4797_v13  ;;  %v4849_v29 = vld [vmem:[%s4569_s28 + $0x4c] sm:$0xff] }
  0xf7   : > { %8332 = vst [vmem:[#allocation52_spill] sm:$0xff] %v4823_v63  ;;  %8333 = vst [vmem:[#allocation53_spill] sm:$0xff] %v4827_v32  ;;  %v4838_v27 = vrot.slane %v4556_v34, %v4589_v49  ;;  %v4842_v28 = vrot.slane %v4558_v35, %v4591_v50  ;;  %v4844_v23 = vadd.f32 %v1328_v22, %v1312_v31 }
  0xf8   : > { %8334 = vst [vmem:[#allocation54_spill] sm:$0xff] %v4834_v5  ;;  %v1512_v30 = vmul.f32 %v4823_v63, %v4807_v2  ;;  %v1544_v36 = vadd.f32 %v1452_v10, %v1432_v6  ;;  %8337 = vst [vmem:[#allocation57_spill] sm:$0xff] %v4849_v29  ;;  %v4853_v33 = vrot.slane %v4561_v37, %v4593_v51  ;;  %v4869_v63 = vld [vmem:[%s4569_s28 + $0x94] sm:$0xff] }
  0xf9   : > { %8335 = vst [vmem:[#allocation55_spill] sm:$0xff] %v4838_v27  ;;  %8336 = vst [vmem:[#allocation56_spill] sm:$0xff] %v4842_v28  ;;  %v1560_v13 = vadd.f32 %v1492_v26, %v1472_v7  ;;  %v1656_v22 = vmul.f32 %v4838_v27, %v1624_v16  ;;  %v1676_v31 = vmul.f32 %v4842_v28, %v4827_v32 }
  0xfa   : > { %8338 = vst [vmem:[#allocation58_spill] sm:$0xff] %v4853_v33  ;;  %8339 = vst [vmem:[#allocation59_spill] sm:$0xff] %v4856_v0  ;;  %v4866_v10 = vrot.slane %v4563_v38, %v4616_v58  ;;  %v1576_v6 = vadd.f32 %v1544_v36, %v1528_v4  ;;  %v1696_v7 = vmul.f32 %v4853_v33, %v4834_v5  ;;  %v1888_v33 = vld [vmem:[%s4569_s28 + $0x5] sm:$0xff]  ;;  %v4889_v5 = vld [vmem:[%s4569_s28 + $0x1d] sm:$0xff] }
  0xfb   : > { %8340 = vst [vmem:[#allocation60_spill] sm:$0xff] %v4859_v41  ;;  %v4875_v26 = vrot.slane %v4565_v39, %v4575_v43  ;;  %v4879_v16 = vrot.slane %v4565_v39, %v4577_v44  ;;  %v1592_v28 = vadd.f32 %v1560_v13, %v1512_v30  ;;  %v4885_v36 = vrot.slane %v4567_v40, %v4579_v45  ;;  %v4896_v13 = vld [vmem:[%s4569_s28 + $0x35] sm:$0xff] }
  0xfc   : > { %8341 = vst [vmem:[#allocation61_spill] sm:$0xff] %v4866_v10  ;;  %v1716_v27 = vmul.f32 %v4866_v10, %v4849_v29  ;;  %v1792_v4 = vadd.f32 %v1676_v31, %v1656_v22  ;;  %8345 = vst [vmem:[#allocation65_spill] sm:$0xff] %v4896_v13  ;;  %v4900_v30 = vrot.slane %v4556_v34, %v4587_v48 }
  0xfd   : > { %8342 = vst [vmem:[#allocation62_spill] sm:$0xff] %v4875_v26  ;;  %8343 = vst [vmem:[#allocation63_spill] sm:$0xff] %v4879_v16  ;;  %v1736_v32 = vmul.f32 %v4875_v26, %v4856_v0  ;;  %v1756_v2 = vmul.f32 %v4879_v16, %v4859_v41  ;;  %v4904_v10 = vrot.slane %v4558_v35, %v4589_v49  ;;  %v4909_v26 = vld [vmem:[%s4569_s28 + $0x4d] sm:$0xff]  ;;  %v4916_v0 = vld [vmem:[%s4569_s28 + $0x65] sm:$0xff] }
  0xfe   : > { %8344 = vst [vmem:[#allocation64_spill] sm:$0xff] %v4885_v36  ;;  %8346 = vst [vmem:[#allocation66_spill] sm:$0xff] %v4900_v30  ;;  %v1608_v22 = vadd.f32 %v1592_v28, %v1576_v6  ;;  %v1776_v31 = vmul.f32 %v4885_v36, %v4869_v63  ;;  %v1808_v29 = vadd.f32 %v1716_v27, %v1696_v7  ;;  %v4929_v7 = vld [vmem:[%s4569_s28 + $0x95] sm:$0xff] }
  0xff   : > { %8347 = vst [vmem:[#allocation67_spill] sm:$0xff] %v4904_v10  ;;  %8348 = vst [vmem:[#allocation68_spill] sm:$0xff] %v4909_v26  ;;  %v4913_v16 = vrot.slane %v4561_v37, %v4591_v50  ;;  %v1824_v41 = vadd.f32 %v1756_v2, %v1736_v32  ;;  %v1920_v24 = vmul.f32 %v4900_v30, %v1888_v33 }
 0x100   : > { %8350 = vst [vmem:[#allocation70_spill] sm:$0xff] %v4916_v0  ;;  %8351 = vst [vmem:[#allocation71_spill] sm:$0xff] %v4919_v25  ;;  %v1940_v28 = vmul.f32 %v4904_v10, %v4889_v5  ;;  %v4926_v27 = vrot.slane %v4563_v38, %v4593_v51  ;;  %v1840_v6 = vadd.f32 %v1808_v29, %v1792_v4 }
 0x101   : > { %8349 = vst [vmem:[#allocation69_spill] sm:$0xff] %v4913_v16  ;;  %v1960_v2 = vmul.f32 %v4913_v16, %v4896_v13  ;;  %v4935_v32 = vrot.slane %v4565_v39, %v4616_v58  ;;  %v4939_v33 = vrot.slane %v4567_v40, %v4575_v43  ;;  %v1856_v10 = vadd.f32 %v1824_v41, %v1776_v31  ;;  %v2152_v16 = vld [vmem:[%s4569_s28 + $0x6] sm:$0xff]  ;;  %v4949_v13 = vld [vmem:[%s4569_s28 + $0x1e] sm:$0xff]  ;;  %v4956_v31 = vld [vmem:[%s4569_s28 + $0x36] sm:$0xff] }
 0x102   : > { %8352 = vst [vmem:[#allocation72_spill] sm:$0xff] %v4926_v27  ;;  %v1980_v30 = vmul.f32 %v4926_v27, %v4909_v26  ;;  %v4945_v29 = vrot.slane %v4567_v40, %v4577_v44  ;;  %v2056_v4 = vadd.f32 %v1940_v28, %v1920_v24  ;;  %v4960_v27 = vrot.slane %v4556_v34, %v4579_v45  ;;  %v4966_v24 = vld [vmem:[#allocation6 + $0x30] ss:$0 sm:$0xff]  ;;  %v4981_v45 = vld [vmem:[%s4569_s28 + $0x66] sm:$0xff] }
 0x103   : > { %8353 = vst [vmem:[#allocation73_spill] sm:$0xff] %v4935_v32  ;;  %8354 = vst [vmem:[#allocation74_spill] sm:$0xff] %v4939_v33  ;;  %v2000_v43 = vmul.f32 %v4935_v32, %v4916_v0  ;;  %v2020_v41 = vmul.f32 %v4939_v33, %v4919_v25  ;;  %v4964_v44 = vrot.slane %v4558_v35, %v4587_v48  ;;  %v4971_v0 = vld [vmem:[%s4569_s28 + $0x4e] sm:$0xff]  ;;  %v4974_v33 = vld [vmem:[%s4569_s28 + $0x96] sm:$0xff] }
 0x104   : > { %8355 = vst [vmem:[#allocation75_spill] sm:$0xff] %v4945_v29  ;;  %8356 = vst [vmem:[#allocation76_spill] sm:$0xff] %v4960_v27  ;;  %v1872_v28 = vadd.f32 %v1856_v10, %v1840_v6  ;;  %v2040_v26 = vmul.f32 %v4945_v29, %v4929_v7  ;;  %v2072_v32 = vadd.f32 %v1980_v30, %v1960_v2  ;;  %v4984_v35 = vld [vmem:[%s4569_s28 + $0x7e] sm:$0xff] }
 0x105   : > { %8357 = vst [vmem:[#allocation77_spill] sm:$0xff] %v4964_v44  ;;  %8358 = vst [vmem:[#allocation78_spill] sm:$0xff] %v4966_v24  ;;  %v4978_v25 = vrot.slane %v4561_v37, %v4589_v49  ;;  %v2088_v34 = vadd.f32 %v2020_v41, %v2000_v43  ;;  %v2184_v48 = vmul.f32 %v4960_v27, %v2152_v16 }
 0x106   : > { %8359 = vst [vmem:[#allocation79_spill] sm:$0xff] %v4971_v0  ;;  %8361 = vst [vmem:[#allocation81_spill] sm:$0xff] %v4981_v45  ;;  %v2204_v10 = vmul.f32 %v4964_v44, %v4949_v13  ;;  %v4991_v30 = vrot.slane %v4563_v38, %v4591_v50  ;;  %v2104_v6 = vadd.f32 %v2072_v32, %v2056_v4 }
 0x107   : > { %8360 = vst [vmem:[#allocation80_spill] sm:$0xff] %v4978_v25  ;;  %8362 = vst [vmem:[#allocation82_spill] sm:$0xff] %v4984_v35  ;;  %v2224_v37 = vmul.f32 %v4978_v25, %v4956_v31  ;;  %v4997_v49 = vrot.slane %v4565_v39, %v4593_v51  ;;  %v5001_v2 = vrot.slane %v4567_v40, %v4616_v58 }
 0x108   : > { %8363 = vst [vmem:[#allocation83_spill] sm:$0xff] %v4991_v30  ;;  %v2120_v16 = vadd.f32 %v2088_v34, %v2040_v26  ;;  %v2244_v43 = vmul.f32 %v4991_v30, %v4971_v0  ;;  %v2304_v38 = vmul.f32 %v4966_v24, %v4974_v33  ;;  %v2320_v50 = vadd.f32 %v2204_v10, %v2184_v48  ;;  %v5015_v26 = vld [vmem:[%s4569_s28 + $0xa8] sm:$0xff] }
 0x109   : > { %8364 = vst [vmem:[#allocation84_spill] sm:$0xff] %v4997_v49  ;;  %8365 = vst [vmem:[#allocation85_spill] sm:$0xff] %v5001_v2  ;;  %v2264_v32 = vmul.f32 %v4997_v49, %v4981_v45  ;;  %v2284_v4 = vmul.f32 %v5001_v2, %v4984_v35  ;;  %v2423_v39 = vadd.f32 %v4782_v17, %v4718_v1 }
 0x10a   : > { %v2439_v40 = vadd.f32 %v1608_v22, %v4844_v23  ;;  %v2136_v51 = vadd.f32 %v2120_v16, %v2104_v6  ;;  %v2336_v58 = vadd.f32 %v2244_v43, %v2224_v37  ;;  %8366 = vst [vmem:[#allocation86_spill] sm:$0xff] %v5015_v26  ;;  %v602_v41 = vmul.f32 %v4606_v55, %v4573_v42  ;;  %v5032_v43 = vld [vmem:[%s4569_s28 + $0xa9] sm:$0xff] }
 0x10b   : > { %v622_v34 = vmul.f32 %v4610_v56, %v4582_v46  ;;  %v2352_v48 = vadd.f32 %v2284_v4, %v2264_v32  ;;  %v642_v24 = vmul.f32 %v4614_v57, %v4585_v47  ;;  %v662_v1 = vmul.f32 %v4620_v59, %v4596_v52  ;;  %8367 = vst [vmem:[#allocation87_spill] sm:$0xff] %v5032_v43  ;;  %v5047_v32 = vld [vmem:[%s7681_s2] ss:$0 sm:$0xff] }
 0x10c   : > { %v2471_v10 = vadd.f32 %v2439_v40, %v2423_v39  ;;  %v2368_v17 = vadd.f32 %v2336_v58, %v2320_v50  ;;  %v2455_v23 = vadd.f32 %v2136_v51, %v1872_v28  ;;  %v682_v22 = vmul.f32 %v4624_v60, %v4599_v53  ;;  %8368 = vst [vmem:[#allocation88_spill] sm:$0xff] %v5047_v32  ;;  %v5054_v51 = vld [vmem:[%s4569_s28 + $0xaa] sm:$0xff] }
 0x10d   : > { %v702_v6 = vmul.f32 %v4628_v61, %v4602_v54  ;;  %v2384_v42 = vadd.f32 %v2352_v48, %v2304_v38  ;;  %v722_v46 = vmul.f32 %v4632_v62, %v5015_v26  ;;  %v738_v37 = vadd.f32 %v622_v34, %v602_v41  ;;  %8371 = vst [vmem:[#allocation89_spill] sm:$0xff] %v5054_v51  ;;  %v8372_v41 = vld [vmem:[#allocation27_spill] sm:$0xff]  ;;  %v8373_v34 = vld [vmem:[#allocation29_spill] sm:$0xff]  ;;  %v8374_v48 = vld [vmem:[#allocation28_spill] sm:$0xff] }
 0x10e   : > { %v754_v16 = vadd.f32 %v662_v1, %v642_v24  ;;  %v866_v52 = vmul.f32 %v4642_v3, %v4653_v8  ;;  %v886_v28 = vmul.f32 %v4667_v14, %v4656_v9  ;;  %v906_v53 = vmul.f32 %v4671_v15, %v4659_v11  ;;  %v8369_v9 = vld [vmem:[#allocation25_spill] sm:$0xff]  ;;  %v8370_v11 = vld [vmem:[#allocation26_spill] sm:$0xff]  ;;  %v8375_v1 = vld [vmem:[#allocation32_spill] sm:$0xff] }
 0x10f   : > { %v770_v47 = vadd.f32 %v702_v6, %v682_v22  ;;  %v2400_v54 = vadd.f32 %v2384_v42, %v2368_v17  ;;  %v926_v50 = vmul.f32 %v4681_v20, %v4662_v12  ;;  %v946_v24 = vmul.f32 %v4685_v21, %v4674_v18  ;;  %v8376_v42 = vld [vmem:[#allocation30_spill] sm:$0xff] }
 0x110   : > { %v786_v38 = vadd.f32 %v754_v16, %v738_v37  ;;  %v966_v4 = vmul.f32 %v8369_v9, %v4677_v19  ;;  %v986_v39 = vmul.f32 %v8370_v11, %v5032_v43  ;;  %v1002_v40 = vadd.f32 %v886_v28, %v866_v52  ;;  %v8378_v37 = vld [vmem:[#allocation31_spill] sm:$0xff]  ;;  %v5067_v52 = vld [vmem:[%s4569_s28 + $0xab] sm:$0xff]  ;;  %v8384_v43 = vld [vmem:[#allocation38_spill] sm:$0xff] }
 0x111   : > { %v802_v8 = vadd.f32 %v770_v47, %v722_v46  ;;  %v2487_v12 = vadd.f32 %v2455_v23, %v2400_v54  ;;  %v1018_v58 = vadd.f32 %v926_v50, %v906_v53  ;;  %v1130_v18 = vmul.f32 %v8373_v34, %v8372_v41  ;;  %v8377_v46 = vld [vmem:[#allocation33_spill] sm:$0xff]  ;;  %v8379_v16 = vld [vmem:[#allocation35_spill] sm:$0xff]  ;;  %8380 = vst [vmem:[#allocation27_spill] sm:$0xff] %v5067_v52  ;;  %v8381_v53 = vld [vmem:[#allocation34_spill] sm:$0xff] }
 0x112   : > { %v1150_v17 = vmul.f32 %v8375_v1, %v8374_v48  ;;  %v1034_v6 = vadd.f32 %v966_v4, %v946_v24  ;;  %v1170_v19 = vmul.f32 %v8377_v46, %v8376_v42  ;;  %v1190_v47 = vmul.f32 %v8379_v16, %v8378_v37  ;;  %v8382_v54 = vld [vmem:[#allocation36_spill] sm:$0xff]  ;;  %v8383_v41 = vld [vmem:[#allocation37_spill] sm:$0xff]  ;;  %v8385_v24 = vld [vmem:[#allocation39_spill] sm:$0xff] }
 0x113   : > { %v5060_v22 = vadd.f32 %v802_v8, %v786_v38  ;;  %v2503_v23 = vadd.f32 %v2487_v12, %v2471_v10  ;;  %v1050_v28 = vadd.f32 %v1018_v58, %v1002_v40  ;;  %v1210_v50 = vmul.f32 %v8382_v54, %v8381_v53  ;;  %v8387_v16 = vld [vmem:[#allocation40_spill] sm:$0xff]  ;;  %v8388_v46 = vld [vmem:[#allocation42_spill] sm:$0xff]  ;;  %v8389_v40 = vld [vmem:[#allocation41_spill] sm:$0xff] }
 0x114   : > { %v1230_v48 = vmul.f32 %v8384_v43, %v8383_v41  ;;  %v1066_v38 = vadd.f32 %v1034_v6, %v986_v39  ;;  %v1250_v8 = vmul.f32 %v8385_v24, %v5054_v51  ;;  %v1266_v4 = vadd.f32 %v1150_v17, %v1130_v18  ;;  %v8390_v12 = vld [vmem:[#allocation43_spill] sm:$0xff]  ;;  %v5083_v53 = vld [vmem:[%s4569_s28 + $0xac] sm:$0xff]  ;;  %v8394_v51 = vld [vmem:[#allocation46_spill] sm:$0xff] }
 0x115   : > { %v1282_v26 = vadd.f32 %v1190_v47, %v1170_v19  ;;  %v5076_v42 = vadd.f32 %v5047_v32, %v2503_v23  ;;  %v1394_v10 = vmul.f32 %v8388_v46, %v8387_v16  ;;  %v1414_v58 = vmul.f32 %v8390_v12, %v8389_v40  ;;  %8391 = vst [vmem:[#allocation30_spill] sm:$0xff] %v5083_v53  ;;  %v8392_v39 = vld [vmem:[#allocation44_spill] sm:$0xff]  ;;  %v8393_v6 = vld [vmem:[#allocation45_spill] sm:$0xff]  ;;  %v8396_v47 = vld [vmem:[#allocation47_spill] sm:$0xff] }
 0x116   : > { %v1298_v37 = vadd.f32 %v1230_v48, %v1210_v50  ;;  %v1082_v54 = vadd.f32 %v1066_v38, %v1050_v28  ;;  %v1434_v43 = vmul.f32 %v8393_v6, %v8392_v39  ;;  %v8395_v18 = vld [vmem:[#allocation48_spill] sm:$0xff]  ;;  %v8397_v23 = vld [vmem:[#allocation50_spill] sm:$0xff]  ;;  %v8398_v16 = vld [vmem:[#allocation49_spill] sm:$0xff] }
 0x117   : > { %8386 = vst [vmem:[#allocation28_spill] sm:$0xff] %v5076_v42  ;;  %v1314_v41 = vadd.f32 %v1282_v26, %v1266_v4  ;;  %v1454_v17 = vmul.f32 %v8395_v18, %v8394_v51  ;;  %2535 = vadd.xlane.f32.xlu0 %v5076_v42  ;;  %v1474_v50 = vmul.f32 %v8397_v23, %v8396_v47  ;;  %v8399_v48 = vld [vmem:[#allocation51_spill] sm:$0xff]  ;;  %v8400_v40 = vld [vmem:[#allocation52_spill] sm:$0xff]  ;;  %v8401_v38 = vld [vmem:[#allocation53_spill] sm:$0xff] }
 0x118   : > { %v1330_v19 = vadd.f32 %v1298_v37, %v1250_v8  ;;  %v1494_v46 = vmul.f32 %v8399_v48, %v8398_v16  ;;  %v1514_v12 = vmul.f32 %v8400_v40, %v5067_v52  ;;  %v1530_v26 = vadd.f32 %v1414_v58, %v1394_v10  ;;  %v8402_v4 = vld [vmem:[#allocation55_spill] sm:$0xff]  ;;  %v8403_v6 = vld [vmem:[#allocation54_spill] sm:$0xff]  ;;  %v8404_v51 = vld [vmem:[#allocation56_spill] sm:$0xff] }
 0x119   : > { %v1546_v28 = vadd.f32 %v1454_v17, %v1434_v43  ;;  %v1658_v39 = vmul.f32 %v8402_v4, %v8401_v38  ;;  %v1678_v18 = vmul.f32 %v8404_v51, %v8403_v6  ;;  %v8405_v37 = vld [vmem:[#allocation57_spill] sm:$0xff]  ;;  %v8406_v32 = vld [vmem:[#allocation58_spill] sm:$0xff]  ;;  %v8407_v23 = vld [vmem:[#allocation59_spill] sm:$0xff]  ;;  %v1778_v58 = vmul.f32 %v4885_v36, %v5083_v53 }
 0x11a   : > { %v1346_v42 = vadd.f32 %v1330_v19, %v1314_v41  ;;  %v1562_v8 = vadd.f32 %v1494_v46, %v1474_v50  ;;  %v1698_v47 = vmul.f32 %v8406_v32, %v8405_v37  ;;  %v8408_v24 = vld [vmem:[#allocation61_spill] sm:$0xff]  ;;  %v8409_v1 = vld [vmem:[#allocation60_spill] sm:$0xff]  ;;  %v8410_v52 = vld [vmem:[#allocation62_spill] sm:$0xff] }
 0x11b   : > { %v1718_v16 = vmul.f32 %v8408_v24, %v8407_v23  ;;  %v1578_v48 = vadd.f32 %v1546_v28, %v1530_v26  ;;  %v1738_v40 = vmul.f32 %v8410_v52, %v8409_v1  ;;  %v8411_v43 = vld [vmem:[#allocation63_spill] sm:$0xff]  ;;  %v1794_v6 = vadd.f32 %v1678_v18, %v1658_v39  ;;  %v5111_v41 = vld [vmem:[%s4569_s28 + $0xad] sm:$0xff]  ;;  %v8413_v19 = vld [vmem:[#allocation66_spill] sm:$0xff] }
 0x11c   : > { %v1758_v10 = vmul.f32 %v8411_v43, %v4869_v63  ;;  %v1594_v17 = vadd.f32 %v1562_v8, %v1514_v12  ;;  %8412 = vst [vmem:[#allocation31_spill] sm:$0xff] %v5111_v41  ;;  %v1922_v50 = vmul.f32 %v8413_v19, %v4889_v5  ;;  %v8414_v26 = vld [vmem:[#allocation65_spill] sm:$0xff]  ;;  %v8415_v28 = vld [vmem:[#allocation67_spill] sm:$0xff]  ;;  %v8416_v1 = vld [vmem:[#allocation68_spill] sm:$0xff] }
 0x11d   : > { %v1810_v46 = vadd.f32 %v1718_v16, %v1698_v47  ;;  %v1942_v38 = vmul.f32 %v8415_v28, %v8414_v26  ;;  %v8417_v37 = vld [vmem:[#allocation69_spill] sm:$0xff]  ;;  %v8418_v43 = vld [vmem:[#allocation70_spill] sm:$0xff]  ;;  %v8419_v52 = vld [vmem:[#allocation72_spill] sm:$0xff] }
 0x11e   : > { %v1826_v23 = vadd.f32 %v1758_v10, %v1738_v40  ;;  %v1962_v63 = vmul.f32 %v8417_v37, %v8416_v1  ;;  %v1982_v53 = vmul.f32 %v8419_v52, %v8418_v43  ;;  %v1610_v12 = vadd.f32 %v1594_v17, %v1578_v48  ;;  %v8420_v39 = vld [vmem:[#allocation71_spill] sm:$0xff]  ;;  %v8421_v8 = vld [vmem:[#allocation73_spill] sm:$0xff]  ;;  %v8422_v16 = vld [vmem:[#allocation74_spill] sm:$0xff] }
 0x11f   : > { %v1842_v18 = vadd.f32 %v1810_v46, %v1794_v6  ;;  %v2002_v47 = vmul.f32 %v8421_v8, %v8420_v39  ;;  %v2022_v5 = vmul.f32 %v8422_v16, %v4929_v7  ;;  %v2042_v10 = vmul.f32 %v4945_v29, %v5111_v41  ;;  %v5128_v1 = vld [vmem:[%s4569_s28 + $0xae] sm:$0xff] }
 0x120   : > { %v1858_v40 = vadd.f32 %v1826_v23, %v1778_v58  ;;  %v2058_v26 = vadd.f32 %v1942_v38, %v1922_v50  ;;  %v2074_v28 = vadd.f32 %v1982_v53, %v1962_v63  ;;  %8423 = vst [vmem:[#allocation34_spill] sm:$0xff] %v5128_v1  ;;  %v2186_v48 = vmul.f32 %v4960_v27, %v4949_v13  ;;  %v569_v58 = vld [vmem:[%s4569_s28 + $0x8] sm:$0xff]  ;;  %v5142_v23 = vld [vmem:[%s4569_s28 + $0x20] sm:$0xff]  ;;  %v5145_v13 = vld [vmem:[%s4569_s28 + $0x38] sm:$0xff] }
 0x121   : > { %v2090_v43 = vadd.f32 %v2022_v5, %v2002_v47  ;;  %v2206_v17 = vmul.f32 %v4964_v44, %v4956_v31  ;;  %v2226_v7 = vmul.f32 %v4978_v25, %v4971_v0  ;;  %v2246_v53 = vmul.f32 %v4991_v30, %v4981_v45  ;;  %8424 = vst [vmem:[#allocation37_spill] sm:$0xff] %v5145_v13  ;;  %v8425_v63 = vld [vmem:[#allocation78_spill] sm:$0xff]  ;;  %v5152_v39 = vld [vmem:[%s4569_s28 + $0x50] sm:$0xff]  ;;  %v5155_v47 = vld [vmem:[%s4569_s28 + $0x68] sm:$0xff] }
 0x122   : > { %v1874_v6 = vadd.f32 %v1858_v40, %v1842_v18  ;;  %v2106_v46 = vadd.f32 %v2074_v28, %v2058_v26  ;;  %v2266_v50 = vmul.f32 %v4997_v49, %v4984_v35  ;;  %v2286_v31 = vmul.f32 %v5001_v2, %v4974_v33  ;;  %8426 = vst [vmem:[#allocation40_spill] sm:$0xff] %v5152_v39 }
 0x123   : > { %v2122_v38 = vadd.f32 %v2090_v43, %v2042_v10  ;;  %v2306_v18 = vmul.f32 %v8425_v63, %v5128_v1  ;;  %v2322_v28 = vadd.f32 %v2206_v17, %v2186_v48  ;;  %8427 = vst [vmem:[#allocation41_spill] sm:$0xff] %v5155_v47  ;;  %v2338_v5 = vadd.f32 %v2246_v53, %v2226_v7  ;;  %v5159_v10 = vld [vmem:[%s4569_s28 + $0x80] sm:$0xff]  ;;  %v5162_v43 = vld [vmem:[%s4569_s28 + $0x98] sm:$0xff] }
 0x124   : > { %v2425_v40 = vadd.f32 %v1082_v54, %v5060_v22  ;;  %v2441_v26 = vadd.f32 %v1610_v12, %v1346_v42  ;;  %8428 = vst [vmem:[#allocation44_spill] sm:$0xff] %v5159_v10  ;;  %8429 = vst [vmem:[#allocation46_spill] sm:$0xff] %v5162_v43  ;;  %v601_v33 = vmul.f32 %v4606_v55, %v569_v58  ;;  %v833_v22 = vld [vmem:[%s4569_s28 + $0x9] sm:$0xff]  ;;  %v5171_v54 = vld [vmem:[%s4569_s28 + $0x21] sm:$0xff] }
 0x125   : > { %v2138_v35 = vadd.f32 %v2122_v38, %v2106_v46  ;;  %v2354_v1 = vadd.f32 %v2286_v31, %v2266_v50  ;;  %v621_v48 = vmul.f32 %v4610_v56, %v5142_v23  ;;  %v641_v17 = vmul.f32 %v4614_v57, %v5145_v13  ;;  %v5178_v46 = vld [vmem:[%s4569_s28 + $0x39] sm:$0xff]  ;;  %v5181_v53 = vld [vmem:[%s4569_s28 + $0x51] sm:$0xff] }
 0x126   : > { %v2370_v42 = vadd.f32 %v2338_v5, %v2322_v28  ;;  %v2473_v12 = vadd.f32 %v2441_v26, %v2425_v40  ;;  %v661_v7 = vmul.f32 %v4620_v59, %v5152_v39  ;;  %v681_v58 = vmul.f32 %v4624_v60, %v5155_v47  ;;  %8430 = vst [vmem:[#allocation47_spill] sm:$0xff] %v5178_v46  ;;  %v5188_v5 = vld [vmem:[%s4569_s28 + $0x69] sm:$0xff]  ;;  %v5191_v40 = vld [vmem:[%s4569_s28 + $0x81] sm:$0xff]  ;;  %v5194_v26 = vld [vmem:[%s4569_s28 + $0x99] sm:$0xff] }
 0x127   : > { %8431 = vst [vmem:[#allocation49_spill] sm:$0xff] %v5181_v53  ;;  %v2386_v50 = vadd.f32 %v2354_v1, %v2306_v18  ;;  %v2457_v38 = vadd.f32 %v2138_v35, %v1874_v6  ;;  %v701_v31 = vmul.f32 %v4628_v61, %v5159_v10  ;;  %v721_v28 = vmul.f32 %v4632_v62, %v5162_v43  ;;  %v1097_v61 = vld [vmem:[%s4569_s28 + $0xa] sm:$0xff]  ;;  %v5205_v43 = vld [vmem:[%s4569_s28 + $0x22] sm:$0xff] }
 0x128   : > { %8432 = vst [vmem:[#allocation53_spill] sm:$0xff] %v5188_v5  ;;  %8433 = vst [vmem:[#allocation54_spill] sm:$0xff] %v5191_v40  ;;  %v737_v45 = vadd.f32 %v621_v48, %v601_v33  ;;  %v753_v0 = vadd.f32 %v661_v7, %v641_v17  ;;  %v865_v1 = vmul.f32 %v4642_v3, %v833_v22  ;;  %v5208_v33 = vld [vmem:[%s4569_s28 + $0x3a] sm:$0xff]  ;;  %v5217_v7 = vld [vmem:[%s4569_s28 + $0x52] sm:$0xff] }
 0x129   : > { %8434 = vst [vmem:[#allocation57_spill] sm:$0xff] %v5194_v26  ;;  %v885_v35 = vmul.f32 %v4667_v14, %v5171_v54  ;;  %v2402_v6 = vadd.f32 %v2386_v50, %v2370_v42  ;;  %v769_v18 = vadd.f32 %v701_v31, %v681_v58  ;;  %v905_v41 = vmul.f32 %v4671_v15, %v5178_v46  ;;  %v5220_v15 = vld [vmem:[%s4569_s28 + $0x6a] sm:$0xff] }
 0x12a   : > { %v925_v62 = vmul.f32 %v4681_v20, %v5181_v53  ;;  %8435 = vst [vmem:[#allocation59_spill] sm:$0xff] %v5205_v43  ;;  %8436 = vst [vmem:[#allocation60_spill] sm:$0xff] %v5208_v33  ;;  %v785_v48 = vadd.f32 %v753_v0, %v737_v45  ;;  %v945_v17 = vmul.f32 %v4685_v21, %v5188_v5  ;;  %v5223_v0 = vld [vmem:[%s4569_s28 + $0x82] sm:$0xff]  ;;  %v5226_v45 = vld [vmem:[%s4569_s28 + $0x9a] sm:$0xff] }
 0x12b   : > { %v965_v22 = vmul.f32 %v8369_v9, %v5191_v40  ;;  %v985_v42 = vmul.f32 %v8370_v11, %v5194_v26  ;;  %8437 = vst [vmem:[#allocation65_spill] sm:$0xff] %v5217_v7  ;;  %v2489_v58 = vadd.f32 %v2457_v38, %v2402_v6  ;;  %v801_v50 = vadd.f32 %v769_v18, %v721_v28  ;;  %v8441_v11 = vld [vmem:[#allocation32_spill] sm:$0xff]  ;;  %v8442_v28 = vld [vmem:[#allocation33_spill] sm:$0xff]  ;;  %v8443_v18 = vld [vmem:[#allocation35_spill] sm:$0xff] }
 0x12c   : > { %v1001_v31 = vadd.f32 %v885_v35, %v865_v1  ;;  %v1017_v20 = vadd.f32 %v925_v62, %v905_v41  ;;  %8438 = vst [vmem:[#allocation68_spill] sm:$0xff] %v5220_v15  ;;  %8439 = vst [vmem:[#allocation70_spill] sm:$0xff] %v5223_v0  ;;  %v1129_v9 = vmul.f32 %v8373_v34, %v1097_v61  ;;  %v1361_v1 = vld [vmem:[%s4569_s28 + $0xb] sm:$0xff]  ;;  %v5242_v61 = vld [vmem:[%s4569_s28 + $0x3b] sm:$0xff] }
 0x12d   : > { %8440 = vst [vmem:[#allocation71_spill] sm:$0xff] %v5226_v45  ;;  %v1033_v21 = vadd.f32 %v965_v22, %v945_v17  ;;  %v1149_v38 = vmul.f32 %v8441_v11, %v5205_v43  ;;  %v1169_v6 = vmul.f32 %v8442_v28, %v5208_v33  ;;  %v2505_v62 = vadd.f32 %v2489_v58, %v2473_v12  ;;  %v5239_v22 = vld [vmem:[%s4569_s28 + $0x23] sm:$0xff]  ;;  %v8446_v28 = vld [vmem:[#allocation38_spill] sm:$0xff] }
 0x12e   : > { %v5234_v41 = vadd.f32 %v801_v50, %v785_v48  ;;  %v1049_v35 = vadd.f32 %v1017_v20, %v1001_v31  ;;  %v1189_v17 = vmul.f32 %v8443_v18, %v5217_v7  ;;  %8444 = vst [vmem:[#allocation78_spill] sm:$0xff] %v5242_v61  ;;  %v8445_v11 = vld [vmem:[#allocation36_spill] sm:$0xff]  ;;  %v1229_v12 = vmul.f32 %v8446_v28, %v5223_v0  ;;  %v8447_v48 = vld [vmem:[#allocation39_spill] sm:$0xff]  ;;  %v5251_v58 = vld [vmem:[%s4569_s28 + $0x53] sm:$0xff] }
 0x12f   : > { %v1065_v34 = vadd.f32 %v1033_v21, %v985_v42  ;;  %v1209_v43 = vmul.f32 %v8445_v11, %v5220_v15  ;;  %v1249_v20 = vmul.f32 %v8447_v48, %v5226_v45  ;;  %8448 = vst [vmem:[#allocation90_spill] sm:$0xff] %v5251_v58  ;;  %v5254_v50 = vld [vmem:[%s4569_s28 + $0x6b] sm:$0xff]  ;;  %v5257_v31 = vld [vmem:[%s4569_s28 + $0x83] sm:$0xff]  ;;  %v1265_v21 = vadd.f32 %v1149_v38, %v1129_v9  ;;  %v5263_v11 = vld [vmem:[%s4569_s28 + $0x9b] sm:$0xff] }
 0x130   : > { %8449 = vst [vmem:[#allocation91_spill] sm:$0xff] %v5254_v50  ;;  %8450 = vst [vmem:[#allocation92_spill] sm:$0xff] %v5257_v31  ;;  %v8451_v18 = vld [vmem:[#allocation88_spill] sm:$0xff]  ;;  %v1281_v42 = vadd.f32 %v1189_v17, %v1169_v6  ;;  %v8454_v28 = vld [vmem:[#allocation42_spill] sm:$0xff] }
 0x131   : > { %v5260_v7 = vadd.f32 %v8451_v18, %v2505_v62  ;;  %8453 = vst [vmem:[#allocation94_spill] sm:$0xff] %v5263_v11  ;;  %v1393_v0 = vmul.f32 %v8454_v28, %v1361_v1  ;;  %v1625_v15 = vld [vmem:[%s4569_s28 + $0xc] sm:$0xff]  ;;  %v5267_v48 = vadd.f32 %v1065_v34, %v1049_v35  ;;  %v1297_v45 = vadd.f32 %v1229_v12, %v1209_v43  ;;  %v8455_v33 = vld [vmem:[#allocation43_spill] sm:$0xff]  ;;  %v8459_v43 = vld [vmem:[#allocation50_spill] sm:$0xff] }
 0x132   : > { %v1413_v26 = vmul.f32 %v8455_v33, %v5239_v22  ;;  %v8456_v62 = vld [vmem:[#allocation45_spill] sm:$0xff]  ;;  %v5274_v9 = vld [vmem:[%s4569_s28 + $0x24] sm:$0xff]  ;;  %v5277_v38 = vld [vmem:[%s4569_s28 + $0x3c] sm:$0xff]  ;;  %v1313_v6 = vadd.f32 %v1281_v42, %v1265_v21  ;;  %v1473_v35 = vmul.f32 %v8459_v43, %v5254_v50  ;;  %v1657_v43 = vmul.f32 %v8402_v4, %v1625_v15 }
 0x133   : > { %8452 = vst [vmem:[#allocation93_spill] sm:$0xff] %v5260_v7  ;;  %v1433_v18 = vmul.f32 %v8456_v62, %v5242_v61  ;;  %8457 = vst [vmem:[#allocation95_spill] sm:$0xff] %v5277_v38  ;;  %2539 = vadd.xlane.f32.xlu1 %v5260_v7  ;;  %v8458_v1 = vld [vmem:[#allocation48_spill] sm:$0xff]  ;;  %v8460_v17 = vld [vmem:[#allocation51_spill] sm:$0xff]  ;;  %v1329_v7 = vadd.f32 %v1297_v45, %v1249_v20  ;;  %v1697_v45 = vmul.f32 %v8406_v32, %v5277_v38 }
 0x134   : > { %v1453_v34 = vmul.f32 %v8458_v1, %v5251_v58  ;;  %v1493_v12 = vmul.f32 %v8460_v17, %v5257_v31  ;;  %v5287_v33 = vld [vmem:[%s4569_s28 + $0x54] sm:$0xff]  ;;  %v5290_v62 = vld [vmem:[%s4569_s28 + $0x6c] sm:$0xff]  ;;  %v5293_v61 = vld [vmem:[%s4569_s28 + $0x84] sm:$0xff]  ;;  %v1529_v1 = vadd.f32 %v1413_v26, %v1393_v0  ;;  %v1677_v31 = vmul.f32 %v8404_v51, %v5274_v9 }
 0x135   : > { %8461 = vst [vmem:[#allocation96_spill] sm:$0xff] %v5287_v33  ;;  %8462 = vst [vmem:[#allocation97_spill] sm:$0xff] %v5290_v62  ;;  %v8464_v21 = vld [vmem:[#allocation52_spill] sm:$0xff]  ;;  %v5298_v58 = vld [vmem:[%s4569_s28 + $0x9c] sm:$0xff]  ;;  %v1717_v26 = vmul.f32 %v8408_v24, %v5287_v33 }
 0x136   : > { %8463 = vst [vmem:[#allocation98_spill] sm:$0xff] %v5293_v61  ;;  %v1513_v42 = vmul.f32 %v8464_v21, %v5263_v11  ;;  %8465 = vst [vmem:[#allocation99_spill] sm:$0xff] %v5298_v58  ;;  %v1545_v50 = vadd.f32 %v1453_v34, %v1433_v18  ;;  %v1561_v17 = vadd.f32 %v1493_v12, %v1473_v35  ;;  %v1889_v20 = vld [vmem:[%s4569_s28 + $0xd] sm:$0xff]  ;;  %v5307_v28 = vld [vmem:[%s4569_s28 + $0x25] sm:$0xff] }
 0x137   : > { %v1345_v21 = vadd.f32 %v1329_v7, %v1313_v6  ;;  %v8466_v0 = vld [vmem:[#allocation62_spill] sm:$0xff]  ;;  %v8467_v18 = vld [vmem:[#allocation63_spill] sm:$0xff]  ;;  %v5322_v32 = vld [vmem:[%s4569_s28 + $0x6d] sm:$0xff]  ;;  %v1777_v6 = vmul.f32 %v4885_v36, %v5298_v58  ;;  %v1793_v24 = vadd.f32 %v1677_v31, %v1657_v43 }
 0x138   : > { %v1737_v15 = vmul.f32 %v8466_v0, %v5290_v62  ;;  %v1757_v34 = vmul.f32 %v8467_v18, %v5293_v61  ;;  %v5316_v35 = vld [vmem:[%s4569_s28 + $0x3d] sm:$0xff]  ;;  %v5319_v12 = vld [vmem:[%s4569_s28 + $0x55] sm:$0xff]  ;;  %8470 = vst [vmem:[#allocation102_spill] sm:$0xff] %v5322_v32  ;;  %v1577_v51 = vadd.f32 %v1545_v50, %v1529_v1  ;;  %v1593_v7 = vadd.f32 %v1561_v17, %v1513_v42  ;;  %v5327_v33 = vld [vmem:[%s4569_s28 + $0x85] sm:$0xff] }
 0x139   : > { %8468 = vst [vmem:[#allocation100_spill] sm:$0xff] %v5316_v35  ;;  %8469 = vst [vmem:[#allocation101_spill] sm:$0xff] %v5319_v12  ;;  %v5330_v0 = vld [vmem:[%s4569_s28 + $0x9d] sm:$0xff]  ;;  %v1809_v62 = vadd.f32 %v1717_v26, %v1697_v45  ;;  %v1921_v61 = vmul.f32 %v8413_v19, %v1889_v20  ;;  %v2153_v1 = vld [vmem:[%s4569_s28 + $0xe] sm:$0xff]  ;;  %v1961_v31 = vmul.f32 %v8417_v37, %v5316_v35 }
 0x13a   : > { %8471 = vst [vmem:[#allocation103_spill] sm:$0xff] %v5327_v33  ;;  %8472 = vst [vmem:[#allocation104_spill] sm:$0xff] %v5330_v0  ;;  %v1825_v18 = vadd.f32 %v1757_v34, %v1737_v15  ;;  %v8473_v38 = vld [vmem:[#allocation67_spill] sm:$0xff]  ;;  %v1609_v42 = vadd.f32 %v1593_v7, %v1577_v51  ;;  %v1981_v43 = vmul.f32 %v8419_v52, %v5319_v12  ;;  %v5349_v20 = vld [vmem:[%s4569_s28 + $0x56] sm:$0xff] }
 0x13b   : > { %v1941_v50 = vmul.f32 %v8473_v38, %v5307_v28  ;;  %v5337_v17 = vld [vmem:[%s4569_s28 + $0x26] sm:$0xff]  ;;  %v2001_v45 = vmul.f32 %v8421_v8, %v5322_v32  ;;  %v5346_v26 = vld [vmem:[%s4569_s28 + $0x3e] sm:$0xff]  ;;  %8475 = vst [vmem:[#allocation106_spill] sm:$0xff] %v5349_v20  ;;  %v1841_v15 = vadd.f32 %v1809_v62, %v1793_v24  ;;  %v2021_v38 = vmul.f32 %v8422_v16, %v5327_v33  ;;  %v5356_v7 = vld [vmem:[%s4569_s28 + $0x6e] sm:$0xff] }
 0x13c   : > { %8474 = vst [vmem:[#allocation105_spill] sm:$0xff] %v5346_v26  ;;  %v1857_v34 = vadd.f32 %v1825_v18, %v1777_v6  ;;  %v2041_v51 = vmul.f32 %v4945_v29, %v5330_v0  ;;  %8476 = vst [vmem:[#allocation107_spill] sm:$0xff] %v5356_v7  ;;  %v5359_v37 = vld [vmem:[%s4569_s28 + $0x86] sm:$0xff]  ;;  %v5362_v52 = vld [vmem:[%s4569_s28 + $0x9e] sm:$0xff]  ;;  %v2073_v8 = vadd.f32 %v1981_v43, %v1961_v31 }
 0x13d   : > { %8477 = vst [vmem:[#allocation108_spill] sm:$0xff] %v5359_v37  ;;  %8478 = vst [vmem:[#allocation109_spill] sm:$0xff] %v5362_v52  ;;  %v2057_v12 = vadd.f32 %v1941_v50, %v1921_v61  ;;  %v2185_v32 = vmul.f32 %v4960_v27, %v2153_v1  ;;  %v2205_v24 = vmul.f32 %v4964_v44, %v5337_v17 }
 0x13e   : > { %v1873_v62 = vadd.f32 %v1857_v34, %v1841_v15  ;;  %v2089_v18 = vadd.f32 %v2021_v38, %v2001_v45  ;;  %v2225_v6 = vmul.f32 %v4978_v25, %v5346_v26  ;;  %v2245_v29 = vmul.f32 %v4991_v30, %v5349_v20  ;;  %v5380_v34 = vld [vmem:[%s4569_s28 + $0xb0] sm:$0xff] }
 0x13f   : > { %v2105_v16 = vadd.f32 %v2073_v8, %v2057_v12  ;;  %v2265_v0 = vmul.f32 %v4997_v49, %v5356_v7  ;;  %v2285_v61 = vmul.f32 %v5001_v2, %v5359_v37  ;;  %v2305_v50 = vmul.f32 %v8425_v63, %v5362_v52  ;;  %8479 = vst [vmem:[#allocation110_spill] sm:$0xff] %v5380_v34 }
 0x140   : > { %v2121_v1 = vadd.f32 %v2089_v18, %v2041_v51  ;;  %v2321_v31 = vadd.f32 %v2205_v24, %v2185_v32  ;;  %v2337_v43 = vadd.f32 %v2245_v29, %v2225_v6  ;;  %v2424_v38 = vadd.f32 %v5267_v48, %v5234_v41  ;;  %v8482_v24 = vld [vmem:[#allocation21_spill] sm:$0xff] }
 0x141   : > { %v2353_v45 = vadd.f32 %v2285_v61, %v2265_v0  ;;  %v2440_v15 = vadd.f32 %v1609_v42, %v1345_v21  ;;  %v603_v8 = vmul.f32 %v4606_v55, %v5142_v23  ;;  %v623_v12 = vmul.f32 %v4610_v56, %v5145_v13  ;;  %v8480_v0 = vld [vmem:[#allocation46_spill] sm:$0xff]  ;;  %v8481_v42 = vld [vmem:[#allocation20_spill] sm:$0xff] }
 0x142   : > { %v2137_v2 = vadd.f32 %v2121_v1, %v2105_v16  ;;  %v2369_v49 = vadd.f32 %v2337_v43, %v2321_v31  ;;  %v643_v32 = vmul.f32 %v4614_v57, %v5152_v39  ;;  %v663_v29 = vmul.f32 %v4620_v59, %v5155_v47  ;;  %v5397_v61 = vld [vmem:[%s4569_s28 + $0xb1] sm:$0xff] }
 0x143   : > { %v2385_v41 = vadd.f32 %v2353_v45, %v2305_v50  ;;  %v2472_v48 = vadd.f32 %v2440_v15, %v2424_v38  ;;  %v683_v21 = vmul.f32 %v4624_v60, %v5159_v10  ;;  %v703_v51 = vmul.f32 %v8481_v42, %v8480_v0  ;;  %8483 = vst [vmem:[#allocation20_spill] sm:$0xff] %v5397_v61  ;;  %v8484_v45 = vld [vmem:[#allocation22_spill] sm:$0xff]  ;;  %v8494_v10 = vld [vmem:[#allocation32_spill] sm:$0xff] }
 0x144   : > { %v2456_v23 = vadd.f32 %v2137_v2, %v1873_v62  ;;  %v723_v18 = vmul.f32 %v8482_v24, %v5380_v34  ;;  %v739_v16 = vadd.f32 %v623_v12, %v603_v8  ;;  %v755_v6 = vadd.f32 %v663_v29, %v643_v32  ;;  %v8485_v62 = vld [vmem:[#allocation23_spill] sm:$0xff]  ;;  %v8486_v8 = vld [vmem:[#allocation24_spill] sm:$0xff] }
 0x145   : > { %v2401_v1 = vadd.f32 %v2385_v41, %v2369_v49  ;;  %v771_v31 = vadd.f32 %v703_v51, %v683_v21  ;;  %v867_v50 = vmul.f32 %v4642_v3, %v5171_v54  ;;  %v887_v43 = vmul.f32 %v4667_v14, %v5178_v46  ;;  %v8487_v49 = vld [vmem:[#allocation57_spill] sm:$0xff]  ;;  %v8489_v54 = vld [vmem:[#allocation26_spill] sm:$0xff] }
 0x146   : > { %v787_v38 = vadd.f32 %v755_v6, %v739_v16  ;;  %v907_v2 = vmul.f32 %v8484_v45, %v5181_v53  ;;  %v927_v15 = vmul.f32 %v8485_v62, %v5188_v5  ;;  %v947_v12 = vmul.f32 %v8486_v8, %v5191_v40  ;;  %v8488_v41 = vld [vmem:[#allocation25_spill] sm:$0xff]  ;;  %v8491_v6 = vld [vmem:[#allocation59_spill] sm:$0xff]  ;;  %v8493_v5 = vld [vmem:[#allocation60_spill] sm:$0xff] }
 0x147   : > { %v2488_v32 = vadd.f32 %v2456_v23, %v2401_v1  ;;  %v803_v29 = vadd.f32 %v771_v31, %v723_v18  ;;  %v967_v21 = vmul.f32 %v8488_v41, %v8487_v49  ;;  %v987_v51 = vmul.f32 %v8489_v54, %v5397_v61  ;;  %v5414_v16 = vld [vmem:[%s4569_s28 + $0xb2] sm:$0xff]  ;;  %v8497_v61 = vld [vmem:[#allocation68_spill] sm:$0xff]  ;;  %v8501_v54 = vld [vmem:[#allocation71_spill] sm:$0xff] }
 0x148   : > { %v1003_v34 = vadd.f32 %v887_v43, %v867_v50  ;;  %v1019_v46 = vadd.f32 %v927_v15, %v907_v2  ;;  %8490 = vst [vmem:[#allocation21_spill] sm:$0xff] %v5414_v16  ;;  %v8492_v53 = vld [vmem:[#allocation29_spill] sm:$0xff]  ;;  %v1151_v47 = vmul.f32 %v8494_v10, %v8493_v5  ;;  %v8498_v50 = vld [vmem:[#allocation35_spill] sm:$0xff]  ;;  %v8499_v2 = vld [vmem:[#allocation70_spill] sm:$0xff] }
 0x149   : > { %v1131_v0 = vmul.f32 %v8492_v53, %v8491_v6  ;;  %v2504_v40 = vadd.f32 %v2488_v32, %v2472_v48  ;;  %v5420_v23 = vadd.f32 %v803_v29, %v787_v38  ;;  %v1035_v18 = vadd.f32 %v967_v21, %v947_v12  ;;  %v8495_v1 = vld [vmem:[#allocation65_spill] sm:$0xff]  ;;  %v8500_v15 = vld [vmem:[#allocation36_spill] sm:$0xff]  ;;  %v8502_v41 = vld [vmem:[#allocation38_spill] sm:$0xff] }
 0x14a   : > { %v8496_v31 = vld [vmem:[#allocation33_spill] sm:$0xff]  ;;  %v1051_v39 = vadd.f32 %v1019_v46, %v1003_v34  ;;  %v1191_v43 = vmul.f32 %v8498_v50, %v8497_v61  ;;  %v1211_v13 = vmul.f32 %v8500_v15, %v8499_v2  ;;  %v1231_v6 = vmul.f32 %v8502_v41, %v8501_v54  ;;  %v8503_v53 = vld [vmem:[#allocation88_spill] sm:$0xff]  ;;  %v8505_v38 = vld [vmem:[#allocation39_spill] sm:$0xff] }
 0x14b   : > { %v1171_v49 = vmul.f32 %v8496_v31, %v8495_v1  ;;  %v5431_v8 = vadd.f32 %v8503_v53, %v2504_v40  ;;  %v1067_v48 = vadd.f32 %v1035_v18, %v987_v51  ;;  %v1251_v12 = vmul.f32 %v8505_v38, %v5414_v16  ;;  %v5436_v29 = vld [vmem:[%s4569_s28 + $0xb3] sm:$0xff]  ;;  %v8509_v1 = vld [vmem:[#allocation43_spill] sm:$0xff]  ;;  %v8513_v16 = vld [vmem:[#allocation48_spill] sm:$0xff] }
 0x14c   : > { %v1267_v32 = vadd.f32 %v1151_v47, %v1131_v0  ;;  %8506 = vst [vmem:[#allocation23_spill] sm:$0xff] %v5436_v29  ;;  %v1299_v34 = vadd.f32 %v1231_v6, %v1211_v13  ;;  %v8507_v21 = vld [vmem:[#allocation42_spill] sm:$0xff]  ;;  %v8511_v51 = vld [vmem:[#allocation45_spill] sm:$0xff]  ;;  %v8512_v53 = vld [vmem:[#allocation91_spill] sm:$0xff] }
 0x14d   : > { %8504 = vst [vmem:[#allocation22_spill] sm:$0xff] %v5431_v8  ;;  %v1283_v46 = vadd.f32 %v1191_v43, %v1171_v49  ;;  %v1395_v61 = vmul.f32 %v8507_v21, %v5239_v22  ;;  %v8508_v2 = vld [vmem:[#allocation78_spill] sm:$0xff]  ;;  %2537 = vadd.xlane.f32.xlu0 %v5431_v8  ;;  %v1083_v40 = vadd.f32 %v1067_v48, %v1051_v39  ;;  %v8514_v47 = vld [vmem:[#allocation92_spill] sm:$0xff]  ;;  %v8516_v43 = vld [vmem:[#allocation51_spill] sm:$0xff] }
 0x14e   : > { %v1415_v5 = vmul.f32 %v8509_v1, %v8508_v2  ;;  %v8510_v54 = vld [vmem:[#allocation90_spill] sm:$0xff]  ;;  %v1455_v38 = vmul.f32 %v8513_v16, %v8512_v53  ;;  %v1331_v13 = vadd.f32 %v1299_v34, %v1251_v12  ;;  %v1495_v22 = vmul.f32 %v8516_v43, %v5263_v11  ;;  %v8517_v6 = vld [vmem:[#allocation52_spill] sm:$0xff]  ;;  %v8519_v53 = vld [vmem:[#allocation95_spill] sm:$0xff] }
 0x14f   : > { %v1435_v18 = vmul.f32 %v8511_v51, %v8510_v54  ;;  %v8515_v0 = vld [vmem:[#allocation50_spill] sm:$0xff]  ;;  %v1315_v49 = vadd.f32 %v1283_v46, %v1267_v32  ;;  %v1515_v2 = vmul.f32 %v8517_v6, %v5436_v29  ;;  %v1659_v8 = vmul.f32 %v8402_v4, %v5274_v9  ;;  %v8520_v54 = vld [vmem:[#allocation56_spill] sm:$0xff]  ;;  %v8523_v11 = vld [vmem:[#allocation97_spill] sm:$0xff] }
 0x150   : > { %v1475_v41 = vmul.f32 %v8515_v0, %v8514_v47  ;;  %v5454_v1 = vld [vmem:[%s4569_s28 + $0xb4] sm:$0xff]  ;;  %v1531_v39 = vadd.f32 %v1415_v5, %v1395_v61  ;;  %v1679_v16 = vmul.f32 %v8520_v54, %v8519_v53  ;;  %v8521_v12 = vld [vmem:[#allocation96_spill] sm:$0xff]  ;;  %v8527_v5 = vld [vmem:[#allocation63_spill] sm:$0xff] }
 0x151   : > { %8518 = vst [vmem:[#allocation59_spill] sm:$0xff] %v5454_v1  ;;  %v1547_v48 = vadd.f32 %v1455_v38, %v1435_v18  ;;  %v1347_v47 = vadd.f32 %v1331_v13, %v1315_v49  ;;  %v8522_v46 = vld [vmem:[#allocation58_spill] sm:$0xff]  ;;  %v8524_v43 = vld [vmem:[#allocation61_spill] sm:$0xff]  ;;  %v1759_v61 = vmul.f32 %v8527_v5, %v5298_v58  ;;  %v1779_v9 = vmul.f32 %v4885_v36, %v5454_v1  ;;  %v8533_v53 = vld [vmem:[#allocation72_spill] sm:$0xff] }
 0x152   : > { %v1563_v32 = vadd.f32 %v1495_v22, %v1475_v41  ;;  %v1699_v34 = vmul.f32 %v8522_v46, %v8521_v12  ;;  %v1719_v0 = vmul.f32 %v8524_v43, %v8523_v11  ;;  %v8525_v6 = vld [vmem:[#allocation98_spill] sm:$0xff]  ;;  %v1795_v18 = vadd.f32 %v1679_v16, %v1659_v8  ;;  %v8531_v11 = vld [vmem:[#allocation69_spill] sm:$0xff] }
 0x153   : > { %v1579_v29 = vadd.f32 %v1547_v48, %v1531_v39  ;;  %v8526_v51 = vld [vmem:[#allocation62_spill] sm:$0xff]  ;;  %v1923_v13 = vmul.f32 %v8413_v19, %v5307_v28  ;;  %v8529_v39 = vld [vmem:[#allocation67_spill] sm:$0xff]  ;;  %v8534_v8 = vld [vmem:[#allocation73_spill] sm:$0xff] }
 0x154   : > { %v1739_v21 = vmul.f32 %v8526_v51, %v8525_v6  ;;  %v1595_v38 = vadd.f32 %v1563_v32, %v1515_v2  ;;  %v1811_v41 = vadd.f32 %v1719_v0, %v1699_v34  ;;  %v5471_v49 = vld [vmem:[%s4569_s28 + $0xb5] sm:$0xff]  ;;  %v1943_v48 = vmul.f32 %v8529_v39, %v5316_v35  ;;  %v8535_v0 = vld [vmem:[#allocation104_spill] sm:$0xff]  ;;  %v8537_v28 = vld [vmem:[#allocation75_spill] sm:$0xff] }
 0x155   : > { %8528 = vst [vmem:[#allocation32_spill] sm:$0xff] %v5471_v49  ;;  %v8530_v6 = vld [vmem:[#allocation101_spill] sm:$0xff]  ;;  %v8532_v58 = vld [vmem:[#allocation102_spill] sm:$0xff]  ;;  %v2003_v16 = vmul.f32 %v8534_v8, %v5327_v33 }
 0x156   : > { %v1827_v22 = vadd.f32 %v1759_v61, %v1739_v21  ;;  %v1963_v12 = vmul.f32 %v8531_v11, %v8530_v6  ;;  %v1983_v5 = vmul.f32 %v8533_v53, %v8532_v58  ;;  %v1611_v1 = vadd.f32 %v1595_v38, %v1579_v29  ;;  %v8536_v32 = vld [vmem:[#allocation74_spill] sm:$0xff]  ;;  %v5630_v58 = vld [vmem:[%s4569_s28 + $0xc4] sm:$0xff] }
 0x157   : > { %v1843_v2 = vadd.f32 %v1811_v41, %v1795_v18  ;;  %v2023_v34 = vmul.f32 %v8536_v32, %v8535_v0  ;;  %v2043_v21 = vmul.f32 %v8537_v28, %v5471_v49  ;;  %v2059_v61 = vadd.f32 %v1943_v48, %v1923_v13  ;;  %v5488_v39 = vld [vmem:[%s4569_s28 + $0xb6] sm:$0xff]  ;;  %v5569_v49 = vld [vmem:[%s4569_s28 + $0x4a] sm:$0xff]  ;;  %v8570_v0 = vld [vmem:[#allocation43_spill] sm:$0xff] }
 0x158   : > { %v1859_v36 = vadd.f32 %v1827_v22, %v1779_v9  ;;  %v2075_v35 = vadd.f32 %v1983_v5, %v1963_v12  ;;  %8538 = vst [vmem:[#allocation33_spill] sm:$0xff] %v5488_v39  ;;  %v2187_v29 = vmul.f32 %v4960_v27, %v5337_v17  ;;  %v2207_v38 = vmul.f32 %v4964_v44, %v5346_v26  ;;  %v8539_v5 = vld [vmem:[#allocation84_spill] sm:$0xff]  ;;  %v8540_v48 = vld [vmem:[#allocation85_spill] sm:$0xff] }
 0x159   : > { %v2091_v6 = vadd.f32 %v2023_v34, %v2003_v16  ;;  %v2227_v18 = vmul.f32 %v4978_v25, %v5349_v20  ;;  %v2247_v12 = vmul.f32 %v4991_v30, %v5356_v7  ;;  %v2267_v13 = vmul.f32 %v8539_v5, %v5359_v37 }
 0x15a   : > { %v1875_v9 = vadd.f32 %v1859_v36, %v1843_v2  ;;  %v2107_v41 = vadd.f32 %v2075_v35, %v2059_v61  ;;  %v2287_v17 = vmul.f32 %v8540_v48, %v5362_v52  ;;  %v2307_v16 = vmul.f32 %v8425_v63, %v5488_v39  ;;  %v5506_v2 = vld [vmem:[%s4569_s28 + $0xc0] sm:$0xff]  ;;  %v3789_v61 = vld [vmem:[%s4569_s28 + $0x30] sm:$0xff] }
 0x15b   : > { %v2123_v22 = vadd.f32 %v2091_v6, %v2043_v21  ;;  %v2323_v34 = vadd.f32 %v2207_v38, %v2187_v29  ;;  %v2339_v20 = vadd.f32 %v2247_v12, %v2227_v18  ;;  %v2426_v36 = vadd.f32 %v1083_v40, %v5420_v23  ;;  %8541 = vst [vmem:[#allocation35_spill] sm:$0xff] %v5506_v2  ;;  %v5511_v21 = vld [vmem:[%s4569_s28 + $0x48] sm:$0xff]  ;;  %v5516_v29 = vld [vmem:[%s4569_s28 + $0x60] sm:$0xff]  ;;  %v5526_v18 = vld [vmem:[%s4569_s28 + $0x90] sm:$0xff] }
 0x15c   : > { %v2442_v35 = vadd.f32 %v1611_v1, %v1347_v47  ;;  %v604_v7 = vmul.f32 %v3789_v61, %v4606_v55  ;;  %v2355_v6 = vadd.f32 %v2287_v17, %v2267_v13  ;;  %8542 = vst [vmem:[#allocation36_spill] sm:$0xff] %v5511_v21  ;;  %v624_v63 = vmul.f32 %v5511_v21, %v4610_v56  ;;  %v5521_v47 = vld [vmem:[%s4569_s28 + $0x78] sm:$0xff]  ;;  %v8557_v52 = vld [vmem:[#allocation29_spill] sm:$0xff] }
 0x15d   : > { %v2139_v37 = vadd.f32 %v2123_v22, %v2107_v41  ;;  %8543 = vst [vmem:[#allocation74_spill] sm:$0xff] %v5516_v29  ;;  %v644_v23 = vmul.f32 %v5516_v29, %v4614_v57  ;;  %v2371_v1 = vadd.f32 %v2339_v20, %v2323_v34  ;;  %8544 = vst [vmem:[#allocation111_spill] sm:$0xff] %v5521_v47  ;;  %v8546_v22 = vld [vmem:[#allocation86_spill] sm:$0xff]  ;;  %v5535_v34 = vld [vmem:[%s4569_s28 + $0xc1] sm:$0xff] }
 0x15e   : > { %v2474_v40 = vadd.f32 %v2442_v35, %v2426_v36  ;;  %v664_v38 = vmul.f32 %v5521_v47, %v4620_v59  ;;  %8545 = vst [vmem:[#allocation112_spill] sm:$0xff] %v5526_v18  ;;  %v684_v41 = vmul.f32 %v5526_v18, %v4624_v60  ;;  %v2387_v12 = vadd.f32 %v2355_v6, %v2307_v16  ;;  %v3794_v61 = vld [vmem:[%s4569_s28 + $0x31] sm:$0xff]  ;;  %v5540_v29 = vld [vmem:[%s4569_s28 + $0x49] sm:$0xff]  ;;  %v5545_v6 = vld [vmem:[%s4569_s28 + $0x61] sm:$0xff] }
 0x15f   : > { %v2458_v13 = vadd.f32 %v2139_v37, %v1875_v9  ;;  %v704_v17 = vmul.f32 %v8481_v42, %v8546_v22  ;;  %v724_v20 = vmul.f32 %v8482_v24, %v5506_v2  ;;  %8547 = vst [vmem:[#allocation86_spill] sm:$0xff] %v5535_v34  ;;  %v740_v36 = vadd.f32 %v624_v63, %v604_v7  ;;  %v5550_v7 = vld [vmem:[%s4569_s28 + $0x79] sm:$0xff] }
 0x160   : > { %v756_v35 = vadd.f32 %v664_v38, %v644_v23  ;;  %v868_v47 = vmul.f32 %v3794_v61, %v4642_v3  ;;  %8548 = vst [vmem:[#allocation113_spill] sm:$0xff] %v5540_v29  ;;  %v888_v16 = vmul.f32 %v5540_v29, %v4667_v14  ;;  %v2403_v37 = vadd.f32 %v2387_v12, %v2371_v1  ;;  %v5555_v38 = vld [vmem:[%s4569_s28 + $0x91] sm:$0xff]  ;;  %v8552_v61 = vld [vmem:[#allocation24_spill] sm:$0xff] }
 0x161   : > { %v772_v9 = vadd.f32 %v704_v17, %v684_v41  ;;  %8549 = vst [vmem:[#allocation114_spill] sm:$0xff] %v5545_v6  ;;  %v908_v22 = vmul.f32 %v5545_v6, %v8484_v45  ;;  %8550 = vst [vmem:[#allocation115_spill] sm:$0xff] %v5550_v7  ;;  %v928_v63 = vmul.f32 %v5550_v7, %v8485_v62  ;;  %v8553_v41 = vld [vmem:[#allocation87_spill] sm:$0xff]  ;;  %v8554_v12 = vld [vmem:[#allocation25_spill] sm:$0xff] }
 0x162   : > { %v788_v23 = vadd.f32 %v756_v35, %v740_v36  ;;  %8551 = vst [vmem:[#allocation116_spill] sm:$0xff] %v5555_v38  ;;  %v948_v1 = vmul.f32 %v5555_v38, %v8552_v61  ;;  %v968_v17 = vmul.f32 %v8554_v12, %v8553_v41  ;;  %v8555_v29 = vld [vmem:[#allocation26_spill] sm:$0xff]  ;;  %v2490_v6 = vadd.f32 %v2458_v13, %v2403_v37  ;;  %v5564_v7 = vld [vmem:[%s4569_s28 + $0xc2] sm:$0xff] }
 0x163   : > { %v988_v2 = vmul.f32 %v8555_v29, %v5535_v34  ;;  %v804_v18 = vadd.f32 %v772_v9, %v724_v20  ;;  %v1004_v21 = vadd.f32 %v888_v16, %v868_v47  ;;  %v1020_v39 = vadd.f32 %v928_v63, %v908_v22  ;;  %8556 = vst [vmem:[#allocation24_spill] sm:$0xff] %v5564_v7  ;;  %v3799_v35 = vld [vmem:[%s4569_s28 + $0x32] sm:$0xff]  ;;  %v5574_v38 = vld [vmem:[%s4569_s28 + $0x62] sm:$0xff]  ;;  %v5581_v37 = vld [vmem:[%s4569_s28 + $0x7a] sm:$0xff] }
 0x164   : > { %v1036_v36 = vadd.f32 %v968_v17, %v948_v1  ;;  %v1132_v26 = vmul.f32 %v3799_v35, %v8557_v52  ;;  %8558 = vst [vmem:[#allocation87_spill] sm:$0xff] %v5569_v49  ;;  %v1152_v41 = vmul.f32 %v5569_v49, %v8494_v10  ;;  %8559 = vst [vmem:[#allocation25_spill] sm:$0xff] %v5574_v38  ;;  %v5586_v63 = vld [vmem:[%s4569_s28 + $0x92] sm:$0xff] }
 0x165   : > { %v1172_v47 = vmul.f32 %v5574_v38, %v8496_v31  ;;  %v2506_v13 = vadd.f32 %v2490_v6, %v2474_v40  ;;  %v5578_v20 = vadd.f32 %v804_v18, %v788_v23  ;;  %v1052_v16 = vadd.f32 %v1020_v39, %v1004_v21  ;;  %8560 = vst [vmem:[#allocation26_spill] sm:$0xff] %v5581_v37  ;;  %v8562_v17 = vld [vmem:[#allocation89_spill] sm:$0xff]  ;;  %v8563_v35 = vld [vmem:[#allocation38_spill] sm:$0xff]  ;;  %v8564_v40 = vld [vmem:[#allocation39_spill] sm:$0xff] }
 0x166   : > { %v1192_v9 = vmul.f32 %v5581_v37, %v8498_v50  ;;  %v1068_v22 = vadd.f32 %v1036_v36, %v988_v2  ;;  %8561 = vst [vmem:[#allocation29_spill] sm:$0xff] %v5586_v63  ;;  %v1212_v1 = vmul.f32 %v5586_v63, %v8500_v15  ;;  %v1232_v38 = vmul.f32 %v8563_v35, %v8562_v17  ;;  %v8565_v21 = vld [vmem:[#allocation88_spill] sm:$0xff]  ;;  %v3804_v2 = vld [vmem:[%s4569_s28 + $0x33] sm:$0xff] }
 0x167   : > { %v1252_v39 = vmul.f32 %v8564_v40, %v5564_v7  ;;  %v5595_v18 = vadd.f32 %v8565_v21, %v2506_v13  ;;  %v1268_v6 = vadd.f32 %v1152_v41, %v1132_v26  ;;  %v5598_v37 = vld [vmem:[%s4569_s28 + $0xc3] sm:$0xff]  ;;  %v8568_v36 = vld [vmem:[#allocation42_spill] sm:$0xff]  ;;  %v5605_v17 = vld [vmem:[%s4569_s28 + $0x4b] sm:$0xff] }
 0x168   : > { %v1284_v23 = vadd.f32 %v1192_v9, %v1172_v47  ;;  %8567 = vst [vmem:[#allocation38_spill] sm:$0xff] %v5598_v37  ;;  %v1396_v49 = vmul.f32 %v3804_v2, %v8568_v36  ;;  %v5602_v34 = vadd.f32 %v1068_v22, %v1052_v16  ;;  %v1300_v63 = vadd.f32 %v1232_v38, %v1212_v1  ;;  %v5610_v13 = vld [vmem:[%s4569_s28 + $0x63] sm:$0xff]  ;;  %v8572_v21 = vld [vmem:[#allocation45_spill] sm:$0xff]  ;;  %v5616_v47 = vld [vmem:[%s4569_s28 + $0x7b] sm:$0xff] }
 0x169   : > { %8566 = vst [vmem:[#allocation89_spill] sm:$0xff] %v5595_v18  ;;  %8569 = vst [vmem:[#allocation39_spill] sm:$0xff] %v5605_v17  ;;  %v1416_v7 = vmul.f32 %v5605_v17, %v8570_v0  ;;  %v1436_v26 = vmul.f32 %v5610_v13, %v8572_v21  ;;  %2541 = vadd.xlane.f32.xlu1 %v5595_v18  ;;  %v8574_v16 = vld [vmem:[#allocation48_spill] sm:$0xff]  ;;  %v5621_v9 = vld [vmem:[%s4569_s28 + $0x93] sm:$0xff] }
 0x16a   : > { %8571 = vst [vmem:[#allocation88_spill] sm:$0xff] %v5610_v13  ;;  %v1316_v41 = vadd.f32 %v1284_v23, %v1268_v6  ;;  %8573 = vst [vmem:[#allocation117_spill] sm:$0xff] %v5616_v47  ;;  %v1456_v38 = vmul.f32 %v5616_v47, %v8574_v16  ;;  %v8576_v22 = vld [vmem:[#allocation50_spill] sm:$0xff]  ;;  %v8577_v2 = vld [vmem:[#allocation27_spill] sm:$0xff]  ;;  %v1332_v13 = vadd.f32 %v1300_v63, %v1252_v39 }
 0x16b   : > { %8575 = vst [vmem:[#allocation118_spill] sm:$0xff] %v5621_v9  ;;  %v1476_v1 = vmul.f32 %v5621_v9, %v8576_v22  ;;  %v8578_v17 = vld [vmem:[#allocation51_spill] sm:$0xff]  ;;  %v8579_v18 = vld [vmem:[#allocation52_spill] sm:$0xff]  ;;  %v1532_v23 = vadd.f32 %v1416_v7, %v1396_v49  ;;  %8580 = vst [vmem:[#allocation27_spill] sm:$0xff] %v5630_v58 }
 0x16c   : > { %v1496_v33 = vmul.f32 %v8578_v17, %v8577_v2  ;;  %v1516_v6 = vmul.f32 %v8579_v18, %v5598_v37  ;;  %v3809_v21 = vld [vmem:[%s4569_s28 + $0x34] sm:$0xff]  ;;  %v1548_v16 = vadd.f32 %v1456_v38, %v1436_v26  ;;  %v5635_v36 = vld [vmem:[%s4569_s28 + $0x4c] sm:$0xff]  ;;  %v5640_v2 = vld [vmem:[%s4569_s28 + $0x64] sm:$0xff]  ;;  %v1348_v49 = vadd.f32 %v1332_v13, %v1316_v41 }
 0x16d   : > { %v1660_v47 = vmul.f32 %v3809_v21, %v8402_v4  ;;  %8581 = vst [vmem:[#allocation119_spill] sm:$0xff] %v5635_v36  ;;  %v1680_v9 = vmul.f32 %v5635_v36, %v8520_v54  ;;  %8582 = vst [vmem:[#allocation120_spill] sm:$0xff] %v5640_v2  ;;  %v1700_v63 = vmul.f32 %v5640_v2, %v8522_v46  ;;  %v5645_v7 = vld [vmem:[%s4569_s28 + $0x7c] sm:$0xff]  ;;  %v8587_v13 = vld [vmem:[#allocation64_spill] sm:$0xff] }
 0x16e   : > { %v1564_v0 = vadd.f32 %v1496_v33, %v1476_v1  ;;  %8583 = vst [vmem:[#allocation121_spill] sm:$0xff] %v5645_v7  ;;  %v1720_v39 = vmul.f32 %v5645_v7, %v8524_v43  ;;  %v5650_v33 = vld [vmem:[%s4569_s28 + $0x94] sm:$0xff]  ;;  %v8586_v38 = vld [vmem:[#allocation63_spill] sm:$0xff]  ;;  %v1580_v36 = vadd.f32 %v1548_v16, %v1532_v23  ;;  %v1780_v41 = vmul.f32 %v8587_v13, %v5630_v58 }
 0x16f   : > { %8584 = vst [vmem:[#allocation122_spill] sm:$0xff] %v5650_v33  ;;  %v1740_v21 = vmul.f32 %v5650_v33, %v8526_v51  ;;  %v8585_v26 = vld [vmem:[#allocation30_spill] sm:$0xff]  ;;  %v1796_v37 = vadd.f32 %v1680_v9, %v1660_v47  ;;  %v5659_v46 = vld [vmem:[%s4569_s28 + $0xc5] sm:$0xff]  ;;  %v5664_v33 = vld [vmem:[%s4569_s28 + $0x4d] sm:$0xff] }
 0x170   : > { %v1760_v1 = vmul.f32 %v8586_v38, %v8585_v26  ;;  %v1596_v2 = vadd.f32 %v1564_v0, %v1516_v6  ;;  %8588 = vst [vmem:[#allocation30_spill] sm:$0xff] %v5659_v46  ;;  %v1812_v7 = vadd.f32 %v1720_v39, %v1700_v63  ;;  %v3814_v54 = vld [vmem:[%s4569_s28 + $0x35] sm:$0xff]  ;;  %8589 = vst [vmem:[#allocation123_spill] sm:$0xff] %v5664_v33  ;;  %v8590_v51 = vld [vmem:[#allocation67_spill] sm:$0xff] }
 0x171   : > { %v1924_v4 = vmul.f32 %v3814_v54, %v8413_v19  ;;  %v1944_v16 = vmul.f32 %v5664_v33, %v8590_v51  ;;  %v5669_v0 = vld [vmem:[%s4569_s28 + $0x65] sm:$0xff]  ;;  %v5674_v9 = vld [vmem:[%s4569_s28 + $0x7d] sm:$0xff]  ;;  %v5679_v63 = vld [vmem:[%s4569_s28 + $0x95] sm:$0xff] }
 0x172   : > { %v1828_v43 = vadd.f32 %v1760_v1, %v1740_v21  ;;  %v1612_v23 = vadd.f32 %v1596_v2, %v1580_v36  ;;  %8591 = vst [vmem:[#allocation124_spill] sm:$0xff] %v5669_v0  ;;  %v1964_v47 = vmul.f32 %v5669_v0, %v8531_v11  ;;  %8592 = vst [vmem:[#allocation125_spill] sm:$0xff] %v5674_v9  ;;  %v8594_v26 = vld [vmem:[#allocation31_spill] sm:$0xff]  ;;  %v3819_v58 = vld [vmem:[%s4569_s28 + $0x36] sm:$0xff] }
 0x173   : > { %v1984_v6 = vmul.f32 %v5674_v9, %v8533_v53  ;;  %8593 = vst [vmem:[#allocation126_spill] sm:$0xff] %v5679_v63  ;;  %v2004_v54 = vmul.f32 %v5679_v63, %v8534_v8  ;;  %v1844_v39 = vadd.f32 %v1812_v7, %v1796_v37  ;;  %v2024_v36 = vmul.f32 %v8536_v32, %v8594_v26  ;;  %v5688_v1 = vld [vmem:[%s4569_s28 + $0xc6] sm:$0xff] }
 0x174   : > { %v1860_v21 = vadd.f32 %v1828_v43, %v1780_v41  ;;  %v2044_v2 = vmul.f32 %v8537_v28, %v5659_v46  ;;  %8595 = vst [vmem:[#allocation31_spill] sm:$0xff] %v5688_v1  ;;  %v2060_v0 = vadd.f32 %v1944_v16, %v1924_v4  ;;  %v2188_v9 = vmul.f32 %v3819_v58, %v4960_v27  ;;  %v8596_v53 = vld [vmem:[#allocation79_spill] sm:$0xff]  ;;  %v8597_v43 = vld [vmem:[#allocation81_spill] sm:$0xff]  ;;  %v8598_v41 = vld [vmem:[#allocation82_spill] sm:$0xff] }
 0x175   : > { %v2076_v33 = vadd.f32 %v1984_v6, %v1964_v47  ;;  %v2208_v11 = vmul.f32 %v4964_v44, %v8596_v53  ;;  %v2092_v37 = vadd.f32 %v2024_v36, %v2004_v54  ;;  %v2228_v7 = vmul.f32 %v4978_v25, %v8597_v43  ;;  %v5699_v28 = vld [vmem:[%s4569_s28 + $0x96] sm:$0xff]  ;;  %v5705_v47 = vld [vmem:[#allocation6 + $0x30] ss:$0 sm:$0xff]  ;;  %v5712_v36 = vld [vmem:[%s4569_s28 + $0xc8] sm:$0xff] }
 0x176   : > { %v1876_v63 = vadd.f32 %v1860_v21, %v1844_v39  ;;  %v2248_v26 = vmul.f32 %v4991_v30, %v8598_v41  ;;  %8599 = vst [vmem:[#allocation79_spill] sm:$0xff] %v5699_v28  ;;  %v2268_v4 = vmul.f32 %v5699_v28, %v8539_v5  ;;  %v8600_v16 = vld [vmem:[#allocation34_spill] sm:$0xff]  ;;  %8601 = vst [vmem:[#allocation81_spill] sm:$0xff] %v5705_v47  ;;  %v8603_v43 = vld [vmem:[#allocation37_spill] sm:$0xff] }
 0x177   : > { %v2108_v46 = vadd.f32 %v2076_v33, %v2060_v0  ;;  %v2288_v58 = vmul.f32 %v8540_v48, %v8600_v16  ;;  %v2308_v53 = vmul.f32 %v5705_v47, %v5688_v1  ;;  %v2124_v6 = vadd.f32 %v2092_v37, %v2044_v2  ;;  %8602 = vst [vmem:[#allocation82_spill] sm:$0xff] %v5712_v36  ;;  %v8604_v16 = vld [vmem:[#allocation40_spill] sm:$0xff]  ;;  %v8605_v1 = vld [vmem:[#allocation41_spill] sm:$0xff]  ;;  %v8608_v37 = vld [vmem:[#allocation110_spill] sm:$0xff] }
 0x178   : > { %v2324_v54 = vadd.f32 %v2208_v11, %v2188_v9  ;;  %v2340_v39 = vadd.f32 %v2248_v26, %v2228_v7  ;;  %v2427_v21 = vadd.f32 %v5602_v34, %v5578_v20  ;;  %v2443_v0 = vadd.f32 %v1612_v23, %v1348_v49  ;;  %v8606_v9 = vld [vmem:[#allocation44_spill] sm:$0xff]  ;;  %v8607_v49 = vld [vmem:[#allocation46_spill] sm:$0xff] }
 0x179   : > { %v2356_v33 = vadd.f32 %v2288_v58, %v2268_v4  ;;  %v605_v41 = vmul.f32 %v4606_v55, %v8603_v43  ;;  %v625_v28 = vmul.f32 %v4610_v56, %v8604_v16  ;;  %v2140_v48 = vadd.f32 %v2124_v6, %v2108_v46  ;;  %v5729_v6 = vld [vmem:[%s4569_s28 + $0xc9] sm:$0xff] }
 0x17a   : > { %v2372_v5 = vadd.f32 %v2340_v39, %v2324_v54  ;;  %v645_v11 = vmul.f32 %v4614_v57, %v8605_v1  ;;  %v665_v2 = vmul.f32 %v4620_v59, %v8606_v9  ;;  %v2475_v20 = vadd.f32 %v2443_v0, %v2427_v21  ;;  %8609 = vst [vmem:[#allocation34_spill] sm:$0xff] %v5729_v6  ;;  %v8610_v39 = vld [vmem:[#allocation47_spill] sm:$0xff]  ;;  %v8611_v21 = vld [vmem:[#allocation49_spill] sm:$0xff] }
 0x17b   : > { %v2388_v34 = vadd.f32 %v2356_v33, %v2308_v53  ;;  %v685_v23 = vmul.f32 %v4624_v60, %v8607_v49  ;;  %v705_v7 = vmul.f32 %v8481_v42, %v8608_v37  ;;  %v2459_v26 = vadd.f32 %v2140_v48, %v1876_v63  ;;  %v8612_v43 = vld [vmem:[#allocation53_spill] sm:$0xff]  ;;  %v8613_v63 = vld [vmem:[#allocation54_spill] sm:$0xff] }
 0x17c   : > { %v725_v4 = vmul.f32 %v8482_v24, %v5712_v36  ;;  %v741_v46 = vadd.f32 %v625_v28, %v605_v41  ;;  %v757_v58 = vadd.f32 %v665_v2, %v645_v11  ;;  %v869_v53 = vmul.f32 %v4642_v3, %v8610_v39  ;;  %v8614_v28 = vld [vmem:[#allocation57_spill] sm:$0xff]  ;;  %v8632_v36 = vld [vmem:[#allocation92_spill] sm:$0xff] }
 0x17d   : > { %v2404_v1 = vadd.f32 %v2388_v34, %v2372_v5  ;;  %v773_v54 = vadd.f32 %v705_v7, %v685_v23  ;;  %v889_v33 = vmul.f32 %v4667_v14, %v8611_v21  ;;  %v909_v48 = vmul.f32 %v8484_v45, %v8612_v43  ;;  %v8615_v5 = vld [vmem:[#allocation20_spill] sm:$0xff]  ;;  %v8618_v39 = vld [vmem:[#allocation65_spill] sm:$0xff] }
 0x17e   : > { %v789_v0 = vadd.f32 %v757_v58, %v741_v46  ;;  %v929_v16 = vmul.f32 %v8485_v62, %v8613_v63  ;;  %v949_v41 = vmul.f32 %v8552_v61, %v8614_v28  ;;  %v969_v2 = vmul.f32 %v8554_v12, %v8615_v5  ;;  %v5746_v7 = vld [vmem:[%s4569_s28 + $0xca] sm:$0xff]  ;;  %v8620_v28 = vld [vmem:[#allocation70_spill] sm:$0xff]  ;;  %v8630_v5 = vld [vmem:[#allocation91_spill] sm:$0xff] }
 0x17f   : > { %v2491_v11 = vadd.f32 %v2459_v26, %v2404_v1  ;;  %v805_v9 = vadd.f32 %v773_v54, %v725_v4  ;;  %v989_v34 = vmul.f32 %v8555_v29, %v5729_v6  ;;  %v1005_v49 = vadd.f32 %v889_v33, %v869_v53  ;;  %8616 = vst [vmem:[#allocation37_spill] sm:$0xff] %v5746_v7  ;;  %v8617_v46 = vld [vmem:[#allocation60_spill] sm:$0xff]  ;;  %v8621_v33 = vld [vmem:[#allocation71_spill] sm:$0xff] }
 0x180   : > { %v1021_v23 = vadd.f32 %v929_v16, %v909_v48  ;;  %v1133_v58 = vmul.f32 %v8557_v52, %v8617_v46  ;;  %v1153_v21 = vmul.f32 %v8494_v10, %v8618_v39  ;;  %v1037_v4 = vadd.f32 %v969_v2, %v949_v41  ;;  %v8619_v1 = vld [vmem:[#allocation68_spill] sm:$0xff]  ;;  %v8622_v16 = vld [vmem:[#allocation21_spill] sm:$0xff]  ;;  %v8626_v39 = vld [vmem:[#allocation78_spill] sm:$0xff] }
 0x181   : > { %v2507_v43 = vadd.f32 %v2491_v11, %v2475_v20  ;;  %v5752_v26 = vadd.f32 %v805_v9, %v789_v0  ;;  %v1173_v54 = vmul.f32 %v8496_v31, %v8619_v1  ;;  %v1193_v53 = vmul.f32 %v8498_v50, %v8620_v28  ;;  %v5765_v20 = vld [vmem:[%s7681_s2] ss:$0 sm:$0xff]  ;;  %v5773_v2 = vld [vmem:[%s4569_s28 + $0xcb] sm:$0xff]  ;;  %v8627_v1 = vld [vmem:[#allocation42_spill] sm:$0xff] }
 0x182   : > { %v1053_v63 = vadd.f32 %v1021_v23, %v1005_v49  ;;  %v1213_v48 = vmul.f32 %v8500_v15, %v8621_v33  ;;  %v1233_v46 = vmul.f32 %v8563_v35, %v8622_v16  ;;  %8623 = vst [vmem:[#allocation40_spill] sm:$0xff] %v5765_v20  ;;  %v1069_v41 = vadd.f32 %v1037_v4, %v989_v34  ;;  %v8628_v33 = vld [vmem:[#allocation90_spill] sm:$0xff]  ;;  %v8629_v16 = vld [vmem:[#allocation43_spill] sm:$0xff]  ;;  %v8631_v34 = vld [vmem:[#allocation45_spill] sm:$0xff] }
 0x183   : > { %v5768_v0 = vadd.f32 %v5765_v20, %v2507_v43  ;;  %v1253_v11 = vmul.f32 %v8564_v40, %v5746_v7  ;;  %v1269_v9 = vadd.f32 %v1153_v21, %v1133_v58  ;;  %8625 = vst [vmem:[#allocation44_spill] sm:$0xff] %v5773_v2  ;;  %v1285_v49 = vadd.f32 %v1193_v53, %v1173_v54  ;;  %v8633_v7 = vld [vmem:[#allocation48_spill] sm:$0xff]  ;;  %v8634_v58 = vld [vmem:[#allocation94_spill] sm:$0xff] }
 0x184   : > { %v1301_v23 = vadd.f32 %v1233_v46, %v1213_v48  ;;  %v1397_v28 = vmul.f32 %v8627_v1, %v8626_v39  ;;  %v1417_v6 = vmul.f32 %v8629_v16, %v8628_v33  ;;  %v1085_v43 = vadd.f32 %v1069_v41, %v1053_v63  ;;  %v8635_v48 = vld [vmem:[#allocation23_spill] sm:$0xff]  ;;  %v5791_v33 = vld [vmem:[%s4569_s28 + $0xcc] sm:$0xff]  ;;  %v8646_v1 = vld [vmem:[#allocation62_spill] sm:$0xff] }
 0x185   : > { %8624 = vst [vmem:[#allocation41_spill] sm:$0xff] %v5768_v0  ;;  %2543 = vadd.xlane.f32.xlu0 %v5768_v0  ;;  %v1437_v4 = vmul.f32 %v8631_v34, %v8630_v5  ;;  %v1457_v37 = vmul.f32 %v8633_v7, %v8632_v36  ;;  %v1477_v21 = vmul.f32 %v8576_v22, %v8634_v58  ;;  %8636 = vst [vmem:[#allocation46_spill] sm:$0xff] %v5791_v33  ;;  %v8637_v5 = vld [vmem:[#allocation95_spill] sm:$0xff]  ;;  %v8639_v36 = vld [vmem:[#allocation96_spill] sm:$0xff] }
 0x186   : > { %v1317_v54 = vadd.f32 %v1285_v49, %v1269_v9  ;;  %v1333_v53 = vadd.f32 %v1301_v23, %v1253_v11  ;;  %v1497_v46 = vmul.f32 %v8578_v17, %v8635_v48  ;;  %v1517_v39 = vmul.f32 %v8579_v18, %v5773_v2  ;;  %v8638_v0 = vld [vmem:[#allocation55_spill] sm:$0xff]  ;;  %v8640_v7 = vld [vmem:[#allocation56_spill] sm:$0xff]  ;;  %v8641_v11 = vld [vmem:[#allocation97_spill] sm:$0xff] }
 0x187   : > { %v1533_v63 = vadd.f32 %v1417_v6, %v1397_v28  ;;  %v1549_v41 = vadd.f32 %v1457_v37, %v1437_v4  ;;  %v1661_v34 = vmul.f32 %v8638_v0, %v8637_v5  ;;  %v1681_v16 = vmul.f32 %v8640_v7, %v8639_v36  ;;  %v8642_v49 = vld [vmem:[#allocation58_spill] sm:$0xff]  ;;  %v8644_v17 = vld [vmem:[#allocation61_spill] sm:$0xff]  ;;  %v8645_v18 = vld [vmem:[#allocation99_spill] sm:$0xff] }
 0x188   : > { %v1349_v58 = vadd.f32 %v1333_v53, %v1317_v54  ;;  %v1565_v9 = vadd.f32 %v1497_v46, %v1477_v21  ;;  %v1701_v23 = vmul.f32 %v8642_v49, %v8641_v11  ;;  %v8643_v48 = vld [vmem:[#allocation98_spill] sm:$0xff]  ;;  %v1741_v20 = vmul.f32 %v8646_v1, %v8645_v18  ;;  %v8647_v6 = vld [vmem:[#allocation59_spill] sm:$0xff]  ;;  %v5808_v54 = vld [vmem:[%s4569_s28 + $0xcd] sm:$0xff] }
 0x189   : > { %v1721_v22 = vmul.f32 %v8644_v17, %v8643_v48  ;;  %v1581_v2 = vadd.f32 %v1549_v41, %v1533_v63  ;;  %v1761_v37 = vmul.f32 %v8586_v38, %v8647_v6  ;;  %v1781_v28 = vmul.f32 %v8587_v13, %v5791_v33  ;;  %8648 = vst [vmem:[#allocation47_spill] sm:$0xff] %v5808_v54  ;;  %v8649_v53 = vld [vmem:[#allocation100_spill] sm:$0xff]  ;;  %v8650_v63 = vld [vmem:[#allocation101_spill] sm:$0xff]  ;;  %v8651_v18 = vld [vmem:[#allocation102_spill] sm:$0xff] }
 0x18a   : > { %v1597_v4 = vadd.f32 %v1565_v9, %v1517_v39  ;;  %v1797_v5 = vadd.f32 %v1681_v16, %v1661_v34  ;;  %v1925_v46 = vmul.f32 %v8413_v19, %v8649_v53  ;;  %v1945_v41 = vmul.f32 %v8590_v51, %v8650_v63  ;;  %v8652_v36 = vld [vmem:[#allocation69_spill] sm:$0xff]  ;;  %v8653_v6 = vld [vmem:[#allocation103_spill] sm:$0xff]  ;;  %v8654_v38 = vld [vmem:[#allocation72_spill] sm:$0xff] }
 0x18b   : > { %v1813_v21 = vadd.f32 %v1721_v22, %v1701_v23  ;;  %v1829_v48 = vadd.f32 %v1761_v37, %v1741_v20  ;;  %v1965_v11 = vmul.f32 %v8652_v36, %v8651_v18  ;;  %v1985_v1 = vmul.f32 %v8654_v38, %v8653_v6  ;;  %v8655_v16 = vld [vmem:[#allocation104_spill] sm:$0xff]  ;;  %v8657_v20 = vld [vmem:[#allocation75_spill] sm:$0xff]  ;;  %v8659_v36 = vld [vmem:[#allocation105_spill] sm:$0xff] }
 0x18c   : > { %v1613_v33 = vadd.f32 %v1597_v4, %v1581_v2  ;;  %v2005_v22 = vmul.f32 %v8534_v8, %v8655_v16  ;;  %v8656_v34 = vld [vmem:[#allocation32_spill] sm:$0xff]  ;;  %v2045_v37 = vmul.f32 %v8657_v20, %v5808_v54  ;;  %v2061_v53 = vadd.f32 %v1945_v41, %v1925_v46  ;;  %v8660_v6 = vld [vmem:[#allocation106_spill] sm:$0xff]  ;;  %v8663_v46 = vld [vmem:[#allocation109_spill] sm:$0xff] }
 0x18d   : > { %v1845_v39 = vadd.f32 %v1813_v21, %v1797_v5  ;;  %v2025_v9 = vmul.f32 %v8536_v32, %v8656_v34  ;;  %v1861_v23 = vadd.f32 %v1829_v48, %v1781_v28  ;;  %v2077_v63 = vadd.f32 %v1985_v1, %v1965_v11  ;;  %v5825_v51 = vld [vmem:[%s4569_s28 + $0xce] sm:$0xff]  ;;  %v8661_v5 = vld [vmem:[#allocation107_spill] sm:$0xff] }
 0x18e   : > { %8658 = vst [vmem:[#allocation49_spill] sm:$0xff] %v5825_v51  ;;  %v2189_v2 = vmul.f32 %v4960_v27, %v8659_v36  ;;  %v2209_v4 = vmul.f32 %v4964_v44, %v8660_v6  ;;  %v2229_v21 = vmul.f32 %v4978_v25, %v8661_v5  ;;  %v8662_v48 = vld [vmem:[#allocation108_spill] sm:$0xff]  ;;  %v8665_v34 = vld [vmem:[#allocation33_spill] sm:$0xff]  ;;  %v2309_v36 = vmul.f32 %v5705_v47, %v5825_v51 }
 0x18f   : > { %v2093_v18 = vadd.f32 %v2025_v9, %v2005_v22  ;;  %v1877_v16 = vadd.f32 %v1861_v23, %v1845_v39  ;;  %v2109_v28 = vadd.f32 %v2077_v63, %v2061_v53  ;;  %v2249_v54 = vmul.f32 %v4991_v30, %v8662_v48  ;;  %v8664_v1 = vld [vmem:[#allocation84_spill] sm:$0xff]  ;;  %v8666_v22 = vld [vmem:[#allocation85_spill] sm:$0xff]  ;;  %v5843_v23 = vld [vmem:[%s4569_s28 + $0xd8] sm:$0xff] }
 0x190   : > { %v2269_v41 = vmul.f32 %v8664_v1, %v8663_v46  ;;  %v2289_v9 = vmul.f32 %v8666_v22, %v8665_v34  ;;  %v2325_v6 = vadd.f32 %v2209_v4, %v2189_v2  ;;  %v2428_v5 = vadd.f32 %v1085_v43, %v5752_v26  ;;  %8667 = vst [vmem:[#allocation53_spill] sm:$0xff] %v5843_v23  ;;  %v8668_v53 = vld [vmem:[#allocation36_spill] sm:$0xff]  ;;  %v8670_v34 = vld [vmem:[#allocation111_spill] sm:$0xff] }
 0x191   : > { %v2125_v11 = vadd.f32 %v2093_v18, %v2045_v37  ;;  %v2341_v44 = vadd.f32 %v2249_v54, %v2229_v21  ;;  %v2444_v39 = vadd.f32 %v1613_v33, %v1349_v58  ;;  %v606_v63 = vmul.f32 %v8668_v53, %v4606_v55  ;;  %v8669_v18 = vld [vmem:[#allocation74_spill] sm:$0xff]  ;;  %v8671_v54 = vld [vmem:[#allocation112_spill] sm:$0xff]  ;;  %v8673_v21 = vld [vmem:[#allocation35_spill] sm:$0xff] }
 0x192   : > { %v2357_v37 = vadd.f32 %v2289_v9, %v2269_v41  ;;  %v626_v46 = vmul.f32 %v8669_v18, %v4610_v56  ;;  %v646_v22 = vmul.f32 %v8670_v34, %v4614_v57  ;;  %v666_v26 = vmul.f32 %v8671_v54, %v4620_v59  ;;  %v5854_v43 = vld [vmem:[%s4569_s28 + $0xa8] sm:$0xff] }
 0x193   : > { %v2141_v48 = vadd.f32 %v2125_v11, %v2109_v28  ;;  %v2373_v51 = vadd.f32 %v2341_v44, %v2325_v6  ;;  %v2476_v2 = vadd.f32 %v2444_v39, %v2428_v5  ;;  %8672 = vst [vmem:[#allocation54_spill] sm:$0xff] %v5854_v43  ;;  %v686_v33 = vmul.f32 %v5854_v43, %v4624_v60  ;;  %v5863_v11 = vld [vmem:[%s4569_s28 + $0xd9] sm:$0xff]  ;;  %v8675_v6 = vld [vmem:[#allocation113_spill] sm:$0xff] }
 0x194   : > { %v2389_v58 = vadd.f32 %v2357_v37, %v2309_v36  ;;  %v706_v28 = vmul.f32 %v8481_v42, %v8673_v21  ;;  %v726_v41 = vmul.f32 %v8482_v24, %v5843_v23  ;;  %8674 = vst [vmem:[#allocation57_spill] sm:$0xff] %v5863_v11  ;;  %v742_v44 = vadd.f32 %v626_v46, %v606_v63  ;;  %v8676_v39 = vld [vmem:[#allocation114_spill] sm:$0xff]  ;;  %v8678_v37 = vld [vmem:[#allocation116_spill] sm:$0xff] }
 0x195   : > { %v2460_v4 = vadd.f32 %v2141_v48, %v1877_v16  ;;  %v758_v9 = vadd.f32 %v666_v26, %v646_v22  ;;  %v870_v5 = vmul.f32 %v8675_v6, %v4642_v3  ;;  %v890_v53 = vmul.f32 %v8676_v39, %v4667_v14  ;;  %v8677_v16 = vld [vmem:[#allocation115_spill] sm:$0xff]  ;;  %v5874_v54 = vld [vmem:[%s4569_s28 + $0xa9] sm:$0xff]  ;;  %v8680_v63 = vld [vmem:[#allocation86_spill] sm:$0xff] }
 0x196   : > { %v2405_v43 = vadd.f32 %v2389_v58, %v2373_v51  ;;  %v774_v36 = vadd.f32 %v706_v28, %v686_v33  ;;  %v910_v48 = vmul.f32 %v8677_v16, %v8484_v45  ;;  %v930_v21 = vmul.f32 %v8678_v37, %v8485_v62  ;;  %8679 = vst [vmem:[#allocation60_spill] sm:$0xff] %v5874_v54  ;;  %v5883_v6 = vld [vmem:[%s4569_s28 + $0xda] sm:$0xff] }
 0x197   : > { %v790_v23 = vadd.f32 %v758_v9, %v742_v44  ;;  %v950_v22 = vmul.f32 %v5874_v54, %v8552_v61  ;;  %v970_v46 = vmul.f32 %v8554_v12, %v8680_v63  ;;  %v990_v51 = vmul.f32 %v8555_v29, %v5863_v11  ;;  %8681 = vst [vmem:[#allocation65_spill] sm:$0xff] %v5883_v6  ;;  %v8682_v44 = vld [vmem:[#allocation87_spill] sm:$0xff]  ;;  %v8683_v54 = vld [vmem:[#allocation25_spill] sm:$0xff]  ;;  %v8684_v63 = vld [vmem:[#allocation26_spill] sm:$0xff] }
 0x198   : > { %v2492_v26 = vadd.f32 %v2460_v4, %v2405_v43  ;;  %v806_v33 = vadd.f32 %v774_v36, %v726_v41  ;;  %v1006_v58 = vadd.f32 %v890_v53, %v870_v5  ;;  %v1022_v28 = vadd.f32 %v930_v21, %v910_v48  ;;  %v8685_v4 = vld [vmem:[#allocation29_spill] sm:$0xff]  ;;  %v8687_v36 = vld [vmem:[#allocation24_spill] sm:$0xff] }
 0x199   : > { %v1038_v37 = vadd.f32 %v970_v46, %v950_v22  ;;  %v1134_v9 = vmul.f32 %v8682_v44, %v8557_v52  ;;  %v1154_v16 = vmul.f32 %v8683_v54, %v8494_v10  ;;  %v1174_v39 = vmul.f32 %v8684_v63, %v8496_v31  ;;  %v5896_v5 = vld [vmem:[%s4569_s28 + $0xaa] sm:$0xff] }
 0x19a   : > { %v2508_v34 = vadd.f32 %v2492_v26, %v2476_v2  ;;  %v5891_v18 = vadd.f32 %v806_v33, %v790_v23  ;;  %v1054_v43 = vadd.f32 %v1022_v28, %v1006_v58  ;;  %v1194_v21 = vmul.f32 %v8685_v4, %v8498_v50  ;;  %8686 = vst [vmem:[#allocation68_spill] sm:$0xff] %v5896_v5  ;;  %v8688_v2 = vld [vmem:[#allocation40_spill] sm:$0xff]  ;;  %v5908_v33 = vld [vmem:[%s4569_s28 + $0xdb] sm:$0xff]  ;;  %v8696_v54 = vld [vmem:[#allocation117_spill] sm:$0xff] }
 0x19b   : > { %v1070_v41 = vadd.f32 %v1038_v37, %v990_v51  ;;  %v1214_v53 = vmul.f32 %v5896_v5, %v8500_v15  ;;  %v1234_v48 = vmul.f32 %v8563_v35, %v8687_v36  ;;  %v1254_v22 = vmul.f32 %v8564_v40, %v5883_v6  ;;  %8690 = vst [vmem:[#allocation71_spill] sm:$0xff] %v5908_v33  ;;  %v8691_v37 = vld [vmem:[#allocation42_spill] sm:$0xff]  ;;  %v8692_v51 = vld [vmem:[#allocation39_spill] sm:$0xff]  ;;  %v8694_v4 = vld [vmem:[#allocation88_spill] sm:$0xff] }
 0x19c   : > { %v5905_v23 = vadd.f32 %v8688_v2, %v2508_v34  ;;  %v1270_v46 = vadd.f32 %v1154_v16, %v1134_v9  ;;  %v1286_v26 = vadd.f32 %v1194_v21, %v1174_v39  ;;  %v1398_v58 = vmul.f32 %v8692_v51, %v8691_v37  ;;  %v8693_v5 = vld [vmem:[#allocation43_spill] sm:$0xff]  ;;  %v8695_v36 = vld [vmem:[#allocation45_spill] sm:$0xff]  ;;  %v8697_v6 = vld [vmem:[#allocation48_spill] sm:$0xff] }
 0x19d   : > { %v1086_v28 = vadd.f32 %v1070_v41, %v1054_v43  ;;  %v1302_v44 = vadd.f32 %v1234_v48, %v1214_v53  ;;  %v1418_v63 = vmul.f32 %v8694_v4, %v8693_v5  ;;  %v1438_v11 = vmul.f32 %v8696_v54, %v8695_v36  ;;  %v8698_v16 = vld [vmem:[#allocation118_spill] sm:$0xff]  ;;  %v5920_v9 = vld [vmem:[%s4569_s28 + $0xab] sm:$0xff]  ;;  %v8702_v41 = vld [vmem:[#allocation51_spill] sm:$0xff] }
 0x19e   : > { %8689 = vst [vmem:[#allocation70_spill] sm:$0xff] %v5905_v23  ;;  %2545 = vadd.xlane.f32.xlu1 %v5905_v23  ;;  %v1318_v34 = vadd.f32 %v1286_v26, %v1270_v46  ;;  %v1458_v39 = vmul.f32 %v8698_v16, %v8697_v6  ;;  %8699 = vst [vmem:[#allocation78_spill] sm:$0xff] %v5920_v9  ;;  %v8700_v21 = vld [vmem:[#allocation50_spill] sm:$0xff]  ;;  %v8703_v4 = vld [vmem:[#allocation52_spill] sm:$0xff] }
 0x19f   : > { %v1478_v51 = vmul.f32 %v5920_v9, %v8700_v21  ;;  %v8701_v43 = vld [vmem:[#allocation38_spill] sm:$0xff]  ;;  %v1334_v48 = vadd.f32 %v1302_v44, %v1254_v22  ;;  %v1518_v5 = vmul.f32 %v8703_v4, %v5908_v33  ;;  %v1534_v54 = vadd.f32 %v1418_v63, %v1398_v58  ;;  %v8705_v46 = vld [vmem:[#allocation119_spill] sm:$0xff]  ;;  %v8706_v36 = vld [vmem:[#allocation120_spill] sm:$0xff] }
 0x1a0   : > { %v1498_v53 = vmul.f32 %v8702_v41, %v8701_v43  ;;  %v5929_v23 = vld [vmem:[%s4569_s28 + $0xdc] sm:$0xff]  ;;  %v1662_v26 = vmul.f32 %v8705_v46, %v8638_v0  ;;  %v1550_v16 = vadd.f32 %v1458_v39, %v1438_v11  ;;  %v1682_v37 = vmul.f32 %v8706_v36, %v8640_v7  ;;  %v8707_v9 = vld [vmem:[#allocation121_spill] sm:$0xff] }
 0x1a1   : > { %8704 = vst [vmem:[#allocation90_spill] sm:$0xff] %v5929_v23  ;;  %v1702_v21 = vmul.f32 %v8707_v9, %v8642_v49  ;;  %v1350_v43 = vadd.f32 %v1334_v48, %v1318_v34  ;;  %v8708_v22 = vld [vmem:[#allocation122_spill] sm:$0xff]  ;;  %v5940_v63 = vld [vmem:[%s4569_s28 + $0xac] sm:$0xff]  ;;  %v8711_v4 = vld [vmem:[#allocation27_spill] sm:$0xff] }
 0x1a2   : > { %v1566_v6 = vadd.f32 %v1498_v53, %v1478_v51  ;;  %v1722_v44 = vmul.f32 %v8708_v22, %v8644_v17  ;;  %8709 = vst [vmem:[#allocation91_spill] sm:$0xff] %v5940_v63  ;;  %v8710_v58 = vld [vmem:[#allocation62_spill] sm:$0xff]  ;;  %v8712_v46 = vld [vmem:[#allocation63_spill] sm:$0xff]  ;;  %v1582_v39 = vadd.f32 %v1550_v16, %v1534_v54  ;;  %v1782_v53 = vmul.f32 %v8587_v13, %v5929_v23  ;;  %v8717_v54 = vld [vmem:[#allocation69_spill] sm:$0xff] }
 0x1a3   : > { %v1742_v33 = vmul.f32 %v5940_v63, %v8710_v58  ;;  %v1762_v11 = vmul.f32 %v8712_v46, %v8711_v4  ;;  %v1798_v9 = vadd.f32 %v1682_v37, %v1662_v26  ;;  %v5949_v34 = vld [vmem:[%s4569_s28 + $0xdd] sm:$0xff]  ;;  %v8716_v63 = vld [vmem:[#allocation124_spill] sm:$0xff] }
 0x1a4   : > { %v1598_v51 = vadd.f32 %v1566_v6, %v1518_v5  ;;  %8713 = vst [vmem:[#allocation92_spill] sm:$0xff] %v5949_v34  ;;  %v1814_v48 = vadd.f32 %v1722_v44, %v1702_v21  ;;  %v8714_v36 = vld [vmem:[#allocation123_spill] sm:$0xff]  ;;  %v8718_v6 = vld [vmem:[#allocation125_spill] sm:$0xff]  ;;  %v8719_v16 = vld [vmem:[#allocation126_spill] sm:$0xff] }
 0x1a5   : > { %v1830_v22 = vadd.f32 %v1762_v11, %v1742_v33  ;;  %v1926_v17 = vmul.f32 %v8714_v36, %v8413_v19  ;;  %v8715_v49 = vld [vmem:[#allocation67_spill] sm:$0xff]  ;;  %v1966_v5 = vmul.f32 %v8718_v6, %v8717_v54  ;;  %v1986_v23 = vmul.f32 %v8719_v16, %v8654_v38  ;;  %v5960_v37 = vld [vmem:[%s4569_s28 + $0xad] sm:$0xff]  ;;  %v8721_v36 = vld [vmem:[#allocation30_spill] sm:$0xff] }
 0x1a6   : > { %v1946_v58 = vmul.f32 %v8716_v63, %v8715_v49  ;;  %v1614_v4 = vadd.f32 %v1598_v51, %v1582_v39  ;;  %8720 = vst [vmem:[#allocation94_spill] sm:$0xff] %v5960_v37  ;;  %v2006_v33 = vmul.f32 %v5960_v37, %v8534_v8  ;;  %v1846_v21 = vadd.f32 %v1814_v48, %v1798_v9  ;;  %v5969_v39 = vld [vmem:[%s4569_s28 + $0xde] sm:$0xff]  ;;  %v3829_v16 = vld [vmem:[%s4569_s28 + $0x4e] sm:$0xff]  ;;  %v5974_v38 = vld [vmem:[%s4569_s28 + $0x66] sm:$0xff] }
 0x1a7   : > { %v1862_v26 = vadd.f32 %v1830_v22, %v1782_v53  ;;  %v2026_v44 = vmul.f32 %v8536_v32, %v8721_v36  ;;  %v2046_v11 = vmul.f32 %v8657_v20, %v5949_v34  ;;  %8722 = vst [vmem:[#allocation95_spill] sm:$0xff] %v5969_v39  ;;  %v2078_v6 = vadd.f32 %v1986_v23, %v1966_v5  ;;  %v8724_v54 = vld [vmem:[#allocation77_spill] sm:$0xff]  ;;  %v5979_v48 = vld [vmem:[%s4569_s28 + $0x7e] sm:$0xff] }
 0x1a8   : > { %v2062_v51 = vadd.f32 %v1946_v58, %v1926_v17  ;;  %v2190_v63 = vmul.f32 %v3829_v16, %v4960_v27  ;;  %8723 = vst [vmem:[#allocation96_spill] sm:$0xff] %v5974_v38  ;;  %v2210_v9 = vmul.f32 %v5974_v38, %v8724_v54  ;;  %8725 = vst [vmem:[#allocation97_spill] sm:$0xff] %v5979_v48  ;;  %v8726_v17 = vld [vmem:[#allocation79_spill] sm:$0xff]  ;;  %v5986_v5 = vld [vmem:[%s4569_s28 + $0xae] sm:$0xff] }
 0x1a9   : > { %v1878_v22 = vadd.f32 %v1862_v26, %v1846_v21  ;;  %v2094_v53 = vadd.f32 %v2026_v44, %v2006_v33  ;;  %v2230_v34 = vmul.f32 %v5979_v48, %v4978_v25  ;;  %v2250_v23 = vmul.f32 %v8726_v17, %v4991_v30  ;;  %8727 = vst [vmem:[#allocation98_spill] sm:$0xff] %v5986_v5  ;;  %v8728_v38 = vld [vmem:[#allocation31_spill] sm:$0xff]  ;;  %v8729_v21 = vld [vmem:[#allocation85_spill] sm:$0xff] }
 0x1aa   : > { %v2110_v58 = vadd.f32 %v2078_v6, %v2062_v51  ;;  %v2270_v16 = vmul.f32 %v5986_v5, %v8664_v1  ;;  %v2290_v33 = vmul.f32 %v8729_v21, %v8728_v38  ;;  %v2310_v26 = vmul.f32 %v5705_v47, %v5969_v39  ;;  %v5996_v51 = vld [vmem:[%s4569_s28 + $0xe0] sm:$0xff]  ;;  %v3833_v30 = vld [vmem:[%s4569_s28 + $0x50] sm:$0xff]  ;;  %v6001_v1 = vld [vmem:[%s4569_s28 + $0x68] sm:$0xff] }
 0x1ab   : > { %v2126_v44 = vadd.f32 %v2094_v53, %v2046_v11  ;;  %v2326_v48 = vadd.f32 %v2210_v9, %v2190_v63  ;;  %v2342_v36 = vadd.f32 %v2250_v23, %v2230_v34  ;;  %v2429_v37 = vadd.f32 %v1086_v28, %v5891_v18  ;;  %8730 = vst [vmem:[#allocation99_spill] sm:$0xff] %v5996_v51  ;;  %v6006_v63 = vld [vmem:[%s4569_s28 + $0x80] sm:$0xff]  ;;  %v8734_v34 = vld [vmem:[#allocation110_spill] sm:$0xff] }
 0x1ac   : > { %v2358_v17 = vadd.f32 %v2290_v33, %v2270_v16  ;;  %v2445_v6 = vadd.f32 %v1614_v4, %v1350_v43  ;;  %v607_v5 = vmul.f32 %v3833_v30, %v4606_v55  ;;  %8731 = vst [vmem:[#allocation100_spill] sm:$0xff] %v6001_v1  ;;  %v627_v38 = vmul.f32 %v6001_v1, %v4610_v56  ;;  %v6011_v4 = vld [vmem:[%s4569_s28 + $0x98] sm:$0xff]  ;;  %v6022_v16 = vld [vmem:[%s4569_s28 + $0xe1] sm:$0xff] }
 0x1ad   : > { %v2142_v39 = vadd.f32 %v2126_v44, %v2110_v58  ;;  %v2374_v47 = vadd.f32 %v2342_v36, %v2326_v48  ;;  %8732 = vst [vmem:[#allocation101_spill] sm:$0xff] %v6006_v63  ;;  %v647_v18 = vmul.f32 %v6006_v63, %v4614_v57  ;;  %8733 = vst [vmem:[#allocation102_spill] sm:$0xff] %v6011_v4  ;;  %v8735_v9 = vld [vmem:[#allocation82_spill] sm:$0xff]  ;;  %v6108_v63 = vld [vmem:[%s4569_s28 + $0xe4] sm:$0xff] }
 0x1ae   : > { %v667_v30 = vmul.f32 %v6011_v4, %v4620_v59  ;;  %v2390_v28 = vadd.f32 %v2358_v17, %v2310_v26  ;;  %v2477_v43 = vadd.f32 %v2445_v6, %v2429_v37  ;;  %v687_v11 = vmul.f32 %v4624_v60, %v8734_v34  ;;  %8736 = vst [vmem:[#allocation103_spill] sm:$0xff] %v6022_v16  ;;  %v3837_v17 = vld [vmem:[%s4569_s28 + $0x51] sm:$0xff]  ;;  %v6027_v26 = vld [vmem:[%s4569_s28 + $0x69] sm:$0xff] }
 0x1af   : > { %v707_v36 = vmul.f32 %v8481_v42, %v8735_v9  ;;  %v2461_v53 = vadd.f32 %v2142_v39, %v1878_v22  ;;  %v727_v48 = vmul.f32 %v8482_v24, %v5996_v51  ;;  %v743_v23 = vadd.f32 %v627_v38, %v607_v5  ;;  %8737 = vst [vmem:[#allocation104_spill] sm:$0xff] %v6027_v26  ;;  %v6032_v22 = vld [vmem:[%s4569_s28 + $0x81] sm:$0xff]  ;;  %v6037_v5 = vld [vmem:[%s4569_s28 + $0x99] sm:$0xff]  ;;  %v6053_v51 = vld [vmem:[%s4569_s28 + $0x6a] sm:$0xff] }
 0x1b0   : > { %v759_v58 = vadd.f32 %v667_v30, %v647_v18  ;;  %v2406_v33 = vadd.f32 %v2390_v28, %v2374_v47  ;;  %v871_v37 = vmul.f32 %v3837_v17, %v4642_v3  ;;  %v891_v6 = vmul.f32 %v6027_v26, %v4667_v14  ;;  %8738 = vst [vmem:[#allocation105_spill] sm:$0xff] %v6032_v22  ;;  %v8740_v18 = vld [vmem:[#allocation20_spill] sm:$0xff]  ;;  %v3841_v26 = vld [vmem:[%s4569_s28 + $0x52] sm:$0xff] }
 0x1b1   : > { %v775_v44 = vadd.f32 %v707_v36, %v687_v11  ;;  %v911_v38 = vmul.f32 %v6032_v22, %v8484_v45  ;;  %8739 = vst [vmem:[#allocation106_spill] sm:$0xff] %v6037_v5  ;;  %v931_v47 = vmul.f32 %v6037_v5, %v8485_v62  ;;  %v951_v30 = vmul.f32 %v8552_v61, %v8740_v18  ;;  %v8741_v11 = vld [vmem:[#allocation34_spill] sm:$0xff]  ;;  %v6048_v22 = vld [vmem:[%s4569_s28 + $0xe2] sm:$0xff] }
 0x1b2   : > { %v791_v39 = vadd.f32 %v759_v58, %v743_v23  ;;  %v2493_v28 = vadd.f32 %v2461_v53, %v2406_v33  ;;  %v971_v36 = vmul.f32 %v8554_v12, %v8741_v11  ;;  %v991_v23 = vmul.f32 %v8555_v29, %v6022_v16  ;;  %8742 = vst [vmem:[#allocation107_spill] sm:$0xff] %v6048_v22  ;;  %v6060_v18 = vld [vmem:[%s4569_s28 + $0x82] sm:$0xff]  ;;  %v8750_v16 = vld [vmem:[#allocation42_spill] sm:$0xff]  ;;  %v6084_v11 = vld [vmem:[%s4569_s28 + $0x6b] sm:$0xff] }
 0x1b3   : > { %v807_v34 = vadd.f32 %v775_v44, %v727_v48  ;;  %v1007_v58 = vadd.f32 %v891_v6, %v871_v37  ;;  %v1023_v17 = vadd.f32 %v931_v47, %v911_v38  ;;  %v1135_v5 = vmul.f32 %v3841_v26, %v8557_v52  ;;  %8743 = vst [vmem:[#allocation108_spill] sm:$0xff] %v6053_v51  ;;  %v6065_v38 = vld [vmem:[%s4569_s28 + $0x9a] sm:$0xff]  ;;  %v8746_v47 = vld [vmem:[#allocation21_spill] sm:$0xff]  ;;  %v8759_v9 = vld [vmem:[#allocation44_spill] sm:$0xff] }
 0x1b4   : > { %v1155_v53 = vmul.f32 %v6053_v51, %v8494_v10  ;;  %v2509_v48 = vadd.f32 %v2493_v28, %v2477_v43  ;;  %v1039_v44 = vadd.f32 %v971_v36, %v951_v30  ;;  %8744 = vst [vmem:[#allocation109_spill] sm:$0xff] %v6060_v18  ;;  %v1175_v37 = vmul.f32 %v6060_v18, %v8496_v31  ;;  %v3845_v51 = vld [vmem:[%s4569_s28 + $0x53] sm:$0xff] }
 0x1b5   : > { %v6057_v33 = vadd.f32 %v807_v34, %v791_v39  ;;  %v1055_v6 = vadd.f32 %v1023_v17, %v1007_v58  ;;  %8745 = vst [vmem:[#allocation36_spill] sm:$0xff] %v6065_v38  ;;  %v1195_v26 = vmul.f32 %v6065_v38, %v8498_v50  ;;  %v1215_v43 = vmul.f32 %v8500_v15, %v8746_v47  ;;  %v8747_v39 = vld [vmem:[#allocation37_spill] sm:$0xff]  ;;  %v6079_v17 = vld [vmem:[%s4569_s28 + $0xe3] sm:$0xff] }
 0x1b6   : > { %v1235_v28 = vmul.f32 %v8563_v35, %v8747_v39  ;;  %v6074_v30 = vadd.f32 %v8688_v2, %v2509_v48  ;;  %v1071_v34 = vadd.f32 %v1039_v44, %v991_v23  ;;  %v1255_v36 = vmul.f32 %v8564_v40, %v6048_v22  ;;  %8749 = vst [vmem:[#allocation87_spill] sm:$0xff] %v6079_v17  ;;  %v8752_v39 = vld [vmem:[#allocation43_spill] sm:$0xff] }
 0x1b7   : > { %v1271_v58 = vadd.f32 %v1155_v53, %v1135_v5  ;;  %v1287_v18 = vadd.f32 %v1195_v26, %v1175_v37  ;;  %v1399_v47 = vmul.f32 %v3845_v51, %v8750_v16  ;;  %8751 = vst [vmem:[#allocation40_spill] sm:$0xff] %v6084_v11  ;;  %v1419_v48 = vmul.f32 %v6084_v11, %v8752_v39  ;;  %v6092_v5 = vld [vmem:[%s4569_s28 + $0x83] sm:$0xff]  ;;  %v8754_v53 = vld [vmem:[#allocation45_spill] sm:$0xff]  ;;  %v6097_v37 = vld [vmem:[%s4569_s28 + $0x9b] sm:$0xff] }
 0x1b8   : > { %8748 = vst [vmem:[#allocation113_spill] sm:$0xff] %v6074_v30  ;;  %v1303_v38 = vadd.f32 %v1235_v28, %v1215_v43  ;;  %2547 = vadd.xlane.f32.xlu0 %v6074_v30  ;;  %v6089_v23 = vadd.f32 %v1071_v34, %v1055_v6  ;;  %8753 = vst [vmem:[#allocation39_spill] sm:$0xff] %v6092_v5  ;;  %v1439_v44 = vmul.f32 %v6092_v5, %v8754_v53  ;;  %v8756_v26 = vld [vmem:[#allocation48_spill] sm:$0xff]  ;;  %v8757_v43 = vld [vmem:[#allocation23_spill] sm:$0xff] }
 0x1b9   : > { %8755 = vst [vmem:[#allocation119_spill] sm:$0xff] %v6097_v37  ;;  %v1459_v51 = vmul.f32 %v6097_v37, %v8756_v26  ;;  %v8758_v28 = vld [vmem:[#allocation50_spill] sm:$0xff]  ;;  %v1319_v11 = vadd.f32 %v1287_v18, %v1271_v58  ;;  %v1499_v6 = vmul.f32 %v8702_v41, %v8759_v9  ;;  %v8760_v34 = vld [vmem:[#allocation52_spill] sm:$0xff]  ;;  %8761 = vst [vmem:[#allocation123_spill] sm:$0xff] %v6108_v63 }
 0x1ba   : > { %v1479_v22 = vmul.f32 %v8758_v28, %v8757_v43  ;;  %v1335_v30 = vadd.f32 %v1303_v38, %v1255_v36  ;;  %v1519_v4 = vmul.f32 %v8760_v34, %v6079_v17  ;;  %v1535_v5 = vadd.f32 %v1419_v48, %v1399_v47  ;;  %v3849_v53 = vld [vmem:[%s4569_s28 + $0x54] sm:$0xff]  ;;  %v6113_v37 = vld [vmem:[%s4569_s28 + $0x6c] sm:$0xff]  ;;  %v6118_v58 = vld [vmem:[%s4569_s28 + $0x84] sm:$0xff] }
 0x1bb   : > { %v1551_v1 = vadd.f32 %v1459_v51, %v1439_v44  ;;  %v1663_v39 = vmul.f32 %v3849_v53, %v8638_v0  ;;  %8762 = vst [vmem:[#allocation110_spill] sm:$0xff] %v6113_v37  ;;  %v1683_v18 = vmul.f32 %v6113_v37, %v8640_v7  ;;  %8763 = vst [vmem:[#allocation20_spill] sm:$0xff] %v6118_v58  ;;  %v8764_v43 = vld [vmem:[#allocation58_spill] sm:$0xff]  ;;  %v8766_v48 = vld [vmem:[#allocation61_spill] sm:$0xff] }
 0x1bc   : > { %v1351_v38 = vadd.f32 %v1335_v30, %v1319_v11  ;;  %v1567_v36 = vadd.f32 %v1499_v6, %v1479_v22  ;;  %v1703_v17 = vmul.f32 %v6118_v58, %v8764_v43  ;;  %v6123_v47 = vld [vmem:[%s4569_s28 + $0x9c] sm:$0xff]  ;;  %v1783_v11 = vmul.f32 %v8587_v13, %v6108_v63  ;;  %v6134_v43 = vld [vmem:[%s4569_s28 + $0xe5] sm:$0xff] }
 0x1bd   : > { %8765 = vst [vmem:[#allocation21_spill] sm:$0xff] %v6123_v47  ;;  %v1723_v53 = vmul.f32 %v6123_v47, %v8766_v48  ;;  %v1583_v44 = vadd.f32 %v1551_v1, %v1535_v5  ;;  %v8767_v51 = vld [vmem:[#allocation59_spill] sm:$0xff]  ;;  %v8768_v9 = vld [vmem:[#allocation62_spill] sm:$0xff]  ;;  %v1799_v6 = vadd.f32 %v1683_v18, %v1663_v39  ;;  %8770 = vst [vmem:[#allocation42_spill] sm:$0xff] %v6134_v43 }
 0x1be   : > { %v1743_v0 = vmul.f32 %v8768_v9, %v8767_v51  ;;  %v8769_v37 = vld [vmem:[#allocation46_spill] sm:$0xff]  ;;  %v1599_v30 = vadd.f32 %v1567_v36, %v1519_v4  ;;  %v6139_v1 = vld [vmem:[%s4569_s28 + $0x6d] sm:$0xff]  ;;  %v6144_v51 = vld [vmem:[%s4569_s28 + $0x85] sm:$0xff] }
 0x1bf   : > { %v1763_v22 = vmul.f32 %v8712_v46, %v8769_v37  ;;  %v1815_v58 = vadd.f32 %v1723_v53, %v1703_v17  ;;  %v3853_v7 = vld [vmem:[%s4569_s28 + $0x55] sm:$0xff]  ;;  %8771 = vst [vmem:[#allocation23_spill] sm:$0xff] %v6139_v1  ;;  %v1947_v5 = vmul.f32 %v6139_v1, %v8715_v49  ;;  %8772 = vst [vmem:[#allocation59_spill] sm:$0xff] %v6144_v51  ;;  %v6149_v39 = vld [vmem:[%s4569_s28 + $0x9d] sm:$0xff] }
 0x1c0   : > { %v1927_v34 = vmul.f32 %v3853_v7, %v8413_v19  ;;  %v8773_v37 = vld [vmem:[#allocation69_spill] sm:$0xff]  ;;  %8774 = vst [vmem:[#allocation127_spill] sm:$0xff] %v6149_v39  ;;  %v8775_v17 = vld [vmem:[#allocation72_spill] sm:$0xff]  ;;  %v1615_v18 = vadd.f32 %v1599_v30, %v1583_v44  ;;  %v2047_v49 = vmul.f32 %v8657_v20, %v6134_v43 }
 0x1c1   : > { %v1831_v47 = vadd.f32 %v1763_v22, %v1743_v0  ;;  %v1967_v4 = vmul.f32 %v6144_v51, %v8773_v37  ;;  %v1987_v7 = vmul.f32 %v6149_v39, %v8775_v17  ;;  %v1847_v0 = vadd.f32 %v1815_v58, %v1799_v6  ;;  %v8776_v36 = vld [vmem:[#allocation32_spill] sm:$0xff]  ;;  %v8777_v22 = vld [vmem:[#allocation47_spill] sm:$0xff]  ;;  %v3857_v46 = vld [vmem:[%s4569_s28 + $0x56] sm:$0xff] }
 0x1c2   : > { %v2007_v53 = vmul.f32 %v8534_v8, %v8776_v36  ;;  %v2027_v1 = vmul.f32 %v8536_v32, %v8777_v22  ;;  %v2063_v51 = vadd.f32 %v1947_v5, %v1927_v34  ;;  %v6160_v19 = vld [vmem:[%s4569_s28 + $0xe6] sm:$0xff]  ;;  %v2191_v44 = vmul.f32 %v3857_v46, %v4960_v27  ;;  %v6165_v58 = vld [vmem:[%s4569_s28 + $0x6e] sm:$0xff]  ;;  %v6175_v5 = vld [vmem:[%s4569_s28 + $0x9e] sm:$0xff] }
 0x1c3   : > { %v1863_v63 = vadd.f32 %v1831_v47, %v1783_v11  ;;  %v2079_v37 = vadd.f32 %v1987_v7, %v1967_v4  ;;  %8778 = vst [vmem:[#allocation32_spill] sm:$0xff] %v6160_v19  ;;  %8779 = vst [vmem:[#allocation128_spill] sm:$0xff] %v6165_v58  ;;  %v2211_v30 = vmul.f32 %v6165_v58, %v8724_v54  ;;  %v6170_v6 = vld [vmem:[%s4569_s28 + $0x86] sm:$0xff]  ;;  %v8783_v7 = vld [vmem:[#allocation33_spill] sm:$0xff] }
 0x1c4   : > { %v2095_v13 = vadd.f32 %v2027_v1, %v2007_v53  ;;  %8780 = vst [vmem:[#allocation129_spill] sm:$0xff] %v6170_v6  ;;  %v2231_v47 = vmul.f32 %v6170_v6, %v4978_v25  ;;  %8781 = vst [vmem:[#allocation130_spill] sm:$0xff] %v6175_v5  ;;  %v8782_v4 = vld [vmem:[#allocation83_spill] sm:$0xff]  ;;  %v8784_v46 = vld [vmem:[#allocation84_spill] sm:$0xff] }
 0x1c5   : > { %v1879_v11 = vadd.f32 %v1863_v63, %v1847_v0  ;;  %v2111_v34 = vadd.f32 %v2079_v37, %v2063_v51  ;;  %v2251_v1 = vmul.f32 %v6175_v5, %v8782_v4  ;;  %v2271_v36 = vmul.f32 %v8784_v46, %v8783_v7  ;;  %v8785_v43 = vld [vmem:[#allocation49_spill] sm:$0xff]  ;;  %v8788_v0 = vld [vmem:[#allocation74_spill] sm:$0xff]  ;;  %v8790_v6 = vld [vmem:[#allocation112_spill] sm:$0xff] }
 0x1c6   : > { %v2127_v53 = vadd.f32 %v2095_v13, %v2047_v49  ;;  %v2291_v22 = vmul.f32 %v8729_v21, %v8785_v43  ;;  %v8786_v58 = vld [vmem:[#allocation81_spill] sm:$0xff]  ;;  %v2327_v54 = vadd.f32 %v2211_v30, %v2191_v44  ;;  %v2430_v63 = vadd.f32 %v6089_v23, %v6057_v33  ;;  %v8789_v49 = vld [vmem:[#allocation111_spill] sm:$0xff] }
 0x1c7   : > { %v2311_v39 = vmul.f32 %v8786_v58, %v6160_v19  ;;  %v2343_v27 = vadd.f32 %v2251_v1, %v2231_v47  ;;  %v2446_v37 = vadd.f32 %v1615_v18, %v1351_v38  ;;  %v6188_v51 = vld [vmem:[%s4569_s28 + $0xf0] sm:$0xff]  ;;  %v608_v5 = vmul.f32 %v8788_v0, %v4606_v55  ;;  %v8791_v47 = vld [vmem:[#allocation54_spill] sm:$0xff]  ;;  %v8792_v23 = vld [vmem:[#allocation35_spill] sm:$0xff] }
 0x1c8   : > { %8787 = vst [vmem:[#allocation33_spill] sm:$0xff] %v6188_v51  ;;  %v2143_v7 = vadd.f32 %v2127_v53, %v2111_v34  ;;  %v2359_v13 = vadd.f32 %v2291_v22, %v2271_v36  ;;  %v628_v43 = vmul.f32 %v8789_v49, %v4610_v56  ;;  %v648_v19 = vmul.f32 %v8790_v6, %v4614_v57  ;;  %v8793_v58 = vld [vmem:[#allocation53_spill] sm:$0xff] }
 0x1c9   : > { %v2375_v44 = vadd.f32 %v2343_v27, %v2327_v54  ;;  %v2478_v30 = vadd.f32 %v2446_v37, %v2430_v63  ;;  %v668_v33 = vmul.f32 %v8791_v47, %v4620_v59  ;;  %v688_v38 = vmul.f32 %v4624_v60, %v8792_v23  ;;  %v6205_v36 = vld [vmem:[%s4569_s28 + $0xf1] sm:$0xff]  ;;  %v8796_v63 = vld [vmem:[#allocation115_spill] sm:$0xff] }
 0x1ca   : > { %v2391_v18 = vadd.f32 %v2359_v13, %v2311_v39  ;;  %v2462_v1 = vadd.f32 %v2143_v7, %v1879_v11  ;;  %v708_v34 = vmul.f32 %v8481_v42, %v8793_v58  ;;  %v728_v22 = vmul.f32 %v8482_v24, %v6188_v51  ;;  %8794 = vst [vmem:[#allocation74_spill] sm:$0xff] %v6205_v36  ;;  %v8795_v54 = vld [vmem:[#allocation114_spill] sm:$0xff]  ;;  %v8797_v11 = vld [vmem:[#allocation116_spill] sm:$0xff] }
 0x1cb   : > { %v744_v53 = vadd.f32 %v628_v43, %v608_v5  ;;  %v760_v27 = vadd.f32 %v668_v33, %v648_v19  ;;  %v872_v6 = vmul.f32 %v8795_v54, %v4642_v3  ;;  %v892_v37 = vmul.f32 %v8796_v63, %v4667_v14  ;;  %v8798_v13 = vld [vmem:[#allocation60_spill] sm:$0xff]  ;;  %v8799_v51 = vld [vmem:[#allocation86_spill] sm:$0xff]  ;;  %v8800_v5 = vld [vmem:[#allocation57_spill] sm:$0xff] }
 0x1cc   : > { %v2407_v0 = vadd.f32 %v2391_v18, %v2375_v44  ;;  %v776_v39 = vadd.f32 %v708_v34, %v688_v38  ;;  %v912_v7 = vmul.f32 %v8797_v11, %v8484_v45  ;;  %v932_v49 = vmul.f32 %v8798_v13, %v8485_v62  ;;  %v6222_v18 = vld [vmem:[%s4569_s28 + $0xf2] sm:$0xff] }
 0x1cd   : > { %v792_v23 = vadd.f32 %v760_v27, %v744_v53  ;;  %v952_v43 = vmul.f32 %v8552_v61, %v8799_v51  ;;  %v972_v19 = vmul.f32 %v8554_v12, %v8800_v5  ;;  %v992_v33 = vmul.f32 %v8555_v29, %v6205_v36  ;;  %8801 = vst [vmem:[#allocation111_spill] sm:$0xff] %v6222_v18  ;;  %v8802_v11 = vld [vmem:[#allocation25_spill] sm:$0xff]  ;;  %v8803_v27 = vld [vmem:[#allocation26_spill] sm:$0xff] }
 0x1ce   : > { %v2494_v54 = vadd.f32 %v2462_v1, %v2407_v0  ;;  %v808_v63 = vadd.f32 %v776_v39, %v728_v22  ;;  %v1008_v44 = vadd.f32 %v892_v37, %v872_v6  ;;  %v1024_v38 = vadd.f32 %v932_v49, %v912_v7  ;;  %v8804_v13 = vld [vmem:[#allocation29_spill] sm:$0xff]  ;;  %v8805_v22 = vld [vmem:[#allocation68_spill] sm:$0xff] }
 0x1cf   : > { %v1040_v34 = vadd.f32 %v972_v19, %v952_v43  ;;  %v1136_v53 = vmul.f32 %v8802_v11, %v8557_v52  ;;  %v1156_v51 = vmul.f32 %v8803_v27, %v8494_v10  ;;  %v1176_v5 = vmul.f32 %v8804_v13, %v8496_v31  ;;  %v8806_v0 = vld [vmem:[#allocation24_spill] sm:$0xff]  ;;  %v8807_v7 = vld [vmem:[#allocation65_spill] sm:$0xff] }
 0x1d0   : > { %v2510_v58 = vadd.f32 %v2494_v54, %v2478_v30  ;;  %v6230_v47 = vadd.f32 %v808_v63, %v792_v23  ;;  %v1056_v1 = vadd.f32 %v1024_v38, %v1008_v44  ;;  %v1196_v6 = vmul.f32 %v8805_v22, %v8498_v50  ;;  %v6244_v23 = vld [vmem:[%s4569_s28 + $0xf3] sm:$0xff]  ;;  %v8810_v54 = vld [vmem:[#allocation88_spill] sm:$0xff]  ;;  %v8811_v38 = vld [vmem:[#allocation43_spill] sm:$0xff] }
 0x1d1   : > { %v1072_v37 = vadd.f32 %v1040_v34, %v992_v33  ;;  %v1216_v39 = vmul.f32 %v8500_v15, %v8806_v0  ;;  %v1236_v49 = vmul.f32 %v8563_v35, %v8807_v7  ;;  %v1256_v43 = vmul.f32 %v8564_v40, %v6222_v18  ;;  %8809 = vst [vmem:[#allocation35_spill] sm:$0xff] %v6244_v23  ;;  %v8812_v34 = vld [vmem:[#allocation117_spill] sm:$0xff]  ;;  %v8814_v0 = vld [vmem:[#allocation118_spill] sm:$0xff]  ;;  %v8817_v18 = vld [vmem:[#allocation71_spill] sm:$0xff] }
 0x1d2   : > { %v6241_v19 = vadd.f32 %v8688_v2, %v2510_v58  ;;  %v1272_v30 = vadd.f32 %v1156_v51, %v1136_v53  ;;  %v1288_v13 = vadd.f32 %v1196_v6, %v1176_v5  ;;  %v1400_v33 = vmul.f32 %v8810_v54, %v8750_v16  ;;  %v8813_v27 = vld [vmem:[#allocation45_spill] sm:$0xff]  ;;  %v8815_v53 = vld [vmem:[#allocation78_spill] sm:$0xff] }
 0x1d3   : > { %v1088_v63 = vadd.f32 %v1072_v37, %v1056_v1  ;;  %v1304_v44 = vadd.f32 %v1236_v49, %v1216_v39  ;;  %v1420_v11 = vmul.f32 %v8812_v34, %v8811_v38  ;;  %v1440_v7 = vmul.f32 %v8814_v0, %v8813_v27  ;;  %v8816_v5 = vld [vmem:[#allocation38_spill] sm:$0xff]  ;;  %v8818_v37 = vld [vmem:[#allocation52_spill] sm:$0xff]  ;;  %v8820_v0 = vld [vmem:[#allocation55_spill] sm:$0xff] }
 0x1d4   : > { %8808 = vst [vmem:[#allocation112_spill] sm:$0xff] %v6241_v19  ;;  %2549 = vadd.xlane.f32.xlu1 %v6241_v19  ;;  %v1320_v58 = vadd.f32 %v1288_v13, %v1272_v30  ;;  %v1460_v51 = vmul.f32 %v8815_v53, %v8756_v26  ;;  %v1480_v6 = vmul.f32 %v8758_v28, %v8816_v5  ;;  %v6262_v34 = vld [vmem:[%s4569_s28 + $0xf4] sm:$0xff]  ;;  %v8821_v19 = vld [vmem:[#allocation120_spill] sm:$0xff] }
 0x1d5   : > { %v1500_v54 = vmul.f32 %v8702_v41, %v8817_v18  ;;  %v1336_v1 = vadd.f32 %v1304_v44, %v1256_v43  ;;  %v1520_v39 = vmul.f32 %v8818_v37, %v6244_v23  ;;  %v1536_v49 = vadd.f32 %v1420_v11, %v1400_v33  ;;  %8819 = vst [vmem:[#allocation114_spill] sm:$0xff] %v6262_v34  ;;  %v8822_v53 = vld [vmem:[#allocation56_spill] sm:$0xff]  ;;  %v8823_v36 = vld [vmem:[#allocation121_spill] sm:$0xff]  ;;  %v8824_v5 = vld [vmem:[#allocation58_spill] sm:$0xff] }
 0x1d6   : > { %v1664_v30 = vmul.f32 %v8821_v19, %v8820_v0  ;;  %v1552_v13 = vadd.f32 %v1460_v51, %v1440_v7  ;;  %v1684_v26 = vmul.f32 %v8823_v36, %v8822_v53  ;;  %v8825_v28 = vld [vmem:[#allocation122_spill] sm:$0xff]  ;;  %v8826_v43 = vld [vmem:[#allocation91_spill] sm:$0xff]  ;;  %v8830_v7 = vld [vmem:[#allocation64_spill] sm:$0xff] }
 0x1d7   : > { %v1568_v22 = vadd.f32 %v1500_v54, %v1480_v6  ;;  %v1704_v27 = vmul.f32 %v8825_v28, %v8824_v5  ;;  %v1352_v18 = vadd.f32 %v1336_v1, %v1320_v58  ;;  %v1724_v44 = vmul.f32 %v8826_v43, %v8766_v48  ;;  %v8827_v23 = vld [vmem:[#allocation27_spill] sm:$0xff]  ;;  %v8828_v11 = vld [vmem:[#allocation90_spill] sm:$0xff]  ;;  %v8833_v1 = vld [vmem:[#allocation124_spill] sm:$0xff] }
 0x1d8   : > { %v1744_v33 = vmul.f32 %v8768_v9, %v8827_v23  ;;  %v8829_v37 = vld [vmem:[#allocation63_spill] sm:$0xff]  ;;  %v1584_v38 = vadd.f32 %v1552_v13, %v1536_v49  ;;  %v1784_v51 = vmul.f32 %v8830_v7, %v6262_v34  ;;  %v1800_v36 = vadd.f32 %v1684_v26, %v1664_v30  ;;  %v6279_v6 = vld [vmem:[%s4569_s28 + $0xf5] sm:$0xff] }
 0x1d9   : > { %v1764_v41 = vmul.f32 %v8829_v37, %v8828_v11  ;;  %v1600_v19 = vadd.f32 %v1568_v22, %v1520_v39  ;;  %8831 = vst [vmem:[#allocation115_spill] sm:$0xff] %v6279_v6  ;;  %v1816_v28 = vadd.f32 %v1724_v44, %v1704_v27  ;;  %v8832_v54 = vld [vmem:[#allocation66_spill] sm:$0xff]  ;;  %v8834_v48 = vld [vmem:[#allocation67_spill] sm:$0xff]  ;;  %v8835_v5 = vld [vmem:[#allocation125_spill] sm:$0xff]  ;;  %v2048_v44 = vmul.f32 %v8657_v20, %v6279_v6 }
 0x1da   : > { %v1928_v43 = vmul.f32 %v8833_v1, %v8832_v54  ;;  %v1948_v23 = vmul.f32 %v8835_v5, %v8834_v48  ;;  %v8836_v53 = vld [vmem:[#allocation69_spill] sm:$0xff]  ;;  %v8837_v11 = vld [vmem:[#allocation126_spill] sm:$0xff]  ;;  %v8840_v27 = vld [vmem:[#allocation92_spill] sm:$0xff] }
 0x1db   : > { %v1832_v58 = vadd.f32 %v1764_v41, %v1744_v33  ;;  %v1616_v9 = vadd.f32 %v1600_v19, %v1584_v38  ;;  %v1968_v49 = vmul.f32 %v8837_v11, %v8836_v53  ;;  %v8838_v22 = vld [vmem:[#allocation94_spill] sm:$0xff]  ;;  %v1848_v30 = vadd.f32 %v1816_v28, %v1800_v36  ;;  %v8842_v19 = vld [vmem:[#allocation76_spill] sm:$0xff]  ;;  %v8844_v53 = vld [vmem:[#allocation77_spill] sm:$0xff] }
 0x1dc   : > { %v1988_v39 = vmul.f32 %v8838_v22, %v8775_v17  ;;  %v8839_v13 = vld [vmem:[#allocation30_spill] sm:$0xff]  ;;  %v2028_v41 = vmul.f32 %v8536_v32, %v8840_v27  ;;  %v2064_v38 = vadd.f32 %v1948_v23, %v1928_v43  ;;  %v8843_v11 = vld [vmem:[#allocation96_spill] sm:$0xff]  ;;  %v8845_v22 = vld [vmem:[#allocation97_spill] sm:$0xff] }
 0x1dd   : > { %v2008_v26 = vmul.f32 %v8534_v8, %v8839_v13  ;;  %v1864_v34 = vadd.f32 %v1832_v58, %v1784_v51  ;;  %v6296_v33 = vld [vmem:[%s4569_s28 + $0xf6] sm:$0xff]  ;;  %v2192_v1 = vmul.f32 %v8843_v11, %v8842_v19  ;;  %v2212_v17 = vmul.f32 %v8845_v22, %v8844_v53  ;;  %v8846_v51 = vld [vmem:[#allocation79_spill] sm:$0xff] }
 0x1de   : > { %8841 = vst [vmem:[#allocation116_spill] sm:$0xff] %v6296_v33  ;;  %v2080_v5 = vadd.f32 %v1988_v39, %v1968_v49  ;;  %v2232_v28 = vmul.f32 %v8846_v51, %v4978_v25  ;;  %v8847_v58 = vld [vmem:[#allocation98_spill] sm:$0xff]  ;;  %v8848_v20 = vld [vmem:[#allocation31_spill] sm:$0xff]  ;;  %v8850_v39 = vld [vmem:[#allocation81_spill] sm:$0xff]  ;;  %v2447_v51 = vadd.f32 %v1616_v9, %v1352_v18 }
 0x1df   : > { %v1880_v13 = vadd.f32 %v1864_v34, %v1848_v30  ;;  %v2096_v36 = vadd.f32 %v2028_v41, %v2008_v26  ;;  %v2252_v27 = vmul.f32 %v8847_v58, %v8782_v4  ;;  %v2272_v43 = vmul.f32 %v8784_v46, %v8848_v20  ;;  %v8849_v23 = vld [vmem:[#allocation95_spill] sm:$0xff]  ;;  %v6314_v25 = vld [vmem:[%s4569_s28 + $0xf8] sm:$0xff]  ;;  %v8853_v20 = vld [vmem:[#allocation101_spill] sm:$0xff] }
 0x1e0   : > { %v2112_v6 = vadd.f32 %v2080_v5, %v2064_v38  ;;  %v2292_v49 = vmul.f32 %v8729_v21, %v8849_v23  ;;  %v2312_v11 = vmul.f32 %v8850_v39, %v6296_v33  ;;  %v2328_v34 = vadd.f32 %v2212_v17, %v2192_v1  ;;  %8851 = vst [vmem:[#allocation86_spill] sm:$0xff] %v6314_v25  ;;  %v8852_v38 = vld [vmem:[#allocation100_spill] sm:$0xff]  ;;  %v8854_v39 = vld [vmem:[#allocation102_spill] sm:$0xff]  ;;  %v6323_v17 = vld [vmem:[%s4569_s28 + $0xb0] sm:$0xff] }
 0x1e1   : > { %v2128_v22 = vadd.f32 %v2096_v36, %v2048_v44  ;;  %v2344_v26 = vadd.f32 %v2252_v27, %v2232_v28  ;;  %v2431_v30 = vadd.f32 %v1088_v63, %v6230_v47  ;;  %v609_v5 = vmul.f32 %v8852_v38, %v4606_v55  ;;  %8855 = vst [vmem:[#allocation25_spill] sm:$0xff] %v6323_v17  ;;  %v8856_v63 = vld [vmem:[#allocation82_spill] sm:$0xff]  ;;  %v8857_v1 = vld [vmem:[#allocation99_spill] sm:$0xff]  ;;  %v8889_v33 = vld [vmem:[#allocation20_spill] sm:$0xff] }
 0x1e2   : > { %v2360_v41 = vadd.f32 %v2292_v49, %v2272_v43  ;;  %v629_v58 = vmul.f32 %v8853_v20, %v4610_v56  ;;  %v649_v44 = vmul.f32 %v8854_v39, %v4614_v57  ;;  %v669_v47 = vmul.f32 %v6323_v17, %v4620_v59  ;;  %v6334_v49 = vld [vmem:[%s4569_s28 + $0xf9] sm:$0xff] }
 0x1e3   : > { %v2144_v23 = vadd.f32 %v2128_v22, %v2112_v6  ;;  %v2376_v21 = vadd.f32 %v2344_v26, %v2328_v34  ;;  %v2479_v18 = vadd.f32 %v2447_v51, %v2431_v30  ;;  %v689_v27 = vmul.f32 %v4624_v60, %v8856_v63  ;;  %8858 = vst [vmem:[#allocation26_spill] sm:$0xff] %v6334_v49  ;;  %v8861_v63 = vld [vmem:[#allocation106_spill] sm:$0xff] }
 0x1e4   : > { %v2392_v9 = vadd.f32 %v2360_v41, %v2312_v11  ;;  %v709_v36 = vmul.f32 %v8481_v42, %v8857_v1  ;;  %v729_v6 = vmul.f32 %v8482_v24, %v6314_v25  ;;  %v745_v22 = vadd.f32 %v629_v58, %v609_v5  ;;  %v8859_v11 = vld [vmem:[#allocation104_spill] sm:$0xff]  ;;  %v8860_v41 = vld [vmem:[#allocation105_spill] sm:$0xff]  ;;  %v8863_v5 = vld [vmem:[#allocation34_spill] sm:$0xff] }
 0x1e5   : > { %v2463_v28 = vadd.f32 %v2144_v23, %v1880_v13  ;;  %v761_v43 = vadd.f32 %v669_v47, %v649_v44  ;;  %v873_v30 = vmul.f32 %v8859_v11, %v4642_v3  ;;  %v893_v51 = vmul.f32 %v8860_v41, %v4667_v14  ;;  %v6343_v23 = vld [vmem:[%s4569_s28 + $0xb1] sm:$0xff]  ;;  %v6354_v11 = vld [vmem:[%s4569_s28 + $0xfa] sm:$0xff] }
 0x1e6   : > { %v2408_v34 = vadd.f32 %v2392_v9, %v2376_v21  ;;  %v777_v26 = vadd.f32 %v709_v36, %v689_v27  ;;  %v913_v13 = vmul.f32 %v8861_v63, %v8484_v45  ;;  %8862 = vst [vmem:[#allocation29_spill] sm:$0xff] %v6343_v23  ;;  %v933_v58 = vmul.f32 %v6343_v23, %v8485_v62  ;;  %v8864_v9 = vld [vmem:[#allocation103_spill] sm:$0xff]  ;;  %v8866_v63 = vld [vmem:[#allocation108_spill] sm:$0xff]  ;;  %v8867_v41 = vld [vmem:[#allocation109_spill] sm:$0xff] }
 0x1e7   : > { %v793_v38 = vadd.f32 %v761_v43, %v745_v22  ;;  %v953_v21 = vmul.f32 %v8552_v61, %v8863_v5  ;;  %v973_v27 = vmul.f32 %v8554_v12, %v8864_v9  ;;  %v993_v36 = vmul.f32 %v8555_v29, %v6334_v49  ;;  %8865 = vst [vmem:[#allocation24_spill] sm:$0xff] %v6354_v11  ;;  %v6365_v49 = vld [vmem:[%s4569_s28 + $0xb2] sm:$0xff]  ;;  %v8884_v1 = vld [vmem:[#allocation51_spill] sm:$0xff] }
 0x1e8   : > { %v2495_v44 = vadd.f32 %v2463_v28, %v2408_v34  ;;  %v809_v47 = vadd.f32 %v777_v26, %v729_v6  ;;  %v1009_v22 = vadd.f32 %v893_v51, %v873_v30  ;;  %v1025_v43 = vadd.f32 %v933_v58, %v913_v13  ;;  %v8868_v34 = vld [vmem:[#allocation36_spill] sm:$0xff]  ;;  %8869 = vst [vmem:[#allocation88_spill] sm:$0xff] %v6365_v49  ;;  %v8870_v51 = vld [vmem:[#allocation37_spill] sm:$0xff]  ;;  %v8871_v13 = vld [vmem:[#allocation107_spill] sm:$0xff] }
 0x1e9   : > { %v1137_v23 = vmul.f32 %v8866_v63, %v8557_v52  ;;  %v1157_v25 = vmul.f32 %v8867_v41, %v8494_v10  ;;  %v1041_v6 = vadd.f32 %v973_v27, %v953_v21  ;;  %v1177_v26 = vmul.f32 %v8868_v34, %v8496_v31  ;;  %v8876_v34 = vld [vmem:[#allocation39_spill] sm:$0xff]  ;;  %v8887_v39 = vld [vmem:[#allocation110_spill] sm:$0xff] }
 0x1ea   : > { %v2511_v5 = vadd.f32 %v2495_v44, %v2479_v18  ;;  %v6360_v28 = vadd.f32 %v809_v47, %v793_v38  ;;  %v1057_v9 = vadd.f32 %v1025_v43, %v1009_v22  ;;  %v1197_v30 = vmul.f32 %v6365_v49, %v8498_v50  ;;  %v6379_v47 = vld [vmem:[%s4569_s28 + $0xfb] sm:$0xff]  ;;  %v8874_v43 = vld [vmem:[#allocation40_spill] sm:$0xff] }
 0x1eb   : > { %v1217_v63 = vmul.f32 %v8500_v15, %v8870_v51  ;;  %v1237_v58 = vmul.f32 %v8563_v35, %v8871_v13  ;;  %v1073_v38 = vadd.f32 %v1041_v6, %v993_v36  ;;  %v1257_v21 = vmul.f32 %v8564_v40, %v6354_v11  ;;  %8873 = vst [vmem:[#allocation118_spill] sm:$0xff] %v6379_v47  ;;  %v8875_v51 = vld [vmem:[#allocation43_spill] sm:$0xff]  ;;  %v6389_v11 = vld [vmem:[%s4569_s28 + $0xb3] sm:$0xff] }
 0x1ec   : > { %v6374_v18 = vadd.f32 %v8688_v2, %v2511_v5  ;;  %v1273_v44 = vadd.f32 %v1157_v25, %v1137_v23  ;;  %v1289_v27 = vadd.f32 %v1197_v30, %v1177_v26  ;;  %v1401_v49 = vmul.f32 %v8874_v43, %v8750_v16  ;;  %v8877_v5 = vld [vmem:[#allocation45_spill] sm:$0xff]  ;;  %v8878_v36 = vld [vmem:[#allocation119_spill] sm:$0xff]  ;;  %8879 = vst [vmem:[#allocation38_spill] sm:$0xff] %v6389_v11  ;;  %v8880_v25 = vld [vmem:[#allocation48_spill] sm:$0xff] }
 0x1ed   : > { %v1305_v22 = vadd.f32 %v1237_v58, %v1217_v63  ;;  %v1421_v41 = vmul.f32 %v8876_v34, %v8875_v51  ;;  %v1089_v2 = vadd.f32 %v1073_v38, %v1057_v9  ;;  %v1441_v6 = vmul.f32 %v8878_v36, %v8877_v5  ;;  %v8881_v26 = vld [vmem:[#allocation44_spill] sm:$0xff]  ;;  %v8882_v30 = vld [vmem:[#allocation50_spill] sm:$0xff]  ;;  %v8883_v13 = vld [vmem:[#allocation87_spill] sm:$0xff] }
 0x1ee   : > { %8872 = vst [vmem:[#allocation117_spill] sm:$0xff] %v6374_v18  ;;  %2551 = vadd.xlane.f32.xlu0 %v6374_v18  ;;  %v1461_v23 = vmul.f32 %v6389_v11, %v8880_v25  ;;  %v1481_v63 = vmul.f32 %v8882_v30, %v8881_v26  ;;  %v1321_v58 = vadd.f32 %v1289_v27, %v1273_v44  ;;  %v8885_v18 = vld [vmem:[#allocation52_spill] sm:$0xff]  ;;  %v6400_v38 = vld [vmem:[%s4569_s28 + $0xfc] sm:$0xff]  ;;  %v8891_v27 = vld [vmem:[#allocation21_spill] sm:$0xff] }
 0x1ef   : > { %v1337_v43 = vadd.f32 %v1305_v22, %v1257_v21  ;;  %v1501_v34 = vmul.f32 %v8884_v1, %v8883_v13  ;;  %v1521_v9 = vmul.f32 %v8885_v18, %v6379_v47  ;;  %8886 = vst [vmem:[#allocation120_spill] sm:$0xff] %v6400_v38  ;;  %v1537_v36 = vadd.f32 %v1421_v41, %v1401_v49  ;;  %v8888_v11 = vld [vmem:[#allocation56_spill] sm:$0xff]  ;;  %v8890_v21 = vld [vmem:[#allocation58_spill] sm:$0xff]  ;;  %v8893_v47 = vld [vmem:[#allocation61_spill] sm:$0xff] }
 0x1f0   : > { %v1553_v17 = vadd.f32 %v1461_v23, %v1441_v6  ;;  %v1665_v20 = vmul.f32 %v8887_v39, %v8820_v0  ;;  %v1685_v25 = vmul.f32 %v8889_v33, %v8888_v11  ;;  %v1705_v22 = vmul.f32 %v8891_v27, %v8890_v21  ;;  %v6409_v13 = vld [vmem:[%s4569_s28 + $0xb4] sm:$0xff]  ;;  %v8896_v1 = vld [vmem:[#allocation123_spill] sm:$0xff] }
 0x1f1   : > { %v1353_v26 = vadd.f32 %v1337_v43, %v1321_v58  ;;  %v1569_v44 = vadd.f32 %v1501_v34, %v1481_v63  ;;  %8892 = vst [vmem:[#allocation121_spill] sm:$0xff] %v6409_v13  ;;  %v1725_v18 = vmul.f32 %v6409_v13, %v8893_v47  ;;  %v8894_v41 = vld [vmem:[#allocation46_spill] sm:$0xff]  ;;  %v1765_v39 = vmul.f32 %v8829_v37, %v8896_v1  ;;  %v8898_v33 = vld [vmem:[#allocation23_spill] sm:$0xff]  ;;  %v8903_v37 = vld [vmem:[#allocation72_spill] sm:$0xff] }
 0x1f2   : > { %v1585_v49 = vadd.f32 %v1553_v17, %v1537_v36  ;;  %v8895_v6 = vld [vmem:[#allocation62_spill] sm:$0xff]  ;;  %v1785_v58 = vmul.f32 %v8830_v7, %v6400_v38  ;;  %v1801_v63 = vadd.f32 %v1685_v25, %v1665_v20  ;;  %v1929_v21 = vmul.f32 %v8898_v33, %v8832_v54  ;;  %v8899_v17 = vld [vmem:[#allocation59_spill] sm:$0xff] }
 0x1f3   : > { %v1745_v23 = vmul.f32 %v8895_v6, %v8894_v41  ;;  %v1601_v34 = vadd.f32 %v1569_v44, %v1521_v9  ;;  %v1817_v43 = vadd.f32 %v1725_v18, %v1705_v22  ;;  %v6420_v27 = vld [vmem:[%s4569_s28 + $0xfd] sm:$0xff]  ;;  %v1949_v36 = vmul.f32 %v8899_v17, %v8834_v48  ;;  %v8900_v41 = vld [vmem:[#allocation69_spill] sm:$0xff] }
 0x1f4   : > { %8897 = vst [vmem:[#allocation122_spill] sm:$0xff] %v6420_v27  ;;  %v8901_v6 = vld [vmem:[#allocation127_spill] sm:$0xff]  ;;  %v6429_v1 = vld [vmem:[%s4569_s28 + $0xb5] sm:$0xff] }
 0x1f5   : > { %v1833_v13 = vadd.f32 %v1765_v39, %v1745_v23  ;;  %v1969_v47 = vmul.f32 %v8901_v6, %v8900_v41  ;;  %8902 = vst [vmem:[#allocation27_spill] sm:$0xff] %v6429_v1  ;;  %v1989_v9 = vmul.f32 %v6429_v1, %v8903_v37  ;;  %v1617_v20 = vadd.f32 %v1601_v34, %v1585_v49  ;;  %v8904_v25 = vld [vmem:[#allocation47_spill] sm:$0xff]  ;;  %v8905_v22 = vld [vmem:[#allocation42_spill] sm:$0xff]  ;;  %v8908_v1 = vld [vmem:[#allocation128_spill] sm:$0xff] }
 0x1f6   : > { %v1849_v18 = vadd.f32 %v1817_v43, %v1801_v63  ;;  %v2009_v44 = vmul.f32 %v8534_v8, %v8904_v25  ;;  %v2029_v33 = vmul.f32 %v8536_v32, %v8905_v22  ;;  %v8906_v39 = vld [vmem:[#allocation75_spill] sm:$0xff]  ;;  %v2065_v38 = vadd.f32 %v1949_v36, %v1929_v21  ;;  %v8909_v49 = vld [vmem:[#allocation129_spill] sm:$0xff]  ;;  %v8910_v63 = vld [vmem:[#allocation80_spill] sm:$0xff] }
 0x1f7   : > { %v1865_v23 = vadd.f32 %v1833_v13, %v1785_v58  ;;  %v2049_v17 = vmul.f32 %v8906_v39, %v6420_v27  ;;  %v2081_v6 = vadd.f32 %v1989_v9, %v1969_v47  ;;  %v6440_v41 = vld [vmem:[%s4569_s28 + $0xfe] sm:$0xff]  ;;  %v2193_v37 = vmul.f32 %v8908_v1, %v8842_v19  ;;  %v6449_v22 = vld [vmem:[%s4569_s28 + $0xb6] sm:$0xff]  ;;  %v8914_v9 = vld [vmem:[#allocation32_spill] sm:$0xff] }
 0x1f8   : > { %8907 = vst [vmem:[#allocation124_spill] sm:$0xff] %v6440_v41  ;;  %v2097_v48 = vadd.f32 %v2029_v33, %v2009_v44  ;;  %v2213_v34 = vmul.f32 %v8909_v49, %v8844_v53  ;;  %v8911_v43 = vld [vmem:[#allocation130_spill] sm:$0xff]  ;;  %8912 = vst [vmem:[#allocation125_spill] sm:$0xff] %v6449_v22  ;;  %v2253_v47 = vmul.f32 %v6449_v22, %v8782_v4  ;;  %v8913_v21 = vld [vmem:[#allocation49_spill] sm:$0xff] }
 0x1f9   : > { %v2233_v25 = vmul.f32 %v8911_v43, %v8910_v63  ;;  %v1881_v13 = vadd.f32 %v1865_v23, %v1849_v18  ;;  %v2113_v58 = vadd.f32 %v2081_v6, %v2065_v38  ;;  %v2273_v36 = vmul.f32 %v8784_v46, %v8913_v21  ;;  %v8915_v44 = vld [vmem:[#allocation85_spill] sm:$0xff]  ;;  %v6457_v49 = vld [vmem:[#allocation6 + $0x30] ss:$0 sm:$0xff]  ;;  %v6463_v27 = vld [vmem:[%s4569_s28 + $0x108] sm:$0xff] }
 0x1fa   : > { %v2129_v1 = vadd.f32 %v2097_v48, %v2049_v17  ;;  %v2293_v33 = vmul.f32 %v8915_v44, %v8914_v9  ;;  %v2313_v18 = vmul.f32 %v6457_v49, %v6440_v41  ;;  %v2329_v38 = vadd.f32 %v2213_v34, %v2193_v37  ;;  %8916 = vst [vmem:[#allocation126_spill] sm:$0xff] %v6463_v27  ;;  %v3869_v22 = vld [vmem:[%s4569_s28 + $0x78] sm:$0xff]  ;;  %v6468_v9 = vld [vmem:[%s4569_s28 + $0x90] sm:$0xff] }
 0x1fb   : > { %v2345_v6 = vadd.f32 %v2253_v47, %v2233_v25  ;;  %v2432_v23 = vadd.f32 %v1089_v2, %v6360_v28  ;;  %v2448_v43 = vadd.f32 %v1617_v20, %v1353_v26  ;;  %v610_v48 = vmul.f32 %v3869_v22, %v4606_v55  ;;  %8917 = vst [vmem:[#allocation30_spill] sm:$0xff] %v6468_v9  ;;  %v8918_v37 = vld [vmem:[#allocation54_spill] sm:$0xff]  ;;  %v6475_v26 = vld [vmem:[%s4569_s28 + $0xc0] sm:$0xff]  ;;  %v8920_v22 = vld [vmem:[#allocation53_spill] sm:$0xff] }
 0x1fc   : > { %v2145_v17 = vadd.f32 %v2129_v1, %v2113_v58  ;;  %v2361_v21 = vadd.f32 %v2293_v33, %v2273_v36  ;;  %v630_v44 = vmul.f32 %v6468_v9, %v4610_v56  ;;  %v650_v34 = vmul.f32 %v8918_v37, %v4614_v57  ;;  %8919 = vst [vmem:[#allocation96_spill] sm:$0xff] %v6475_v26  ;;  %v8921_v36 = vld [vmem:[#allocation33_spill] sm:$0xff]  ;;  %v3875_v41 = vld [vmem:[%s4569_s28 + $0x7a] sm:$0xff] }
 0x1fd   : > { %v2377_v28 = vadd.f32 %v2345_v6, %v2329_v38  ;;  %v2480_v2 = vadd.f32 %v2448_v43, %v2432_v23  ;;  %v670_v20 = vmul.f32 %v6475_v26, %v4620_v59  ;;  %v690_v25 = vmul.f32 %v4624_v60, %v8920_v22  ;;  %v6486_v37 = vld [vmem:[%s4569_s28 + $0x109] sm:$0xff]  ;;  %v3872_v6 = vld [vmem:[%s4569_s28 + $0x79] sm:$0xff]  ;;  %v6491_v26 = vld [vmem:[%s4569_s28 + $0x91] sm:$0xff] }
 0x1fe   : > { %v2393_v58 = vadd.f32 %v2361_v21, %v2313_v18  ;;  %v2464_v47 = vadd.f32 %v2145_v17, %v1881_v13  ;;  %v710_v1 = vmul.f32 %v8481_v42, %v8921_v36  ;;  %v730_v33 = vmul.f32 %v8482_v24, %v6463_v27  ;;  %8922 = vst [vmem:[#allocation77_spill] sm:$0xff] %v6486_v37  ;;  %v8924_v21 = vld [vmem:[#allocation60_spill] sm:$0xff] }
 0x1ff   : > { %v746_v43 = vadd.f32 %v630_v44, %v610_v48  ;;  %v762_v38 = vadd.f32 %v670_v20, %v650_v34  ;;  %v874_v23 = vmul.f32 %v3872_v6, %v4642_v3  ;;  %8923 = vst [vmem:[#allocation79_spill] sm:$0xff] %v6491_v26  ;;  %v894_v18 = vmul.f32 %v6491_v26, %v4667_v14  ;;  %v6498_v27 = vld [vmem:[%s4569_s28 + $0xc1] sm:$0xff]  ;;  %v8926_v34 = vld [vmem:[#allocation57_spill] sm:$0xff]  ;;  %v8927_v6 = vld [vmem:[#allocation74_spill] sm:$0xff] }
 0x200   : > { %v2409_v13 = vadd.f32 %v2393_v58, %v2377_v28  ;;  %v778_v17 = vadd.f32 %v710_v1, %v690_v25  ;;  %v914_v22 = vmul.f32 %v8924_v21, %v8484_v45  ;;  %8925 = vst [vmem:[#allocation31_spill] sm:$0xff] %v6498_v27  ;;  %v934_v44 = vmul.f32 %v6498_v27, %v8485_v62  ;;  %v6509_v26 = vld [vmem:[%s4569_s28 + $0x10a] sm:$0xff] }
 0x201   : > { %v794_v48 = vadd.f32 %v762_v38, %v746_v43  ;;  %v954_v20 = vmul.f32 %v8552_v61, %v8926_v34  ;;  %v974_v36 = vmul.f32 %v8554_v12, %v8927_v6  ;;  %v994_v28 = vmul.f32 %v8555_v29, %v6486_v37  ;;  %8928 = vst [vmem:[#allocation81_spill] sm:$0xff] %v6509_v26  ;;  %v6514_v38 = vld [vmem:[%s4569_s28 + $0x92] sm:$0xff]  ;;  %v8930_v6 = vld [vmem:[#allocation68_spill] sm:$0xff] }
 0x202   : > { %v2496_v25 = vadd.f32 %v2464_v47, %v2409_v13  ;;  %v810_v58 = vadd.f32 %v778_v17, %v730_v33  ;;  %v1010_v1 = vadd.f32 %v894_v18, %v874_v23  ;;  %v1026_v21 = vadd.f32 %v934_v44, %v914_v22  ;;  %8929 = vst [vmem:[#allocation100_spill] sm:$0xff] %v6514_v38  ;;  %v6523_v18 = vld [vmem:[%s4569_s28 + $0xc2] sm:$0xff]  ;;  %v8932_v13 = vld [vmem:[#allocation65_spill] sm:$0xff] }
 0x203   : > { %v1042_v9 = vadd.f32 %v974_v36, %v954_v20  ;;  %v1138_v43 = vmul.f32 %v3875_v41, %v8557_v52  ;;  %v1158_v34 = vmul.f32 %v6514_v38, %v8494_v10  ;;  %v1178_v37 = vmul.f32 %v8930_v6, %v8496_v31  ;;  %8931 = vst [vmem:[#allocation82_spill] sm:$0xff] %v6523_v18  ;;  %v8933_v22 = vld [vmem:[#allocation111_spill] sm:$0xff]  ;;  %v6568_v27 = vld [vmem:[%s4569_s28 + $0x10c] sm:$0xff] }
 0x204   : > { %v2512_v47 = vadd.f32 %v2496_v25, %v2480_v2  ;;  %v6520_v33 = vadd.f32 %v810_v58, %v794_v48  ;;  %v1058_v23 = vadd.f32 %v1026_v21, %v1010_v1  ;;  %v1198_v41 = vmul.f32 %v6523_v18, %v8498_v50  ;;  %v6536_v48 = vld [vmem:[%s7681_s2] ss:$0 sm:$0xff]  ;;  %v8943_v18 = vld [vmem:[#allocation52_spill] sm:$0xff]  ;;  %8944 = vst [vmem:[#allocation40_spill] sm:$0xff] %v6568_v27 }
 0x205   : > { %v1074_v36 = vadd.f32 %v1042_v9, %v994_v28  ;;  %v1218_v17 = vmul.f32 %v8500_v15, %v8932_v13  ;;  %v1238_v44 = vmul.f32 %v8563_v35, %v8933_v22  ;;  %v1258_v2 = vmul.f32 %v8564_v40, %v6509_v26  ;;  %v6542_v28 = vld [vmem:[%s4569_s28 + $0x10b] sm:$0xff]  ;;  %v3879_v25 = vld [vmem:[%s4569_s28 + $0x7b] sm:$0xff]  ;;  %v6549_v13 = vld [vmem:[%s4569_s28 + $0x93] sm:$0xff] }
 0x206   : > { %v6539_v20 = vadd.f32 %v6536_v48, %v2512_v47  ;;  %v1274_v6 = vadd.f32 %v1158_v34, %v1138_v43  ;;  %v1290_v9 = vadd.f32 %v1198_v41, %v1178_v37  ;;  %8935 = vst [vmem:[#allocation34_spill] sm:$0xff] %v6542_v28  ;;  %v1402_v58 = vmul.f32 %v3879_v25, %v8750_v16  ;;  %v8937_v47 = vld [vmem:[#allocation78_spill] sm:$0xff]  ;;  %v6557_v34 = vld [vmem:[%s4569_s28 + $0xc3] sm:$0xff] }
 0x207   : > { %v6546_v1 = vadd.f32 %v1074_v36, %v1058_v23  ;;  %v1306_v21 = vadd.f32 %v1238_v44, %v1218_v17  ;;  %8936 = vst [vmem:[#allocation108_spill] sm:$0xff] %v6549_v13  ;;  %v1422_v26 = vmul.f32 %v6549_v13, %v8875_v51  ;;  %v1442_v43 = vmul.f32 %v8937_v47, %v8877_v5  ;;  %v8939_v41 = vld [vmem:[#allocation48_spill] sm:$0xff]  ;;  %v8940_v36 = vld [vmem:[#allocation71_spill] sm:$0xff] }
 0x208   : > { %8934 = vst [vmem:[#allocation104_spill] sm:$0xff] %v6539_v20  ;;  %2553 = vadd.xlane.f32.xlu1 %v6539_v20  ;;  %v1322_v37 = vadd.f32 %v1290_v9, %v1274_v6  ;;  %8938 = vst [vmem:[#allocation37_spill] sm:$0xff] %v6557_v34  ;;  %v1462_v23 = vmul.f32 %v6557_v34, %v8939_v41  ;;  %v1482_v17 = vmul.f32 %v8882_v30, %v8940_v36  ;;  %v8941_v44 = vld [vmem:[#allocation35_spill] sm:$0xff]  ;;  %v6573_v34 = vld [vmem:[%s4569_s28 + $0x94] sm:$0xff] }
 0x209   : > { %v8942_v25 = vld [vmem:[#allocation51_spill] sm:$0xff]  ;;  %v1338_v13 = vadd.f32 %v1306_v21, %v1258_v2  ;;  %v1522_v38 = vmul.f32 %v8943_v18, %v6542_v28  ;;  %v1538_v47 = vadd.f32 %v1422_v26, %v1402_v58  ;;  %8945 = vst [vmem:[#allocation44_spill] sm:$0xff] %v6573_v34  ;;  %v1686_v36 = vmul.f32 %v6573_v34, %v8888_v11  ;;  %v8949_v58 = vld [vmem:[#allocation61_spill] sm:$0xff] }
 0x20a   : > { %v1502_v22 = vmul.f32 %v8942_v25, %v8941_v44  ;;  %v3882_v6 = vld [vmem:[%s4569_s28 + $0x7c] sm:$0xff]  ;;  %v1554_v20 = vadd.f32 %v1462_v23, %v1442_v43  ;;  %v6580_v26 = vld [vmem:[%s4569_s28 + $0xc4] sm:$0xff]  ;;  %v1786_v34 = vmul.f32 %v8830_v7, %v6568_v27 }
 0x20b   : > { %v1666_v9 = vmul.f32 %v3882_v6, %v8820_v0  ;;  %v8946_v44 = vld [vmem:[#allocation58_spill] sm:$0xff]  ;;  %v8947_v2 = vld [vmem:[#allocation91_spill] sm:$0xff]  ;;  %v1354_v28 = vadd.f32 %v1338_v13, %v1322_v37  ;;  %8948 = vst [vmem:[#allocation110_spill] sm:$0xff] %v6580_v26  ;;  %v1726_v18 = vmul.f32 %v6580_v26, %v8949_v58 }
 0x20c   : > { %v1570_v5 = vadd.f32 %v1502_v22, %v1482_v17  ;;  %v1706_v21 = vmul.f32 %v8947_v2, %v8946_v44  ;;  %v8950_v25 = vld [vmem:[#allocation90_spill] sm:$0xff]  ;;  %v8953_v23 = vld [vmem:[#allocation63_spill] sm:$0xff]  ;;  %v1586_v0 = vadd.f32 %v1554_v20, %v1538_v47  ;;  %v6591_v2 = vld [vmem:[%s4569_s28 + $0x10d] sm:$0xff] }
 0x20d   : > { %v8951_v6 = vld [vmem:[#allocation62_spill] sm:$0xff]  ;;  %v1802_v11 = vadd.f32 %v1686_v36, %v1666_v9  ;;  %8954 = vst [vmem:[#allocation46_spill] sm:$0xff] %v6591_v2  ;;  %v6603_v27 = vld [vmem:[%s4569_s28 + $0xc5] sm:$0xff] }
 0x20e   : > { %v1746_v22 = vmul.f32 %v8951_v6, %v8950_v25  ;;  %v8952_v43 = vld [vmem:[#allocation114_spill] sm:$0xff]  ;;  %v1602_v30 = vadd.f32 %v1570_v5, %v1522_v38  ;;  %v1818_v13 = vadd.f32 %v1726_v18, %v1706_v21  ;;  %v8956_v25 = vld [vmem:[#allocation67_spill] sm:$0xff]  ;;  %v8957_v5 = vld [vmem:[#allocation69_spill] sm:$0xff]  ;;  %8959 = vst [vmem:[#allocation47_spill] sm:$0xff] %v6603_v27 }
 0x20f   : > { %v1766_v17 = vmul.f32 %v8953_v23, %v8952_v43  ;;  %v3885_v44 = vld [vmem:[%s4569_s28 + $0x7d] sm:$0xff]  ;;  %v6596_v58 = vld [vmem:[%s4569_s28 + $0x95] sm:$0xff]  ;;  %v8960_v9 = vld [vmem:[#allocation72_spill] sm:$0xff] }
 0x210   : > { %v1930_v26 = vmul.f32 %v3885_v44, %v8832_v54  ;;  %8955 = vst [vmem:[#allocation23_spill] sm:$0xff] %v6596_v58  ;;  %v1950_v43 = vmul.f32 %v6596_v58, %v8956_v25  ;;  %v1618_v20 = vadd.f32 %v1602_v30, %v1586_v0  ;;  %v8958_v38 = vld [vmem:[#allocation94_spill] sm:$0xff]  ;;  %v1990_v18 = vmul.f32 %v6603_v27, %v8960_v9  ;;  %v8961_v36 = vld [vmem:[#allocation92_spill] sm:$0xff] }
 0x211   : > { %v1834_v37 = vadd.f32 %v1766_v17, %v1746_v22  ;;  %v1970_v47 = vmul.f32 %v8958_v38, %v8957_v5  ;;  %v2010_v21 = vmul.f32 %v8534_v8, %v8961_v36  ;;  %v1850_v44 = vadd.f32 %v1818_v13, %v1802_v11  ;;  %v8962_v17 = vld [vmem:[#allocation115_spill] sm:$0xff]  ;;  %v6614_v30 = vld [vmem:[%s4569_s28 + $0x10e] sm:$0xff]  ;;  %v6619_v7 = vld [vmem:[%s4569_s28 + $0x96] sm:$0xff] }
 0x212   : > { %v2030_v54 = vmul.f32 %v8536_v32, %v8962_v17  ;;  %v2050_v0 = vmul.f32 %v8906_v39, %v6591_v2  ;;  %8963 = vst [vmem:[#allocation75_spill] sm:$0xff] %v6614_v30  ;;  %v2066_v38 = vadd.f32 %v1950_v43, %v1930_v26  ;;  %v8964_v5 = vld [vmem:[#allocation97_spill] sm:$0xff]  ;;  %8965 = vst [vmem:[#allocation128_spill] sm:$0xff] %v6619_v7  ;;  %v8966_v13 = vld [vmem:[#allocation98_spill] sm:$0xff] }
 0x213   : > { %v1866_v22 = vadd.f32 %v1834_v37, %v1786_v34  ;;  %v2082_v58 = vadd.f32 %v1990_v18, %v1970_v47  ;;  %v2194_v25 = vmul.f32 %v8964_v5, %v8842_v19  ;;  %v2214_v36 = vmul.f32 %v6619_v7, %v8844_v53  ;;  %v6626_v17 = vld [vmem:[%s4569_s28 + $0xc6] sm:$0xff]  ;;  %v8970_v2 = vld [vmem:[#allocation85_spill] sm:$0xff] }
 0x214   : > { %v2098_v34 = vadd.f32 %v2030_v54, %v2010_v21  ;;  %v2234_v37 = vmul.f32 %v8966_v13, %v8910_v63  ;;  %8967 = vst [vmem:[#allocation49_spill] sm:$0xff] %v6626_v17  ;;  %v2254_v26 = vmul.f32 %v6626_v17, %v8782_v4  ;;  %v8968_v47 = vld [vmem:[#allocation95_spill] sm:$0xff]  ;;  %v8969_v18 = vld [vmem:[#allocation116_spill] sm:$0xff]  ;;  %v2433_v13 = vadd.f32 %v6546_v1, %v6520_v33  ;;  %v6639_v17 = vld [vmem:[%s4569_s28 + $0x110] sm:$0xff] }
 0x215   : > { %v1882_v11 = vadd.f32 %v1866_v22, %v1850_v44  ;;  %v2114_v43 = vadd.f32 %v2082_v58, %v2066_v38  ;;  %v2274_v5 = vmul.f32 %v8784_v46, %v8968_v47  ;;  %v2294_v27 = vmul.f32 %v8970_v2, %v8969_v18  ;;  %8971 = vst [vmem:[#allocation54_spill] sm:$0xff] %v6639_v17  ;;  %v8972_v58 = vld [vmem:[#allocation101_spill] sm:$0xff]  ;;  %v8973_v47 = vld [vmem:[#allocation102_spill] sm:$0xff]  ;;  %v8976_v1 = vld [vmem:[#allocation99_spill] sm:$0xff] }
 0x216   : > { %v2314_v44 = vmul.f32 %v6457_v49, %v6614_v30  ;;  %v2130_v54 = vadd.f32 %v2098_v34, %v2050_v0  ;;  %v2330_v21 = vadd.f32 %v2214_v36, %v2194_v25  ;;  %v2346_v22 = vadd.f32 %v2254_v26, %v2234_v37  ;;  %v8974_v0 = vld [vmem:[#allocation25_spill] sm:$0xff]  ;;  %v6648_v36 = vld [vmem:[%s4569_s28 + $0xc8] sm:$0xff]  ;;  %v8977_v34 = vld [vmem:[#allocation86_spill] sm:$0xff] }
 0x217   : > { %v2362_v7 = vadd.f32 %v2294_v27, %v2274_v5  ;;  %v2449_v63 = vadd.f32 %v1618_v20, %v1354_v28  ;;  %v611_v38 = vmul.f32 %v8972_v58, %v4606_v55  ;;  %v631_v18 = vmul.f32 %v8973_v47, %v4610_v56  ;;  %8975 = vst [vmem:[#allocation53_spill] sm:$0xff] %v6648_v36 }
 0x218   : > { %v2146_v2 = vadd.f32 %v2130_v54, %v2114_v43  ;;  %v2378_v46 = vadd.f32 %v2346_v22, %v2330_v21  ;;  %v651_v25 = vmul.f32 %v8974_v0, %v4614_v57  ;;  %v671_v27 = vmul.f32 %v6648_v36, %v4620_v59  ;;  %v6659_v21 = vld [vmem:[%s4569_s28 + $0x111] sm:$0xff]  ;;  %v9005_v36 = vld [vmem:[#allocation55_spill] sm:$0xff]  ;;  %v9006_v0 = vld [vmem:[#allocation20_spill] sm:$0xff] }
 0x219   : > { %v2394_v33 = vadd.f32 %v2362_v7, %v2314_v44  ;;  %v2481_v28 = vadd.f32 %v2449_v63, %v2433_v13  ;;  %v691_v20 = vmul.f32 %v4624_v60, %v8976_v1  ;;  %v711_v37 = vmul.f32 %v8481_v42, %v8977_v34  ;;  %8978 = vst [vmem:[#allocation60_spill] sm:$0xff] %v6659_v21  ;;  %v8979_v7 = vld [vmem:[#allocation105_spill] sm:$0xff]  ;;  %v8980_v44 = vld [vmem:[#allocation106_spill] sm:$0xff] }
 0x21a   : > { %v2465_v26 = vadd.f32 %v2146_v2, %v1882_v11  ;;  %v731_v43 = vmul.f32 %v8482_v24, %v6639_v17  ;;  %v747_v5 = vadd.f32 %v631_v18, %v611_v38  ;;  %v763_v54 = vadd.f32 %v671_v27, %v651_v25  ;;  %v8981_v1 = vld [vmem:[#allocation29_spill] sm:$0xff]  ;;  %v8983_v38 = vld [vmem:[#allocation103_spill] sm:$0xff] }
 0x21b   : > { %v2410_v22 = vadd.f32 %v2394_v33, %v2378_v46  ;;  %v779_v58 = vadd.f32 %v711_v37, %v691_v20  ;;  %v875_v63 = vmul.f32 %v8979_v7, %v4642_v3  ;;  %v895_v13 = vmul.f32 %v8980_v44, %v4667_v14  ;;  %v6668_v11 = vld [vmem:[%s4569_s28 + $0xc9] sm:$0xff]  ;;  %v8984_v33 = vld [vmem:[#allocation26_spill] sm:$0xff] }
 0x21c   : > { %v795_v47 = vadd.f32 %v763_v54, %v747_v5  ;;  %v915_v2 = vmul.f32 %v8981_v1, %v8484_v45  ;;  %8982 = vst [vmem:[#allocation57_spill] sm:$0xff] %v6668_v11  ;;  %v935_v18 = vmul.f32 %v6668_v11, %v8485_v62  ;;  %v955_v46 = vmul.f32 %v8552_v61, %v8983_v38  ;;  %v6679_v7 = vld [vmem:[%s4569_s28 + $0x112] sm:$0xff]  ;;  %v8987_v1 = vld [vmem:[#allocation36_spill] sm:$0xff] }
 0x21d   : > { %v2497_v25 = vadd.f32 %v2465_v26, %v2410_v22  ;;  %v811_v27 = vadd.f32 %v779_v58, %v731_v43  ;;  %v975_v20 = vmul.f32 %v8554_v12, %v8984_v33  ;;  %v995_v37 = vmul.f32 %v8555_v29, %v6659_v21  ;;  %8985 = vst [vmem:[#allocation68_spill] sm:$0xff] %v6679_v7  ;;  %v8986_v44 = vld [vmem:[#allocation109_spill] sm:$0xff]  ;;  %v8988_v22 = vld [vmem:[#allocation88_spill] sm:$0xff] }
 0x21e   : > { %v1011_v5 = vadd.f32 %v895_v13, %v875_v63  ;;  %v1027_v54 = vadd.f32 %v935_v18, %v915_v2  ;;  %v1139_v11 = vmul.f32 %v8986_v44, %v8557_v52  ;;  %v1159_v17 = vmul.f32 %v8987_v1, %v8494_v10  ;;  %v6690_v21 = vld [vmem:[%s4569_s28 + $0xca] sm:$0xff]  ;;  %v8990_v13 = vld [vmem:[#allocation107_spill] sm:$0xff] }
 0x21f   : > { %v2513_v38 = vadd.f32 %v2497_v25, %v2481_v28  ;;  %v6685_v26 = vadd.f32 %v811_v27, %v795_v47  ;;  %v1043_v43 = vadd.f32 %v975_v20, %v955_v46  ;;  %v1179_v58 = vmul.f32 %v8988_v22, %v8496_v31  ;;  %8989 = vst [vmem:[#allocation65_spill] sm:$0xff] %v6690_v21  ;;  %v8991_v18 = vld [vmem:[#allocation24_spill] sm:$0xff]  ;;  %v6704_v27 = vld [vmem:[%s4569_s28 + $0x113] sm:$0xff]  ;;  %v9002_v22 = vld [vmem:[#allocation51_spill] sm:$0xff] }
 0x220   : > { %v1059_v33 = vadd.f32 %v1027_v54, %v1011_v5  ;;  %v1199_v63 = vmul.f32 %v6690_v21, %v8498_v50  ;;  %v1219_v2 = vmul.f32 %v8500_v15, %v8990_v13  ;;  %v1239_v1 = vmul.f32 %v8563_v35, %v8991_v18  ;;  %8993 = vst [vmem:[#allocation71_spill] sm:$0xff] %v6704_v27  ;;  %v8994_v54 = vld [vmem:[#allocation39_spill] sm:$0xff]  ;;  %v8996_v18 = vld [vmem:[#allocation45_spill] sm:$0xff] }
 0x221   : > { %v6699_v28 = vadd.f32 %v6536_v48, %v2513_v38  ;;  %v1075_v47 = vadd.f32 %v1043_v43, %v995_v37  ;;  %v1259_v46 = vmul.f32 %v8564_v40, %v6679_v7  ;;  %v1275_v25 = vadd.f32 %v1159_v17, %v1139_v11  ;;  %v8995_v13 = vld [vmem:[#allocation119_spill] sm:$0xff]  ;;  %v8997_v37 = vld [vmem:[#allocation38_spill] sm:$0xff]  ;;  %v6714_v7 = vld [vmem:[%s4569_s28 + $0xcb] sm:$0xff] }
 0x222   : > { %v1291_v20 = vadd.f32 %v1199_v63, %v1179_v58  ;;  %v1307_v5 = vadd.f32 %v1239_v1, %v1219_v2  ;;  %v1403_v44 = vmul.f32 %v8994_v54, %v8750_v16  ;;  %v1423_v21 = vmul.f32 %v8995_v13, %v8875_v51  ;;  %8998 = vst [vmem:[#allocation91_spill] sm:$0xff] %v6714_v7  ;;  %v8999_v11 = vld [vmem:[#allocation87_spill] sm:$0xff]  ;;  %v9000_v58 = vld [vmem:[#allocation50_spill] sm:$0xff] }
 0x223   : > { %8992 = vst [vmem:[#allocation78_spill] sm:$0xff] %v6699_v28  ;;  %2555 = vadd.xlane.f32.xlu0 %v6699_v28  ;;  %v1091_v38 = vadd.f32 %v1075_v47, %v1059_v33  ;;  %v1443_v43 = vmul.f32 %v8997_v37, %v8996_v18  ;;  %v1463_v17 = vmul.f32 %v6714_v7, %v8939_v41  ;;  %v9001_v54 = vld [vmem:[#allocation118_spill] sm:$0xff]  ;;  %v9003_v28 = vld [vmem:[#allocation52_spill] sm:$0xff]  ;;  %v9008_v41 = vld [vmem:[#allocation21_spill] sm:$0xff] }
 0x224   : > { %v1483_v63 = vmul.f32 %v9000_v58, %v8999_v11  ;;  %v1323_v2 = vadd.f32 %v1291_v20, %v1275_v25  ;;  %v1339_v1 = vadd.f32 %v1307_v5, %v1259_v46  ;;  %v1503_v13 = vmul.f32 %v9002_v22, %v9001_v54  ;;  %v6725_v47 = vld [vmem:[%s4569_s28 + $0x114] sm:$0xff]  ;;  %v9007_v7 = vld [vmem:[#allocation56_spill] sm:$0xff] }
 0x225   : > { %v1523_v33 = vmul.f32 %v9003_v28, %v6704_v27  ;;  %9004 = vst [vmem:[#allocation90_spill] sm:$0xff] %v6725_v47  ;;  %v1539_v37 = vadd.f32 %v1423_v21, %v1403_v44  ;;  %v1555_v34 = vadd.f32 %v1463_v17, %v1443_v43  ;;  %v1667_v30 = vmul.f32 %v9006_v0, %v9005_v36  ;;  %v9009_v46 = vld [vmem:[#allocation58_spill] sm:$0xff]  ;;  %v9010_v20 = vld [vmem:[#allocation121_spill] sm:$0xff]  ;;  %v9013_v44 = vld [vmem:[#allocation123_spill] sm:$0xff] }
 0x226   : > { %v1687_v18 = vmul.f32 %v9008_v41, %v9007_v7  ;;  %v1355_v11 = vadd.f32 %v1339_v1, %v1323_v2  ;;  %v1571_v25 = vadd.f32 %v1503_v13, %v1483_v63  ;;  %v1707_v5 = vmul.f32 %v9010_v20, %v9009_v46  ;;  %v6734_v54 = vld [vmem:[%s4569_s28 + $0xcc] sm:$0xff]  ;;  %v6745_v20 = vld [vmem:[%s4569_s28 + $0x115] sm:$0xff]  ;;  %v9018_v7 = vld [vmem:[#allocation59_spill] sm:$0xff] }
 0x227   : > { %9011 = vst [vmem:[#allocation94_spill] sm:$0xff] %v6734_v54  ;;  %v9012_v27 = vld [vmem:[#allocation61_spill] sm:$0xff]  ;;  %v1587_v21 = vadd.f32 %v1555_v34, %v1539_v37  ;;  %v1747_v43 = vmul.f32 %v8951_v6, %v9013_v44  ;;  %v9014_v17 = vld [vmem:[#allocation120_spill] sm:$0xff]  ;;  %9016 = vst [vmem:[#allocation72_spill] sm:$0xff] %v6745_v20 }
 0x228   : > { %v1727_v28 = vmul.f32 %v6734_v54, %v9012_v27  ;;  %v1767_v0 = vmul.f32 %v8953_v23, %v9014_v17  ;;  %v9015_v41 = vld [vmem:[#allocation64_spill] sm:$0xff]  ;;  %v1603_v63 = vadd.f32 %v1571_v25, %v1523_v33  ;;  %v1803_v1 = vadd.f32 %v1687_v18, %v1667_v30  ;;  %v9017_v46 = vld [vmem:[#allocation66_spill] sm:$0xff]  ;;  %v9019_v34 = vld [vmem:[#allocation67_spill] sm:$0xff] }
 0x229   : > { %v1787_v2 = vmul.f32 %v9015_v41, %v6725_v47  ;;  %v1931_v36 = vmul.f32 %v9018_v7, %v9017_v46  ;;  %v9020_v37 = vld [vmem:[#allocation127_spill] sm:$0xff]  ;;  %v9021_v44 = vld [vmem:[#allocation69_spill] sm:$0xff] }
 0x22a   : > { %v1819_v13 = vadd.f32 %v1727_v28, %v1707_v5  ;;  %v1835_v54 = vadd.f32 %v1767_v0, %v1747_v43  ;;  %v1951_v27 = vmul.f32 %v9020_v37, %v9019_v34  ;;  %v9022_v6 = vld [vmem:[#allocation27_spill] sm:$0xff]  ;;  %v6754_v17 = vld [vmem:[%s4569_s28 + $0xcd] sm:$0xff]  ;;  %v1619_v30 = vadd.f32 %v1603_v63, %v1587_v21  ;;  %v9024_v28 = vld [vmem:[#allocation42_spill] sm:$0xff] }
 0x22b   : > { %v1971_v22 = vmul.f32 %v9022_v6, %v9021_v44  ;;  %9023 = vst [vmem:[#allocation92_spill] sm:$0xff] %v6754_v17  ;;  %v1991_v33 = vmul.f32 %v6754_v17, %v8960_v9  ;;  %v2011_v25 = vmul.f32 %v8534_v8, %v9024_v28  ;;  %v9025_v5 = vld [vmem:[#allocation122_spill] sm:$0xff]  ;;  %v2051_v0 = vmul.f32 %v8906_v39, %v6745_v20  ;;  %v9027_v17 = vld [vmem:[#allocation129_spill] sm:$0xff] }
 0x22c   : > { %v1851_v18 = vadd.f32 %v1819_v13, %v1803_v1  ;;  %v2031_v7 = vmul.f32 %v8536_v32, %v9025_v5  ;;  %v1867_v43 = vadd.f32 %v1835_v54, %v1787_v2  ;;  %v2067_v37 = vadd.f32 %v1951_v27, %v1931_v36  ;;  %v6765_v47 = vld [vmem:[%s4569_s28 + $0x116] sm:$0xff]  ;;  %v9029_v13 = vld [vmem:[#allocation80_spill] sm:$0xff] }
 0x22d   : > { %v2083_v6 = vadd.f32 %v1991_v33, %v1971_v22  ;;  %9026 = vst [vmem:[#allocation97_spill] sm:$0xff] %v6765_v47  ;;  %v2195_v21 = vmul.f32 %v9027_v17, %v8842_v19  ;;  %v9028_v63 = vld [vmem:[#allocation130_spill] sm:$0xff]  ;;  %v9030_v28 = vld [vmem:[#allocation125_spill] sm:$0xff]  ;;  %v9032_v22 = vld [vmem:[#allocation32_spill] sm:$0xff] }
 0x22e   : > { %v2099_v44 = vadd.f32 %v2031_v7, %v2011_v25  ;;  %v2215_v1 = vmul.f32 %v9028_v63, %v8844_v53  ;;  %v2235_v8 = vmul.f32 %v9030_v28, %v9029_v13  ;;  %v1883_v5 = vadd.f32 %v1867_v43, %v1851_v18  ;;  %v6774_v2 = vld [vmem:[%s4569_s28 + $0xce] sm:$0xff] }
 0x22f   : > { %v2115_v54 = vadd.f32 %v2083_v6, %v2067_v37  ;;  %9031 = vst [vmem:[#allocation98_spill] sm:$0xff] %v6774_v2  ;;  %v2255_v36 = vmul.f32 %v6774_v2, %v8782_v4  ;;  %v9033_v27 = vld [vmem:[#allocation84_spill] sm:$0xff]  ;;  %v9035_v17 = vld [vmem:[#allocation85_spill] sm:$0xff]  ;;  %v2315_v63 = vmul.f32 %v6457_v49, %v6765_v47  ;;  %v2434_v6 = vadd.f32 %v1091_v38, %v6685_v26  ;;  %v6786_v37 = vld [vmem:[%s4569_s28 + $0x120] sm:$0xff] }
 0x230   : > { %v2275_v33 = vmul.f32 %v9033_v27, %v9032_v22  ;;  %v2131_v25 = vadd.f32 %v2099_v44, %v2051_v0  ;;  %v9034_v7 = vld [vmem:[#allocation124_spill] sm:$0xff]  ;;  %v2331_v28 = vadd.f32 %v2215_v1, %v2195_v21  ;;  %v2450_v43 = vadd.f32 %v1619_v30, %v1355_v11  ;;  %9036 = vst [vmem:[#allocation95_spill] sm:$0xff] %v6786_v37  ;;  %v9037_v2 = vld [vmem:[#allocation30_spill] sm:$0xff]  ;;  %v9041_v30 = vld [vmem:[#allocation33_spill] sm:$0xff] }
 0x231   : > { %v2295_v20 = vmul.f32 %v9035_v17, %v9034_v7  ;;  %v2347_v18 = vadd.f32 %v2255_v36, %v2235_v8  ;;  %v612_v4 = vmul.f32 %v9037_v2, %v4606_v55  ;;  %v6791_v0 = vld [vmem:[%s4569_s28 + $0xa8] sm:$0xff]  ;;  %v6798_v38 = vld [vmem:[%s4569_s28 + $0xd8] sm:$0xff] }
 0x232   : > { %v2147_v22 = vadd.f32 %v2131_v25, %v2115_v54  ;;  %9038 = vst [vmem:[#allocation101_spill] sm:$0xff] %v6791_v0  ;;  %v632_v7 = vmul.f32 %v6791_v0, %v4610_v56  ;;  %v9039_v21 = vld [vmem:[#allocation96_spill] sm:$0xff]  ;;  %v2482_v26 = vadd.f32 %v2450_v43, %v2434_v6  ;;  %9040 = vst [vmem:[#allocation102_spill] sm:$0xff] %v6798_v38  ;;  %v9042_v36 = vld [vmem:[#allocation126_spill] sm:$0xff] }
 0x233   : > { %v2363_v44 = vadd.f32 %v2295_v20, %v2275_v33  ;;  %v652_v8 = vmul.f32 %v9039_v21, %v4614_v57  ;;  %v2379_v1 = vadd.f32 %v2347_v18, %v2331_v28  ;;  %v672_v11 = vmul.f32 %v6798_v38, %v4620_v59  ;;  %v6809_v21 = vld [vmem:[%s4569_s28 + $0x121] sm:$0xff]  ;;  %v6814_v38 = vld [vmem:[%s4569_s28 + $0xa9] sm:$0xff] }
 0x234   : > { %v692_v20 = vmul.f32 %v4624_v60, %v9041_v30  ;;  %v2466_v2 = vadd.f32 %v2147_v22, %v1883_v5  ;;  %v712_v33 = vmul.f32 %v8481_v42, %v9042_v36  ;;  %v732_v25 = vmul.f32 %v8482_v24, %v6786_v37  ;;  %9043 = vst [vmem:[#allocation99_spill] sm:$0xff] %v6809_v21  ;;  %v9044_v6 = vld [vmem:[#allocation79_spill] sm:$0xff] }
 0x235   : > { %v2395_v54 = vadd.f32 %v2363_v44, %v2315_v63  ;;  %v748_v28 = vadd.f32 %v632_v7, %v612_v4  ;;  %v764_v18 = vadd.f32 %v672_v11, %v652_v8  ;;  %v876_v43 = vmul.f32 %v9044_v6, %v4642_v3  ;;  %9045 = vst [vmem:[#allocation105_spill] sm:$0xff] %v6814_v38  ;;  %v9046_v44 = vld [vmem:[#allocation31_spill] sm:$0xff]  ;;  %v9048_v8 = vld [vmem:[#allocation74_spill] sm:$0xff]  ;;  %v9049_v6 = vld [vmem:[#allocation77_spill] sm:$0xff] }
 0x236   : > { %v896_v63 = vmul.f32 %v6814_v38, %v4667_v14  ;;  %v780_v22 = vadd.f32 %v712_v33, %v692_v20  ;;  %v916_v30 = vmul.f32 %v9046_v44, %v8484_v45  ;;  %v6821_v37 = vld [vmem:[%s4569_s28 + $0xd9] sm:$0xff]  ;;  %v956_v11 = vmul.f32 %v8552_v61, %v9048_v8  ;;  %v6832_v38 = vld [vmem:[%s4569_s28 + $0x122] sm:$0xff] }
 0x237   : > { %v2411_v5 = vadd.f32 %v2395_v54, %v2379_v1  ;;  %9047 = vst [vmem:[#allocation106_spill] sm:$0xff] %v6821_v37  ;;  %v936_v4 = vmul.f32 %v6821_v37, %v8485_v62  ;;  %v796_v7 = vadd.f32 %v764_v18, %v748_v28  ;;  %v976_v36 = vmul.f32 %v8554_v12, %v9049_v6  ;;  %v9051_v37 = vld [vmem:[#allocation100_spill] sm:$0xff]  ;;  %v9053_v6 = vld [vmem:[#allocation82_spill] sm:$0xff] }
 0x238   : > { %v996_v1 = vmul.f32 %v8555_v29, %v6809_v21  ;;  %v812_v54 = vadd.f32 %v780_v22, %v732_v25  ;;  %v1012_v33 = vadd.f32 %v896_v63, %v876_v43  ;;  %9050 = vst [vmem:[#allocation103_spill] sm:$0xff] %v6832_v38  ;;  %v1140_v28 = vmul.f32 %v9051_v37, %v8557_v52  ;;  %v6837_v18 = vld [vmem:[%s4569_s28 + $0xaa] sm:$0xff]  ;;  %v6846_v43 = vld [vmem:[%s4569_s28 + $0xda] sm:$0xff] }
 0x239   : > { %v2498_v20 = vadd.f32 %v2466_v2, %v2411_v5  ;;  %v1028_v44 = vadd.f32 %v936_v4, %v916_v30  ;;  %v1044_v0 = vadd.f32 %v976_v36, %v956_v11  ;;  %9052 = vst [vmem:[#allocation109_spill] sm:$0xff] %v6837_v18  ;;  %v1160_v8 = vmul.f32 %v6837_v18, %v8494_v10  ;;  %v9055_v63 = vld [vmem:[#allocation111_spill] sm:$0xff]  ;;  %v9056_v22 = vld [vmem:[#allocation81_spill] sm:$0xff] }
 0x23a   : > { %v1180_v47 = vmul.f32 %v9053_v6, %v8496_v31  ;;  %v6843_v2 = vadd.f32 %v812_v54, %v796_v7  ;;  %9054 = vst [vmem:[#allocation36_spill] sm:$0xff] %v6846_v43  ;;  %v1200_v36 = vmul.f32 %v6846_v43, %v8498_v50  ;;  %v1220_v5 = vmul.f32 %v8500_v15, %v9055_v63  ;;  %v6860_v11 = vld [vmem:[%s4569_s28 + $0x123] sm:$0xff] }
 0x23b   : > { %v2514_v21 = vadd.f32 %v2498_v20, %v2482_v26  ;;  %v1060_v25 = vadd.f32 %v1028_v44, %v1012_v33  ;;  %v1076_v37 = vadd.f32 %v1044_v0, %v996_v1  ;;  %v1240_v30 = vmul.f32 %v8563_v35, %v9056_v22  ;;  %9058 = vst [vmem:[#allocation39_spill] sm:$0xff] %v6860_v11  ;;  %v9059_v20 = vld [vmem:[#allocation108_spill] sm:$0xff] }
 0x23c   : > { %v1260_v26 = vmul.f32 %v8564_v40, %v6832_v38  ;;  %v1276_v44 = vadd.f32 %v1160_v8, %v1140_v28  ;;  %v1292_v7 = vadd.f32 %v1200_v36, %v1180_v47  ;;  %v1404_v0 = vmul.f32 %v9059_v20, %v8750_v16  ;;  %v6867_v33 = vld [vmem:[%s4569_s28 + $0xab] sm:$0xff]  ;;  %v6875_v28 = vld [vmem:[%s4569_s28 + $0xdb] sm:$0xff] }
 0x23d   : > { %v6857_v4 = vadd.f32 %v6536_v48, %v2514_v21  ;;  %v6864_v1 = vadd.f32 %v1076_v37, %v1060_v25  ;;  %v1308_v54 = vadd.f32 %v1240_v30, %v1220_v5  ;;  %9060 = vst [vmem:[#allocation119_spill] sm:$0xff] %v6867_v33  ;;  %v1424_v63 = vmul.f32 %v6867_v33, %v8875_v51  ;;  %v9061_v38 = vld [vmem:[#allocation45_spill] sm:$0xff]  ;;  %v9064_v8 = vld [vmem:[#allocation48_spill] sm:$0xff]  ;;  %v9065_v36 = vld [vmem:[#allocation35_spill] sm:$0xff] }
 0x23e   : > { %v9062_v21 = vld [vmem:[#allocation37_spill] sm:$0xff]  ;;  %v1324_v47 = vadd.f32 %v1292_v7, %v1276_v44  ;;  %9063 = vst [vmem:[#allocation87_spill] sm:$0xff] %v6875_v28  ;;  %v1464_v25 = vmul.f32 %v6875_v28, %v9064_v8  ;;  %v1484_v37 = vmul.f32 %v9000_v58, %v9065_v36  ;;  %v9066_v5 = vld [vmem:[#allocation34_spill] sm:$0xff]  ;;  %v9067_v30 = vld [vmem:[#allocation51_spill] sm:$0xff] }
 0x23f   : > { %9057 = vst [vmem:[#allocation107_spill] sm:$0xff] %v6857_v4  ;;  %v1444_v22 = vmul.f32 %v9062_v21, %v9061_v38  ;;  %2557 = vadd.xlane.f32.xlu1 %v6857_v4  ;;  %v1504_v20 = vmul.f32 %v9067_v30, %v9066_v5  ;;  %v1340_v43 = vadd.f32 %v1308_v54, %v1260_v26  ;;  %v9068_v33 = vld [vmem:[#allocation52_spill] sm:$0xff]  ;;  %v9070_v44 = vld [vmem:[#allocation55_spill] sm:$0xff]  ;;  %v9074_v5 = vld [vmem:[#allocation58_spill] sm:$0xff] }
 0x240   : > { %v1524_v6 = vmul.f32 %v9068_v33, %v6860_v11  ;;  %v1540_v21 = vadd.f32 %v1424_v63, %v1404_v0  ;;  %v6886_v18 = vld [vmem:[%s4569_s28 + $0x124] sm:$0xff]  ;;  %v6891_v28 = vld [vmem:[%s4569_s28 + $0xac] sm:$0xff]  ;;  %v9075_v26 = vld [vmem:[#allocation110_spill] sm:$0xff] }
 0x241   : > { %9069 = vst [vmem:[#allocation20_spill] sm:$0xff] %v6886_v18  ;;  %v9071_v7 = vld [vmem:[#allocation44_spill] sm:$0xff]  ;;  %v1556_v38 = vadd.f32 %v1464_v25, %v1444_v22  ;;  %v1572_v51 = vadd.f32 %v1504_v20, %v1484_v37  ;;  %9072 = vst [vmem:[#allocation21_spill] sm:$0xff] %v6891_v28  ;;  %v1708_v54 = vmul.f32 %v9075_v26, %v9074_v5  ;;  %v6898_v11 = vld [vmem:[%s4569_s28 + $0xdc] sm:$0xff] }
 0x242   : > { %v1668_v4 = vmul.f32 %v9071_v7, %v9070_v44  ;;  %v9073_v8 = vld [vmem:[#allocation56_spill] sm:$0xff]  ;;  %v1356_v30 = vadd.f32 %v1340_v43, %v1324_v47  ;;  %9076 = vst [vmem:[#allocation123_spill] sm:$0xff] %v6898_v11  ;;  %v9077_v0 = vld [vmem:[#allocation61_spill] sm:$0xff]  ;;  %v9078_v33 = vld [vmem:[#allocation114_spill] sm:$0xff] }
 0x243   : > { %v1688_v36 = vmul.f32 %v6891_v28, %v9073_v8  ;;  %v1728_v63 = vmul.f32 %v6898_v11, %v9077_v0  ;;  %v9079_v7 = vld [vmem:[#allocation62_spill] sm:$0xff]  ;;  %v9080_v25 = vld [vmem:[#allocation40_spill] sm:$0xff]  ;;  %v1588_v20 = vadd.f32 %v1556_v38, %v1540_v21  ;;  %v1604_v44 = vadd.f32 %v1572_v51, %v1524_v6  ;;  %v9082_v5 = vld [vmem:[#allocation23_spill] sm:$0xff] }
 0x244   : > { %v1748_v22 = vmul.f32 %v9079_v7, %v9078_v33  ;;  %v1768_v37 = vmul.f32 %v8953_v23, %v9080_v25  ;;  %v1788_v28 = vmul.f32 %v9015_v41, %v6886_v18  ;;  %v6909_v43 = vld [vmem:[%s4569_s28 + $0x125] sm:$0xff]  ;;  %v1932_v11 = vmul.f32 %v9082_v5, %v9017_v46  ;;  %v6914_v0 = vld [vmem:[%s4569_s28 + $0xad] sm:$0xff]  ;;  %v6921_v18 = vld [vmem:[%s4569_s28 + $0xdd] sm:$0xff] }
 0x245   : > { %v1804_v8 = vadd.f32 %v1688_v36, %v1668_v4  ;;  %9081 = vst [vmem:[#allocation64_spill] sm:$0xff] %v6909_v43  ;;  %v1820_v47 = vadd.f32 %v1728_v63, %v1708_v54  ;;  %9083 = vst [vmem:[#allocation59_spill] sm:$0xff] %v6914_v0  ;;  %v1952_v33 = vmul.f32 %v6914_v0, %v9019_v34  ;;  %v9084_v51 = vld [vmem:[#allocation69_spill] sm:$0xff]  ;;  %v9085_v6 = vld [vmem:[#allocation47_spill] sm:$0xff] }
 0x246   : > { %v1836_v26 = vadd.f32 %v1768_v37, %v1748_v22  ;;  %v1620_v38 = vadd.f32 %v1604_v44, %v1588_v20  ;;  %v1972_v21 = vmul.f32 %v9085_v6, %v9084_v51  ;;  %9086 = vst [vmem:[#allocation127_spill] sm:$0xff] %v6921_v18  ;;  %v1992_v4 = vmul.f32 %v6921_v18, %v8960_v9  ;;  %v9087_v36 = vld [vmem:[#allocation115_spill] sm:$0xff]  ;;  %v9088_v54 = vld [vmem:[#allocation73_spill] sm:$0xff]  ;;  %v9089_v37 = vld [vmem:[#allocation46_spill] sm:$0xff] }
 0x247   : > { %v2012_v63 = vmul.f32 %v9088_v54, %v9087_v36  ;;  %v1852_v5 = vadd.f32 %v1820_v47, %v1804_v8  ;;  %v2032_v25 = vmul.f32 %v8536_v32, %v9089_v37  ;;  %v2052_v44 = vmul.f32 %v8906_v39, %v6909_v43  ;;  %v6932_v20 = vld [vmem:[%s4569_s28 + $0x126] sm:$0xff]  ;;  %v6937_v46 = vld [vmem:[%s4569_s28 + $0xae] sm:$0xff]  ;;  %v6944_v43 = vld [vmem:[%s4569_s28 + $0xde] sm:$0xff] }
 0x248   : > { %v1868_v22 = vadd.f32 %v1836_v26, %v1788_v28  ;;  %9090 = vst [vmem:[#allocation42_spill] sm:$0xff] %v6932_v20  ;;  %v2068_v6 = vadd.f32 %v1952_v33, %v1932_v11  ;;  %v2084_v0 = vadd.f32 %v1992_v4, %v1972_v21  ;;  %v9091_v51 = vld [vmem:[#allocation128_spill] sm:$0xff]  ;;  %9092 = vst [vmem:[#allocation129_spill] sm:$0xff] %v6937_v46  ;;  %v9093_v26 = vld [vmem:[#allocation49_spill] sm:$0xff] }
 0x249   : > { %v2196_v34 = vmul.f32 %v9091_v51, %v8842_v19  ;;  %v2216_v36 = vmul.f32 %v6937_v46, %v8844_v53  ;;  %v2100_v8 = vadd.f32 %v2032_v25, %v2012_v63  ;;  %v2236_v47 = vmul.f32 %v9093_v26, %v9029_v13  ;;  %9094 = vst [vmem:[#allocation130_spill] sm:$0xff] %v6944_v43  ;;  %v9095_v37 = vld [vmem:[#allocation83_spill] sm:$0xff]  ;;  %v9096_v21 = vld [vmem:[#allocation116_spill] sm:$0xff] }
 0x24a   : > { %v1884_v28 = vadd.f32 %v1868_v22, %v1852_v5  ;;  %v2256_v11 = vmul.f32 %v6944_v43, %v9095_v37  ;;  %v2116_v33 = vadd.f32 %v2084_v0, %v2068_v6  ;;  %v2276_v51 = vmul.f32 %v9033_v27, %v9096_v21  ;;  %v9097_v4 = vld [vmem:[#allocation75_spill] sm:$0xff]  ;;  %v6957_v43 = vld [vmem:[%s4569_s28 + $0x128] sm:$0xff]  ;;  %v3911_v0 = vld [vmem:[%s4569_s28 + $0x98] sm:$0xff] }
 0x24b   : > { %v2296_v46 = vmul.f32 %v9035_v17, %v9097_v4  ;;  %v2316_v5 = vmul.f32 %v6457_v49, %v6932_v20  ;;  %v2132_v25 = vadd.f32 %v2100_v8, %v2052_v44  ;;  %v2332_v63 = vadd.f32 %v2216_v36, %v2196_v34  ;;  %9098 = vst [vmem:[#allocation32_spill] sm:$0xff] %v6957_v43  ;;  %v9099_v21 = vld [vmem:[#allocation25_spill] sm:$0xff]  ;;  %v6966_v36 = vld [vmem:[%s4569_s28 + $0xe0] sm:$0xff]  ;;  %v9103_v8 = vld [vmem:[#allocation54_spill] sm:$0xff] }
 0x24c   : > { %v2348_v22 = vadd.f32 %v2256_v11, %v2236_v47  ;;  %v2435_v26 = vadd.f32 %v6864_v1, %v6843_v2  ;;  %v2451_v13 = vadd.f32 %v1620_v38, %v1356_v30  ;;  %v613_v6 = vmul.f32 %v3911_v0, %v4606_v55  ;;  %v9100_v34 = vld [vmem:[#allocation53_spill] sm:$0xff]  ;;  %9101 = vst [vmem:[#allocation30_spill] sm:$0xff] %v6966_v36  ;;  %v9102_v30 = vld [vmem:[#allocation86_spill] sm:$0xff] }
 0x24d   : > { %v2364_v18 = vadd.f32 %v2296_v46, %v2276_v51  ;;  %v633_v4 = vmul.f32 %v9099_v21, %v4610_v56  ;;  %v2148_v17 = vadd.f32 %v2132_v25, %v2116_v33  ;;  %v653_v44 = vmul.f32 %v9100_v34, %v4614_v57  ;;  %v3919_v34 = vld [vmem:[%s4569_s28 + $0x9c] sm:$0xff] }
 0x24e   : > { %v2380_v20 = vadd.f32 %v2348_v22, %v2332_v63  ;;  %v673_v46 = vmul.f32 %v6966_v36, %v4620_v59  ;;  %v2483_v1 = vadd.f32 %v2451_v13, %v2435_v26  ;;  %v693_v38 = vmul.f32 %v4624_v60, %v9102_v30  ;;  %v6977_v63 = vld [vmem:[%s4569_s28 + $0x129] sm:$0xff]  ;;  %v6986_v30 = vld [vmem:[%s4569_s28 + $0xe1] sm:$0xff] }
 0x24f   : > { %v2396_v2 = vadd.f32 %v2364_v18, %v2316_v5  ;;  %v713_v47 = vmul.f32 %v8481_v42, %v9103_v8  ;;  %v2467_v11 = vadd.f32 %v2148_v17, %v1884_v28  ;;  %v733_v33 = vmul.f32 %v8482_v24, %v6957_v43  ;;  %9104 = vst [vmem:[#allocation33_spill] sm:$0xff] %v6977_v63  ;;  %v3913_v18 = vld [vmem:[%s4569_s28 + $0x99] sm:$0xff]  ;;  %v9105_v26 = vld [vmem:[#allocation29_spill] sm:$0xff] }
 0x250   : > { %v749_v51 = vadd.f32 %v633_v4, %v613_v6  ;;  %v765_v25 = vadd.f32 %v673_v46, %v653_v44  ;;  %v877_v13 = vmul.f32 %v3913_v18, %v4642_v3  ;;  %v897_v5 = vmul.f32 %v9105_v26, %v4667_v14  ;;  %v9106_v17 = vld [vmem:[#allocation57_spill] sm:$0xff]  ;;  %9107 = vst [vmem:[#allocation79_spill] sm:$0xff] %v6986_v30  ;;  %v9108_v6 = vld [vmem:[#allocation26_spill] sm:$0xff]  ;;  %v9126_v8 = vld [vmem:[#allocation51_spill] sm:$0xff] }
 0x251   : > { %v2412_v22 = vadd.f32 %v2396_v2, %v2380_v20  ;;  %v781_v0 = vadd.f32 %v713_v47, %v693_v38  ;;  %v917_v28 = vmul.f32 %v9106_v17, %v8484_v45  ;;  %v937_v4 = vmul.f32 %v6986_v30, %v8485_v62  ;;  %v9109_v2 = vld [vmem:[#allocation60_spill] sm:$0xff]  ;;  %v3915_v26 = vld [vmem:[%s4569_s28 + $0x9a] sm:$0xff] }
 0x252   : > { %v797_v21 = vadd.f32 %v765_v25, %v749_v51  ;;  %v957_v20 = vmul.f32 %v8552_v61, %v9108_v6  ;;  %v977_v38 = vmul.f32 %v8554_v12, %v9109_v2  ;;  %v997_v47 = vmul.f32 %v8555_v29, %v6977_v63  ;;  %v6997_v18 = vld [vmem:[%s4569_s28 + $0x12a] sm:$0xff] }
 0x253   : > { %v2499_v44 = vadd.f32 %v2467_v11, %v2412_v22  ;;  %v813_v46 = vadd.f32 %v781_v0, %v733_v33  ;;  %v1013_v51 = vadd.f32 %v897_v5, %v877_v13  ;;  %v1029_v25 = vadd.f32 %v937_v4, %v917_v28  ;;  %9110 = vst [vmem:[#allocation74_spill] sm:$0xff] %v6997_v18  ;;  %v9111_v17 = vld [vmem:[#allocation88_spill] sm:$0xff]  ;;  %v9112_v22 = vld [vmem:[#allocation65_spill] sm:$0xff] }
 0x254   : > { %v1141_v30 = vmul.f32 %v3915_v26, %v8557_v52  ;;  %v1161_v6 = vmul.f32 %v9111_v17, %v8494_v10  ;;  %v1045_v33 = vadd.f32 %v977_v38, %v957_v20  ;;  %v1181_v0 = vmul.f32 %v9112_v22, %v8496_v31  ;;  %v7008_v13 = vld [vmem:[%s4569_s28 + $0xe2] sm:$0xff]  ;;  %v9119_v22 = vld [vmem:[#allocation38_spill] sm:$0xff] }
 0x255   : > { %v2515_v43 = vadd.f32 %v2499_v44, %v2483_v1  ;;  %v7003_v11 = vadd.f32 %v813_v46, %v797_v21  ;;  %v1061_v63 = vadd.f32 %v1029_v25, %v1013_v51  ;;  %9113 = vst [vmem:[#allocation100_spill] sm:$0xff] %v7008_v13  ;;  %v1201_v5 = vmul.f32 %v7008_v13, %v8498_v50  ;;  %v9114_v28 = vld [vmem:[#allocation24_spill] sm:$0xff]  ;;  %v3917_v25 = vld [vmem:[%s4569_s28 + $0x9b] sm:$0xff] }
 0x256   : > { %v1221_v4 = vmul.f32 %v8500_v15, %v9114_v28  ;;  %v9115_v26 = vld [vmem:[#allocation68_spill] sm:$0xff]  ;;  %v1077_v17 = vadd.f32 %v1045_v33, %v997_v47  ;;  %v1261_v20 = vmul.f32 %v8564_v40, %v6997_v18  ;;  %v1277_v44 = vadd.f32 %v1161_v6, %v1141_v30  ;;  %v9118_v13 = vld [vmem:[#allocation43_spill] sm:$0xff]  ;;  %v9120_v47 = vld [vmem:[#allocation45_spill] sm:$0xff] }
 0x257   : > { %v1241_v1 = vmul.f32 %v8563_v35, %v9115_v26  ;;  %v7017_v21 = vadd.f32 %v6536_v48, %v2515_v43  ;;  %v7022_v46 = vld [vmem:[%s4569_s28 + $0x12b] sm:$0xff]  ;;  %v1293_v38 = vadd.f32 %v1201_v5, %v1181_v0  ;;  %v1405_v28 = vmul.f32 %v3917_v25, %v8750_v16  ;;  %v9121_v33 = vld [vmem:[#allocation91_spill] sm:$0xff]  ;;  %v9124_v0 = vld [vmem:[#allocation118_spill] sm:$0xff] }
 0x258   : > { %9117 = vst [vmem:[#allocation108_spill] sm:$0xff] %v7022_v46  ;;  %v1425_v26 = vmul.f32 %v9119_v22, %v9118_v13  ;;  %v1093_v43 = vadd.f32 %v1077_v17, %v1061_v63  ;;  %v1445_v2 = vmul.f32 %v9121_v33, %v9120_v47  ;;  %v7032_v18 = vld [vmem:[%s4569_s28 + $0xe3] sm:$0xff]  ;;  %v1485_v5 = vmul.f32 %v9000_v58, %v9124_v0  ;;  %v7043_v17 = vld [vmem:[%s4569_s28 + $0x12c] sm:$0xff] }
 0x259   : > { %9116 = vst [vmem:[#allocation111_spill] sm:$0xff] %v7017_v21  ;;  %v1309_v51 = vadd.f32 %v1241_v1, %v1221_v4  ;;  %2559 = vadd.xlane.f32.xlu0 %v7017_v21  ;;  %9122 = vst [vmem:[#allocation35_spill] sm:$0xff] %v7032_v18  ;;  %v9123_v30 = vld [vmem:[#allocation48_spill] sm:$0xff]  ;;  %v1325_v4 = vadd.f32 %v1293_v38, %v1277_v44  ;;  %v9125_v25 = vld [vmem:[#allocation71_spill] sm:$0xff] }
 0x25a   : > { %v1465_v6 = vmul.f32 %v7032_v18, %v9123_v30  ;;  %v1505_v22 = vmul.f32 %v9126_v8, %v9125_v25  ;;  %v9127_v21 = vld [vmem:[#allocation52_spill] sm:$0xff]  ;;  %9128 = vst [vmem:[#allocation44_spill] sm:$0xff] %v7043_v17  ;;  %v1541_v33 = vadd.f32 %v1425_v26, %v1405_v28  ;;  %v9129_v47 = vld [vmem:[#allocation55_spill] sm:$0xff]  ;;  %v9131_v13 = vld [vmem:[#allocation121_spill] sm:$0xff] }
 0x25b   : > { %v1341_v1 = vadd.f32 %v1309_v51, %v1261_v20  ;;  %v1525_v63 = vmul.f32 %v9127_v21, %v7022_v46  ;;  %v1669_v18 = vmul.f32 %v3919_v34, %v9129_v47  ;;  %v9130_v30 = vld [vmem:[#allocation56_spill] sm:$0xff]  ;;  %v9132_v38 = vld [vmem:[#allocation58_spill] sm:$0xff]  ;;  %v9135_v46 = vld [vmem:[#allocation61_spill] sm:$0xff] }
 0x25c   : > { %v1557_v36 = vadd.f32 %v1465_v6, %v1445_v2  ;;  %v1689_v0 = vmul.f32 %v9131_v13, %v9130_v30  ;;  %v1573_v20 = vadd.f32 %v1505_v22, %v1485_v5  ;;  %v9133_v51 = vld [vmem:[#allocation94_spill] sm:$0xff]  ;;  %v7052_v8 = vld [vmem:[%s4569_s28 + $0xe4] sm:$0xff]  ;;  %v1789_v13 = vmul.f32 %v9015_v41, %v7043_v17  ;;  %v7063_v22 = vld [vmem:[%s4569_s28 + $0x12d] sm:$0xff] }
 0x25d   : > { %v1357_v44 = vadd.f32 %v1341_v1, %v1325_v4  ;;  %v1709_v25 = vmul.f32 %v9133_v51, %v9132_v38  ;;  %9134 = vst [vmem:[#allocation114_spill] sm:$0xff] %v7052_v8  ;;  %v1729_v26 = vmul.f32 %v7052_v8, %v9135_v46  ;;  %v9136_v28 = vld [vmem:[#allocation120_spill] sm:$0xff]  ;;  %v9137_v21 = vld [vmem:[#allocation90_spill] sm:$0xff]  ;;  %9138 = vst [vmem:[#allocation23_spill] sm:$0xff] %v7063_v22 }
 0x25e   : > { %v1589_v2 = vadd.f32 %v1557_v36, %v1541_v33  ;;  %v1749_v6 = vmul.f32 %v9079_v7, %v9136_v28  ;;  %v1769_v34 = vmul.f32 %v8953_v23, %v9137_v21  ;;  %v1605_v5 = vadd.f32 %v1573_v20, %v1525_v63  ;;  %v3921_v51 = vld [vmem:[%s4569_s28 + $0x9d] sm:$0xff]  ;;  %v9142_v7 = vld [vmem:[#allocation69_spill] sm:$0xff]  ;;  %v9143_v46 = vld [vmem:[#allocation92_spill] sm:$0xff] }
 0x25f   : > { %v1805_v4 = vadd.f32 %v1689_v0, %v1669_v18  ;;  %v1821_v1 = vadd.f32 %v1729_v26, %v1709_v25  ;;  %v9139_v38 = vld [vmem:[#allocation66_spill] sm:$0xff]  ;;  %v9140_v33 = vld [vmem:[#allocation67_spill] sm:$0xff]  ;;  %v1973_v21 = vmul.f32 %v9143_v46, %v9142_v7  ;;  %v7083_v17 = vld [vmem:[%s4569_s28 + $0x12e] sm:$0xff] }
 0x260   : > { %v1933_v30 = vmul.f32 %v3921_v51, %v9139_v38  ;;  %v1837_v36 = vadd.f32 %v1769_v34, %v1749_v6  ;;  %v9141_v8 = vld [vmem:[#allocation27_spill] sm:$0xff]  ;;  %v1621_v25 = vadd.f32 %v1605_v5, %v1589_v2  ;;  %v9145_v0 = vld [vmem:[#allocation122_spill] sm:$0xff]  ;;  %v9146_v51 = vld [vmem:[#allocation72_spill] sm:$0xff]  ;;  %9147 = vst [vmem:[#allocation73_spill] sm:$0xff] %v7083_v17 }
 0x261   : > { %v1953_v28 = vmul.f32 %v9141_v8, %v9140_v33  ;;  %v7072_v23 = vld [vmem:[%s4569_s28 + $0xe5] sm:$0xff]  ;;  %v1853_v63 = vadd.f32 %v1821_v1, %v1805_v4  ;;  %v2013_v20 = vmul.f32 %v9088_v54, %v9145_v0  ;;  %v2033_v26 = vmul.f32 %v8536_v32, %v9146_v51  ;;  %v9148_v5 = vld [vmem:[#allocation125_spill] sm:$0xff]  ;;  %v9150_v0 = vld [vmem:[#allocation98_spill] sm:$0xff] }
 0x262   : > { %9144 = vst [vmem:[#allocation115_spill] sm:$0xff] %v7072_v23  ;;  %v1993_v18 = vmul.f32 %v7072_v23, %v8960_v9  ;;  %v1869_v6 = vadd.f32 %v1837_v36, %v1789_v13  ;;  %v2053_v8 = vmul.f32 %v8906_v39, %v7063_v22  ;;  %v3923_v33 = vld [vmem:[%s4569_s28 + $0x9e] sm:$0xff]  ;;  %v2217_v4 = vmul.f32 %v9148_v5, %v8844_v53  ;;  %v9149_v1 = vld [vmem:[#allocation80_spill] sm:$0xff] }
 0x263   : > { %v2069_v34 = vadd.f32 %v1953_v28, %v1933_v30  ;;  %v2101_v7 = vadd.f32 %v2033_v26, %v2013_v20  ;;  %v2197_v2 = vmul.f32 %v3923_v33, %v8842_v19  ;;  %v2237_v23 = vmul.f32 %v9150_v0, %v9149_v1  ;;  %v7092_v36 = vld [vmem:[%s4569_s28 + $0xe6] sm:$0xff]  ;;  %v9153_v20 = vld [vmem:[#allocation97_spill] sm:$0xff] }
 0x264   : > { %v2085_v46 = vadd.f32 %v1993_v18, %v1973_v21  ;;  %v1885_v51 = vadd.f32 %v1869_v6, %v1853_v63  ;;  %9151 = vst [vmem:[#allocation128_spill] sm:$0xff] %v7092_v36  ;;  %v2257_v21 = vmul.f32 %v7092_v36, %v9095_v37  ;;  %v9152_v30 = vld [vmem:[#allocation124_spill] sm:$0xff]  ;;  %v9154_v33 = vld [vmem:[#allocation85_spill] sm:$0xff]  ;;  %v2317_v5 = vmul.f32 %v6457_v49, %v7083_v17  ;;  %v594_v6 = vld [vmem:[%s4569_s28 + $0x138] sm:$0xff] }
 0x265   : > { %v2277_v28 = vmul.f32 %v9033_v27, %v9152_v30  ;;  %v2133_v18 = vadd.f32 %v2101_v7, %v2053_v8  ;;  %v2297_v26 = vmul.f32 %v9154_v33, %v9153_v20  ;;  %v2333_v22 = vadd.f32 %v2217_v4, %v2197_v2  ;;  %v9156_v7 = vld [vmem:[#allocation96_spill] sm:$0xff]  ;;  %v9157_v20 = vld [vmem:[#allocation102_spill] sm:$0xff]  ;;  %v9159_v4 = vld [vmem:[#allocation95_spill] sm:$0xff] }
 0x266   : > { %v2117_v13 = vadd.f32 %v2085_v46, %v2069_v34  ;;  %v2349_v0 = vadd.f32 %v2257_v21, %v2237_v23  ;;  %v2436_v46 = vadd.f32 %v1093_v43, %v7003_v11  ;;  %v2452_v63 = vadd.f32 %v1621_v25, %v1357_v44  ;;  %v9155_v34 = vld [vmem:[#allocation101_spill] sm:$0xff]  ;;  %v9158_v43 = vld [vmem:[#allocation126_spill] sm:$0xff] }
 0x267   : > { %v614_v36 = vmul.f32 %v9155_v34, %v4606_v55  ;;  %v2365_v30 = vadd.f32 %v2297_v26, %v2277_v28  ;;  %v634_v8 = vmul.f32 %v9156_v7, %v4610_v56  ;;  %v654_v33 = vmul.f32 %v9157_v20, %v4614_v57  ;;  %v3925_v23 = vld [vmem:[%s4569_s28 + $0xf0] sm:$0xff]  ;;  %v858_v28 = vld [vmem:[%s4569_s28 + $0x139] sm:$0xff] }
 0x268   : > { %v2149_v37 = vadd.f32 %v2133_v18, %v2117_v13  ;;  %v2381_v27 = vadd.f32 %v2349_v0, %v2333_v22  ;;  %v2484_v49 = vadd.f32 %v2452_v63, %v2436_v46  ;;  %v674_v11 = vmul.f32 %v3925_v23, %v4620_v59  ;;  %v9160_v22 = vld [vmem:[#allocation105_spill] sm:$0xff]  ;;  %v9161_v20 = vld [vmem:[#allocation31_spill] sm:$0xff]  ;;  %v9184_v17 = vld [vmem:[#allocation58_spill] sm:$0xff] }
 0x269   : > { %v694_v44 = vmul.f32 %v4624_v60, %v9158_v43  ;;  %v2397_v25 = vadd.f32 %v2365_v30, %v2317_v5  ;;  %v714_v13 = vmul.f32 %v8481_v42, %v9159_v4  ;;  %v734_v21 = vmul.f32 %v8482_v24, %v594_v6  ;;  %v9162_v5 = vld [vmem:[#allocation106_spill] sm:$0xff]  ;;  %v9163_v6 = vld [vmem:[#allocation77_spill] sm:$0xff] }
 0x26a   : > { %v2468_v2 = vadd.f32 %v2149_v37, %v1885_v51  ;;  %v750_v18 = vadd.f32 %v634_v8, %v614_v36  ;;  %v766_v26 = vadd.f32 %v674_v11, %v654_v33  ;;  %v878_v0 = vmul.f32 %v9160_v22, %v4642_v3  ;;  %v3926_v51 = vld [vmem:[%s4569_s28 + $0xf1] sm:$0xff]  ;;  %v9164_v33 = vld [vmem:[#allocation99_spill] sm:$0xff] }
 0x26b   : > { %v898_v46 = vmul.f32 %v9161_v20, %v4667_v14  ;;  %v2413_v63 = vadd.f32 %v2397_v25, %v2381_v27  ;;  %v782_v34 = vadd.f32 %v714_v13, %v694_v44  ;;  %v918_v37 = vmul.f32 %v9162_v5, %v8484_v45  ;;  %v1122_v25 = vld [vmem:[%s4569_s28 + $0x13a] sm:$0xff]  ;;  %v9165_v13 = vld [vmem:[#allocation109_spill] sm:$0xff]  ;;  %v9167_v20 = vld [vmem:[#allocation36_spill] sm:$0xff] }
 0x26c   : > { %v938_v30 = vmul.f32 %v3926_v51, %v8485_v62  ;;  %v798_v7 = vadd.f32 %v766_v26, %v750_v18  ;;  %v958_v36 = vmul.f32 %v8552_v61, %v9163_v6  ;;  %v978_v8 = vmul.f32 %v8554_v12, %v9164_v33  ;;  %v9166_v18 = vld [vmem:[#allocation82_spill] sm:$0xff] }
 0x26d   : > { %v998_v23 = vmul.f32 %v8555_v29, %v858_v28  ;;  %v2500_v11 = vadd.f32 %v2468_v2, %v2413_v63  ;;  %v814_v43 = vadd.f32 %v782_v34, %v734_v21  ;;  %v1014_v27 = vadd.f32 %v898_v46, %v878_v0  ;;  %v3927_v2 = vld [vmem:[%s4569_s28 + $0xf2] sm:$0xff]  ;;  %v9169_v34 = vld [vmem:[#allocation103_spill] sm:$0xff] }
 0x26e   : > { %v1030_v44 = vadd.f32 %v938_v30, %v918_v37  ;;  %v1046_v4 = vadd.f32 %v978_v8, %v958_v36  ;;  %v1142_v22 = vmul.f32 %v9165_v13, %v8557_v52  ;;  %v1162_v26 = vmul.f32 %v9166_v18, %v8494_v10  ;;  %v9168_v46 = vld [vmem:[#allocation81_spill] sm:$0xff]  ;;  %v1386_v33 = vld [vmem:[%s4569_s28 + $0x13b] sm:$0xff] }
 0x26f   : > { %v1182_v5 = vmul.f32 %v9167_v20, %v8496_v31  ;;  %v2516_v51 = vadd.f32 %v2500_v11, %v2484_v49  ;;  %v7138_v6 = vadd.f32 %v814_v43, %v798_v7  ;;  %v1202_v21 = vmul.f32 %v3927_v2, %v8498_v50  ;;  %v9171_v8 = vld [vmem:[#allocation119_spill] sm:$0xff]  ;;  %v9174_v13 = vld [vmem:[#allocation45_spill] sm:$0xff] }
 0x270   : > { %v1062_v28 = vadd.f32 %v1030_v44, %v1014_v27  ;;  %v1078_v0 = vadd.f32 %v1046_v4, %v998_v23  ;;  %v1222_v63 = vmul.f32 %v8500_v15, %v9168_v46  ;;  %v1242_v37 = vmul.f32 %v8563_v35, %v9169_v34  ;;  %v9172_v27 = vld [vmem:[#allocation43_spill] sm:$0xff]  ;;  %v9173_v44 = vld [vmem:[#allocation37_spill] sm:$0xff]  ;;  %v9180_v46 = vld [vmem:[#allocation52_spill] sm:$0xff] }
 0x271   : > { %v1262_v30 = vmul.f32 %v8564_v40, %v1122_v25  ;;  %v7148_v36 = vadd.f32 %v6536_v48, %v2516_v51  ;;  %v1278_v49 = vadd.f32 %v1162_v26, %v1142_v22  ;;  %v1294_v7 = vadd.f32 %v1202_v21, %v1182_v5  ;;  %v9175_v18 = vld [vmem:[#allocation87_spill] sm:$0xff]  ;;  %v3928_v25 = vld [vmem:[%s4569_s28 + $0xf3] sm:$0xff]  ;;  %v9176_v22 = vld [vmem:[#allocation48_spill] sm:$0xff] }
 0x272   : > { %v1406_v11 = vmul.f32 %v9171_v8, %v8750_v16  ;;  %v1094_v43 = vadd.f32 %v1078_v0, %v1062_v28  ;;  %v1310_v23 = vadd.f32 %v1242_v37, %v1222_v63  ;;  %v1426_v4 = vmul.f32 %v9173_v44, %v9172_v27  ;;  %v9177_v5 = vld [vmem:[#allocation34_spill] sm:$0xff]  ;;  %v9178_v2 = vld [vmem:[#allocation39_spill] sm:$0xff]  ;;  %v9181_v8 = vld [vmem:[#allocation21_spill] sm:$0xff] }
 0x273   : > { %9170 = vst [vmem:[#allocation116_spill] sm:$0xff] %v7148_v36  ;;  %v1446_v20 = vmul.f32 %v9175_v18, %v9174_v13  ;;  %2561 = vadd.xlane.f32.xlu1 %v7148_v36  ;;  %v1326_v48 = vadd.f32 %v1294_v7, %v1278_v49  ;;  %v1466_v26 = vmul.f32 %v3928_v25, %v9176_v22  ;;  %v9179_v21 = vld [vmem:[#allocation51_spill] sm:$0xff]  ;;  %v9182_v7 = vld [vmem:[#allocation56_spill] sm:$0xff]  ;;  %v9183_v36 = vld [vmem:[#allocation110_spill] sm:$0xff] }
 0x274   : > { %v1486_v51 = vmul.f32 %v9000_v58, %v9177_v5  ;;  %v1506_v28 = vmul.f32 %v9179_v21, %v9178_v2  ;;  %v1342_v0 = vadd.f32 %v1310_v23, %v1262_v30  ;;  %v1526_v63 = vmul.f32 %v9180_v46, %v1386_v33  ;;  %v1650_v37 = vld [vmem:[%s4569_s28 + $0x13c] sm:$0xff]  ;;  %v3929_v2 = vld [vmem:[%s4569_s28 + $0xf4] sm:$0xff]  ;;  %v9187_v33 = vld [vmem:[#allocation40_spill] sm:$0xff] }
 0x275   : > { %v1542_v34 = vadd.f32 %v1426_v4, %v1406_v11  ;;  %v1670_v44 = vmul.f32 %v9181_v8, %v9129_v47  ;;  %v1558_v18 = vadd.f32 %v1466_v26, %v1446_v20  ;;  %v1690_v25 = vmul.f32 %v9183_v36, %v9182_v7  ;;  %v9185_v22 = vld [vmem:[#allocation123_spill] sm:$0xff]  ;;  %v9186_v30 = vld [vmem:[#allocation61_spill] sm:$0xff]  ;;  %v9188_v11 = vld [vmem:[#allocation62_spill] sm:$0xff] }
 0x276   : > { %v1574_v49 = vadd.f32 %v1506_v28, %v1486_v51  ;;  %v1710_v5 = vmul.f32 %v9185_v22, %v9184_v17  ;;  %v1358_v58 = vadd.f32 %v1342_v0, %v1326_v48  ;;  %v1730_v23 = vmul.f32 %v3929_v2, %v9186_v30  ;;  %v9189_v46 = vld [vmem:[#allocation20_spill] sm:$0xff]  ;;  %v9190_v21 = vld [vmem:[#allocation63_spill] sm:$0xff] }
 0x277   : > { %v1750_v4 = vmul.f32 %v9188_v11, %v9187_v33  ;;  %v1770_v13 = vmul.f32 %v9190_v21, %v9189_v46  ;;  %v1590_v8 = vadd.f32 %v1558_v18, %v1542_v34  ;;  %v1790_v26 = vmul.f32 %v9015_v41, %v1650_v37  ;;  %v1914_v51 = vld [vmem:[%s4569_s28 + $0x13d] sm:$0xff]  ;;  %v9194_v33 = vld [vmem:[#allocation69_spill] sm:$0xff] }
 0x278   : > { %v1606_v20 = vadd.f32 %v1574_v49, %v1526_v63  ;;  %v1806_v36 = vadd.f32 %v1690_v25, %v1670_v44  ;;  %v1822_v28 = vadd.f32 %v1730_v23, %v1710_v5  ;;  %v9191_v48 = vld [vmem:[#allocation59_spill] sm:$0xff]  ;;  %v3930_v46 = vld [vmem:[%s4569_s28 + $0xf5] sm:$0xff]  ;;  %v2054_v25 = vmul.f32 %v8906_v39, %v1914_v51 }
 0x279   : > { %v1838_v22 = vadd.f32 %v1770_v13, %v1750_v4  ;;  %v1934_v0 = vmul.f32 %v9191_v48, %v9139_v38  ;;  %v9192_v17 = vld [vmem:[#allocation67_spill] sm:$0xff]  ;;  %v1994_v63 = vmul.f32 %v3930_v46, %v8960_v9  ;;  %v9196_v34 = vld [vmem:[#allocation46_spill] sm:$0xff]  ;;  %v9197_v13 = vld [vmem:[#allocation64_spill] sm:$0xff] }
 0x27a   : > { %v9193_v2 = vld [vmem:[#allocation47_spill] sm:$0xff]  ;;  %v1622_v7 = vadd.f32 %v1606_v20, %v1590_v8  ;;  %v2014_v37 = vmul.f32 %v9088_v54, %v9196_v34  ;;  %v1854_v44 = vadd.f32 %v1822_v28, %v1806_v36  ;;  %v2034_v49 = vmul.f32 %v8536_v32, %v9197_v13  ;;  %v9198_v8 = vld [vmem:[#allocation129_spill] sm:$0xff]  ;;  %v9200_v36 = vld [vmem:[#allocation130_spill] sm:$0xff] }
 0x27b   : > { %v1954_v30 = vmul.f32 %v9193_v2, %v9192_v17  ;;  %v9195_v11 = vld [vmem:[#allocation127_spill] sm:$0xff]  ;;  %v1870_v18 = vadd.f32 %v1838_v22, %v1790_v26  ;;  %v9199_v20 = vld [vmem:[#allocation49_spill] sm:$0xff]  ;;  %v2238_v26 = vmul.f32 %v9200_v36, %v9149_v1 }
 0x27c   : > { %v1974_v47 = vmul.f32 %v9195_v11, %v9194_v33  ;;  %v2178_v5 = vld [vmem:[%s4569_s28 + $0x13e] sm:$0xff]  ;;  %v2198_v11 = vmul.f32 %v9198_v8, %v8842_v19  ;;  %v2218_v48 = vmul.f32 %v9199_v20, %v8844_v53  ;;  %v2102_v46 = vadd.f32 %v2034_v49, %v2014_v37  ;;  %v3931_v28 = vld [vmem:[%s4569_s28 + $0xf6] sm:$0xff] }
 0x27d   : > { %v2070_v23 = vadd.f32 %v1954_v30, %v1934_v0  ;;  %v1886_v2 = vadd.f32 %v1870_v18, %v1854_v44  ;;  %v9201_v22 = vld [vmem:[#allocation83_spill] sm:$0xff]  ;;  %v9203_v30 = vld [vmem:[#allocation84_spill] sm:$0xff]  ;;  %v9204_v0 = vld [vmem:[#allocation42_spill] sm:$0xff]  ;;  %v2437_v20 = vadd.f32 %v1094_v43, %v7138_v6  ;;  %v2453_v1 = vadd.f32 %v1622_v7, %v1358_v58 }
 0x27e   : > { %v2086_v4 = vadd.f32 %v1994_v63, %v1974_v47  ;;  %v2258_v34 = vmul.f32 %v3931_v28, %v9201_v22  ;;  %v9202_v13 = vld [vmem:[#allocation75_spill] sm:$0xff]  ;;  %v9205_v63 = vld [vmem:[#allocation85_spill] sm:$0xff]  ;;  %v2134_v37 = vadd.f32 %v2102_v46, %v2054_v25  ;;  %v2334_v18 = vadd.f32 %v2218_v48, %v2198_v11  ;;  %v3934_v11 = vld [vmem:[%s4569_s28 + $0xf8] sm:$0xff] }
 0x27f   : > { %v2278_v47 = vmul.f32 %v9203_v30, %v9202_v13  ;;  %v2298_v8 = vmul.f32 %v9205_v63, %v9204_v0  ;;  %v7206_v19 = vld [vmem:[#allocation6 + $0x30] ss:$0 sm:$0xff]  ;;  %v9206_v13 = vld [vmem:[#allocation53_spill] sm:$0xff]  ;;  %v675_v48 = vmul.f32 %v3934_v11, %v4620_v59  ;;  %v2485_v58 = vadd.f32 %v2453_v1, %v2437_v20  ;;  %v9208_v43 = vld [vmem:[#allocation54_spill] sm:$0xff] }
 0x280   : > { %v2118_v51 = vadd.f32 %v2086_v4, %v2070_v23  ;;  %v2318_v44 = vmul.f32 %v7206_v19, %v2178_v5  ;;  %v2350_v49 = vadd.f32 %v2258_v34, %v2238_v26  ;;  %v595_v28 = vld [vmem:[%s4569_s28 + $0x140] sm:$0xff]  ;;  %v3933_v23 = vld [vmem:[%s4569_s28 + $0xb0] sm:$0xff]  ;;  %v635_v0 = vmul.f32 %v9206_v13, %v4610_v56  ;;  %v9207_v5 = vld [vmem:[#allocation30_spill] sm:$0xff] }
 0x281   : > { %v2366_v36 = vadd.f32 %v2298_v8, %v2278_v47  ;;  %v615_v4 = vmul.f32 %v3933_v23, %v4606_v55  ;;  %v655_v25 = vmul.f32 %v9207_v5, %v4614_v57  ;;  %v695_v7 = vmul.f32 %v4624_v60, %v9208_v43  ;;  %v9209_v46 = vld [vmem:[#allocation32_spill] sm:$0xff]  ;;  %v9210_v1 = vld [vmem:[#allocation57_spill] sm:$0xff]  ;;  %v7238_v23 = vpop.xlane.xlu0 %2535 }
 0x282   : > { %v2150_v63 = vadd.f32 %v2134_v37, %v2118_v51  ;;  %v2382_v30 = vadd.f32 %v2350_v49, %v2334_v18  ;;  %v715_v55 = vmul.f32 %v8481_v42, %v9209_v46  ;;  %v735_v56 = vmul.f32 %v8482_v24, %v595_v28  ;;  %v859_v47 = vld [vmem:[%s4569_s28 + $0x141] sm:$0xff]  ;;  %v3935_v37 = vld [vmem:[%s4569_s28 + $0xb1] sm:$0xff] }
 0x283   : > { %v2398_v6 = vadd.f32 %v2366_v36, %v2318_v44  ;;  %v751_v34 = vadd.f32 %v635_v0, %v615_v4  ;;  %v767_v51 = vadd.f32 %v675_v48, %v655_v25  ;;  %v879_v59 = vmul.f32 %v3935_v37, %v4642_v3  ;;  %v9211_v18 = vld [vmem:[#allocation79_spill] sm:$0xff]  ;;  %v9213_v36 = vld [vmem:[#allocation33_spill] sm:$0xff] }
 0x284   : > { %v2469_v26 = vadd.f32 %v2150_v63, %v1886_v2  ;;  %v783_v57 = vadd.f32 %v715_v55, %v695_v7  ;;  %v899_v44 = vmul.f32 %v9210_v1, %v4667_v14  ;;  %v919_v42 = vmul.f32 %v9211_v18, %v8484_v45  ;;  %v3936_v2 = vld [vmem:[%s4569_s28 + $0xf9] sm:$0xff]  ;;  %v9212_v63 = vld [vmem:[#allocation60_spill] sm:$0xff]  ;;  %v9219_v37 = vld [vmem:[#allocation45_spill] sm:$0xff] }
 0x285   : > { %v2414_v8 = vadd.f32 %v2398_v6, %v2382_v30  ;;  %v799_v60 = vadd.f32 %v767_v51, %v751_v34  ;;  %v939_v24 = vmul.f32 %v3936_v2, %v8485_v62  ;;  %v959_v49 = vmul.f32 %v8552_v61, %v9212_v63  ;;  %v1123_v13 = vld [vmem:[%s4569_s28 + $0x142] sm:$0xff]  ;;  %v3937_v45 = vld [vmem:[%s4569_s28 + $0xb2] sm:$0xff]  ;;  %v3938_v6 = vld [vmem:[%s4569_s28 + $0xfa] sm:$0xff] }
 0x286   : > { %v815_v20 = vadd.f32 %v783_v57, %v735_v56  ;;  %v979_v28 = vmul.f32 %v8554_v12, %v9213_v36  ;;  %v999_v3 = vmul.f32 %v8555_v29, %v859_v47  ;;  %v1015_v14 = vadd.f32 %v899_v44, %v879_v59  ;;  %v9214_v62 = vld [vmem:[#allocation65_spill] sm:$0xff]  ;;  %v9215_v12 = vld [vmem:[#allocation100_spill] sm:$0xff]  ;;  %v9220_v59 = vld [vmem:[#allocation35_spill] sm:$0xff] }
 0x287   : > { %v2501_v30 = vadd.f32 %v2469_v26, %v2414_v8  ;;  %v1031_v4 = vadd.f32 %v939_v24, %v919_v42  ;;  %v1143_v0 = vmul.f32 %v3937_v45, %v8557_v52  ;;  %v1163_v61 = vmul.f32 %v9214_v62, %v8494_v10  ;;  %v9216_v7 = vld [vmem:[#allocation68_spill] sm:$0xff]  ;;  %v9217_v52 = vld [vmem:[#allocation74_spill] sm:$0xff]  ;;  %v7258_v10 = vld [vmem:[%s7681_s2] ss:$0 sm:$0xff]  ;;  %v7278_v24 = vpop.xlane.xlu0 %2537 }
 0x288   : > { %v7245_v25 = vadd.f32 %v815_v20, %v799_v60  ;;  %v1047_v11 = vadd.f32 %v979_v28, %v959_v49  ;;  %v1183_v29 = vmul.f32 %v9215_v12, %v8496_v31  ;;  %v1203_v43 = vmul.f32 %v3938_v6, %v8498_v50  ;;  %v1387_v50 = vld [vmem:[%s4569_s28 + $0x143] sm:$0xff]  ;;  %v3940_v51 = vld [vmem:[%s4569_s28 + $0xb3] sm:$0xff] }
 0x289   : > { %v2517_v5 = vadd.f32 %v2501_v30, %v2485_v58  ;;  %v1063_v48 = vadd.f32 %v1031_v4, %v1015_v14  ;;  %v1223_v46 = vmul.f32 %v8500_v15, %v9216_v7  ;;  %v1243_v55 = vmul.f32 %v8563_v35, %v9217_v52  ;;  %v9218_v35 = vld [vmem:[#allocation91_spill] sm:$0xff]  ;;  %v9221_v44 = vld [vmem:[#allocation48_spill] sm:$0xff]  ;;  %v9223_v42 = vld [vmem:[#allocation50_spill] sm:$0xff] }
 0x28a   : > { %v1079_v31 = vadd.f32 %v1047_v11, %v999_v3  ;;  %v1263_v26 = vmul.f32 %v8564_v40, %v1123_v13  ;;  %v1279_v56 = vadd.f32 %v1163_v61, %v1143_v0  ;;  %v1295_v34 = vadd.f32 %v1203_v43, %v1183_v29  ;;  %v3941_v40 = vld [vmem:[%s4569_s28 + $0xfb] sm:$0xff]  ;;  %v9224_v49 = vld [vmem:[#allocation108_spill] sm:$0xff]  ;;  %v9232_v43 = vld [vmem:[#allocation61_spill] sm:$0xff] }
 0x28b   : > { %v7261_v58 = vadd.f32 %v7258_v10, %v2517_v5  ;;  %v1311_v15 = vadd.f32 %v1243_v55, %v1223_v46  ;;  %v1407_v47 = vmul.f32 %v3940_v51, %v8750_v16  ;;  %v1427_v8 = vmul.f32 %v9218_v35, %v9172_v27  ;;  %v9222_v18 = vld [vmem:[#allocation71_spill] sm:$0xff]  ;;  %v9226_v20 = vld [vmem:[#allocation52_spill] sm:$0xff]  ;;  %v3942_v4 = vld [vmem:[%s4569_s28 + $0xb4] sm:$0xff]  ;;  %v2540_v46 = vpop.xlane.xlu1 %2539 }
 0x28c   : > { %v7270_v57 = vadd.f32 %v1079_v31, %v1063_v48  ;;  %v1447_v1 = vmul.f32 %v9220_v59, %v9219_v37  ;;  %v1467_v60 = vmul.f32 %v3941_v40, %v9221_v44  ;;  %v1487_v2 = vmul.f32 %v9223_v42, %v9222_v18  ;;  %v9225_v27 = vld [vmem:[#allocation51_spill] sm:$0xff]  ;;  %v9228_v0 = vld [vmem:[#allocation56_spill] sm:$0xff]  ;;  %v9229_v62 = vld [vmem:[#allocation94_spill] sm:$0xff] }
 0x28d   : > { %2563 = vadd.xlane.f32.xlu0 %v7261_v58  ;;  %v1327_v16 = vadd.f32 %v1295_v34, %v1279_v56  ;;  %v1343_v63 = vadd.f32 %v1311_v15, %v1263_v26  ;;  %v1507_v30 = vmul.f32 %v9225_v27, %v9224_v49  ;;  %v1527_v36 = vmul.f32 %v9226_v20, %v1387_v50  ;;  %v1651_v28 = vld [vmem:[%s4569_s28 + $0x144] sm:$0xff]  ;;  %v9230_v12 = vld [vmem:[#allocation58_spill] sm:$0xff] }
 0x28e   : > { %v1543_v3 = vadd.f32 %v1427_v8, %v1407_v47  ;;  %v1559_v14 = vadd.f32 %v1467_v60, %v1447_v1  ;;  %v9227_v13 = vld [vmem:[#allocation55_spill] sm:$0xff]  ;;  %v1691_v61 = vmul.f32 %v9229_v62, %v9228_v0  ;;  %v9231_v29 = vld [vmem:[#allocation114_spill] sm:$0xff]  ;;  %v9235_v56 = vld [vmem:[#allocation44_spill] sm:$0xff]  ;;  %v1791_v34 = vmul.f32 %v9015_v41, %v1651_v28  ;;  %v2544_v41 = vpop.xlane.xlu0 %2543 }
 0x28f   : > { %v1671_v45 = vmul.f32 %v3942_v4, %v9227_v13  ;;  %v1359_v5 = vadd.f32 %v1343_v63, %v1327_v16  ;;  %v1575_v11 = vadd.f32 %v1507_v30, %v1487_v2  ;;  %v1711_v48 = vmul.f32 %v9231_v29, %v9230_v12  ;;  %v3943_v6 = vld [vmem:[%s4569_s28 + $0xfc] sm:$0xff]  ;;  %v1915_v35 = vld [vmem:[%s4569_s28 + $0x145] sm:$0xff] }
 0x290   : > { %v1731_v7 = vmul.f32 %v3943_v6, %v9232_v43  ;;  %v1591_v52 = vadd.f32 %v1559_v14, %v1543_v3  ;;  %v9233_v55 = vld [vmem:[#allocation90_spill] sm:$0xff]  ;;  %v1771_v50 = vmul.f32 %v9190_v21, %v9235_v56  ;;  %v9236_v1 = vld [vmem:[#allocation92_spill] sm:$0xff]  ;;  %v9237_v44 = vld [vmem:[#allocation115_spill] sm:$0xff]  ;;  %v2055_v30 = vmul.f32 %v8906_v39, %v1915_v35 }
 0x291   : > { %v9234_v31 = vld [vmem:[#allocation62_spill] sm:$0xff]  ;;  %v1607_v15 = vadd.f32 %v1575_v11, %v1527_v36  ;;  %v1807_v51 = vadd.f32 %v1691_v61, %v1671_v45  ;;  %v1955_v40 = vmul.f32 %v9236_v1, %v9192_v17  ;;  %v1975_v60 = vmul.f32 %v9237_v44, %v9194_v33  ;;  %v9238_v16 = vld [vmem:[#allocation72_spill] sm:$0xff]  ;;  %v9239_v49 = vld [vmem:[#allocation23_spill] sm:$0xff] }
 0x292   : > { %v1751_v26 = vmul.f32 %v9234_v31, %v9233_v55  ;;  %v1823_v47 = vadd.f32 %v1731_v7, %v1711_v48  ;;  %v3944_v8 = vld [vmem:[%s4569_s28 + $0xb5] sm:$0xff]  ;;  %v3945_v18 = vld [vmem:[%s4569_s28 + $0xfd] sm:$0xff]  ;;  %v2015_v63 = vmul.f32 %v9088_v54, %v9238_v16  ;;  %v2179_v36 = vld [vmem:[%s4569_s28 + $0x146] sm:$0xff]  ;;  %v2542_v54 = vpop.xlane.xlu1 %2541  ;;  %v2438_v31 = vadd.f32 %v7270_v57, %v7245_v25  ;;  %v2548_v56 = vpop.xlane.xlu0 %2547 }
 0x293   : > { %v1935_v37 = vmul.f32 %v3944_v8, %v9139_v38  ;;  %v1995_v21 = vmul.f32 %v3945_v18, %v8960_v9  ;;  %v1623_v42 = vadd.f32 %v1607_v15, %v1591_v52  ;;  %v2035_v38 = vmul.f32 %v8536_v32, %v9239_v49  ;;  %v3946_v28 = vld [vmem:[%s4569_s28 + $0xb6] sm:$0xff]  ;;  %v9240_v3 = vld [vmem:[#allocation76_spill] sm:$0xff]  ;;  %v3947_v32 = vld [vmem:[%s4569_s28 + $0xfe] sm:$0xff]  ;;  %s9264_s28 = sld [smem:[#allocation133_spill]] }
 0x294   : > { %v1839_v59 = vadd.f32 %v1771_v50, %v1751_v26  ;;  %v1855_v2 = vadd.f32 %v1823_v47, %v1807_v51  ;;  %v2199_v9 = vmul.f32 %v3946_v28, %v9240_v3  ;;  %v9241_v14 = vld [vmem:[#allocation98_spill] sm:$0xff]  ;;  %v9242_v13 = vld [vmem:[#allocation80_spill] sm:$0xff]  ;;  %v2259_v11 = vmul.f32 %v3947_v32, %v9201_v22  ;;  %v9244_v39 = vld [vmem:[#allocation97_spill] sm:$0xff] }
 0x295   : > { %v2071_v17 = vadd.f32 %v1955_v40, %v1935_v37  ;;  %v2087_v20 = vadd.f32 %v1995_v21, %v1975_v60  ;;  %v2103_v33 = vadd.f32 %v2035_v38, %v2015_v63  ;;  %v2219_v4 = vmul.f32 %v9241_v14, %v8844_v53  ;;  %v9243_v45 = vld [vmem:[#allocation128_spill] sm:$0xff]  ;;  %v9246_v6 = vld [vmem:[#allocation73_spill] sm:$0xff] }
 0x296   : > { %v1871_v27 = vadd.f32 %v1839_v59, %v1791_v34  ;;  %v2239_v0 = vmul.f32 %v9243_v45, %v9242_v13  ;;  %v9245_v12 = vld [vmem:[#allocation84_spill] sm:$0xff]  ;;  %v9247_v43 = vld [vmem:[#allocation85_spill] sm:$0xff]  ;;  %v2319_v52 = vmul.f32 %v7206_v19, %v2179_v36  ;;  %v2567_v26 = vmul.f32 0.25, %v7238_v23  ;;  %v2546_v40 = vpop.xlane.xlu1 %2545  ;;  %v2552_v63 = vpop.xlane.xlu0 %2551 }
 0x297   : > { %v2119_v61 = vadd.f32 %v2087_v20, %v2071_v17  ;;  %v2279_v29 = vmul.f32 %v9245_v12, %v9244_v39  ;;  %v2135_v48 = vadd.f32 %v2103_v33, %v2055_v30  ;;  %v2299_v7 = vmul.f32 %v9247_v43, %v9246_v6  ;;  %v9248_v47 = vld [vmem:[#allocation28_spill] sm:$0xff]  ;;  %v9249_v59 = vld [vmem:[#allocation93_spill] sm:$0xff] }
 0x298   : > { %v1887_v62 = vadd.f32 %v1871_v27, %v1855_v2  ;;  %v2335_v55 = vadd.f32 %v2219_v4, %v2199_v9  ;;  %v2351_v53 = vadd.f32 %v2259_v11, %v2239_v0  ;;  %v2454_v22 = vadd.f32 %v1623_v42, %v1359_v5  ;;  %v9252_v42 = vld [vmem:[#allocation41_spill] sm:$0xff] }
 0x299   : > { %v2151_v50 = vadd.f32 %v2135_v48, %v2119_v61  ;;  %v2367_v34 = vadd.f32 %v2299_v7, %v2279_v29  ;;  %v2569_v15 = vmul.f32 0.25, %v2540_v46  ;;  %v7329_v35 = vsub.f32 %v9248_v47, %v2567_v26  ;;  %v9253_v30 = vld [vmem:[#allocation113_spill] sm:$0xff]  ;;  %v9257_v48 = vld [vmem:[#allocation112_spill] sm:$0xff]  ;;  %v9259_v47 = vld [vmem:[#allocation78_spill] sm:$0xff] }
 0x29a   : > { %v2383_v51 = vadd.f32 %v2351_v53, %v2335_v55  ;;  %v2568_v8 = vmul.f32 0.25, %v7278_v24  ;;  %v9250_v25 = vlaneseq  ;;  %v2571_v5 = vmul.f32 0.25, %v2544_v41  ;;  %v9251_v24 = vld [vmem:[#allocation22_spill] sm:$0xff]  ;;  %v2550_v20 = vpop.xlane.xlu1 %2549  ;;  %v9254_v28 = vld [vmem:[#allocation89_spill] sm:$0xff]  ;;  %v9258_v53 = vld [vmem:[#allocation104_spill] sm:$0xff] }
 0x29b   : > { %v2399_v37 = vadd.f32 %v2367_v34, %v2319_v52  ;;  %v2470_v19 = vadd.f32 %v2151_v50, %v1887_v62  ;;  %v7333_v1 = vsub.f32 %v9249_v59, %v2569_v15  ;;  %v2602_v23 = vmul.f32 %v7329_v35, %v7329_v35  ;;  %v9255_v45 = vld [vmem:[#allocation117_spill] sm:$0xff]  ;;  %v9256_v62 = vld [vmem:[#allocation70_spill] sm:$0xff] }
 0x29c   : > { %v7336_v57 = vand.u32 127, %v9250_v25  ;;  %v2486_v44 = vadd.f32 %v2454_v22, %v2438_v31  ;;  %v2570_v60 = vmul.f32 0.25, %v2542_v54  ;;  %v7343_v21 = vsub.f32 %v9251_v24, %v2568_v8  ;;  %v3711_v25 = vld [vmem:[#allocation8 + $0x10] sm:$0xff]   ;;  %v9260_v24 = vld [vmem:[#allocation107_spill] sm:$0xff] }
 0x29d   : > { %v2415_v46 = vadd.f32 %v2399_v37, %v2383_v51  ;;  %v2604_v18 = vmul.f32 %v7333_v1, %v7333_v1  ;;  %v7347_v2 = vsub.f32 %v9252_v42, %v2571_v5  ;;  %v2573_v16 = vmul.f32 0.25, %v2548_v56  ;;  %v3709_v37 = vld [vmem:[#allocation8] sm:$0xff]  }
 0x29e   : > { %vm2601_vm0 = vcmp.lt.s32.totalorder %v7336_v57, 4  ;;  %v2575_v33 = vmul.f32 0.25, %v2552_v63  ;;  %v7359_v3 = vsub.f32 %v9254_v28, %v2570_v60  ;;  %v2572_v9 = vmul.f32 0.25, %v2546_v40  ;;  %v2554_v39 = vpop.xlane.xlu1 %2553  ;;  %3505 = vmatprep.subr.bf16.mxu0 %v3709_v37  ;;  %v3713_v5 = vld [vmem:[#allocation8 + $0x20] sm:$0xff]   ;;  %v3716_v28 = vld [vmem:[#allocation8 + $0x38] sm:$0xff]  }
 0x29f   : > { %v2502_v49 = vadd.f32 %v2470_v19, %v2415_v46  ;;  %v2620_v41 = vsel %vm2601_vm0, %v2602_v23, 0.0  ;;  %v2622_v38 = vsel %vm2601_vm0, %v2604_v18, 0.0  ;;  %v7354_v17 = vsub.f32 %v9253_v30, %v2573_v16  ;;  %v3710_v19 = vld [vmem:[#allocation8 + $0x8] sm:$0xff]   ;;  %3506 = vmatpush3.bf16.msra.mxu0 %v3709_v37  ;;  %v3712_v23 = vld [vmem:[#allocation8 + $0x18] sm:$0xff]   ;;  %v3715_v18 = vld [vmem:[#allocation8 + $0x30] sm:$0xff]  }
 0x2a0   : > { %2636 = vadd.xlane.f32.xlu0 %v2620_v41  ;;  %v2606_v36 = vmul.f32 %v7347_v2, %v7347_v2  ;;  %v2603_v14 = vmul.f32 %v7343_v21, %v7343_v21  ;;  %v7370_v0 = vsub.f32 %v9255_v45, %v2575_v33  ;;  %v7375_v61 = vsub.f32 %v9256_v62, %v2572_v9  ;;  %v3714_v46 = vld [vmem:[#allocation8 + $0x28] sm:$0xff]   ;;  %v9262_v9 = vld [vmem:[#allocation116_spill] sm:$0xff] }
 0x2a1   : > { %v2518_v27 = vadd.f32 %v2502_v49, %v2486_v44  ;;  %v2608_v54 = vmul.f32 %v7354_v17, %v7354_v17  ;;  %v2605_v11 = vmul.f32 %v7359_v3, %v7359_v3  ;;  %v2576_v7 = vmul.f32 0.25, %v2554_v39  ;;  %3507 = vmatprep.subr.bf16.mxu0 %v3710_v19 }
 0x2a2   : > { %v2624_v13 = vsel %vm2601_vm0, %v2606_v36, 0.0  ;;  %v2621_v32 = vsel %vm2601_vm0, %v2603_v14, 0.0  ;;  %v2610_v29 = vmul.f32 %v7370_v0, %v7370_v0  ;;  %v2607_v52 = vmul.f32 %v7375_v61, %v7375_v61 }
 0x2a3   : > { %v7364_v4 = vadd.f32 %v7258_v10, %v2518_v27  ;;  %v2574_v10 = vmul.f32 0.25, %v2550_v20  ;;  %v2626_v12 = vsel %vm2601_vm0, %v2608_v54, 0.0  ;;  %v2623_v43 = vsel %vm2601_vm0, %v2605_v11, 0.0  ;;  %3508 = vmatpush3.bf16.msra.mxu0 %v3710_v19 }
 0x2a4   : > { %2640 = vadd.xlane.f32.xlu0 %v2622_v38  ;;  %v2628_v55 = vsel %vm2601_vm0, %v2610_v29, 0.0  ;;  %v7395_v31 = vsub.f32 %v9258_v53, %v2576_v7  ;;  %v2625_v26 = vsel %vm2601_vm0, %v2607_v52, 0.0  ;;  %3509 = vmatprep.subr.bf16.mxu0 %v3711_v25  ;;  %v9261_v38 = vld [vmem:[#allocation111_spill] sm:$0xff] }
 0x2a5   : > { %2565 = vadd.xlane.f32.xlu1 %v7364_v4  ;;  %v7386_v6 = vsub.f32 %v9257_v48, %v2574_v10 }
 0x2a6   : > { %v2611_v34 = vmul.f32 %v7395_v31, %v7395_v31 }
 0x2a7   : > { %v2609_v56 = vmul.f32 %v7386_v6, %v7386_v6  ;;  %3510 = vmatpush3.bf16.msra.mxu0 %v3711_v25 }
 0x2a8   : > { %2644 = vadd.xlane.f32.xlu0 %v2624_v13  ;;  %v2629_v22 = vsel %vm2601_vm0, %v2611_v34, 0.0  ;;  %3511 = vmatprep.subr.bf16.mxu0 %v3712_v23 }
 0x2a9   : > { %2638 = vadd.xlane.f32.xlu1 %v2621_v32  ;;  %v2627_v50 = vsel %vm2601_vm0, %v2609_v56, 0.0 }
 0x2ab   : > { %3512 = vmatpush3.bf16.msra.mxu0 %v3712_v23 }
 0x2ac   : > { %2648 = vadd.xlane.f32.xlu0 %v2626_v12  ;;  %3513 = vmatprep.subr.bf16.mxu0 %v3713_v5 }
 0x2ad   : > { %2642 = vadd.xlane.f32.xlu1 %v2623_v43 }
 0x2af   : > { %3514 = vmatpush3.bf16.msra.mxu0 %v3713_v5 }
 0x2b0   : > { %2652 = vadd.xlane.f32.xlu0 %v2628_v55  ;;  %v2556_v15 = vpop.xlane.xlu0 %2555  ;;  %3515 = vmatprep.subr.bf16.mxu0 %v3714_v46 }
 0x2b1   : > { %2646 = vadd.xlane.f32.xlu1 %v2625_v26  ;;  %v2577_v51 = vmul.f32 0.25, %v2556_v15 }
 0x2b3   : > { %v7408_v8 = vsub.f32 %v9259_v47, %v2577_v51  ;;  %3516 = vmatpush3.bf16.msra.mxu0 %v3714_v46 }
 0x2b4   : > { %3517 = vmatprep.subr.bf16.mxu0 %v3715_v18 }
 0x2b5   : > { %2650 = vadd.xlane.f32.xlu1 %v2627_v50  ;;  %v2612_v59 = vmul.f32 %v7408_v8, %v7408_v8 }
 0x2b7   : > { %v2630_v40 = vsel %vm2601_vm0, %v2612_v59, 0.0  ;;  %3518 = vmatpush3.bf16.msra.mxu0 %v3715_v18 }
 0x2b8   : > { %2656 = vadd.xlane.f32.xlu0 %v2630_v40  ;;  %3519 = vmatprep.subr.bf16.mxu0 %v3716_v28 }
 0x2b9   : > { %2654 = vadd.xlane.f32.xlu1 %v2629_v22 }
 0x2bb   : > { %3520 = vmatpush3.bf16.msra.mxu0 %v3716_v28 }
 0x2cc   : > { %v2558_v44 = vpop.xlane.xlu1 %2557 }
 0x2cd   : > { %v2578_v60 = vmul.f32 0.25, %v2558_v44 }
 0x2cf   : > { %v7415_v42 = vsub.f32 %v9260_v24, %v2578_v60 }
 0x2d1   : > { %v2613_v16 = vmul.f32 %v7415_v42, %v7415_v42 }
 0x2d3   : > { %v2631_v63 = vsel %vm2601_vm0, %v2613_v16, 0.0 }
 0x2d4   : > { %2658 = vadd.xlane.f32.xlu1 %v2631_v63 }
 0x2e6   : > { %v2560_v49 = vpop.xlane.xlu0 %2559 }
 0x2e7   : > { %v2579_v41 = vmul.f32 0.25, %v2560_v49  ;;  %v7453_v49 = vld [vmem:[%s9263_s10] ss:$0 sm:$0xff]  ;;  %s9267_s10 = sld [smem:[#allocation138_spill]] }
 0x2e9   : > { %v7422_v27 = vsub.f32 %v9261_v38, %v2579_v41 }
 0x2eb   : > { %v2614_v30 = vmul.f32 %v7422_v27, %v7422_v27 }
 0x2ed   : > { %v2632_v20 = vsel %vm2601_vm0, %v2614_v30, 0.0 }
 0x2ee   : > { %2660 = vadd.xlane.f32.xlu0 %v2632_v20 }
 0x300   : > { %v2562_v36 = vpop.xlane.xlu1 %2561 }
 0x301   : > { %v2580_v33 = vmul.f32 0.25, %v2562_v36 }
 0x303   : > { %v7429_v14 = vsub.f32 %v9262_v9, %v2580_v33  ;;  %v7461_v9 = vld [vmem:[%s9264_s28] ss:$0 sm:$0xff]  ;;  %s3297_s28 = sadd.s32 %s3472_s11, %s3466_s26 }
 0x304   : > { %s3467_s19 = sshll.u32 %s3297_s28, 7 }
 0x305   : > { %v2615_v13 = vmul.f32 %v7429_v14, %v7429_v14  ;;  %s7609_s20 = scalar_lea.hbm %s9270_s27, %s3467_s19 }
 0x307   : > { %v2633_v45 = vsel %vm2601_vm0, %v2615_v13, 0.0 }
 0x308   : > { %2662 = vadd.xlane.f32.xlu1 %v2633_v45 }
 0x31a   : > { %v2564_v54 = vpop.xlane.xlu0 %2563 }
 0x31b   : > { %v2581_v62 = vmul.f32 0.25, %v2564_v54 }
 0x31d   : > { %v7436_v32 = vsub.f32 %v7261_v58, %v2581_v62 }
 0x31f   : > { %v2616_v10 = vmul.f32 %v7436_v32, %v7436_v32 }
 0x321   : > { %v2634_v11 = vsel %vm2601_vm0, %v2616_v10, 0.0 }
 0x322   : > { %2664 = vadd.xlane.f32.xlu0 %v2634_v11 }
 0x32d   : > { %v2637_v39 = vpop.xlane.xlu0 %2636 }
 0x32e   : > { %v2668_v12 = vmul.f32 0.25, %v2637_v39 }
 0x330   : > { %v2684_v29 = vadd.f32 1e-05, %v2668_v12 }
 0x331   : > { %v2641_v48 = vpop.xlane.xlu0 %2640 }
 0x332   : > { %v2566_v43 = vpop.xlane.xlu1 %2565  ;;  %v2670_v7 = vmul.f32 0.25, %v2641_v48  ;;  %3725 = vrsqrt.f32 %v2684_v29 }
 0x333   : > { %v2582_v52 = vmul.f32 0.25, %v2566_v43 }
 0x334   : > { %v2686_v58 = vadd.f32 1e-05, %v2670_v7 }
 0x335   : > { %v7443_v55 = vsub.f32 %v7364_v4, %v2582_v52  ;;  %v2645_v53 = vpop.xlane.xlu0 %2644 }
 0x336   : > { %v2639_v26 = vpop.xlane.xlu1 %2638  ;;  %v2672_v56 = vmul.f32 0.25, %v2645_v53  ;;  %3727 = vrsqrt.f32 %v2686_v58 }
 0x337   : > { %v2617_v50 = vmul.f32 %v7443_v55, %v7443_v55  ;;  %v2669_v34 = vmul.f32 0.25, %v2639_v26 }
 0x338   : > { %v2688_v22 = vadd.f32 1e-05, %v2672_v56 }
 0x339   : > { %v2635_v15 = vsel %vm2601_vm0, %v2617_v50, 0.0  ;;  %v2685_v51 = vadd.f32 1e-05, %v2669_v34  ;;  %v2649_v47 = vpop.xlane.xlu0 %2648 }
 0x33a   : > { %2666 = vadd.xlane.f32.xlu1 %v2635_v15  ;;  %v2643_v37 = vpop.xlane.xlu1 %2642  ;;  %v2674_v4 = vmul.f32 0.25, %v2649_v47 }
 0x33b   : > { %3729 = vrsqrt.f32 %v2685_v51  ;;  %v2671_v19 = vmul.f32 0.25, %v2643_v37 }
 0x33c   : > { %3731 = vrsqrt.f32 %v2688_v22  ;;  %v2690_v40 = vadd.f32 1e-05, %v2674_v4  ;;  %v3726_v46 = vpop.eup %3725 }
 0x33d   : > { %v2687_v59 = vadd.f32 1e-05, %v2671_v19  ;;  %v2653_v25 = vpop.xlane.xlu0 %2652  ;;  %v2716_v24 = vmul.f32 %v3726_v46, %v7329_v35 }
 0x33e   : > { %v2647_v23 = vpop.xlane.xlu1 %2646  ;;  %v2676_v5 = vmul.f32 0.25, %v2653_v25 }
 0x33f   : > { %3733 = vrsqrt.f32 %v2687_v59  ;;  %v2673_v44 = vmul.f32 0.25, %v2647_v23  ;;  %v2739_v33 = vmul.f32 %v7453_v49, %v2716_v24 }
 0x340   : > { %3735 = vrsqrt.f32 %v2690_v40  ;;  %v2692_v57 = vadd.f32 1e-05, %v2676_v5  ;;  %v3728_v16 = vpop.eup %3727 }
 0x341   : > { %v2689_v60 = vadd.f32 1e-05, %v2673_v44  ;;  %v2718_v28 = vmul.f32 %v3728_v16, %v7333_v1  ;;  %v2762_v10 = vadd.f32 %v7461_v9, %v2739_v33  ;;  %v3717_v44 = vld [vmem:[#allocation9] sm:$0xff]  }
 0x342   : > { %v2651_v18 = vpop.xlane.xlu1 %2650  ;;  %3537 = vmatprep.subr.bf16.mxu1 %v3717_v44 }
 0x343   : > { %3737 = vrsqrt.f32 %v2689_v60  ;;  %v2675_v63 = vmul.f32 0.25, %v2651_v18  ;;  %v2741_v1 = vmul.f32 %v7453_v49, %v2718_v28  ;;  %v3718_v60 = vld [vmem:[#allocation9 + $0x8] sm:$0xff]   ;;  %3538 = vmatpush3.bf16.msra.mxu1 %v3717_v44 }
 0x344   : > { %3739 = vrsqrt.f32 %v2692_v57  ;;  %3539 = vmatprep.subr.bf16.mxu1 %v3718_v60 }
 0x345   : > { %v3730_v41 = vpop.eup %3729  ;;  %v2691_v38 = vadd.f32 1e-05, %v2675_v63  ;;  %v2764_v7 = vadd.f32 %v7461_v9, %v2741_v1  ;;  %v2657_v25 = vpop.xlane.xlu0 %2656 }
 0x346   : > { %v3732_v30 = vpop.eup %3731  ;;  %v2655_v20 = vpop.xlane.xlu1 %2654  ;;  %v2717_v36 = vmul.f32 %v3730_v41, %v7343_v21  ;;  %v2678_v5 = vmul.f32 0.25, %v2657_v25 }
 0x347   : > { %3741 = vrsqrt.f32 %v2691_v38  ;;  %v2677_v35 = vmul.f32 0.25, %v2655_v20  ;;  %v2720_v62 = vmul.f32 %v3732_v30, %v7347_v2  ;;  %3540 = vmatpush3.bf16.msra.mxu1 %v3718_v60 }
 0x348   : > { %v2740_v13 = vmul.f32 %v7453_v49, %v2717_v36  ;;  %v2694_v57 = vadd.f32 1e-05, %v2678_v5 }
 0x349   : > { %v3734_v45 = vpop.eup %3733  ;;  %v2693_v54 = vadd.f32 1e-05, %v2677_v35  ;;  %v2743_v43 = vmul.f32 %v7453_v49, %v2720_v62 }
 0x34a   : > { %v2763_v21 = vadd.f32 %v7461_v9, %v2740_v13  ;;  %v2719_v11 = vmul.f32 %v3734_v45, %v7359_v3  ;;  %v3736_v39 = vpop.eup %3735 }
 0x34b   : > { %3743 = vrsqrt.f32 %v2693_v54  ;;  %v2722_v58 = vmul.f32 %v3736_v39, %v7354_v17  ;;  %v2766_v50 = vadd.f32 %v7461_v9, %v2743_v43  ;;  %v3719_v43 = vld [vmem:[#allocation9 + $0x10] sm:$0xff]  }
 0x34c   : > { %v2778_v12 = vpack.c.bf16 %v2763_v21, %v2762_v10  ;;  %v2742_v29 = vmul.f32 %v7453_v49, %v2719_v11  ;;  %3745 = vrsqrt.f32 %v2694_v57  ;;  %3541 = vmatprep.subr.bf16.mxu1 %v3719_v43 }
 0x34d   : > { %v3738_v48 = vpop.eup %3737  ;;  %v2745_v15 = vmul.f32 %v7453_v49, %v2722_v58  ;;  %3542 = vmatpush3.bf16.msra.mxu1 %v3719_v43  ;;  %v3722_v58 = vld [vmem:[#allocation9 + $0x28] sm:$0xff]  }
 0x34e   : > { %3521 = vmatprep.mubr.bf16.mxu0 %v2778_v12  ;;  %v2765_v2 = vadd.f32 %v7461_v9, %v2742_v29  ;;  %v2721_v52 = vmul.f32 %v3738_v48, %v7375_v61  ;;  %v3740_v3 = vpop.eup %3739 }
 0x34f   : > { %v2724_v51 = vmul.f32 %v3740_v3, %v7370_v0  ;;  %v2768_v37 = vadd.f32 %v7461_v9, %v2745_v15 }
 0x350   : > { %v2779_v53 = vpack.c.bf16 %v2765_v2, %v2764_v7  ;;  %v2744_v26 = vmul.f32 %v7453_v49, %v2721_v52  ;;  %v3720_v7 = vld [vmem:[#allocation9 + $0x18] sm:$0xff]   ;;  %v3721_v52 = vld [vmem:[#allocation9 + $0x20] sm:$0xff]  }
 0x351   : > { %v3742_v56 = vpop.eup %3741  ;;  %v2747_v59 = vmul.f32 %v7453_v49, %v2724_v51  ;;  %3543 = vmatprep.subr.bf16.mxu1 %v3720_v7 }
 0x352   : > { %3522 = vmatmul.mubr.bf16.vlgmr.msra.gmra.mrb[0].mxu0 %v2779_v53  ;;  %v2767_v34 = vadd.f32 %v7461_v9, %v2744_v26  ;;  %v2723_v22 = vmul.f32 %v3742_v56, %v7386_v6  ;;  %3544 = vmatpush3.bf16.msra.mxu1 %v3720_v7 }
 0x353   : > { %v2770_v0 = vadd.f32 %v7461_v9, %v2747_v59  ;;  %3545 = vmatprep.subr.bf16.mxu1 %v3721_v52 }
 0x354   : > { %v2780_v47 = vpack.c.bf16 %v2767_v34, %v2766_v50  ;;  %v2746_v61 = vmul.f32 %v7453_v49, %v2723_v22 }
 0x355   : > { %v3744_v17 = vpop.eup %3743 }
 0x356   : > { %3525 = vmatprep.mubr.bf16.mxu0 %v2780_v47  ;;  %v2769_v4 = vadd.f32 %v7461_v9, %v2746_v61  ;;  %v2725_v19 = vmul.f32 %v3744_v17, %v7395_v31  ;;  %v3746_v16 = vpop.eup %3745  ;;  %3546 = vmatpush3.bf16.msra.mxu1 %v3721_v52 }
 0x357   : > { %v2726_v63 = vmul.f32 %v3746_v16, %v7408_v8  ;;  %3547 = vmatprep.subr.bf16.mxu1 %v3722_v58 }
 0x358   : > { %v2781_v40 = vpack.c.bf16 %v2769_v4, %v2768_v37  ;;  %v2748_v6 = vmul.f32 %v7453_v49, %v2725_v19  ;;  %v3723_v37 = vld [vmem:[#allocation9 + $0x30] sm:$0xff]   ;;  %v3724_v4 = vld [vmem:[#allocation9 + $0x38] sm:$0xff]  }
 0x359   : > { %v2749_v30 = vmul.f32 %v7453_v49, %v2726_v63 }
 0x35a   : > { %3526 = vmatmul.mubr.bf16.gmra.mrb[4].mxu0 %v2781_v40  ;;  %v2771_v23 = vadd.f32 %v7461_v9, %v2748_v6  ;;  %3548 = vmatpush3.bf16.msra.mxu1 %v3722_v58 }
 0x35b   : > { %v2772_v36 = vadd.f32 %v7461_v9, %v2749_v30  ;;  %3549 = vmatprep.subr.bf16.mxu1 %v3723_v37 }
 0x35c   : > { %v2782_v46 = vpack.c.bf16 %v2771_v23, %v2770_v0 }
 0x35e   : > { %3529 = vmatprep.mubr.bf16.mxu0 %v2782_v46  ;;  %3550 = vmatpush3.bf16.msra.mxu1 %v3723_v37 }
 0x35f   : > { %3551 = vmatprep.subr.bf16.mxu1 %v3724_v4 }
 0x361   : > { %v2659_v31 = vpop.xlane.xlu1 %2658 }
 0x362   : > { %v2679_v18 = vmul.f32 0.25, %v2659_v31  ;;  %3552 = vmatpush3.bf16.msra.mxu1 %v3724_v4 }
 0x364   : > { %v2695_v24 = vadd.f32 1e-05, %v2679_v18 }
 0x366   : > { %3747 = vrsqrt.f32 %v2695_v24 }
 0x370   : > { %v3748_v41 = vpop.eup %3747 }
 0x371   : > { %v2727_v38 = vmul.f32 %v3748_v41, %v7415_v42 }
 0x373   : > { %v2750_v20 = vmul.f32 %v7453_v49, %v2727_v38 }
 0x375   : > { %v2773_v33 = vadd.f32 %v7461_v9, %v2750_v20 }
 0x377   : > { %v2783_v28 = vpack.c.bf16 %v2773_v33, %v2772_v36 }
 0x379   : > { %3530 = vmatmul.mubr.bf16.gmra.mrb[8].mxu0 %v2783_v28 }
 0x37b   : > { %v2661_v35 = vpop.xlane.xlu0 %2660 }
 0x37c   : > { %v2680_v13 = vmul.f32 0.25, %v2661_v35 }
 0x37e   : > { %v2696_v45 = vadd.f32 1e-05, %v2680_v13 }
 0x380   : > { %3749 = vrsqrt.f32 %v2696_v45 }
 0x38a   : > { %v3750_v10 = vpop.eup %3749 }
 0x38b   : > { %v2728_v42 = vmul.f32 %v3750_v10, %v7422_v27 }
 0x38d   : > { %v2751_v1 = vmul.f32 %v7453_v49, %v2728_v42 }
 0x38f   : > { %v2774_v12 = vadd.f32 %v7461_v9, %v2751_v1 }
 0x395   : > { %v2663_v54 = vpop.xlane.xlu1 %2662 }
 0x396   : > { %v2681_v62 = vmul.f32 0.25, %v2663_v54 }
 0x398   : > { %v2697_v8 = vadd.f32 1e-05, %v2681_v62 }
 0x39a   : > { %3751 = vrsqrt.f32 %v2697_v8 }
 0x3a4   : > { %v3752_v21 = vpop.eup %3751 }
 0x3a5   : > { %v2729_v11 = vmul.f32 %v3752_v21, %v7429_v14 }
 0x3a7   : > { %v2752_v39 = vmul.f32 %v7453_v49, %v2729_v11 }
 0x3a9   : > { %v2775_v29 = vadd.f32 %v7461_v9, %v2752_v39 }
 0x3ab   : > { %v2784_v48 = vpack.c.bf16 %v2775_v29, %v2774_v12 }
 0x3ad   : > { %3533 = vmatprep.mubr.bf16.mxu0 %v2784_v48 }
 0x3af   : > { %v2665_v2 = vpop.xlane.xlu0 %2664 }
 0x3b0   : > { %v2682_v27 = vmul.f32 0.25, %v2665_v2 }
 0x3b2   : > { %v2698_v14 = vadd.f32 1e-05, %v2682_v27 }
 0x3b4   : > { %3753 = vrsqrt.f32 %v2698_v14 }
 0x3be   : > { %v3754_v56 = vpop.eup %3753 }
 0x3bf   : > { %v2730_v50 = vmul.f32 %v3754_v56, %v7436_v32  ;;  %v7510_v32 = vld [vmem:[%s9265_s3] ss:$0 sm:$0xff] }
 0x3c1   : > { %v2753_v15 = vmul.f32 %v7453_v49, %v2730_v50 }
 0x3c3   : > { %v2776_v47 = vadd.f32 %v7461_v9, %v2753_v15 }
 0x3c7   : > { %v2667_v3 = vpop.xlane.xlu1 %2666 }
 0x3c8   : > { %v2683_v53 = vmul.f32 0.25, %v2667_v3 }
 0x3ca   : > { %v2699_v26 = vadd.f32 1e-05, %v2683_v53 }
 0x3cc   : > { %3755 = vrsqrt.f32 %v2699_v26 }
 0x3d6   : > { %v3756_v34 = vpop.eup %3755 }
 0x3d7   : > { %v2731_v22 = vmul.f32 %v3756_v34, %v7443_v55 }
 0x3d9   : > { %v2754_v51 = vmul.f32 %v7453_v49, %v2731_v22 }
 0x3db   : > { %v2777_v61 = vadd.f32 %v7461_v9, %v2754_v51 }
 0x3dd   : > { %v2785_v17 = vpack.c.bf16 %v2777_v61, %v2776_v47 }
 0x3df   : > { %3534 = vmatmul.mubr.bf16.gmra.mrb[12].mxu0 %v2785_v17 }
 0x425   : > { %v3523_v55 = vpop.f32.mrb[0].mxu0 }
 0x426   : > { %v2900_v49 = vadd.f32 %v3523_v55, %v7510_v32  ;;  %v2891_v19 = vpop.f32.mrb[1].mxu0 }
 0x427   : > { %v2892_v59 = vadd.f32 %v7510_v32, %v2891_v19  ;;  %v3524_v9 = vpop.f32.mrb[2].mxu0 }
 0x428   : > { %v2972_v40 = vmul.f32 0.70710677, %v2900_v49  ;;  %v2903_v6 = vadd.f32 %v3524_v9, %v7510_v32  ;;  %v2894_v25 = vpop.f32.mrb[3].mxu0  ;;  %v2956_v54 = vmul.f32 0.5, %v2900_v49 }
 0x429   : > { %v2970_v0 = vmul.f32 0.70710677, %v2892_v59  ;;  %v2895_v23 = vadd.f32 %v7510_v32, %v2894_v25  ;;  %v2954_v10 = vmul.f32 0.5, %v2892_v59 }
 0x42a   : > { %3757 = verf.f32 %v2972_v40  ;;  %v2973_v5 = vmul.f32 0.70710677, %v2903_v6  ;;  %v2957_v62 = vmul.f32 0.5, %v2903_v6 }
 0x42b   : > { %3759 = verf.f32 %v2970_v0  ;;  %v2971_v46 = vmul.f32 0.70710677, %v2895_v23  ;;  %v2955_v42 = vmul.f32 0.5, %v2895_v23 }
 0x42c   : > { %3761 = verf.f32 %v2973_v5 }
 0x42d   : > { %3763 = verf.f32 %v2971_v46  ;;  %v3527_v44 = vpop.f32.mrb[4].mxu0 }
 0x42e   : > { %v2916_v60 = vadd.f32 %v3527_v44, %v7510_v32  ;;  %v2907_v57 = vpop.f32.mrb[5].mxu0 }
 0x42f   : > { %v2908_v31 = vadd.f32 %v7510_v32, %v2907_v57  ;;  %v3528_v18 = vpop.f32.mrb[6].mxu0 }
 0x430   : > { %v2976_v24 = vmul.f32 0.70710677, %v2916_v60  ;;  %v2919_v16 = vadd.f32 %v3528_v18, %v7510_v32  ;;  %v2910_v63 = vpop.f32.mrb[7].mxu0  ;;  %v2960_v58 = vmul.f32 0.5, %v2916_v60 }
 0x431   : > { %v2974_v41 = vmul.f32 0.70710677, %v2908_v31  ;;  %v2911_v38 = vadd.f32 %v7510_v32, %v2910_v63  ;;  %v2958_v26 = vmul.f32 0.5, %v2908_v31 }
 0x432   : > { %3765 = verf.f32 %v2976_v24  ;;  %v2977_v30 = vmul.f32 0.70710677, %v2919_v16  ;;  %v2961_v3 = vmul.f32 0.5, %v2919_v16 }
 0x433   : > { %3767 = verf.f32 %v2974_v41  ;;  %v2975_v20 = vmul.f32 0.70710677, %v2911_v38  ;;  %v2959_v56 = vmul.f32 0.5, %v2911_v38 }
 0x434   : > { %v3758_v36 = vpop.eup %3757  ;;  %3769 = verf.f32 %v2977_v30 }
 0x435   : > { %v3760_v33 = vpop.eup %3759  ;;  %v3004_v28 = vadd.f32 1.0, %v3758_v36  ;;  %3771 = verf.f32 %v2975_v20 }
 0x436   : > { %v3762_v35 = vpop.eup %3761  ;;  %v3002_v13 = vadd.f32 1.0, %v3760_v33 }
 0x437   : > { %v3764_v45 = vpop.eup %3763  ;;  %v3005_v8 = vadd.f32 1.0, %v3762_v35  ;;  %v3020_v11 = vmul.f32 %v3004_v28, %v2956_v54 }
 0x438   : > { %v3003_v21 = vadd.f32 1.0, %v3764_v45  ;;  %v3018_v39 = vmul.f32 %v3002_v13, %v2954_v10 }
 0x439   : > { %v3021_v1 = vmul.f32 %v3005_v8, %v2957_v62 }
 0x43a   : > { %v3019_v12 = vmul.f32 %v3003_v21, %v2955_v42 }
 0x43b   : > { %v3035_v29 = vpack.c.bf16 %v3021_v1, %v3020_v11 }
 0x43c   : > { %v3766_v48 = vpop.eup %3765  ;;  %v3034_v43 = vpack.c.bf16 %v3019_v12, %v3018_v39 }
 0x43d   : > { %v3768_v7 = vpop.eup %3767  ;;  %v3008_v2 = vadd.f32 1.0, %v3766_v48 }
 0x43e   : > { %v3770_v27 = vpop.eup %3769  ;;  %v3006_v52 = vadd.f32 1.0, %v3768_v7  ;;  %3553 = vmatprep.mubr.bf16.mxu1 %v3034_v43 }
 0x43f   : > { %v3772_v14 = vpop.eup %3771  ;;  %v3009_v53 = vadd.f32 1.0, %v3770_v27  ;;  %3554 = vmatmul.mubr.bf16.vlgmr.msra.gmra.mrb[0].mxu1 %v3035_v29  ;;  %v3024_v34 = vmul.f32 %v3008_v2, %v2960_v58 }
 0x440   : > { %v3007_v50 = vadd.f32 1.0, %v3772_v14  ;;  %v3022_v15 = vmul.f32 %v3006_v52, %v2958_v26 }
 0x441   : > { %v3025_v22 = vmul.f32 %v3009_v53, %v2961_v3 }
 0x442   : > { %v3023_v51 = vmul.f32 %v3007_v50, %v2959_v56 }
 0x443   : > { %v3037_v47 = vpack.c.bf16 %v3025_v22, %v3024_v34 }
 0x444   : > { %v3036_v61 = vpack.c.bf16 %v3023_v51, %v3022_v15  ;;  %v7532_v15 = vld [vmem:[%s9266_s9] ss:$0 sm:$0xff]  ;;  %s7618_s9 = scalar_lea.sflag [#allocation5], %s433_s7 }
 0x446   : > { %3557 = vmatprep.mubr.bf16.mxu1 %v3036_v61 }
 0x447   : > { %3558 = vmatmul.mubr.bf16.gmra.mrb[4].mxu1 %v3037_v47  ;;  %v7540_v47 = vld [vmem:[%s9267_s10] ss:$0 sm:$0xff]  ;;  %s4068_s10 = scalar_lea.vmem %s4067_s6, 4096 }
 0x44c   : > { %v3531_v17 = vpop.f32.mrb[8].mxu0 }
 0x44d   : > { %v2932_v37 = vadd.f32 %v3531_v17, %v7510_v32  ;;  %v2923_v4 = vpop.f32.mrb[9].mxu0 }
 0x44e   : > { %v2924_v55 = vadd.f32 %v7510_v32, %v2923_v4  ;;  %v3532_v49 = vpop.f32.mrb[10].mxu0 }
 0x44f   : > { %v2980_v19 = vmul.f32 0.70710677, %v2932_v37  ;;  %v2935_v59 = vadd.f32 %v3532_v49, %v7510_v32  ;;  %v2926_v9 = vpop.f32.mrb[11].mxu0  ;;  %v2964_v31 = vmul.f32 0.5, %v2932_v37  ;;  %v3237_v37 = vld [vmem:[%s7535_s5 + $0x10] sm:$0xff] }
 0x450   : > { %v2978_v40 = vmul.f32 0.70710677, %v2924_v55  ;;  %v2927_v6 = vadd.f32 %v7510_v32, %v2926_v9  ;;  %v2962_v16 = vmul.f32 0.5, %v2924_v55 }
 0x451   : > { %3773 = verf.f32 %v2980_v19  ;;  %v2981_v25 = vmul.f32 0.70710677, %v2935_v59  ;;  %v2965_v18 = vmul.f32 0.5, %v2935_v59  ;;  %v3235_v19 = vld [vmem:[%s7535_s5] sm:$0xff] }
 0x452   : > { %3775 = verf.f32 %v2978_v40  ;;  %v2979_v0 = vmul.f32 0.70710677, %v2927_v6  ;;  %v2963_v63 = vmul.f32 0.5, %v2927_v6  ;;  %v3238_v6 = vld [vmem:[%s7535_s5 + $0x18] sm:$0xff] }
 0x453   : > { %3777 = verf.f32 %v2981_v25 }
 0x454   : > { %3779 = verf.f32 %v2979_v0 }
 0x45b   : > { %v3774_v23 = vpop.eup %3773 }
 0x45c   : > { %v3776_v5 = vpop.eup %3775  ;;  %v3012_v46 = vadd.f32 1.0, %v3774_v23 }
 0x45d   : > { %v3778_v44 = vpop.eup %3777  ;;  %v3010_v60 = vadd.f32 1.0, %v3776_v5  ;;  %v3236_v5 = vld [vmem:[%s7535_s5 + $0x8] sm:$0xff] }
 0x45e   : > { %v3780_v57 = vpop.eup %3779  ;;  %v3013_v24 = vadd.f32 1.0, %v3778_v44  ;;  %v3028_v38 = vmul.f32 %v3012_v46, %v2964_v31 }
 0x45f   : > { %v3011_v41 = vadd.f32 1.0, %v3780_v57  ;;  %v3026_v20 = vmul.f32 %v3010_v60, %v2962_v16  ;;  %v3241_v16 = vld [vmem:[%s7535_s5 + $0x30] sm:$0xff] }
 0x460   : > { %v3029_v30 = vmul.f32 %v3013_v24, %v2965_v18 }
 0x461   : > { %v3027_v36 = vmul.f32 %v3011_v41, %v2963_v63 }
 0x462   : > { %v3039_v33 = vpack.c.bf16 %v3029_v30, %v3028_v38  ;;  %v3239_v30 = vld [vmem:[%s7535_s5 + $0x20] sm:$0xff] }
 0x463   : > { %v3038_v28 = vpack.c.bf16 %v3027_v36, %v3026_v20 }
 0x465   : > { %3561 = vmatprep.mubr.bf16.mxu1 %v3038_v28  ;;  %v3242_v28 = vld [vmem:[%s7535_s5 + $0x38] sm:$0xff] }
 0x466   : > { %3562 = vmatmul.mubr.bf16.gmra.mrb[8].mxu1 %v3039_v33 }
 0x4b2   : > { %v3535_v35 = vpop.f32.mrb[12].mxu0 }
 0x4b3   : > { %v2948_v13 = vadd.f32 %v3535_v35, %v7510_v32  ;;  %v2939_v45 = vpop.f32.mrb[13].mxu0 }
 0x4b4   : > { %v2940_v54 = vadd.f32 %v7510_v32, %v2939_v45  ;;  %v3536_v62 = vpop.f32.mrb[14].mxu0 }
 0x4b5   : > { %v2984_v8 = vmul.f32 0.70710677, %v2948_v13  ;;  %v2951_v10 = vadd.f32 %v3536_v62, %v7510_v32  ;;  %v2942_v42 = vpop.f32.mrb[15].mxu0  ;;  %v2968_v27 = vmul.f32 0.5, %v2948_v13 }
 0x4b6   : > { %v2982_v21 = vmul.f32 0.70710677, %v2940_v54  ;;  %v2943_v11 = vadd.f32 %v7510_v32, %v2942_v42  ;;  %v2966_v58 = vmul.f32 0.5, %v2940_v54  ;;  %v3240_v54 = vld [vmem:[%s7535_s5 + $0x28] sm:$0xff] }
 0x4b7   : > { %3781 = verf.f32 %v2984_v8  ;;  %v2985_v1 = vmul.f32 0.70710677, %v2951_v10  ;;  %v2969_v52 = vmul.f32 0.5, %v2951_v10 }
 0x4b8   : > { %3783 = verf.f32 %v2982_v21  ;;  %v2983_v39 = vmul.f32 0.70710677, %v2943_v11  ;;  %v2967_v3 = vmul.f32 0.5, %v2943_v11 }
 0x4b9   : > { %3785 = verf.f32 %v2985_v1 }
 0x4ba   : > { %3787 = verf.f32 %v2983_v39  ;;  %v3245_v39 = vld [vmem:[%s7535_s5 + $0x50] sm:$0xff] }
 0x4c1   : > { %v3782_v12 = vpop.eup %3781 }
 0x4c2   : > { %v3784_v29 = vpop.eup %3783  ;;  %v3016_v48 = vadd.f32 1.0, %v3782_v12 }
 0x4c3   : > { %v3786_v43 = vpop.eup %3785  ;;  %v3014_v7 = vadd.f32 1.0, %v3784_v29 }
 0x4c4   : > { %v3788_v2 = vpop.eup %3787  ;;  %v3017_v14 = vadd.f32 1.0, %v3786_v43  ;;  %v3032_v53 = vmul.f32 %v3016_v48, %v2968_v27  ;;  %v3243_v43 = vld [vmem:[%s7535_s5 + $0x40] sm:$0xff] }
 0x4c5   : > { %v3015_v32 = vadd.f32 1.0, %v3788_v2  ;;  %v3030_v56 = vmul.f32 %v3014_v7, %v2966_v58 }
 0x4c6   : > { %v3033_v26 = vmul.f32 %v3017_v14, %v2969_v52  ;;  %v3246_v52 = vld [vmem:[%s7535_s5 + $0x58] sm:$0xff] }
 0x4c7   : > { %v3031_v50 = vmul.f32 %v3015_v32, %v2967_v3  ;;  %v3244_v32 = vld [vmem:[%s7535_s5 + $0x48] sm:$0xff] }
 0x4c8   : > { %v3041_v34 = vpack.c.bf16 %v3033_v26, %v3032_v53 }
 0x4c9   : > { %v3040_v22 = vpack.c.bf16 %v3031_v50, %v3030_v56 }
 0x4cb   : > { %3565 = vmatprep.mubr.bf16.mxu1 %v3040_v22 }
 0x4cc   : > { %3566 = vmatmul.mubr.bf16.gmra.mrb[12].mxu1 %v3041_v34 }
 0x512   : > { %v3555_v51 = vpop.f32.mrb[0].mxu1 }
 0x513   : > { %v3156_v61 = vadd.f32 %v3555_v51, %v7532_v15  ;;  %v3147_v17 = vpop.f32.mrb[1].mxu1 }
 0x514   : > { %v3148_v4 = vadd.f32 %v7532_v15, %v3147_v17  ;;  %v3556_v55 = vpop.f32.mrb[2].mxu1 }
 0x515   : > { %v3219_v49 = vmul.f32 %v7540_v47, %v3156_v61  ;;  %v3159_v59 = vadd.f32 %v3556_v55, %v7532_v15  ;;  %v3150_v9 = vpop.f32.mrb[3].mxu1  ;;  %v3249_v61 = vld [vmem:[%s7535_s5 + $0x70] sm:$0xff]  ;;  %v3247_v55 = vld [vmem:[%s7535_s5 + $0x60] sm:$0xff] }
 0x516   : > { %v3217_v40 = vmul.f32 %v7540_v47, %v3148_v4  ;;  %v3151_v25 = vadd.f32 %v7532_v15, %v3150_v9  ;;  %v3250_v9 = vld [vmem:[%s7535_s5 + $0x78] sm:$0xff] }
 0x517   : > { %v3253_v0 = vadd.f32 %v3237_v37, %v3219_v49  ;;  %v3220_v23 = vmul.f32 %v7540_v47, %v3159_v59 }
 0x518   : > { %v3251_v46 = vadd.f32 %v3235_v19, %v3217_v40  ;;  %v3218_v44 = vmul.f32 %v7540_v47, %v3151_v25 }
 0x519   : > { %3269 = vst [vmem:[%s4520_s4 + $0x10] sm:$0xff] %v3253_v0  ;;  %v3254_v60 = vadd.f32 %v3238_v6, %v3220_v23  ;;  %v3248_v0 = vld [vmem:[%s7535_s5 + $0x68] sm:$0xff]  ;;  %s4062_s5 = scalar_lea.vmem %s7611_s29, 2048 }
 0x51a   : > { %3267 = vst [vmem:[%s4520_s4] sm:$0xff] %v3251_v46  ;;  %v3252_v57 = vadd.f32 %v3236_v5, %v3218_v44  ;;  %v3559_v31 = vpop.f32.mrb[4].mxu1  ;;  %p4063_p3 = scmp.ne.s32.totalorder %s7611_s29, %s4062_s5  ;;  %p4070_p0 = scmp.lt.s32.totalorder %s4068_s10, %s4062_s5 }
 0x51b   : > { %3270 = vst [vmem:[%s4520_s4 + $0x18] sm:$0xff] %v3254_v60  ;;  %v3172_v18 = vadd.f32 %v3559_v31, %v7532_v15  ;;  %v3163_v24 = vpop.f32.mrb[5].mxu1 }
 0x51c   : > { %3268 = vst [vmem:[%s4520_s4 + $0x8] sm:$0xff] %v3252_v57  ;;  %v3164_v63 = vadd.f32 %v7532_v15, %v3163_v24  ;;  %v3560_v41 = vpop.f32.mrb[6].mxu1  ;;  %p4064_p9 = pnand %p4063_p3, %p9271_p7  ;;  %p4071_p5 = por %p4070_p0, %p4069_p11 }
 0x51d   : > { %v3223_v38 = vmul.f32 %v7540_v47, %v3172_v18  ;;  %v3175_v20 = vadd.f32 %v3560_v41, %v7532_v15  ;;  %v3166_v36 = vpop.f32.mrb[7].mxu1 }
 0x51e   : > { %v3221_v33 = vmul.f32 %v7540_v47, %v3164_v63  ;;  %v3167_v35 = vadd.f32 %v7532_v15, %v3166_v36  ;;  %p4065_p13 = pneg %p4064_p9 }
 0x51f   : > { %v3257_v13 = vadd.f32 %v3241_v16, %v3223_v38  ;;  %v3224_v45 = vmul.f32 %v7540_v47, %v3175_v20 }
 0x520   : > { %v3255_v62 = vadd.f32 %v3239_v30, %v3221_v33  ;;  %v3222_v8 = vmul.f32 %v7540_v47, %v3167_v35  ;;  %p4072_p8 = pnand %p4071_p5, %p4065_p13 }
 0x521   : > { %3273 = vst [vmem:[%s4520_s4 + $0x30] sm:$0xff] %v3257_v13  ;;  %v3258_v10 = vadd.f32 %v3242_v28, %v3224_v45 }
 0x522   : > { %3271 = vst [vmem:[%s4520_s4 + $0x20] sm:$0xff] %v3255_v62  ;;  %v3256_v42 = vadd.f32 %v3240_v54, %v3222_v8 }
 0x523   : > { %3274 = vst [vmem:[%s4520_s4 + $0x38] sm:$0xff] %v3258_v10 }
 0x524   : > { %3272 = vst [vmem:[%s4520_s4 + $0x28] sm:$0xff] %v3256_v42 }
 0x539   : > { %v3563_v21 = vpop.f32.mrb[8].mxu1 }
 0x53a   : > { %v3188_v11 = vadd.f32 %v3563_v21, %v7532_v15  ;;  %v3179_v1 = vpop.f32.mrb[9].mxu1 }
 0x53b   : > { %v3180_v12 = vadd.f32 %v7532_v15, %v3179_v1  ;;  %v3564_v29 = vpop.f32.mrb[10].mxu1 }
 0x53c   : > { %v3227_v48 = vmul.f32 %v7540_v47, %v3188_v11  ;;  %v3191_v7 = vadd.f32 %v3564_v29, %v7532_v15  ;;  %v3182_v2 = vpop.f32.mrb[11].mxu1 }
 0x53d   : > { %v3225_v27 = vmul.f32 %v7540_v47, %v3180_v12  ;;  %v3183_v14 = vadd.f32 %v7532_v15, %v3182_v2 }
 0x53e   : > { %v3261_v58 = vadd.f32 %v3245_v39, %v3227_v48  ;;  %v3228_v3 = vmul.f32 %v7540_v47, %v3191_v7 }
 0x53f   : > { %v3259_v53 = vadd.f32 %v3243_v43, %v3225_v27  ;;  %v3226_v26 = vmul.f32 %v7540_v47, %v3183_v14 }
 0x540   : > { %3277 = vst [vmem:[%s4520_s4 + $0x50] sm:$0xff] %v3261_v58  ;;  %v3262_v56 = vadd.f32 %v3246_v52, %v3228_v3 }
 0x541   : > { %3275 = vst [vmem:[%s4520_s4 + $0x40] sm:$0xff] %v3259_v53  ;;  %v3260_v50 = vadd.f32 %v3244_v32, %v3226_v26 }
 0x542   : > { %3278 = vst [vmem:[%s4520_s4 + $0x58] sm:$0xff] %v3262_v56 }
 0x543   : > { %3276 = vst [vmem:[%s4520_s4 + $0x48] sm:$0xff] %v3260_v50 }
 0x59f   : > { %v3567_v34 = vpop.f32.mrb[12].mxu1 }
 0x5a0   : > { %v3204_v22 = vadd.f32 %v3567_v34, %v7532_v15  ;;  %v3195_v51 = vpop.f32.mrb[13].mxu1 }
 0x5a1   : > { %v3196_v17 = vadd.f32 %v7532_v15, %v3195_v51  ;;  %v3568_v37 = vpop.f32.mrb[14].mxu1 }
 0x5a2   : > { %v3231_v4 = vmul.f32 %v7540_v47, %v3204_v22  ;;  %v3207_v49 = vadd.f32 %v3568_v37, %v7532_v15  ;;  %v3198_v19 = vpop.f32.mrb[15].mxu1 }
 0x5a3   : > { %v3229_v59 = vmul.f32 %v7540_v47, %v3196_v17  ;;  %v3199_v40 = vadd.f32 %v7532_v15, %v3198_v19 }
 0x5a4   : > { %v3265_v6 = vadd.f32 %v3249_v61, %v3231_v4  ;;  %v3232_v25 = vmul.f32 %v7540_v47, %v3207_v49 }
 0x5a5   : > { %v3263_v23 = vadd.f32 %v3247_v55, %v3229_v59  ;;  %v3230_v5 = vmul.f32 %v7540_v47, %v3199_v40 }
 0x5a6   : > { %3281 = vst [vmem:[%s4520_s4 + $0x70] sm:$0xff] %v3265_v6  ;;  %v3266_v46 = vadd.f32 %v3250_v9, %v3232_v25 }
 0x5a7   : > { %3279 = vst [vmem:[%s4520_s4 + $0x60] sm:$0xff] %v3263_v23  ;;  %v3264_v15 = vadd.f32 %v3248_v0, %v3230_v5 }
 0x5a8   : > { %3282 = vst [vmem:[%s4520_s4 + $0x78] sm:$0xff] %v3266_v46 }
 0x5a9   : > { %3280 = vst [vmem:[%s4520_s4 + $0x68] sm:$0xff] %v3264_v15 }
 0x5aa   : > { %4075 = shalt.err (!%p4072_p8)
}
 0x5ab   : > { %s4076_s7 = scalar_lea.hbm %s7609_s20, 2048  ;;  %s4080_s11 = scalar_lea.hbm %s9270_s27, 8192 }
 0x5ac   : > { %p4077_p12 = scmp.ne.s32.totalorder %s7609_s20, %s4076_s7  ;;  %p4081_p10 = scmp.lt.u32.totalorder %s7609_s20, %s9270_s27 }
 0x5ad   : > { %p4082_p1 = scmp.lt.u32.totalorder %s4080_s11, %s4076_s7  ;;  %p4084_p3 = scmp.lt.u32.totalorder %s4076_s7, %s7609_s20 }
 0x5ae   : > { %p4078_p2 = pnand %p4077_p12, %p9271_p7 }
 0x5af   : > { %p4083_p4 = por %p4082_p1, %p4081_p10 }
 0x5b0   : > { %p4079_p6 = pneg %p4078_p2 }
 0x5b1   : > { %p4085_p9 = por %p4084_p3, %p4083_p4 }
 0x5b3   : > { %p4086_p13 = pnand %p4085_p9, %p4079_p6 }
 0x5b5   : > { %4089 = shalt.err (!%p4086_p13)
}
 0x5b6   : > { %s4204_s19 = smov 128   ;;  %s4205_s3 = smov 8  }
 0x5b7   : > { %3583 = dma.vmem_to_hbm [thread:$0]  (%p9271_p7), %s7611_s29, 2048, %s7609_s20, %s7618_s9, %s4204_s19, %s4204_s19, %s4205_s3  }
 0x5b8 PF: > { %s9272_s13 = sld [smem:[#allocation16_spill]]  ;;  %s9273_s5 = sld [smem:[#allocation19_spill]] }
 0x5b9   : > { %p3610_p11 = scmp.ge.s32.totalorder %s4192_s23, 2 }
 0x5be   : > { %s3315_s8 = sand.u32 1, %s9272_s13   ;;  %p9274_p0 = scmp.ne.s32.totalorder %s9273_s5, 0 }
 0x5bf   : > { %s3316_s6 = scalar_lea.sflag [#allocation5], %s3315_s8 }
 0x5c0   : > { %p3600_p5 = pnand %p3610_p11, %p9274_p0 }
 0x5c2   : > { %4147 = dma.done.wait (!%p3600_p5), %s3316_s6, 2048  }
 0x5c3   : > { %4149 = vsyncadd (!%p3600_p5), %s3316_s6, 4294965248  ;;  %s28_s23 = sadd.s32 1, %s4192_s23   ;;  %s9275_s13 = smov %s4156_s14 }
 0x5c4   : > { %p25_p8 = scmp.ge.s32.totalorder %s28_s23, 6   ;;  %s9276_s14 = smov %s4160_s15 }
 0x5c5   : > { %s9277_s15 = smov %s4452_s16  ;;  %s9278_s16 = smov %s4168_s17 }
 0x5c6   : > { %s9279_s17 = smov %s4172_s18  ;;  %s9280_s18 = smov %s4447_s25 }
 0x5c7   : > { %s9281_s19 = smov %s4184_s21  ;;  %s9282_s20 = smov %s4188_s22 }
 0x5c8   : > { %s9283_s21 = smov %s9286_s1  ;;  %s9284_s22 = smov %s9290_s12 }
 0x5c9   :  { %27 = sbr.rel (!%p25_p8) target bundleno = 21 (0x15), region = 125 }
 0x5d0   :  { %3321 = vsyncpa [#allocation4], 1 }
 0x5d1   :  { %3323 = vsyncpa [#allocation4 + $0x1], 1 }
 0x5d2   :  { %3324 = vsyncpa [#allocation7], 1 }
 0x5d3   :  { %3325 = vsyncpa [#allocation10], 1 }
 0x5d4   :  { %3326 = vsyncpa [#allocation5], 1 }
 0x5d5   :  { %3328 = vsyncpa [#allocation5 + $0x1], 1 }

</bundles_post_ra>
